<compile_context>
chip_gen: v7x
topology: tpu7x:2x2x1
jax: 0.10.0
libtpu: 0.0.40
codegen_flags: <defaults>
</compile_context>

<pallas_src>
import math
from functools import partial

import jax
import jax.numpy as jnp
from jax import lax
from jax.experimental import pallas as pl
from jax.experimental.pallas import tpu as pltpu

_UNROLL_T_MAX = 16      # fully unroll the time loop only for tiny T
_UNROLL_B_MAX = 8       # fully unroll the attention batch loop only for tiny B_blk


# ----------------------------------------------------------------------------
# Fused kernel: one program handles a block of B_blk batch rows end-to-end.
# All flattened (B_blk*T, *) buffers are TIME-major: row = t*B_blk + b.
# ----------------------------------------------------------------------------
def marea_kernel(*refs, B_blk, T, H, nh, approx_softmax):
    Hq = H // 2
    hd = H // nh
    f32 = jnp.float32
    bf16 = jnp.bfloat16

    (x_ref,
     g1l0_wih, g1l0_whh, g1l0_bih, g1l0_bhn,
     g1l1_wih, g1l1_whh, g1l1_bih, g1l1_bhn,
     g2_wih, g2_whh, g2_bih, g2_bhn,
     w_qkv_ref, b_qkv_ref, w_out_ref, b_out_ref,
     fe_w1a, fe_w1b, fe_b1, bn1_s, bn1_t,
     fe_w2, fe_b2, bn2_s, bn2_t,
     fe_w3, fe_b3,
     wh_ref, bh_ref,
     out_ref,
     gxr_s, gxz_s, gxn_s,
     g2r_s, g2z_s, g2n_s,
     seq_s, qkv_s) = refs

    # Scratch reuse (GRU1 buffers are dead once GRU1 / QKV are done):
    heads_s = gxn_s      # per-head attention outputs (pre-W_out), (B_blk*T, H)
    attn_s = seq_s       # attention output (post-W_out),          (B_blk*T, H)

    # -- hoisted input-to-hidden gate pre-activations: one full-slab matmul/gate --
    def hoist_gates(x2d, wih3_ref, bih3_ref, gr_s, gz_s, gn_s):
        xb = x2d.astype(bf16)
        gr_s[...] = jnp.dot(xb, wih3_ref[0], preferred_element_type=f32) + bih3_ref[0]
        gz_s[...] = jnp.dot(xb, wih3_ref[1], preferred_element_type=f32) + bih3_ref[1]
        gn_s[...] = jnp.dot(xb, wih3_ref[2], preferred_element_type=f32) + bih3_ref[2]

    # -- serial recurrence: only h @ W_hh inside the time loop; contiguous reads --
    def gru_scan(whh3_ref, bhn_ref, gr_s, gz_s, gn_s, hidden, seq_out):
        w_r = whh3_ref[0]          # (hidden, hidden) bf16, hoisted out of the loop
        w_z = whh3_ref[1]
        w_n = whh3_ref[2]
        b_hn = bhn_ref[...]

        def step(row, h, hsum):
            gr = gr_s[pl.ds(row, B_blk), :]
            gz = gz_s[pl.ds(row, B_blk), :]
            gn = gn_s[pl.ds(row, B_blk), :]
            hb = h.astype(bf16)                                     # MXU input
            r = jax.nn.sigmoid(gr + jnp.dot(hb, w_r, preferred_element_type=f32))
            z = jax.nn.sigmoid(gz + jnp.dot(hb, w_z, preferred_element_type=f32))
            n = jnp.tanh(gn + r * (jnp.dot(hb, w_n, preferred_element_type=f32) + b_hn))
            h_new = (1.0 - z) * n + z * h
            if seq_out is not None:
                seq_out[pl.ds(row, B_blk), :] = h_new               # contiguous store
            return h_new, hsum + h_new

        h = jnp.zeros((B_blk, hidden), f32)
        hsum = jnp.zeros((B_blk, hidden), f32)
        if T <= _UNROLL_T_MAX:                    # tiny T: full static unroll
            for t in range(T):
                h, hsum = step(t * B_blk, h, hsum)
        else:                                     # long T: rolled loop, small unroll
            def body(t, carry):
                row = pl.multiple_of(t * B_blk, B_blk)
                return step(row, *carry)
            h, hsum = lax.fori_loop(0, T, body, (h, hsum), unroll=2)
        return h, hsum

    # ---- GRU1 layer 0 (x is time-major) --------------------------------------
    hoist_gates(x_ref[0], g1l0_wih, g1l0_bih, gxr_s, gxz_s, gxn_s)
    gru_scan(g1l0_whh, g1l0_bhn, gxr_s, gxz_s, gxn_s, H, seq_out=seq_s)

    # ---- GRU1 layer 1 (dropout between layers = identity in eval mode) -------
    hoist_gates(seq_s[...], g1l1_wih, g1l1_bih, gxr_s, gxz_s, gxn_s)
    gru_scan(g1l1_whh, g1l1_bhn, gxr_s, gxz_s, gxn_s, H, seq_out=seq_s)

    # ---- Multi-head self-attention -------------------------------------------
    # Full-slab fused QKV projection (1/sqrt(hd) pre-folded into the Q columns).
    qkv_s[...] = (jnp.dot(seq_s[...].astype(bf16), w_qkv_ref[...],
                          preferred_element_type=f32) + b_qkv_ref[...])

    def attend_one(b):
        qkv_b = qkv_s[pl.ds(b, T, stride=B_blk), :]        # rows of batch b: (T, 3H)
        q = qkv_b[:, 0:H].astype(bf16)
        k = qkv_b[:, H:2 * H].astype(bf16)
        v = qkv_b[:, 2 * H:3 * H].astype(bf16)
        ohs = []
        for hh in range(nh):
            sl = slice(hh * hd, (hh + 1) * hd)
            s = lax.dot_general(q[:, sl], k[:, sl], (((1,), (1,)), ((), ())),
                                preferred_element_type=f32)          # (T, T)
            s = s - jnp.max(s, axis=-1, keepdims=True)
            p = jnp.exp(s)
            den = jnp.sum(p, axis=-1, keepdims=True)
            if approx_softmax:
                p = p * pl.reciprocal(den, approx=True)               # EUP slot
            else:
                p = p / den                                           # exact path
            ohs.append(jnp.dot(p.astype(bf16), v[:, sl], preferred_element_type=f32))
        # one strided store per batch row (time-major), W_out deferred to a slab matmul
        heads_s[pl.ds(b, T, stride=B_blk), :] = jnp.concatenate(ohs, axis=1)

    if B_blk <= _UNROLL_B_MAX:
        for b in range(B_blk):
            attend_one(b)
    else:
        @pl.loop(0, B_blk)
        def _(b):
            attend_one(b)

    # Single full-slab output projection for all heads / rows.
    attn_s[...] = (jnp.dot(heads_s[...].astype(bf16), w_out_ref[...],
                           preferred_element_type=f32) + b_out_ref[...])

    # ---- GRU2 (input attn_s is time-major); no sequence output needed --------
    hoist_gates(attn_s[...], g2_wih, g2_bih, g2r_s, g2z_s, g2n_s)
    h_last, h_sum = gru_scan(g2_whh, g2_bhn, g2r_s, g2z_s, g2n_s, Hq, seq_out=None)
    h_mean = h_sum * (1.0 / T)

    # ---- Feature extractor (concat-free split W1) + fused prediction heads ---
    f1 = (jnp.dot(h_last.astype(bf16), fe_w1a[...], preferred_element_type=f32)
          + jnp.dot(h_mean.astype(bf16), fe_w1b[...], preferred_element_type=f32)
          + fe_b1[...])
    f1 = jnp.maximum(f1, 0.0) * bn1_s[...] + bn1_t[...]
    f2 = jnp.maximum(jnp.dot(f1.astype(bf16), fe_w2[...], preferred_element_type=f32)
                     + fe_b2[...], 0.0)
    f2 = f2 * bn2_s[...] + bn2_t[...]
    f3 = jnp.maximum(jnp.dot(f2.astype(bf16), fe_w3[...], preferred_element_type=f32)
                     + fe_b3[...], 0.0)
    hm = jnp.dot(f3.astype(bf16), wh_ref[...], preferred_element_type=f32) + bh_ref[...]
    ret = jnp.tanh(hm[:, 0:1])
    mom = jnp.tanh(hm[:, 1:2])
    vol = jax.nn.sigmoid(hm[:, 2:3])
    out_ref[...] = (1.0 - vol) * ret + vol * mom


# ----------------------------------------------------------------------------
# Wrapper
# ----------------------------------------------------------------------------
def _invariant_spec(a):
    nd = a.ndim
    return pl.BlockSpec(a.shape, lambda i, _nd=nd: (0,) * _nd)


def _default_batch_block(B, T, H, cap=128, vmem_budget=40 << 20):
    """Largest batch block <= cap whose scratch fits the VMEM budget (v7x-safe)."""
    Hq = H // 2
    per_row = 4 * (7 * H + 3 * Hq)                    # f32 scratch bytes per (t, b) row
    vmem_rows = max(8, vmem_budget // max(per_row * T, 1))
    cap = max(8, min(cap, int(vmem_rows)))
    if B <= cap:
        return B
    start = cap - cap % 8
    for blk in range(start, 7, -8):                   # multiple-of-8 divisor of B
        if B % blk == 0:
            return blk
    return B                                          # fallback: single block


def marea_forward(x, kparams, *, num_heads=8, batch_block=None, approx_softmax=True):
    B, T, D = x.shape
    H = kparams[1].shape[-1]          # g1l0 whh3: (3, H, H)
    Hq = kparams[9].shape[-1]         # g2   whh3: (3, Hq, Hq)
    assert H % num_heads == 0
    B_blk = _default_batch_block(B, T, H) if batch_block is None else batch_block
    assert B % B_blk == 0
    NB = B // B_blk                   # NB > 1 + "parallel" -> v7x 2-TC sharding
    if NB > 1:
        assert B_blk % 8 == 0, "multi-block grid requires B_blk % 8 == 0 (output tiling)"

    # Time-major within each batch block: row = t * B_blk + b_local.
    x_tm = (jnp.transpose(x.astype(jnp.float32), (1, 0, 2))
            .reshape(T, NB, B_blk, D)
            .transpose(1, 0, 2, 3)
            .reshape(NB, T * B_blk, D))

    in_specs = [pl.BlockSpec((1, T * B_blk, D), lambda i: (i, 0, 0))]
    in_specs += [_invariant_spec(a) for a in kparams]

    scratch_shapes = [
        pltpu.VMEM((T * B_blk, H), jnp.float32),       # GRU1 r-gate pre-acts
        pltpu.VMEM((T * B_blk, H), jnp.float32),       # GRU1 z-gate pre-acts
        pltpu.VMEM((T * B_blk, H), jnp.float32),       # GRU1 n-gate (reused: attn heads)
        pltpu.VMEM((T * B_blk, Hq), jnp.float32),      # GRU2 r-gate pre-acts
        pltpu.VMEM((T * B_blk, Hq), jnp.float32),      # GRU2 z-gate pre-acts
        pltpu.VMEM((T * B_blk, Hq), jnp.float32),      # GRU2 n-gate pre-acts
        pltpu.VMEM((T * B_blk, H), jnp.float32),       # GRU1 sequence (reused: attn out)
        pltpu.VMEM((T * B_blk, 3 * H), jnp.float32),   # fused QKV
    ]

    # Explicit VMEM budget: scratch + double-buffered x block + weight copies.
    scratch_bytes = 4 * T * B_blk * (7 * H + 3 * Hq)
    weight_bytes = sum(a.size * a.dtype.itemsize for a in kparams)
    x_block_bytes = 4 * T * B_blk * D
    need = scratch_bytes + 2 * (weight_bytes + x_block_bytes) + (2 << 20)
    vmem_limit = int(min(max(int(need * 1.25), 32 << 20), 128 << 20))

    grid_spec = pltpu.PrefetchScalarGridSpec(
        num_scalar_prefetch=0,
        grid=(NB,),
        in_specs=in_specs,
        out_specs=pl.BlockSpec((B_blk, 1), lambda i: (i, 0)),
        scratch_shapes=scratch_shapes,
    )
    kernel = partial(marea_kernel, B_blk=B_blk, T=T, H=H, nh=num_heads,
                     approx_softmax=approx_softmax)
    return pl.pallas_call(
        kernel,
        grid_spec=grid_spec,
        out_shape=jax.ShapeDtypeStruct((B, 1), jnp.float32),
        compiler_params=pltpu.CompilerParams(
            dimension_semantics=("parallel",),
            vmem_limit_bytes=vmem_limit),
    )(x_tm, *kparams)


# ----------------------------------------------------------------------------
# Parameter generation in PyTorch conventions + conversion to kernel layout
# ----------------------------------------------------------------------------
def init_torch_style_params(key, D, H):
    Hq = H // 2
    ks = iter(jax.random.split(key, 48))

    def rnd(shape, scale=0.1):
        return (scale * jax.random.normal(next(ks), shape)).astype(jnp.float32)

    p = {}
    p["gru1_wih_l0"] = rnd((3 * H, D)); p["gru1_whh_l0"] = rnd((3 * H, H))
    p["gru1_bih_l0"] = rnd((3 * H,), 0.05); p["gru1_bhh_l0"] = rnd((3 * H,), 0.05)
    p["gru1_wih_l1"] = rnd((3 * H, H)); p["gru1_whh_l1"] = rnd((3 * H, H))
    p["gru1_bih_l1"] = rnd((3 * H,), 0.05); p["gru1_bhh_l1"] = rnd((3 * H,), 0.05)
    p["gru2_wih"] = rnd((3 * Hq, H)); p["gru2_whh"] = rnd((3 * Hq, Hq))
    p["gru2_bih"] = rnd((3 * Hq,), 0.05); p["gru2_bhh"] = rnd((3 * Hq,), 0.05)
    p["attn_in_w"] = rnd((3 * H, H)); p["attn_in_b"] = rnd((3 * H,), 0.05)
    p["attn_out_w"] = rnd((H, H)); p["attn_out_b"] = rnd((H,), 0.05)
    p["fe1_w"] = rnd((256, 2 * Hq)); p["fe1_b"] = rnd((256,), 0.05)
    p["bn1_g"] = 1.0 + rnd((256,)); p["bn1_b"] = rnd((256,), 0.05)
    p["bn1_rm"] = rnd((256,), 0.05)
    p["bn1_rv"] = 1.0 + 0.1 * jnp.abs(jax.random.normal(next(ks), (256,)))
    p["fe2_w"] = rnd((128, 256)); p["fe2_b"] = rnd((128,), 0.05)
    p["bn2_g"] = 1.0 + rnd((128,)); p["bn2_b"] = rnd((128,), 0.05)
    p["bn2_rm"] = rnd((128,), 0.05)
    p["bn2_rv"] = 1.0 + 0.1 * jnp.abs(jax.random.normal(next(ks), (128,)))
    p["fe3_w"] = rnd((64, 128)); p["fe3_b"] = rnd((64,), 0.05)
    p["ret_w"] = rnd((1, 64)); p["ret_b"] = rnd((1,), 0.05)
    p["mom_w"] = rnd((1, 64)); p["mom_b"] = rnd((1,), 0.05)
    p["vol_w"] = rnd((1, 64)); p["vol_b"] = rnd((1,), 0.05)
    return p


def _pack_gru(wih, whh, bih, bhh, Hh):
    """PyTorch (3H, Din)/(3H, H) stacked [r; z; n] -> per-gate transposed packs."""
    wih3 = jnp.stack([wih[g * Hh:(g + 1) * Hh].T for g in range(3)])   # (3, Din, Hh)
    whh3 = jnp.stack([whh[g * Hh:(g + 1) * Hh].T for g in range(3)])   # (3, Hh, Hh)
    b_r = (bih[0:Hh] + bhh[0:Hh]).reshape(1, Hh)
    b_z = (bih[Hh:2 * Hh] + bhh[Hh:2 * Hh]).reshape(1, Hh)
    b_in = bih[2 * Hh:3 * Hh].reshape(1, Hh)
    bih3 = jnp.stack([b_r, b_z, b_in])                                 # (3, 1, Hh)
    bhn = bhh[2 * Hh:3 * Hh].reshape(1, Hh)
    return wih3, whh3, bih3, bhn


def prepare_kernel_params(p, D, H, num_heads):
    Hq = H // 2
    hd = H // num_heads
    scale = 1.0 / math.sqrt(hd)
    eps = 1e-5
    bf16 = jnp.bfloat16
    kp = []
    # GRU weight packs (matmul weights in bf16, biases stay f32).
    for wih, whh, bih, bhh, Hh in [
        (p["gru1_wih_l0"], p["gru1_whh_l0"], p["gru1_bih_l0"], p["gru1_bhh_l0"], H),
        (p["gru1_wih_l1"], p["gru1_whh_l1"], p["gru1_bih_l1"], p["gru1_bhh_l1"], H),
        (p["gru2_wih"], p["gru2_whh"], p["gru2_bih"], p["gru2_bhh"], Hq),
    ]:
        wih3, whh3, bih3, bhn = _pack_gru(wih, whh, bih, bhh, Hh)
        kp += [wih3.astype(bf16), whh3.astype(bf16), bih3, bhn]
    # MHA: fused QKV with 1/sqrt(hd) folded into Q; full (H, H) output projection.
    wq, wk, wv = p["attn_in_w"][0:H], p["attn_in_w"][H:2 * H], p["attn_in_w"][2 * H:3 * H]
    bq, bk, bv = p["attn_in_b"][0:H], p["attn_in_b"][H:2 * H], p["attn_in_b"][2 * H:3 * H]
    w_qkv = jnp.concatenate([wq.T * scale, wk.T, wv.T], axis=1).astype(bf16)   # (H, 3H)
    b_qkv = jnp.concatenate([bq * scale, bk, bv]).reshape(1, 3 * H)
    w_out = p["attn_out_w"].T.astype(bf16)                                     # (H, H)
    b_out = p["attn_out_b"].reshape(1, H)
    kp += [w_qkv, b_qkv, w_out, b_out]
    # Feature extractor with eval-mode BN folded to scale/shift; W1 split in two
    # halves (h_last / h_mean) to avoid the lane concat in-kernel.
    w1t = p["fe1_w"].T                                                          # (2Hq, 256)
    w1a, w1b = w1t[:Hq].astype(bf16), w1t[Hq:].astype(bf16)
    bn1_s = (p["bn1_g"] / jnp.sqrt(p["bn1_rv"] + eps)).reshape(1, -1)
    bn1_t = (p["bn1_b"] - p["bn1_rm"] * p["bn1_g"] / jnp.sqrt(p["bn1_rv"] + eps)).reshape(1, -1)
    bn2_s = (p["bn2_g"] / jnp.sqrt(p["bn2_rv"] + eps)).reshape(1, -1)
    bn2_t = (p["bn2_b"] - p["bn2_rm"] * p["bn2_g"] / jnp.sqrt(p["bn2_rv"] + eps)).reshape(1, -1)
    kp += [w1a, w1b, p["fe1_b"].reshape(1, -1), bn1_s, bn1_t,
           p["fe2_w"].T.astype(bf16), p["fe2_b"].reshape(1, -1), bn2_s, bn2_t,
           p["fe3_w"].T.astype(bf16), p["fe3_b"].reshape(1, -1)]
    # Fused prediction heads: [return, momentum, volatility] -> (64, 3).
    w_heads = jnp.concatenate([p["ret_w"].T, p["mom_w"].T, p["vol_w"].T], axis=1).astype(bf16)
    b_heads = jnp.concatenate([p["ret_b"], p["mom_b"], p["vol_b"]]).reshape(1, 3)
    kp += [w_heads, b_heads]
    return kp


if __name__ == "__main__":
    B, T, D, H, NH = 2, 8, 10, 32, 8      # small shapes; H divisible by 8 heads
    root = jax.random.PRNGKey(0)
    k_param, k_x = jax.random.split(root)
    torch_params = init_torch_style_params(k_param, D, H)
    kparams = prepare_kernel_params(torch_params, D, H, NH)
    x = jax.random.normal(k_x, (B, T, D), dtype=jnp.float32)

    out = marea_forward(x, kparams, num_heads=NH)
    out = jax.block_until_ready(out)
    assert out.shape == (B, 1) and out.dtype == jnp.float32
    assert bool(jnp.all(jnp.isfinite(out)))
    print("KERNEL_OK")
</pallas_src>

<mosaic_0001>
module attributes {stable_mosaic.version = 11 : i64} {
  func.func @marea_kernel(%arg0: i32, %arg1: memref<1x16x10xf32, #tpu.memory_space<vmem>>, %arg2: memref<3x10x32xbf16, #tpu.memory_space<vmem>>, %arg3: memref<3x32x32xbf16, #tpu.memory_space<vmem>>, %arg4: memref<3x1x32xf32, #tpu.memory_space<vmem>>, %arg5: memref<1x32xf32, #tpu.memory_space<vmem>>, %arg6: memref<3x32x32xbf16, #tpu.memory_space<vmem>>, %arg7: memref<3x32x32xbf16, #tpu.memory_space<vmem>>, %arg8: memref<3x1x32xf32, #tpu.memory_space<vmem>>, %arg9: memref<1x32xf32, #tpu.memory_space<vmem>>, %arg10: memref<3x32x16xbf16, #tpu.memory_space<vmem>>, %arg11: memref<3x16x16xbf16, #tpu.memory_space<vmem>>, %arg12: memref<3x1x16xf32, #tpu.memory_space<vmem>>, %arg13: memref<1x16xf32, #tpu.memory_space<vmem>>, %arg14: memref<32x96xbf16, #tpu.memory_space<vmem>>, %arg15: memref<1x96xf32, #tpu.memory_space<vmem>>, %arg16: memref<32x32xbf16, #tpu.memory_space<vmem>>, %arg17: memref<1x32xf32, #tpu.memory_space<vmem>>, %arg18: memref<16x256xbf16, #tpu.memory_space<vmem>>, %arg19: memref<16x256xbf16, #tpu.memory_space<vmem>>, %arg20: memref<1x256xf32, #tpu.memory_space<vmem>>, %arg21: memref<1x256xf32, #tpu.memory_space<vmem>>, %arg22: memref<1x256xf32, #tpu.memory_space<vmem>>, %arg23: memref<256x128xbf16, #tpu.memory_space<vmem>>, %arg24: memref<1x128xf32, #tpu.memory_space<vmem>>, %arg25: memref<1x128xf32, #tpu.memory_space<vmem>>, %arg26: memref<1x128xf32, #tpu.memory_space<vmem>>, %arg27: memref<128x64xbf16, #tpu.memory_space<vmem>>, %arg28: memref<1x64xf32, #tpu.memory_space<vmem>>, %arg29: memref<64x3xbf16, #tpu.memory_space<vmem>>, %arg30: memref<1x3xf32, #tpu.memory_space<vmem>>, %arg31: memref<2x1xf32, #tpu.memory_space<vmem>>, %arg32: memref<16x32xf32, #tpu.memory_space<vmem>>, %arg33: memref<16x32xf32, #tpu.memory_space<vmem>>, %arg34: memref<16x32xf32, #tpu.memory_space<vmem>>, %arg35: memref<16x16xf32, #tpu.memory_space<vmem>>, %arg36: memref<16x16xf32, #tpu.memory_space<vmem>>, %arg37: memref<16x16xf32, #tpu.memory_space<vmem>>, %arg38: memref<16x32xf32, #tpu.memory_space<vmem>>, %arg39: memref<16x96xf32, #tpu.memory_space<vmem>>) attributes {dimension_semantics = [#tpu.dimension_semantics<parallel>], iteration_bounds = array<i64: 1>, scalar_prefetch = 0 : i64, scratch_operands = 8 : i64, tpu.core_type = #tpu.core_type<tc>, window_params = [{transform_indices = @transform_0, window_bounds = array<i64: 1, 16, 10>}, {pipeline_mode = #tpu.pipeline_mode<synchronous>, transform_indices = @transform_1, window_bounds = array<i64: 3, 10, 32>}, {pipeline_mode = #tpu.pipeline_mode<synchronous>, transform_indices = @transform_2, window_bounds = array<i64: 3, 32, 32>}, {pipeline_mode = #tpu.pipeline_mode<synchronous>, transform_indices = @transform_3, window_bounds = array<i64: 3, 1, 32>}, {pipeline_mode = #tpu.pipeline_mode<synchronous>, transform_indices = @transform_4, window_bounds = array<i64: 1, 32>}, {pipeline_mode = #tpu.pipeline_mode<synchronous>, transform_indices = @transform_5, window_bounds = array<i64: 3, 32, 32>}, {pipeline_mode = #tpu.pipeline_mode<synchronous>, transform_indices = @transform_6, window_bounds = array<i64: 3, 32, 32>}, {pipeline_mode = #tpu.pipeline_mode<synchronous>, transform_indices = @transform_7, window_bounds = array<i64: 3, 1, 32>}, {pipeline_mode = #tpu.pipeline_mode<synchronous>, transform_indices = @transform_8, window_bounds = array<i64: 1, 32>}, {pipeline_mode = #tpu.pipeline_mode<synchronous>, transform_indices = @transform_9, window_bounds = array<i64: 3, 32, 16>}, {pipeline_mode = #tpu.pipeline_mode<synchronous>, transform_indices = @transform_10, window_bounds = array<i64: 3, 16, 16>}, {pipeline_mode = #tpu.pipeline_mode<synchronous>, transform_indices = @transform_11, window_bounds = array<i64: 3, 1, 16>}, {pipeline_mode = #tpu.pipeline_mode<synchronous>, transform_indices = @transform_12, window_bounds = array<i64: 1, 16>}, {pipeline_mode = #tpu.pipeline_mode<synchronous>, transform_indices = @transform_13, window_bounds = array<i64: 32, 96>}, {pipeline_mode = #tpu.pipeline_mode<synchronous>, transform_indices = @transform_14, window_bounds = array<i64: 1, 96>}, {pipeline_mode = #tpu.pipeline_mode<synchronous>, transform_indices = @transform_15, window_bounds = array<i64: 32, 32>}, {pipeline_mode = #tpu.pipeline_mode<synchronous>, transform_indices = @transform_16, window_bounds = array<i64: 1, 32>}, {pipeline_mode = #tpu.pipeline_mode<synchronous>, transform_indices = @transform_17, window_bounds = array<i64: 16, 256>}, {pipeline_mode = #tpu.pipeline_mode<synchronous>, transform_indices = @transform_18, window_bounds = array<i64: 16, 256>}, {pipeline_mode = #tpu.pipeline_mode<synchronous>, transform_indices = @transform_19, window_bounds = array<i64: 1, 256>}, {pipeline_mode = #tpu.pipeline_mode<synchronous>, transform_indices = @transform_20, window_bounds = array<i64: 1, 256>}, {pipeline_mode = #tpu.pipeline_mode<synchronous>, transform_indices = @transform_21, window_bounds = array<i64: 1, 256>}, {pipeline_mode = #tpu.pipeline_mode<synchronous>, transform_indices = @transform_22, window_bounds = array<i64: 256, 128>}, {pipeline_mode = #tpu.pipeline_mode<synchronous>, transform_indices = @transform_23, window_bounds = array<i64: 1, 128>}, {pipeline_mode = #tpu.pipeline_mode<synchronous>, transform_indices = @transform_24, window_bounds = array<i64: 1, 128>}, {pipeline_mode = #tpu.pipeline_mode<synchronous>, transform_indices = @transform_25, window_bounds = array<i64: 1, 128>}, {pipeline_mode = #tpu.pipeline_mode<synchronous>, transform_indices = @transform_26, window_bounds = array<i64: 128, 64>}, {pipeline_mode = #tpu.pipeline_mode<synchronous>, transform_indices = @transform_27, window_bounds = array<i64: 1, 64>}, {pipeline_mode = #tpu.pipeline_mode<synchronous>, transform_indices = @transform_28, window_bounds = array<i64: 64, 3>}, {pipeline_mode = #tpu.pipeline_mode<synchronous>, transform_indices = @transform_29, window_bounds = array<i64: 1, 3>}, {transform_indices = @transform_30, window_bounds = array<i64: 2, 1>}]} {
    %c0 = arith.constant 0 : index
    %c0_0 = arith.constant 0 : index
    %c0_1 = arith.constant 0 : index
    %0 = vector.load %arg1[%c0, %c0_0, %c0_1] : memref<1x16x10xf32, #tpu.memory_space<vmem>>, vector<1x16x10xf32>
    %1 = vector.shape_cast %0 : vector<1x16x10xf32> to vector<16x10xf32>
    %2 = arith.truncf %1 : vector<16x10xf32> to vector<16x10xbf16>
    %c0_2 = arith.constant 0 : index
    %c0_3 = arith.constant 0 : index
    %c0_4 = arith.constant 0 : index
    %3 = vector.load %arg2[%c0_2, %c0_3, %c0_4] : memref<3x10x32xbf16, #tpu.memory_space<vmem>>, vector<1x10x32xbf16>
    %4 = vector.shape_cast %3 : vector<1x10x32xbf16> to vector<10x32xbf16>
    %cst = arith.constant dense<0.000000e+00> : vector<16x32xf32>
    %5 = tpu.matmul %2, %4, %cst {dimension_numbers = #tpu.dot_dimension_numbers<[1], [0], [0], [1], [0, 0, 1, 1], [], []>} : vector<16x10xbf16>, vector<10x32xbf16>, vector<16x32xf32> -> vector<16x32xf32>
    %c0_5 = arith.constant 0 : index
    %c0_6 = arith.constant 0 : index
    %c0_7 = arith.constant 0 : index
    %6 = vector.load %arg4[%c0_5, %c0_6, %c0_7] : memref<3x1x32xf32, #tpu.memory_space<vmem>>, vector<1x1x32xf32>
    %7 = vector.shape_cast %6 : vector<1x1x32xf32> to vector<1x32xf32>
    %8 = vector.broadcast %7 : vector<1x32xf32> to vector<16x32xf32>
    %9 = arith.addf %5, %8 : vector<16x32xf32>
    %c0_8 = arith.constant 0 : index
    %c0_9 = arith.constant 0 : index
    %10 = vector.load %arg32[%c0_8, %c0_9] : memref<16x32xf32, #tpu.memory_space<vmem>>, vector<16x32xf32>
    tpu.vector_store %arg32[%c0_8, %c0_9], %9 {strides = array<i32>} : memref<16x32xf32, #tpu.memory_space<vmem>>, vector<16x32xf32>,
    %c1 = arith.constant 1 : index
    %c0_10 = arith.constant 0 : index
    %c0_11 = arith.constant 0 : index
    %11 = vector.load %arg2[%c1, %c0_10, %c0_11] : memref<3x10x32xbf16, #tpu.memory_space<vmem>>, vector<1x10x32xbf16>
    %12 = vector.shape_cast %11 : vector<1x10x32xbf16> to vector<10x32xbf16>
    %cst_12 = arith.constant dense<0.000000e+00> : vector<16x32xf32>
    %13 = tpu.matmul %2, %12, %cst_12 {dimension_numbers = #tpu.dot_dimension_numbers<[1], [0], [0], [1], [0, 0, 1, 1], [], []>} : vector<16x10xbf16>, vector<10x32xbf16>, vector<16x32xf32> -> vector<16x32xf32>
    %c1_13 = arith.constant 1 : index
    %c0_14 = arith.constant 0 : index
    %c0_15 = arith.constant 0 : index
    %14 = vector.load %arg4[%c1_13, %c0_14, %c0_15] : memref<3x1x32xf32, #tpu.memory_space<vmem>>, vector<1x1x32xf32>
    %15 = vector.shape_cast %14 : vector<1x1x32xf32> to vector<1x32xf32>
    %16 = vector.broadcast %15 : vector<1x32xf32> to vector<16x32xf32>
    %17 = arith.addf %13, %16 : vector<16x32xf32>
    %c0_16 = arith.constant 0 : index
    %c0_17 = arith.constant 0 : index
    %18 = vector.load %arg33[%c0_16, %c0_17] : memref<16x32xf32, #tpu.memory_space<vmem>>, vector<16x32xf32>
    tpu.vector_store %arg33[%c0_16, %c0_17], %17 {strides = array<i32>} : memref<16x32xf32, #tpu.memory_space<vmem>>, vector<16x32xf32>,
    %c2 = arith.constant 2 : index
    %c0_18 = arith.constant 0 : index
    %c0_19 = arith.constant 0 : index
    %19 = vector.load %arg2[%c2, %c0_18, %c0_19] : memref<3x10x32xbf16, #tpu.memory_space<vmem>>, vector<1x10x32xbf16>
    %20 = vector.shape_cast %19 : vector<1x10x32xbf16> to vector<10x32xbf16>
    %cst_20 = arith.constant dense<0.000000e+00> : vector<16x32xf32>
    %21 = tpu.matmul %2, %20, %cst_20 {dimension_numbers = #tpu.dot_dimension_numbers<[1], [0], [0], [1], [0, 0, 1, 1], [], []>} : vector<16x10xbf16>, vector<10x32xbf16>, vector<16x32xf32> -> vector<16x32xf32>
    %c2_21 = arith.constant 2 : index
    %c0_22 = arith.constant 0 : index
    %c0_23 = arith.constant 0 : index
    %22 = vector.load %arg4[%c2_21, %c0_22, %c0_23] : memref<3x1x32xf32, #tpu.memory_space<vmem>>, vector<1x1x32xf32>
    %23 = vector.shape_cast %22 : vector<1x1x32xf32> to vector<1x32xf32>
    %24 = vector.broadcast %23 : vector<1x32xf32> to vector<16x32xf32>
    %25 = arith.addf %21, %24 : vector<16x32xf32>
    %c0_24 = arith.constant 0 : index
    %c0_25 = arith.constant 0 : index
    %26 = vector.load %arg34[%c0_24, %c0_25] : memref<16x32xf32, #tpu.memory_space<vmem>>, vector<16x32xf32>
    tpu.vector_store %arg34[%c0_24, %c0_25], %25 {strides = array<i32>} : memref<16x32xf32, #tpu.memory_space<vmem>>, vector<16x32xf32>,
    %c0_26 = arith.constant 0 : index
    %c0_27 = arith.constant 0 : index
    %c0_28 = arith.constant 0 : index
    %27 = vector.load %arg3[%c0_26, %c0_27, %c0_28] : memref<3x32x32xbf16, #tpu.memory_space<vmem>>, vector<1x32x32xbf16>
    %28 = vector.shape_cast %27 : vector<1x32x32xbf16> to vector<32x32xbf16>
    %c1_29 = arith.constant 1 : index
    %c0_30 = arith.constant 0 : index
    %c0_31 = arith.constant 0 : index
    %29 = vector.load %arg3[%c1_29, %c0_30, %c0_31] : memref<3x32x32xbf16, #tpu.memory_space<vmem>>, vector<1x32x32xbf16>
    %30 = vector.shape_cast %29 : vector<1x32x32xbf16> to vector<32x32xbf16>
    %c2_32 = arith.constant 2 : index
    %c0_33 = arith.constant 0 : index
    %c0_34 = arith.constant 0 : index
    %31 = vector.load %arg3[%c2_32, %c0_33, %c0_34] : memref<3x32x32xbf16, #tpu.memory_space<vmem>>, vector<1x32x32xbf16>
    %32 = vector.shape_cast %31 : vector<1x32x32xbf16> to vector<32x32xbf16>
    %c0_35 = arith.constant 0 : index
    %c0_36 = arith.constant 0 : index
    %33 = vector.load %arg5[%c0_35, %c0_36] : memref<1x32xf32, #tpu.memory_space<vmem>>, vector<1x32xf32>
    %cst_37 = arith.constant 0.000000e+00 : f32
    %34 = vector.broadcast %cst_37 : f32 to vector<2x32xf32>
    %c0_38 = arith.constant 0 : index
    %c0_39 = arith.constant 0 : index
    %35 = vector.load %arg32[%c0_38, %c0_39] : memref<16x32xf32, #tpu.memory_space<vmem>>, vector<2x32xf32>
    %c0_40 = arith.constant 0 : index
    %c0_41 = arith.constant 0 : index
    %36 = vector.load %arg33[%c0_40, %c0_41] : memref<16x32xf32, #tpu.memory_space<vmem>>, vector<2x32xf32>
    %c0_42 = arith.constant 0 : index
    %c0_43 = arith.constant 0 : index
    %37 = vector.load %arg34[%c0_42, %c0_43] : memref<16x32xf32, #tpu.memory_space<vmem>>, vector<2x32xf32>
    %38 = arith.truncf %34 : vector<2x32xf32> to vector<2x32xbf16>
    %cst_44 = arith.constant dense<0.000000e+00> : vector<2x32xf32>
    %39 = tpu.matmul %38, %28, %cst_44 {dimension_numbers = #tpu.dot_dimension_numbers<[1], [0], [0], [1], [0, 0, 1, 1], [], []>} : vector<2x32xbf16>, vector<32x32xbf16>, vector<2x32xf32> -> vector<2x32xf32>
    %40 = arith.addf %35, %39 : vector<2x32xf32>
    %41 = arith.negf %40 : vector<2x32xf32>
    %42 = math.exp %41 : vector<2x32xf32>
    %cst_45 = arith.constant 1.000000e+00 : f32
    %43 = vector.broadcast %cst_45 : f32 to vector<2x32xf32>
    %44 = arith.addf %43, %42 : vector<2x32xf32>
    %45 = arith.divf %43, %44 : vector<2x32xf32>
    %cst_46 = arith.constant dense<0.000000e+00> : vector<2x32xf32>
    %46 = tpu.matmul %38, %30, %cst_46 {dimension_numbers = #tpu.dot_dimension_numbers<[1], [0], [0], [1], [0, 0, 1, 1], [], []>} : vector<2x32xbf16>, vector<32x32xbf16>, vector<2x32xf32> -> vector<2x32xf32>
    %47 = arith.addf %36, %46 : vector<2x32xf32>
    %48 = arith.negf %47 : vector<2x32xf32>
    %49 = math.exp %48 : vector<2x32xf32>
    %cst_47 = arith.constant 1.000000e+00 : f32
    %50 = vector.broadcast %cst_47 : f32 to vector<2x32xf32>
    %51 = arith.addf %50, %49 : vector<2x32xf32>
    %52 = arith.divf %50, %51 : vector<2x32xf32>
    %cst_48 = arith.constant dense<0.000000e+00> : vector<2x32xf32>
    %53 = tpu.matmul %38, %32, %cst_48 {dimension_numbers = #tpu.dot_dimension_numbers<[1], [0], [0], [1], [0, 0, 1, 1], [], []>} : vector<2x32xbf16>, vector<32x32xbf16>, vector<2x32xf32> -> vector<2x32xf32>
    %54 = vector.broadcast %33 : vector<1x32xf32> to vector<2x32xf32>
    %55 = arith.addf %53, %54 : vector<2x32xf32>
    %56 = arith.mulf %45, %55 : vector<2x32xf32>
    %57 = arith.addf %37, %56 : vector<2x32xf32>
    %58 = math.tanh %57 : vector<2x32xf32>
    %cst_49 = arith.constant 1.000000e+00 : f32
    %59 = vector.broadcast %cst_49 : f32 to vector<2x32xf32>
    %60 = arith.subf %59, %52 : vector<2x32xf32>
    %61 = arith.mulf %60, %58 : vector<2x32xf32>
    %62 = arith.mulf %52, %34 : vector<2x32xf32>
    %63 = arith.addf %61, %62 : vector<2x32xf32>
    %c0_50 = arith.constant 0 : index
    %c0_51 = arith.constant 0 : index
    %64 = vector.load %arg38[%c0_50, %c0_51] : memref<16x32xf32, #tpu.memory_space<vmem>>, vector<2x32xf32>
    tpu.vector_store %arg38[%c0_50, %c0_51], %63 {strides = array<i32>} : memref<16x32xf32, #tpu.memory_space<vmem>>, vector<2x32xf32>,
    %c2_52 = arith.constant 2 : index
    %c0_53 = arith.constant 0 : index
    %65 = vector.load %arg32[%c2_52, %c0_53] : memref<16x32xf32, #tpu.memory_space<vmem>>, vector<2x32xf32>
    %c2_54 = arith.constant 2 : index
    %c0_55 = arith.constant 0 : index
    %66 = vector.load %arg33[%c2_54, %c0_55] : memref<16x32xf32, #tpu.memory_space<vmem>>, vector<2x32xf32>
    %c2_56 = arith.constant 2 : index
    %c0_57 = arith.constant 0 : index
    %67 = vector.load %arg34[%c2_56, %c0_57] : memref<16x32xf32, #tpu.memory_space<vmem>>, vector<2x32xf32>
    %68 = arith.truncf %63 : vector<2x32xf32> to vector<2x32xbf16>
    %cst_58 = arith.constant dense<0.000000e+00> : vector<2x32xf32>
    %69 = tpu.matmul %68, %28, %cst_58 {dimension_numbers = #tpu.dot_dimension_numbers<[1], [0], [0], [1], [0, 0, 1, 1], [], []>} : vector<2x32xbf16>, vector<32x32xbf16>, vector<2x32xf32> -> vector<2x32xf32>
    %70 = arith.addf %65, %69 : vector<2x32xf32>
    %71 = arith.negf %70 : vector<2x32xf32>
    %72 = math.exp %71 : vector<2x32xf32>
    %cst_59 = arith.constant 1.000000e+00 : f32
    %73 = vector.broadcast %cst_59 : f32 to vector<2x32xf32>
    %74 = arith.addf %73, %72 : vector<2x32xf32>
    %75 = arith.divf %73, %74 : vector<2x32xf32>
    %cst_60 = arith.constant dense<0.000000e+00> : vector<2x32xf32>
    %76 = tpu.matmul %68, %30, %cst_60 {dimension_numbers = #tpu.dot_dimension_numbers<[1], [0], [0], [1], [0, 0, 1, 1], [], []>} : vector<2x32xbf16>, vector<32x32xbf16>, vector<2x32xf32> -> vector<2x32xf32>
    %77 = arith.addf %66, %76 : vector<2x32xf32>
    %78 = arith.negf %77 : vector<2x32xf32>
    %79 = math.exp %78 : vector<2x32xf32>
    %cst_61 = arith.constant 1.000000e+00 : f32
    %80 = vector.broadcast %cst_61 : f32 to vector<2x32xf32>
    %81 = arith.addf %80, %79 : vector<2x32xf32>
    %82 = arith.divf %80, %81 : vector<2x32xf32>
    %cst_62 = arith.constant dense<0.000000e+00> : vector<2x32xf32>
    %83 = tpu.matmul %68, %32, %cst_62 {dimension_numbers = #tpu.dot_dimension_numbers<[1], [0], [0], [1], [0, 0, 1, 1], [], []>} : vector<2x32xbf16>, vector<32x32xbf16>, vector<2x32xf32> -> vector<2x32xf32>
    %84 = vector.broadcast %33 : vector<1x32xf32> to vector<2x32xf32>
    %85 = arith.addf %83, %84 : vector<2x32xf32>
    %86 = arith.mulf %75, %85 : vector<2x32xf32>
    %87 = arith.addf %67, %86 : vector<2x32xf32>
    %88 = math.tanh %87 : vector<2x32xf32>
    %cst_63 = arith.constant 1.000000e+00 : f32
    %89 = vector.broadcast %cst_63 : f32 to vector<2x32xf32>
    %90 = arith.subf %89, %82 : vector<2x32xf32>
    %91 = arith.mulf %90, %88 : vector<2x32xf32>
    %92 = arith.mulf %82, %63 : vector<2x32xf32>
    %93 = arith.addf %91, %92 : vector<2x32xf32>
    %c2_64 = arith.constant 2 : index
    %c0_65 = arith.constant 0 : index
    %94 = vector.load %arg38[%c2_64, %c0_65] : memref<16x32xf32, #tpu.memory_space<vmem>>, vector<2x32xf32>
    tpu.vector_store %arg38[%c2_64, %c0_65], %93 {strides = array<i32>} : memref<16x32xf32, #tpu.memory_space<vmem>>, vector<2x32xf32>,
    %c4 = arith.constant 4 : index
    %c0_66 = arith.constant 0 : index
    %95 = vector.load %arg32[%c4, %c0_66] : memref<16x32xf32, #tpu.memory_space<vmem>>, vector<2x32xf32>
    %c4_67 = arith.constant 4 : index
    %c0_68 = arith.constant 0 : index
    %96 = vector.load %arg33[%c4_67, %c0_68] : memref<16x32xf32, #tpu.memory_space<vmem>>, vector<2x32xf32>
    %c4_69 = arith.constant 4 : index
    %c0_70 = arith.constant 0 : index
    %97 = vector.load %arg34[%c4_69, %c0_70] : memref<16x32xf32, #tpu.memory_space<vmem>>, vector<2x32xf32>
    %98 = arith.truncf %93 : vector<2x32xf32> to vector<2x32xbf16>
    %cst_71 = arith.constant dense<0.000000e+00> : vector<2x32xf32>
    %99 = tpu.matmul %98, %28, %cst_71 {dimension_numbers = #tpu.dot_dimension_numbers<[1], [0], [0], [1], [0, 0, 1, 1], [], []>} : vector<2x32xbf16>, vector<32x32xbf16>, vector<2x32xf32> -> vector<2x32xf32>
    %100 = arith.addf %95, %99 : vector<2x32xf32>
    %101 = arith.negf %100 : vector<2x32xf32>
    %102 = math.exp %101 : vector<2x32xf32>
    %cst_72 = arith.constant 1.000000e+00 : f32
    %103 = vector.broadcast %cst_72 : f32 to vector<2x32xf32>
    %104 = arith.addf %103, %102 : vector<2x32xf32>
    %105 = arith.divf %103, %104 : vector<2x32xf32>
    %cst_73 = arith.constant dense<0.000000e+00> : vector<2x32xf32>
    %106 = tpu.matmul %98, %30, %cst_73 {dimension_numbers = #tpu.dot_dimension_numbers<[1], [0], [0], [1], [0, 0, 1, 1], [], []>} : vector<2x32xbf16>, vector<32x32xbf16>, vector<2x32xf32> -> vector<2x32xf32>
    %107 = arith.addf %96, %106 : vector<2x32xf32>
    %108 = arith.negf %107 : vector<2x32xf32>
    %109 = math.exp %108 : vector<2x32xf32>
    %cst_74 = arith.constant 1.000000e+00 : f32
    %110 = vector.broadcast %cst_74 : f32 to vector<2x32xf32>
    %111 = arith.addf %110, %109 : vector<2x32xf32>
    %112 = arith.divf %110, %111 : vector<2x32xf32>
    %cst_75 = arith.constant dense<0.000000e+00> : vector<2x32xf32>
    %113 = tpu.matmul %98, %32, %cst_75 {dimension_numbers = #tpu.dot_dimension_numbers<[1], [0], [0], [1], [0, 0, 1, 1], [], []>} : vector<2x32xbf16>, vector<32x32xbf16>, vector<2x32xf32> -> vector<2x32xf32>
    %114 = vector.broadcast %33 : vector<1x32xf32> to vector<2x32xf32>
    %115 = arith.addf %113, %114 : vector<2x32xf32>
    %116 = arith.mulf %105, %115 : vector<2x32xf32>
    %117 = arith.addf %97, %116 : vector<2x32xf32>
    %118 = math.tanh %117 : vector<2x32xf32>
    %cst_76 = arith.constant 1.000000e+00 : f32
    %119 = vector.broadcast %cst_76 : f32 to vector<2x32xf32>
    %120 = arith.subf %119, %112 : vector<2x32xf32>
    %121 = arith.mulf %120, %118 : vector<2x32xf32>
    %122 = arith.mulf %112, %93 : vector<2x32xf32>
    %123 = arith.addf %121, %122 : vector<2x32xf32>
    %c4_77 = arith.constant 4 : index
    %c0_78 = arith.constant 0 : index
    %124 = vector.load %arg38[%c4_77, %c0_78] : memref<16x32xf32, #tpu.memory_space<vmem>>, vector<2x32xf32>
    tpu.vector_store %arg38[%c4_77, %c0_78], %123 {strides = array<i32>} : memref<16x32xf32, #tpu.memory_space<vmem>>, vector<2x32xf32>,
    %c6 = arith.constant 6 : index
    %c0_79 = arith.constant 0 : index
    %125 = vector.load %arg32[%c6, %c0_79] : memref<16x32xf32, #tpu.memory_space<vmem>>, vector<2x32xf32>
    %c6_80 = arith.constant 6 : index
    %c0_81 = arith.constant 0 : index
    %126 = vector.load %arg33[%c6_80, %c0_81] : memref<16x32xf32, #tpu.memory_space<vmem>>, vector<2x32xf32>
    %c6_82 = arith.constant 6 : index
    %c0_83 = arith.constant 0 : index
    %127 = vector.load %arg34[%c6_82, %c0_83] : memref<16x32xf32, #tpu.memory_space<vmem>>, vector<2x32xf32>
    %128 = arith.truncf %123 : vector<2x32xf32> to vector<2x32xbf16>
    %cst_84 = arith.constant dense<0.000000e+00> : vector<2x32xf32>
    %129 = tpu.matmul %128, %28, %cst_84 {dimension_numbers = #tpu.dot_dimension_numbers<[1], [0], [0], [1], [0, 0, 1, 1], [], []>} : vector<2x32xbf16>, vector<32x32xbf16>, vector<2x32xf32> -> vector<2x32xf32>
    %130 = arith.addf %125, %129 : vector<2x32xf32>
    %131 = arith.negf %130 : vector<2x32xf32>
    %132 = math.exp %131 : vector<2x32xf32>
    %cst_85 = arith.constant 1.000000e+00 : f32
    %133 = vector.broadcast %cst_85 : f32 to vector<2x32xf32>
    %134 = arith.addf %133, %132 : vector<2x32xf32>
    %135 = arith.divf %133, %134 : vector<2x32xf32>
    %cst_86 = arith.constant dense<0.000000e+00> : vector<2x32xf32>
    %136 = tpu.matmul %128, %30, %cst_86 {dimension_numbers = #tpu.dot_dimension_numbers<[1], [0], [0], [1], [0, 0, 1, 1], [], []>} : vector<2x32xbf16>, vector<32x32xbf16>, vector<2x32xf32> -> vector<2x32xf32>
    %137 = arith.addf %126, %136 : vector<2x32xf32>
    %138 = arith.negf %137 : vector<2x32xf32>
    %139 = math.exp %138 : vector<2x32xf32>
    %cst_87 = arith.constant 1.000000e+00 : f32
    %140 = vector.broadcast %cst_87 : f32 to vector<2x32xf32>
    %141 = arith.addf %140, %139 : vector<2x32xf32>
    %142 = arith.divf %140, %141 : vector<2x32xf32>
    %cst_88 = arith.constant dense<0.000000e+00> : vector<2x32xf32>
    %143 = tpu.matmul %128, %32, %cst_88 {dimension_numbers = #tpu.dot_dimension_numbers<[1], [0], [0], [1], [0, 0, 1, 1], [], []>} : vector<2x32xbf16>, vector<32x32xbf16>, vector<2x32xf32> -> vector<2x32xf32>
    %144 = vector.broadcast %33 : vector<1x32xf32> to vector<2x32xf32>
    %145 = arith.addf %143, %144 : vector<2x32xf32>
    %146 = arith.mulf %135, %145 : vector<2x32xf32>
    %147 = arith.addf %127, %146 : vector<2x32xf32>
    %148 = math.tanh %147 : vector<2x32xf32>
    %cst_89 = arith.constant 1.000000e+00 : f32
    %149 = vector.broadcast %cst_89 : f32 to vector<2x32xf32>
    %150 = arith.subf %149, %142 : vector<2x32xf32>
    %151 = arith.mulf %150, %148 : vector<2x32xf32>
    %152 = arith.mulf %142, %123 : vector<2x32xf32>
    %153 = arith.addf %151, %152 : vector<2x32xf32>
    %c6_90 = arith.constant 6 : index
    %c0_91 = arith.constant 0 : index
    %154 = vector.load %arg38[%c6_90, %c0_91] : memref<16x32xf32, #tpu.memory_space<vmem>>, vector<2x32xf32>
    tpu.vector_store %arg38[%c6_90, %c0_91], %153 {strides = array<i32>} : memref<16x32xf32, #tpu.memory_space<vmem>>, vector<2x32xf32>,
    %c8 = arith.constant 8 : index
    %c0_92 = arith.constant 0 : index
    %155 = vector.load %arg32[%c8, %c0_92] : memref<16x32xf32, #tpu.memory_space<vmem>>, vector<2x32xf32>
    %c8_93 = arith.constant 8 : index
    %c0_94 = arith.constant 0 : index
    %156 = vector.load %arg33[%c8_93, %c0_94] : memref<16x32xf32, #tpu.memory_space<vmem>>, vector<2x32xf32>
    %c8_95 = arith.constant 8 : index
    %c0_96 = arith.constant 0 : index
    %157 = vector.load %arg34[%c8_95, %c0_96] : memref<16x32xf32, #tpu.memory_space<vmem>>, vector<2x32xf32>
    %158 = arith.truncf %153 : vector<2x32xf32> to vector<2x32xbf16>
    %cst_97 = arith.constant dense<0.000000e+00> : vector<2x32xf32>
    %159 = tpu.matmul %158, %28, %cst_97 {dimension_numbers = #tpu.dot_dimension_numbers<[1], [0], [0], [1], [0, 0, 1, 1], [], []>} : vector<2x32xbf16>, vector<32x32xbf16>, vector<2x32xf32> -> vector<2x32xf32>
    %160 = arith.addf %155, %159 : vector<2x32xf32>
    %161 = arith.negf %160 : vector<2x32xf32>
    %162 = math.exp %161 : vector<2x32xf32>
    %cst_98 = arith.constant 1.000000e+00 : f32
    %163 = vector.broadcast %cst_98 : f32 to vector<2x32xf32>
    %164 = arith.addf %163, %162 : vector<2x32xf32>
    %165 = arith.divf %163, %164 : vector<2x32xf32>
    %cst_99 = arith.constant dense<0.000000e+00> : vector<2x32xf32>
    %166 = tpu.matmul %158, %30, %cst_99 {dimension_numbers = #tpu.dot_dimension_numbers<[1], [0], [0], [1], [0, 0, 1, 1], [], []>} : vector<2x32xbf16>, vector<32x32xbf16>, vector<2x32xf32> -> vector<2x32xf32>
    %167 = arith.addf %156, %166 : vector<2x32xf32>
    %168 = arith.negf %167 : vector<2x32xf32>
    %169 = math.exp %168 : vector<2x32xf32>
    %cst_100 = arith.constant 1.000000e+00 : f32
    %170 = vector.broadcast %cst_100 : f32 to vector<2x32xf32>
    %171 = arith.addf %170, %169 : vector<2x32xf32>
    %172 = arith.divf %170, %171 : vector<2x32xf32>
    %cst_101 = arith.constant dense<0.000000e+00> : vector<2x32xf32>
    %173 = tpu.matmul %158, %32, %cst_101 {dimension_numbers = #tpu.dot_dimension_numbers<[1], [0], [0], [1], [0, 0, 1, 1], [], []>} : vector<2x32xbf16>, vector<32x32xbf16>, vector<2x32xf32> -> vector<2x32xf32>
    %174 = vector.broadcast %33 : vector<1x32xf32> to vector<2x32xf32>
    %175 = arith.addf %173, %174 : vector<2x32xf32>
    %176 = arith.mulf %165, %175 : vector<2x32xf32>
    %177 = arith.addf %157, %176 : vector<2x32xf32>
    %178 = math.tanh %177 : vector<2x32xf32>
    %cst_102 = arith.constant 1.000000e+00 : f32
    %179 = vector.broadcast %cst_102 : f32 to vector<2x32xf32>
    %180 = arith.subf %179, %172 : vector<2x32xf32>
    %181 = arith.mulf %180, %178 : vector<2x32xf32>
    %182 = arith.mulf %172, %153 : vector<2x32xf32>
    %183 = arith.addf %181, %182 : vector<2x32xf32>
    %c8_103 = arith.constant 8 : index
    %c0_104 = arith.constant 0 : index
    %184 = vector.load %arg38[%c8_103, %c0_104] : memref<16x32xf32, #tpu.memory_space<vmem>>, vector<2x32xf32>
    tpu.vector_store %arg38[%c8_103, %c0_104], %183 {strides = array<i32>} : memref<16x32xf32, #tpu.memory_space<vmem>>, vector<2x32xf32>,
    %c10 = arith.constant 10 : index
    %c0_105 = arith.constant 0 : index
    %185 = vector.load %arg32[%c10, %c0_105] : memref<16x32xf32, #tpu.memory_space<vmem>>, vector<2x32xf32>
    %c10_106 = arith.constant 10 : index
    %c0_107 = arith.constant 0 : index
    %186 = vector.load %arg33[%c10_106, %c0_107] : memref<16x32xf32, #tpu.memory_space<vmem>>, vector<2x32xf32>
    %c10_108 = arith.constant 10 : index
    %c0_109 = arith.constant 0 : index
    %187 = vector.load %arg34[%c10_108, %c0_109] : memref<16x32xf32, #tpu.memory_space<vmem>>, vector<2x32xf32>
    %188 = arith.truncf %183 : vector<2x32xf32> to vector<2x32xbf16>
    %cst_110 = arith.constant dense<0.000000e+00> : vector<2x32xf32>
    %189 = tpu.matmul %188, %28, %cst_110 {dimension_numbers = #tpu.dot_dimension_numbers<[1], [0], [0], [1], [0, 0, 1, 1], [], []>} : vector<2x32xbf16>, vector<32x32xbf16>, vector<2x32xf32> -> vector<2x32xf32>
    %190 = arith.addf %185, %189 : vector<2x32xf32>
    %191 = arith.negf %190 : vector<2x32xf32>
    %192 = math.exp %191 : vector<2x32xf32>
    %cst_111 = arith.constant 1.000000e+00 : f32
    %193 = vector.broadcast %cst_111 : f32 to vector<2x32xf32>
    %194 = arith.addf %193, %192 : vector<2x32xf32>
    %195 = arith.divf %193, %194 : vector<2x32xf32>
    %cst_112 = arith.constant dense<0.000000e+00> : vector<2x32xf32>
    %196 = tpu.matmul %188, %30, %cst_112 {dimension_numbers = #tpu.dot_dimension_numbers<[1], [0], [0], [1], [0, 0, 1, 1], [], []>} : vector<2x32xbf16>, vector<32x32xbf16>, vector<2x32xf32> -> vector<2x32xf32>
    %197 = arith.addf %186, %196 : vector<2x32xf32>
    %198 = arith.negf %197 : vector<2x32xf32>
    %199 = math.exp %198 : vector<2x32xf32>
    %cst_113 = arith.constant 1.000000e+00 : f32
    %200 = vector.broadcast %cst_113 : f32 to vector<2x32xf32>
    %201 = arith.addf %200, %199 : vector<2x32xf32>
    %202 = arith.divf %200, %201 : vector<2x32xf32>
    %cst_114 = arith.constant dense<0.000000e+00> : vector<2x32xf32>
    %203 = tpu.matmul %188, %32, %cst_114 {dimension_numbers = #tpu.dot_dimension_numbers<[1], [0], [0], [1], [0, 0, 1, 1], [], []>} : vector<2x32xbf16>, vector<32x32xbf16>, vector<2x32xf32> -> vector<2x32xf32>
    %204 = vector.broadcast %33 : vector<1x32xf32> to vector<2x32xf32>
    %205 = arith.addf %203, %204 : vector<2x32xf32>
    %206 = arith.mulf %195, %205 : vector<2x32xf32>
    %207 = arith.addf %187, %206 : vector<2x32xf32>
    %208 = math.tanh %207 : vector<2x32xf32>
    %cst_115 = arith.constant 1.000000e+00 : f32
    %209 = vector.broadcast %cst_115 : f32 to vector<2x32xf32>
    %210 = arith.subf %209, %202 : vector<2x32xf32>
    %211 = arith.mulf %210, %208 : vector<2x32xf32>
    %212 = arith.mulf %202, %183 : vector<2x32xf32>
    %213 = arith.addf %211, %212 : vector<2x32xf32>
    %c10_116 = arith.constant 10 : index
    %c0_117 = arith.constant 0 : index
    %214 = vector.load %arg38[%c10_116, %c0_117] : memref<16x32xf32, #tpu.memory_space<vmem>>, vector<2x32xf32>
    tpu.vector_store %arg38[%c10_116, %c0_117], %213 {strides = array<i32>} : memref<16x32xf32, #tpu.memory_space<vmem>>, vector<2x32xf32>,
    %c12 = arith.constant 12 : index
    %c0_118 = arith.constant 0 : index
    %215 = vector.load %arg32[%c12, %c0_118] : memref<16x32xf32, #tpu.memory_space<vmem>>, vector<2x32xf32>
    %c12_119 = arith.constant 12 : index
    %c0_120 = arith.constant 0 : index
    %216 = vector.load %arg33[%c12_119, %c0_120] : memref<16x32xf32, #tpu.memory_space<vmem>>, vector<2x32xf32>
    %c12_121 = arith.constant 12 : index
    %c0_122 = arith.constant 0 : index
    %217 = vector.load %arg34[%c12_121, %c0_122] : memref<16x32xf32, #tpu.memory_space<vmem>>, vector<2x32xf32>
    %218 = arith.truncf %213 : vector<2x32xf32> to vector<2x32xbf16>
    %cst_123 = arith.constant dense<0.000000e+00> : vector<2x32xf32>
    %219 = tpu.matmul %218, %28, %cst_123 {dimension_numbers = #tpu.dot_dimension_numbers<[1], [0], [0], [1], [0, 0, 1, 1], [], []>} : vector<2x32xbf16>, vector<32x32xbf16>, vector<2x32xf32> -> vector<2x32xf32>
    %220 = arith.addf %215, %219 : vector<2x32xf32>
    %221 = arith.negf %220 : vector<2x32xf32>
    %222 = math.exp %221 : vector<2x32xf32>
    %cst_124 = arith.constant 1.000000e+00 : f32
    %223 = vector.broadcast %cst_124 : f32 to vector<2x32xf32>
    %224 = arith.addf %223, %222 : vector<2x32xf32>
    %225 = arith.divf %223, %224 : vector<2x32xf32>
    %cst_125 = arith.constant dense<0.000000e+00> : vector<2x32xf32>
    %226 = tpu.matmul %218, %30, %cst_125 {dimension_numbers = #tpu.dot_dimension_numbers<[1], [0], [0], [1], [0, 0, 1, 1], [], []>} : vector<2x32xbf16>, vector<32x32xbf16>, vector<2x32xf32> -> vector<2x32xf32>
    %227 = arith.addf %216, %226 : vector<2x32xf32>
    %228 = arith.negf %227 : vector<2x32xf32>
    %229 = math.exp %228 : vector<2x32xf32>
    %cst_126 = arith.constant 1.000000e+00 : f32
    %230 = vector.broadcast %cst_126 : f32 to vector<2x32xf32>
    %231 = arith.addf %230, %229 : vector<2x32xf32>
    %232 = arith.divf %230, %231 : vector<2x32xf32>
    %cst_127 = arith.constant dense<0.000000e+00> : vector<2x32xf32>
    %233 = tpu.matmul %218, %32, %cst_127 {dimension_numbers = #tpu.dot_dimension_numbers<[1], [0], [0], [1], [0, 0, 1, 1], [], []>} : vector<2x32xbf16>, vector<32x32xbf16>, vector<2x32xf32> -> vector<2x32xf32>
    %234 = vector.broadcast %33 : vector<1x32xf32> to vector<2x32xf32>
    %235 = arith.addf %233, %234 : vector<2x32xf32>
    %236 = arith.mulf %225, %235 : vector<2x32xf32>
    %237 = arith.addf %217, %236 : vector<2x32xf32>
    %238 = math.tanh %237 : vector<2x32xf32>
    %cst_128 = arith.constant 1.000000e+00 : f32
    %239 = vector.broadcast %cst_128 : f32 to vector<2x32xf32>
    %240 = arith.subf %239, %232 : vector<2x32xf32>
    %241 = arith.mulf %240, %238 : vector<2x32xf32>
    %242 = arith.mulf %232, %213 : vector<2x32xf32>
    %243 = arith.addf %241, %242 : vector<2x32xf32>
    %c12_129 = arith.constant 12 : index
    %c0_130 = arith.constant 0 : index
    %244 = vector.load %arg38[%c12_129, %c0_130] : memref<16x32xf32, #tpu.memory_space<vmem>>, vector<2x32xf32>
    tpu.vector_store %arg38[%c12_129, %c0_130], %243 {strides = array<i32>} : memref<16x32xf32, #tpu.memory_space<vmem>>, vector<2x32xf32>,
    %c14 = arith.constant 14 : index
    %c0_131 = arith.constant 0 : index
    %245 = vector.load %arg32[%c14, %c0_131] : memref<16x32xf32, #tpu.memory_space<vmem>>, vector<2x32xf32>
    %c14_132 = arith.constant 14 : index
    %c0_133 = arith.constant 0 : index
    %246 = vector.load %arg33[%c14_132, %c0_133] : memref<16x32xf32, #tpu.memory_space<vmem>>, vector<2x32xf32>
    %c14_134 = arith.constant 14 : index
    %c0_135 = arith.constant 0 : index
    %247 = vector.load %arg34[%c14_134, %c0_135] : memref<16x32xf32, #tpu.memory_space<vmem>>, vector<2x32xf32>
    %248 = arith.truncf %243 : vector<2x32xf32> to vector<2x32xbf16>
    %cst_136 = arith.constant dense<0.000000e+00> : vector<2x32xf32>
    %249 = tpu.matmul %248, %28, %cst_136 {dimension_numbers = #tpu.dot_dimension_numbers<[1], [0], [0], [1], [0, 0, 1, 1], [], []>} : vector<2x32xbf16>, vector<32x32xbf16>, vector<2x32xf32> -> vector<2x32xf32>
    %250 = arith.addf %245, %249 : vector<2x32xf32>
    %251 = arith.negf %250 : vector<2x32xf32>
    %252 = math.exp %251 : vector<2x32xf32>
    %cst_137 = arith.constant 1.000000e+00 : f32
    %253 = vector.broadcast %cst_137 : f32 to vector<2x32xf32>
    %254 = arith.addf %253, %252 : vector<2x32xf32>
    %255 = arith.divf %253, %254 : vector<2x32xf32>
    %cst_138 = arith.constant dense<0.000000e+00> : vector<2x32xf32>
    %256 = tpu.matmul %248, %30, %cst_138 {dimension_numbers = #tpu.dot_dimension_numbers<[1], [0], [0], [1], [0, 0, 1, 1], [], []>} : vector<2x32xbf16>, vector<32x32xbf16>, vector<2x32xf32> -> vector<2x32xf32>
    %257 = arith.addf %246, %256 : vector<2x32xf32>
    %258 = arith.negf %257 : vector<2x32xf32>
    %259 = math.exp %258 : vector<2x32xf32>
    %cst_139 = arith.constant 1.000000e+00 : f32
    %260 = vector.broadcast %cst_139 : f32 to vector<2x32xf32>
    %261 = arith.addf %260, %259 : vector<2x32xf32>
    %262 = arith.divf %260, %261 : vector<2x32xf32>
    %cst_140 = arith.constant dense<0.000000e+00> : vector<2x32xf32>
    %263 = tpu.matmul %248, %32, %cst_140 {dimension_numbers = #tpu.dot_dimension_numbers<[1], [0], [0], [1], [0, 0, 1, 1], [], []>} : vector<2x32xbf16>, vector<32x32xbf16>, vector<2x32xf32> -> vector<2x32xf32>
    %264 = vector.broadcast %33 : vector<1x32xf32> to vector<2x32xf32>
    %265 = arith.addf %263, %264 : vector<2x32xf32>
    %266 = arith.mulf %255, %265 : vector<2x32xf32>
    %267 = arith.addf %247, %266 : vector<2x32xf32>
    %268 = math.tanh %267 : vector<2x32xf32>
    %cst_141 = arith.constant 1.000000e+00 : f32
    %269 = vector.broadcast %cst_141 : f32 to vector<2x32xf32>
    %270 = arith.subf %269, %262 : vector<2x32xf32>
    %271 = arith.mulf %270, %268 : vector<2x32xf32>
    %272 = arith.mulf %262, %243 : vector<2x32xf32>
    %273 = arith.addf %271, %272 : vector<2x32xf32>
    %c14_142 = arith.constant 14 : index
    %c0_143 = arith.constant 0 : index
    %274 = vector.load %arg38[%c14_142, %c0_143] : memref<16x32xf32, #tpu.memory_space<vmem>>, vector<2x32xf32>
    tpu.vector_store %arg38[%c14_142, %c0_143], %273 {strides = array<i32>} : memref<16x32xf32, #tpu.memory_space<vmem>>, vector<2x32xf32>,
    %c0_144 = arith.constant 0 : index
    %c0_145 = arith.constant 0 : index
    %275 = vector.load %arg38[%c0_144, %c0_145] : memref<16x32xf32, #tpu.memory_space<vmem>>, vector<16x32xf32>
    %276 = arith.truncf %275 : vector<16x32xf32> to vector<16x32xbf16>
    %c0_146 = arith.constant 0 : index
    %c0_147 = arith.constant 0 : index
    %c0_148 = arith.constant 0 : index
    %277 = vector.load %arg6[%c0_146, %c0_147, %c0_148] : memref<3x32x32xbf16, #tpu.memory_space<vmem>>, vector<1x32x32xbf16>
    %278 = vector.shape_cast %277 : vector<1x32x32xbf16> to vector<32x32xbf16>
    %cst_149 = arith.constant dense<0.000000e+00> : vector<16x32xf32>
    %279 = tpu.matmul %276, %278, %cst_149 {dimension_numbers = #tpu.dot_dimension_numbers<[1], [0], [0], [1], [0, 0, 1, 1], [], []>} : vector<16x32xbf16>, vector<32x32xbf16>, vector<16x32xf32> -> vector<16x32xf32>
    %c0_150 = arith.constant 0 : index
    %c0_151 = arith.constant 0 : index
    %c0_152 = arith.constant 0 : index
    %280 = vector.load %arg8[%c0_150, %c0_151, %c0_152] : memref<3x1x32xf32, #tpu.memory_space<vmem>>, vector<1x1x32xf32>
    %281 = vector.shape_cast %280 : vector<1x1x32xf32> to vector<1x32xf32>
    %282 = vector.broadcast %281 : vector<1x32xf32> to vector<16x32xf32>
    %283 = arith.addf %279, %282 : vector<16x32xf32>
    %c0_153 = arith.constant 0 : index
    %c0_154 = arith.constant 0 : index
    %284 = vector.load %arg32[%c0_153, %c0_154] : memref<16x32xf32, #tpu.memory_space<vmem>>, vector<16x32xf32>
    tpu.vector_store %arg32[%c0_153, %c0_154], %283 {strides = array<i32>} : memref<16x32xf32, #tpu.memory_space<vmem>>, vector<16x32xf32>,
    %c1_155 = arith.constant 1 : index
    %c0_156 = arith.constant 0 : index
    %c0_157 = arith.constant 0 : index
    %285 = vector.load %arg6[%c1_155, %c0_156, %c0_157] : memref<3x32x32xbf16, #tpu.memory_space<vmem>>, vector<1x32x32xbf16>
    %286 = vector.shape_cast %285 : vector<1x32x32xbf16> to vector<32x32xbf16>
    %cst_158 = arith.constant dense<0.000000e+00> : vector<16x32xf32>
    %287 = tpu.matmul %276, %286, %cst_158 {dimension_numbers = #tpu.dot_dimension_numbers<[1], [0], [0], [1], [0, 0, 1, 1], [], []>} : vector<16x32xbf16>, vector<32x32xbf16>, vector<16x32xf32> -> vector<16x32xf32>
    %c1_159 = arith.constant 1 : index
    %c0_160 = arith.constant 0 : index
    %c0_161 = arith.constant 0 : index
    %288 = vector.load %arg8[%c1_159, %c0_160, %c0_161] : memref<3x1x32xf32, #tpu.memory_space<vmem>>, vector<1x1x32xf32>
    %289 = vector.shape_cast %288 : vector<1x1x32xf32> to vector<1x32xf32>
    %290 = vector.broadcast %289 : vector<1x32xf32> to vector<16x32xf32>
    %291 = arith.addf %287, %290 : vector<16x32xf32>
    %c0_162 = arith.constant 0 : index
    %c0_163 = arith.constant 0 : index
    %292 = vector.load %arg33[%c0_162, %c0_163] : memref<16x32xf32, #tpu.memory_space<vmem>>, vector<16x32xf32>
    tpu.vector_store %arg33[%c0_162, %c0_163], %291 {strides = array<i32>} : memref<16x32xf32, #tpu.memory_space<vmem>>, vector<16x32xf32>,
    %c2_164 = arith.constant 2 : index
    %c0_165 = arith.constant 0 : index
    %c0_166 = arith.constant 0 : index
    %293 = vector.load %arg6[%c2_164, %c0_165, %c0_166] : memref<3x32x32xbf16, #tpu.memory_space<vmem>>, vector<1x32x32xbf16>
    %294 = vector.shape_cast %293 : vector<1x32x32xbf16> to vector<32x32xbf16>
    %cst_167 = arith.constant dense<0.000000e+00> : vector<16x32xf32>
    %295 = tpu.matmul %276, %294, %cst_167 {dimension_numbers = #tpu.dot_dimension_numbers<[1], [0], [0], [1], [0, 0, 1, 1], [], []>} : vector<16x32xbf16>, vector<32x32xbf16>, vector<16x32xf32> -> vector<16x32xf32>
    %c2_168 = arith.constant 2 : index
    %c0_169 = arith.constant 0 : index
    %c0_170 = arith.constant 0 : index
    %296 = vector.load %arg8[%c2_168, %c0_169, %c0_170] : memref<3x1x32xf32, #tpu.memory_space<vmem>>, vector<1x1x32xf32>
    %297 = vector.shape_cast %296 : vector<1x1x32xf32> to vector<1x32xf32>
    %298 = vector.broadcast %297 : vector<1x32xf32> to vector<16x32xf32>
    %299 = arith.addf %295, %298 : vector<16x32xf32>
    %c0_171 = arith.constant 0 : index
    %c0_172 = arith.constant 0 : index
    %300 = vector.load %arg34[%c0_171, %c0_172] : memref<16x32xf32, #tpu.memory_space<vmem>>, vector<16x32xf32>
    tpu.vector_store %arg34[%c0_171, %c0_172], %299 {strides = array<i32>} : memref<16x32xf32, #tpu.memory_space<vmem>>, vector<16x32xf32>,
    %c0_173 = arith.constant 0 : index
    %c0_174 = arith.constant 0 : index
    %c0_175 = arith.constant 0 : index
    %301 = vector.load %arg7[%c0_173, %c0_174, %c0_175] : memref<3x32x32xbf16, #tpu.memory_space<vmem>>, vector<1x32x32xbf16>
    %302 = vector.shape_cast %301 : vector<1x32x32xbf16> to vector<32x32xbf16>
    %c1_176 = arith.constant 1 : index
    %c0_177 = arith.constant 0 : index
    %c0_178 = arith.constant 0 : index
    %303 = vector.load %arg7[%c1_176, %c0_177, %c0_178] : memref<3x32x32xbf16, #tpu.memory_space<vmem>>, vector<1x32x32xbf16>
    %304 = vector.shape_cast %303 : vector<1x32x32xbf16> to vector<32x32xbf16>
    %c2_179 = arith.constant 2 : index
    %c0_180 = arith.constant 0 : index
    %c0_181 = arith.constant 0 : index
    %305 = vector.load %arg7[%c2_179, %c0_180, %c0_181] : memref<3x32x32xbf16, #tpu.memory_space<vmem>>, vector<1x32x32xbf16>
    %306 = vector.shape_cast %305 : vector<1x32x32xbf16> to vector<32x32xbf16>
    %c0_182 = arith.constant 0 : index
    %c0_183 = arith.constant 0 : index
    %307 = vector.load %arg9[%c0_182, %c0_183] : memref<1x32xf32, #tpu.memory_space<vmem>>, vector<1x32xf32>
    %cst_184 = arith.constant 0.000000e+00 : f32
    %308 = vector.broadcast %cst_184 : f32 to vector<2x32xf32>
    %c0_185 = arith.constant 0 : index
    %c0_186 = arith.constant 0 : index
    %309 = vector.load %arg32[%c0_185, %c0_186] : memref<16x32xf32, #tpu.memory_space<vmem>>, vector<2x32xf32>
    %c0_187 = arith.constant 0 : index
    %c0_188 = arith.constant 0 : index
    %310 = vector.load %arg33[%c0_187, %c0_188] : memref<16x32xf32, #tpu.memory_space<vmem>>, vector<2x32xf32>
    %c0_189 = arith.constant 0 : index
    %c0_190 = arith.constant 0 : index
    %311 = vector.load %arg34[%c0_189, %c0_190] : memref<16x32xf32, #tpu.memory_space<vmem>>, vector<2x32xf32>
    %312 = arith.truncf %308 : vector<2x32xf32> to vector<2x32xbf16>
    %cst_191 = arith.constant dense<0.000000e+00> : vector<2x32xf32>
    %313 = tpu.matmul %312, %302, %cst_191 {dimension_numbers = #tpu.dot_dimension_numbers<[1], [0], [0], [1], [0, 0, 1, 1], [], []>} : vector<2x32xbf16>, vector<32x32xbf16>, vector<2x32xf32> -> vector<2x32xf32>
    %314 = arith.addf %309, %313 : vector<2x32xf32>
    %315 = arith.negf %314 : vector<2x32xf32>
    %316 = math.exp %315 : vector<2x32xf32>
    %cst_192 = arith.constant 1.000000e+00 : f32
    %317 = vector.broadcast %cst_192 : f32 to vector<2x32xf32>
    %318 = arith.addf %317, %316 : vector<2x32xf32>
    %319 = arith.divf %317, %318 : vector<2x32xf32>
    %cst_193 = arith.constant dense<0.000000e+00> : vector<2x32xf32>
    %320 = tpu.matmul %312, %304, %cst_193 {dimension_numbers = #tpu.dot_dimension_numbers<[1], [0], [0], [1], [0, 0, 1, 1], [], []>} : vector<2x32xbf16>, vector<32x32xbf16>, vector<2x32xf32> -> vector<2x32xf32>
    %321 = arith.addf %310, %320 : vector<2x32xf32>
    %322 = arith.negf %321 : vector<2x32xf32>
    %323 = math.exp %322 : vector<2x32xf32>
    %cst_194 = arith.constant 1.000000e+00 : f32
    %324 = vector.broadcast %cst_194 : f32 to vector<2x32xf32>
    %325 = arith.addf %324, %323 : vector<2x32xf32>
    %326 = arith.divf %324, %325 : vector<2x32xf32>
    %cst_195 = arith.constant dense<0.000000e+00> : vector<2x32xf32>
    %327 = tpu.matmul %312, %306, %cst_195 {dimension_numbers = #tpu.dot_dimension_numbers<[1], [0], [0], [1], [0, 0, 1, 1], [], []>} : vector<2x32xbf16>, vector<32x32xbf16>, vector<2x32xf32> -> vector<2x32xf32>
    %328 = vector.broadcast %307 : vector<1x32xf32> to vector<2x32xf32>
    %329 = arith.addf %327, %328 : vector<2x32xf32>
    %330 = arith.mulf %319, %329 : vector<2x32xf32>
    %331 = arith.addf %311, %330 : vector<2x32xf32>
    %332 = math.tanh %331 : vector<2x32xf32>
    %cst_196 = arith.constant 1.000000e+00 : f32
    %333 = vector.broadcast %cst_196 : f32 to vector<2x32xf32>
    %334 = arith.subf %333, %326 : vector<2x32xf32>
    %335 = arith.mulf %334, %332 : vector<2x32xf32>
    %336 = arith.mulf %326, %308 : vector<2x32xf32>
    %337 = arith.addf %335, %336 : vector<2x32xf32>
    %c0_197 = arith.constant 0 : index
    %c0_198 = arith.constant 0 : index
    %338 = vector.load %arg38[%c0_197, %c0_198] : memref<16x32xf32, #tpu.memory_space<vmem>>, vector<2x32xf32>
    tpu.vector_store %arg38[%c0_197, %c0_198], %337 {strides = array<i32>} : memref<16x32xf32, #tpu.memory_space<vmem>>, vector<2x32xf32>,
    %c2_199 = arith.constant 2 : index
    %c0_200 = arith.constant 0 : index
    %339 = vector.load %arg32[%c2_199, %c0_200] : memref<16x32xf32, #tpu.memory_space<vmem>>, vector<2x32xf32>
    %c2_201 = arith.constant 2 : index
    %c0_202 = arith.constant 0 : index
    %340 = vector.load %arg33[%c2_201, %c0_202] : memref<16x32xf32, #tpu.memory_space<vmem>>, vector<2x32xf32>
    %c2_203 = arith.constant 2 : index
    %c0_204 = arith.constant 0 : index
    %341 = vector.load %arg34[%c2_203, %c0_204] : memref<16x32xf32, #tpu.memory_space<vmem>>, vector<2x32xf32>
    %342 = arith.truncf %337 : vector<2x32xf32> to vector<2x32xbf16>
    %cst_205 = arith.constant dense<0.000000e+00> : vector<2x32xf32>
    %343 = tpu.matmul %342, %302, %cst_205 {dimension_numbers = #tpu.dot_dimension_numbers<[1], [0], [0], [1], [0, 0, 1, 1], [], []>} : vector<2x32xbf16>, vector<32x32xbf16>, vector<2x32xf32> -> vector<2x32xf32>
    %344 = arith.addf %339, %343 : vector<2x32xf32>
    %345 = arith.negf %344 : vector<2x32xf32>
    %346 = math.exp %345 : vector<2x32xf32>
    %cst_206 = arith.constant 1.000000e+00 : f32
    %347 = vector.broadcast %cst_206 : f32 to vector<2x32xf32>
    %348 = arith.addf %347, %346 : vector<2x32xf32>
    %349 = arith.divf %347, %348 : vector<2x32xf32>
    %cst_207 = arith.constant dense<0.000000e+00> : vector<2x32xf32>
    %350 = tpu.matmul %342, %304, %cst_207 {dimension_numbers = #tpu.dot_dimension_numbers<[1], [0], [0], [1], [0, 0, 1, 1], [], []>} : vector<2x32xbf16>, vector<32x32xbf16>, vector<2x32xf32> -> vector<2x32xf32>
    %351 = arith.addf %340, %350 : vector<2x32xf32>
    %352 = arith.negf %351 : vector<2x32xf32>
    %353 = math.exp %352 : vector<2x32xf32>
    %cst_208 = arith.constant 1.000000e+00 : f32
    %354 = vector.broadcast %cst_208 : f32 to vector<2x32xf32>
    %355 = arith.addf %354, %353 : vector<2x32xf32>
    %356 = arith.divf %354, %355 : vector<2x32xf32>
    %cst_209 = arith.constant dense<0.000000e+00> : vector<2x32xf32>
    %357 = tpu.matmul %342, %306, %cst_209 {dimension_numbers = #tpu.dot_dimension_numbers<[1], [0], [0], [1], [0, 0, 1, 1], [], []>} : vector<2x32xbf16>, vector<32x32xbf16>, vector<2x32xf32> -> vector<2x32xf32>
    %358 = vector.broadcast %307 : vector<1x32xf32> to vector<2x32xf32>
    %359 = arith.addf %357, %358 : vector<2x32xf32>
    %360 = arith.mulf %349, %359 : vector<2x32xf32>
    %361 = arith.addf %341, %360 : vector<2x32xf32>
    %362 = math.tanh %361 : vector<2x32xf32>
    %cst_210 = arith.constant 1.000000e+00 : f32
    %363 = vector.broadcast %cst_210 : f32 to vector<2x32xf32>
    %364 = arith.subf %363, %356 : vector<2x32xf32>
    %365 = arith.mulf %364, %362 : vector<2x32xf32>
    %366 = arith.mulf %356, %337 : vector<2x32xf32>
    %367 = arith.addf %365, %366 : vector<2x32xf32>
    %c2_211 = arith.constant 2 : index
    %c0_212 = arith.constant 0 : index
    %368 = vector.load %arg38[%c2_211, %c0_212] : memref<16x32xf32, #tpu.memory_space<vmem>>, vector<2x32xf32>
    tpu.vector_store %arg38[%c2_211, %c0_212], %367 {strides = array<i32>} : memref<16x32xf32, #tpu.memory_space<vmem>>, vector<2x32xf32>,
    %c4_213 = arith.constant 4 : index
    %c0_214 = arith.constant 0 : index
    %369 = vector.load %arg32[%c4_213, %c0_214] : memref<16x32xf32, #tpu.memory_space<vmem>>, vector<2x32xf32>
    %c4_215 = arith.constant 4 : index
    %c0_216 = arith.constant 0 : index
    %370 = vector.load %arg33[%c4_215, %c0_216] : memref<16x32xf32, #tpu.memory_space<vmem>>, vector<2x32xf32>
    %c4_217 = arith.constant 4 : index
    %c0_218 = arith.constant 0 : index
    %371 = vector.load %arg34[%c4_217, %c0_218] : memref<16x32xf32, #tpu.memory_space<vmem>>, vector<2x32xf32>
    %372 = arith.truncf %367 : vector<2x32xf32> to vector<2x32xbf16>
    %cst_219 = arith.constant dense<0.000000e+00> : vector<2x32xf32>
    %373 = tpu.matmul %372, %302, %cst_219 {dimension_numbers = #tpu.dot_dimension_numbers<[1], [0], [0], [1], [0, 0, 1, 1], [], []>} : vector<2x32xbf16>, vector<32x32xbf16>, vector<2x32xf32> -> vector<2x32xf32>
    %374 = arith.addf %369, %373 : vector<2x32xf32>
    %375 = arith.negf %374 : vector<2x32xf32>
    %376 = math.exp %375 : vector<2x32xf32>
    %cst_220 = arith.constant 1.000000e+00 : f32
    %377 = vector.broadcast %cst_220 : f32 to vector<2x32xf32>
    %378 = arith.addf %377, %376 : vector<2x32xf32>
    %379 = arith.divf %377, %378 : vector<2x32xf32>
    %cst_221 = arith.constant dense<0.000000e+00> : vector<2x32xf32>
    %380 = tpu.matmul %372, %304, %cst_221 {dimension_numbers = #tpu.dot_dimension_numbers<[1], [0], [0], [1], [0, 0, 1, 1], [], []>} : vector<2x32xbf16>, vector<32x32xbf16>, vector<2x32xf32> -> vector<2x32xf32>
    %381 = arith.addf %370, %380 : vector<2x32xf32>
    %382 = arith.negf %381 : vector<2x32xf32>
    %383 = math.exp %382 : vector<2x32xf32>
    %cst_222 = arith.constant 1.000000e+00 : f32
    %384 = vector.broadcast %cst_222 : f32 to vector<2x32xf32>
    %385 = arith.addf %384, %383 : vector<2x32xf32>
    %386 = arith.divf %384, %385 : vector<2x32xf32>
    %cst_223 = arith.constant dense<0.000000e+00> : vector<2x32xf32>
    %387 = tpu.matmul %372, %306, %cst_223 {dimension_numbers = #tpu.dot_dimension_numbers<[1], [0], [0], [1], [0, 0, 1, 1], [], []>} : vector<2x32xbf16>, vector<32x32xbf16>, vector<2x32xf32> -> vector<2x32xf32>
    %388 = vector.broadcast %307 : vector<1x32xf32> to vector<2x32xf32>
    %389 = arith.addf %387, %388 : vector<2x32xf32>
    %390 = arith.mulf %379, %389 : vector<2x32xf32>
    %391 = arith.addf %371, %390 : vector<2x32xf32>
    %392 = math.tanh %391 : vector<2x32xf32>
    %cst_224 = arith.constant 1.000000e+00 : f32
    %393 = vector.broadcast %cst_224 : f32 to vector<2x32xf32>
    %394 = arith.subf %393, %386 : vector<2x32xf32>
    %395 = arith.mulf %394, %392 : vector<2x32xf32>
    %396 = arith.mulf %386, %367 : vector<2x32xf32>
    %397 = arith.addf %395, %396 : vector<2x32xf32>
    %c4_225 = arith.constant 4 : index
    %c0_226 = arith.constant 0 : index
    %398 = vector.load %arg38[%c4_225, %c0_226] : memref<16x32xf32, #tpu.memory_space<vmem>>, vector<2x32xf32>
    tpu.vector_store %arg38[%c4_225, %c0_226], %397 {strides = array<i32>} : memref<16x32xf32, #tpu.memory_space<vmem>>, vector<2x32xf32>,
    %c6_227 = arith.constant 6 : index
    %c0_228 = arith.constant 0 : index
    %399 = vector.load %arg32[%c6_227, %c0_228] : memref<16x32xf32, #tpu.memory_space<vmem>>, vector<2x32xf32>
    %c6_229 = arith.constant 6 : index
    %c0_230 = arith.constant 0 : index
    %400 = vector.load %arg33[%c6_229, %c0_230] : memref<16x32xf32, #tpu.memory_space<vmem>>, vector<2x32xf32>
    %c6_231 = arith.constant 6 : index
    %c0_232 = arith.constant 0 : index
    %401 = vector.load %arg34[%c6_231, %c0_232] : memref<16x32xf32, #tpu.memory_space<vmem>>, vector<2x32xf32>
    %402 = arith.truncf %397 : vector<2x32xf32> to vector<2x32xbf16>
    %cst_233 = arith.constant dense<0.000000e+00> : vector<2x32xf32>
    %403 = tpu.matmul %402, %302, %cst_233 {dimension_numbers = #tpu.dot_dimension_numbers<[1], [0], [0], [1], [0, 0, 1, 1], [], []>} : vector<2x32xbf16>, vector<32x32xbf16>, vector<2x32xf32> -> vector<2x32xf32>
    %404 = arith.addf %399, %403 : vector<2x32xf32>
    %405 = arith.negf %404 : vector<2x32xf32>
    %406 = math.exp %405 : vector<2x32xf32>
    %cst_234 = arith.constant 1.000000e+00 : f32
    %407 = vector.broadcast %cst_234 : f32 to vector<2x32xf32>
    %408 = arith.addf %407, %406 : vector<2x32xf32>
    %409 = arith.divf %407, %408 : vector<2x32xf32>
    %cst_235 = arith.constant dense<0.000000e+00> : vector<2x32xf32>
    %410 = tpu.matmul %402, %304, %cst_235 {dimension_numbers = #tpu.dot_dimension_numbers<[1], [0], [0], [1], [0, 0, 1, 1], [], []>} : vector<2x32xbf16>, vector<32x32xbf16>, vector<2x32xf32> -> vector<2x32xf32>
    %411 = arith.addf %400, %410 : vector<2x32xf32>
    %412 = arith.negf %411 : vector<2x32xf32>
    %413 = math.exp %412 : vector<2x32xf32>
    %cst_236 = arith.constant 1.000000e+00 : f32
    %414 = vector.broadcast %cst_236 : f32 to vector<2x32xf32>
    %415 = arith.addf %414, %413 : vector<2x32xf32>
    %416 = arith.divf %414, %415 : vector<2x32xf32>
    %cst_237 = arith.constant dense<0.000000e+00> : vector<2x32xf32>
    %417 = tpu.matmul %402, %306, %cst_237 {dimension_numbers = #tpu.dot_dimension_numbers<[1], [0], [0], [1], [0, 0, 1, 1], [], []>} : vector<2x32xbf16>, vector<32x32xbf16>, vector<2x32xf32> -> vector<2x32xf32>
    %418 = vector.broadcast %307 : vector<1x32xf32> to vector<2x32xf32>
    %419 = arith.addf %417, %418 : vector<2x32xf32>
    %420 = arith.mulf %409, %419 : vector<2x32xf32>
    %421 = arith.addf %401, %420 : vector<2x32xf32>
    %422 = math.tanh %421 : vector<2x32xf32>
    %cst_238 = arith.constant 1.000000e+00 : f32
    %423 = vector.broadcast %cst_238 : f32 to vector<2x32xf32>
    %424 = arith.subf %423, %416 : vector<2x32xf32>
    %425 = arith.mulf %424, %422 : vector<2x32xf32>
    %426 = arith.mulf %416, %397 : vector<2x32xf32>
    %427 = arith.addf %425, %426 : vector<2x32xf32>
    %c6_239 = arith.constant 6 : index
    %c0_240 = arith.constant 0 : index
    %428 = vector.load %arg38[%c6_239, %c0_240] : memref<16x32xf32, #tpu.memory_space<vmem>>, vector<2x32xf32>
    tpu.vector_store %arg38[%c6_239, %c0_240], %427 {strides = array<i32>} : memref<16x32xf32, #tpu.memory_space<vmem>>, vector<2x32xf32>,
    %c8_241 = arith.constant 8 : index
    %c0_242 = arith.constant 0 : index
    %429 = vector.load %arg32[%c8_241, %c0_242] : memref<16x32xf32, #tpu.memory_space<vmem>>, vector<2x32xf32>
    %c8_243 = arith.constant 8 : index
    %c0_244 = arith.constant 0 : index
    %430 = vector.load %arg33[%c8_243, %c0_244] : memref<16x32xf32, #tpu.memory_space<vmem>>, vector<2x32xf32>
    %c8_245 = arith.constant 8 : index
    %c0_246 = arith.constant 0 : index
    %431 = vector.load %arg34[%c8_245, %c0_246] : memref<16x32xf32, #tpu.memory_space<vmem>>, vector<2x32xf32>
    %432 = arith.truncf %427 : vector<2x32xf32> to vector<2x32xbf16>
    %cst_247 = arith.constant dense<0.000000e+00> : vector<2x32xf32>
    %433 = tpu.matmul %432, %302, %cst_247 {dimension_numbers = #tpu.dot_dimension_numbers<[1], [0], [0], [1], [0, 0, 1, 1], [], []>} : vector<2x32xbf16>, vector<32x32xbf16>, vector<2x32xf32> -> vector<2x32xf32>
    %434 = arith.addf %429, %433 : vector<2x32xf32>
    %435 = arith.negf %434 : vector<2x32xf32>
    %436 = math.exp %435 : vector<2x32xf32>
    %cst_248 = arith.constant 1.000000e+00 : f32
    %437 = vector.broadcast %cst_248 : f32 to vector<2x32xf32>
    %438 = arith.addf %437, %436 : vector<2x32xf32>
    %439 = arith.divf %437, %438 : vector<2x32xf32>
    %cst_249 = arith.constant dense<0.000000e+00> : vector<2x32xf32>
    %440 = tpu.matmul %432, %304, %cst_249 {dimension_numbers = #tpu.dot_dimension_numbers<[1], [0], [0], [1], [0, 0, 1, 1], [], []>} : vector<2x32xbf16>, vector<32x32xbf16>, vector<2x32xf32> -> vector<2x32xf32>
    %441 = arith.addf %430, %440 : vector<2x32xf32>
    %442 = arith.negf %441 : vector<2x32xf32>
    %443 = math.exp %442 : vector<2x32xf32>
    %cst_250 = arith.constant 1.000000e+00 : f32
    %444 = vector.broadcast %cst_250 : f32 to vector<2x32xf32>
    %445 = arith.addf %444, %443 : vector<2x32xf32>
    %446 = arith.divf %444, %445 : vector<2x32xf32>
    %cst_251 = arith.constant dense<0.000000e+00> : vector<2x32xf32>
    %447 = tpu.matmul %432, %306, %cst_251 {dimension_numbers = #tpu.dot_dimension_numbers<[1], [0], [0], [1], [0, 0, 1, 1], [], []>} : vector<2x32xbf16>, vector<32x32xbf16>, vector<2x32xf32> -> vector<2x32xf32>
    %448 = vector.broadcast %307 : vector<1x32xf32> to vector<2x32xf32>
    %449 = arith.addf %447, %448 : vector<2x32xf32>
    %450 = arith.mulf %439, %449 : vector<2x32xf32>
    %451 = arith.addf %431, %450 : vector<2x32xf32>
    %452 = math.tanh %451 : vector<2x32xf32>
    %cst_252 = arith.constant 1.000000e+00 : f32
    %453 = vector.broadcast %cst_252 : f32 to vector<2x32xf32>
    %454 = arith.subf %453, %446 : vector<2x32xf32>
    %455 = arith.mulf %454, %452 : vector<2x32xf32>
    %456 = arith.mulf %446, %427 : vector<2x32xf32>
    %457 = arith.addf %455, %456 : vector<2x32xf32>
    %c8_253 = arith.constant 8 : index
    %c0_254 = arith.constant 0 : index
    %458 = vector.load %arg38[%c8_253, %c0_254] : memref<16x32xf32, #tpu.memory_space<vmem>>, vector<2x32xf32>
    tpu.vector_store %arg38[%c8_253, %c0_254], %457 {strides = array<i32>} : memref<16x32xf32, #tpu.memory_space<vmem>>, vector<2x32xf32>,
    %c10_255 = arith.constant 10 : index
    %c0_256 = arith.constant 0 : index
    %459 = vector.load %arg32[%c10_255, %c0_256] : memref<16x32xf32, #tpu.memory_space<vmem>>, vector<2x32xf32>
    %c10_257 = arith.constant 10 : index
    %c0_258 = arith.constant 0 : index
    %460 = vector.load %arg33[%c10_257, %c0_258] : memref<16x32xf32, #tpu.memory_space<vmem>>, vector<2x32xf32>
    %c10_259 = arith.constant 10 : index
    %c0_260 = arith.constant 0 : index
    %461 = vector.load %arg34[%c10_259, %c0_260] : memref<16x32xf32, #tpu.memory_space<vmem>>, vector<2x32xf32>
    %462 = arith.truncf %457 : vector<2x32xf32> to vector<2x32xbf16>
    %cst_261 = arith.constant dense<0.000000e+00> : vector<2x32xf32>
    %463 = tpu.matmul %462, %302, %cst_261 {dimension_numbers = #tpu.dot_dimension_numbers<[1], [0], [0], [1], [0, 0, 1, 1], [], []>} : vector<2x32xbf16>, vector<32x32xbf16>, vector<2x32xf32> -> vector<2x32xf32>
    %464 = arith.addf %459, %463 : vector<2x32xf32>
    %465 = arith.negf %464 : vector<2x32xf32>
    %466 = math.exp %465 : vector<2x32xf32>
    %cst_262 = arith.constant 1.000000e+00 : f32
    %467 = vector.broadcast %cst_262 : f32 to vector<2x32xf32>
    %468 = arith.addf %467, %466 : vector<2x32xf32>
    %469 = arith.divf %467, %468 : vector<2x32xf32>
    %cst_263 = arith.constant dense<0.000000e+00> : vector<2x32xf32>
    %470 = tpu.matmul %462, %304, %cst_263 {dimension_numbers = #tpu.dot_dimension_numbers<[1], [0], [0], [1], [0, 0, 1, 1], [], []>} : vector<2x32xbf16>, vector<32x32xbf16>, vector<2x32xf32> -> vector<2x32xf32>
    %471 = arith.addf %460, %470 : vector<2x32xf32>
    %472 = arith.negf %471 : vector<2x32xf32>
    %473 = math.exp %472 : vector<2x32xf32>
    %cst_264 = arith.constant 1.000000e+00 : f32
    %474 = vector.broadcast %cst_264 : f32 to vector<2x32xf32>
    %475 = arith.addf %474, %473 : vector<2x32xf32>
    %476 = arith.divf %474, %475 : vector<2x32xf32>
    %cst_265 = arith.constant dense<0.000000e+00> : vector<2x32xf32>
    %477 = tpu.matmul %462, %306, %cst_265 {dimension_numbers = #tpu.dot_dimension_numbers<[1], [0], [0], [1], [0, 0, 1, 1], [], []>} : vector<2x32xbf16>, vector<32x32xbf16>, vector<2x32xf32> -> vector<2x32xf32>
    %478 = vector.broadcast %307 : vector<1x32xf32> to vector<2x32xf32>
    %479 = arith.addf %477, %478 : vector<2x32xf32>
    %480 = arith.mulf %469, %479 : vector<2x32xf32>
    %481 = arith.addf %461, %480 : vector<2x32xf32>
    %482 = math.tanh %481 : vector<2x32xf32>
    %cst_266 = arith.constant 1.000000e+00 : f32
    %483 = vector.broadcast %cst_266 : f32 to vector<2x32xf32>
    %484 = arith.subf %483, %476 : vector<2x32xf32>
    %485 = arith.mulf %484, %482 : vector<2x32xf32>
    %486 = arith.mulf %476, %457 : vector<2x32xf32>
    %487 = arith.addf %485, %486 : vector<2x32xf32>
    %c10_267 = arith.constant 10 : index
    %c0_268 = arith.constant 0 : index
    %488 = vector.load %arg38[%c10_267, %c0_268] : memref<16x32xf32, #tpu.memory_space<vmem>>, vector<2x32xf32>
    tpu.vector_store %arg38[%c10_267, %c0_268], %487 {strides = array<i32>} : memref<16x32xf32, #tpu.memory_space<vmem>>, vector<2x32xf32>,
    %c12_269 = arith.constant 12 : index
    %c0_270 = arith.constant 0 : index
    %489 = vector.load %arg32[%c12_269, %c0_270] : memref<16x32xf32, #tpu.memory_space<vmem>>, vector<2x32xf32>
    %c12_271 = arith.constant 12 : index
    %c0_272 = arith.constant 0 : index
    %490 = vector.load %arg33[%c12_271, %c0_272] : memref<16x32xf32, #tpu.memory_space<vmem>>, vector<2x32xf32>
    %c12_273 = arith.constant 12 : index
    %c0_274 = arith.constant 0 : index
    %491 = vector.load %arg34[%c12_273, %c0_274] : memref<16x32xf32, #tpu.memory_space<vmem>>, vector<2x32xf32>
    %492 = arith.truncf %487 : vector<2x32xf32> to vector<2x32xbf16>
    %cst_275 = arith.constant dense<0.000000e+00> : vector<2x32xf32>
    %493 = tpu.matmul %492, %302, %cst_275 {dimension_numbers = #tpu.dot_dimension_numbers<[1], [0], [0], [1], [0, 0, 1, 1], [], []>} : vector<2x32xbf16>, vector<32x32xbf16>, vector<2x32xf32> -> vector<2x32xf32>
    %494 = arith.addf %489, %493 : vector<2x32xf32>
    %495 = arith.negf %494 : vector<2x32xf32>
    %496 = math.exp %495 : vector<2x32xf32>
    %cst_276 = arith.constant 1.000000e+00 : f32
    %497 = vector.broadcast %cst_276 : f32 to vector<2x32xf32>
    %498 = arith.addf %497, %496 : vector<2x32xf32>
    %499 = arith.divf %497, %498 : vector<2x32xf32>
    %cst_277 = arith.constant dense<0.000000e+00> : vector<2x32xf32>
    %500 = tpu.matmul %492, %304, %cst_277 {dimension_numbers = #tpu.dot_dimension_numbers<[1], [0], [0], [1], [0, 0, 1, 1], [], []>} : vector<2x32xbf16>, vector<32x32xbf16>, vector<2x32xf32> -> vector<2x32xf32>
    %501 = arith.addf %490, %500 : vector<2x32xf32>
    %502 = arith.negf %501 : vector<2x32xf32>
    %503 = math.exp %502 : vector<2x32xf32>
    %cst_278 = arith.constant 1.000000e+00 : f32
    %504 = vector.broadcast %cst_278 : f32 to vector<2x32xf32>
    %505 = arith.addf %504, %503 : vector<2x32xf32>
    %506 = arith.divf %504, %505 : vector<2x32xf32>
    %cst_279 = arith.constant dense<0.000000e+00> : vector<2x32xf32>
    %507 = tpu.matmul %492, %306, %cst_279 {dimension_numbers = #tpu.dot_dimension_numbers<[1], [0], [0], [1], [0, 0, 1, 1], [], []>} : vector<2x32xbf16>, vector<32x32xbf16>, vector<2x32xf32> -> vector<2x32xf32>
    %508 = vector.broadcast %307 : vector<1x32xf32> to vector<2x32xf32>
    %509 = arith.addf %507, %508 : vector<2x32xf32>
    %510 = arith.mulf %499, %509 : vector<2x32xf32>
    %511 = arith.addf %491, %510 : vector<2x32xf32>
    %512 = math.tanh %511 : vector<2x32xf32>
    %cst_280 = arith.constant 1.000000e+00 : f32
    %513 = vector.broadcast %cst_280 : f32 to vector<2x32xf32>
    %514 = arith.subf %513, %506 : vector<2x32xf32>
    %515 = arith.mulf %514, %512 : vector<2x32xf32>
    %516 = arith.mulf %506, %487 : vector<2x32xf32>
    %517 = arith.addf %515, %516 : vector<2x32xf32>
    %c12_281 = arith.constant 12 : index
    %c0_282 = arith.constant 0 : index
    %518 = vector.load %arg38[%c12_281, %c0_282] : memref<16x32xf32, #tpu.memory_space<vmem>>, vector<2x32xf32>
    tpu.vector_store %arg38[%c12_281, %c0_282], %517 {strides = array<i32>} : memref<16x32xf32, #tpu.memory_space<vmem>>, vector<2x32xf32>,
    %c14_283 = arith.constant 14 : index
    %c0_284 = arith.constant 0 : index
    %519 = vector.load %arg32[%c14_283, %c0_284] : memref<16x32xf32, #tpu.memory_space<vmem>>, vector<2x32xf32>
    %c14_285 = arith.constant 14 : index
    %c0_286 = arith.constant 0 : index
    %520 = vector.load %arg33[%c14_285, %c0_286] : memref<16x32xf32, #tpu.memory_space<vmem>>, vector<2x32xf32>
    %c14_287 = arith.constant 14 : index
    %c0_288 = arith.constant 0 : index
    %521 = vector.load %arg34[%c14_287, %c0_288] : memref<16x32xf32, #tpu.memory_space<vmem>>, vector<2x32xf32>
    %522 = arith.truncf %517 : vector<2x32xf32> to vector<2x32xbf16>
    %cst_289 = arith.constant dense<0.000000e+00> : vector<2x32xf32>
    %523 = tpu.matmul %522, %302, %cst_289 {dimension_numbers = #tpu.dot_dimension_numbers<[1], [0], [0], [1], [0, 0, 1, 1], [], []>} : vector<2x32xbf16>, vector<32x32xbf16>, vector<2x32xf32> -> vector<2x32xf32>
    %524 = arith.addf %519, %523 : vector<2x32xf32>
    %525 = arith.negf %524 : vector<2x32xf32>
    %526 = math.exp %525 : vector<2x32xf32>
    %cst_290 = arith.constant 1.000000e+00 : f32
    %527 = vector.broadcast %cst_290 : f32 to vector<2x32xf32>
    %528 = arith.addf %527, %526 : vector<2x32xf32>
    %529 = arith.divf %527, %528 : vector<2x32xf32>
    %cst_291 = arith.constant dense<0.000000e+00> : vector<2x32xf32>
    %530 = tpu.matmul %522, %304, %cst_291 {dimension_numbers = #tpu.dot_dimension_numbers<[1], [0], [0], [1], [0, 0, 1, 1], [], []>} : vector<2x32xbf16>, vector<32x32xbf16>, vector<2x32xf32> -> vector<2x32xf32>
    %531 = arith.addf %520, %530 : vector<2x32xf32>
    %532 = arith.negf %531 : vector<2x32xf32>
    %533 = math.exp %532 : vector<2x32xf32>
    %cst_292 = arith.constant 1.000000e+00 : f32
    %534 = vector.broadcast %cst_292 : f32 to vector<2x32xf32>
    %535 = arith.addf %534, %533 : vector<2x32xf32>
    %536 = arith.divf %534, %535 : vector<2x32xf32>
    %cst_293 = arith.constant dense<0.000000e+00> : vector<2x32xf32>
    %537 = tpu.matmul %522, %306, %cst_293 {dimension_numbers = #tpu.dot_dimension_numbers<[1], [0], [0], [1], [0, 0, 1, 1], [], []>} : vector<2x32xbf16>, vector<32x32xbf16>, vector<2x32xf32> -> vector<2x32xf32>
    %538 = vector.broadcast %307 : vector<1x32xf32> to vector<2x32xf32>
    %539 = arith.addf %537, %538 : vector<2x32xf32>
    %540 = arith.mulf %529, %539 : vector<2x32xf32>
    %541 = arith.addf %521, %540 : vector<2x32xf32>
    %542 = math.tanh %541 : vector<2x32xf32>
    %cst_294 = arith.constant 1.000000e+00 : f32
    %543 = vector.broadcast %cst_294 : f32 to vector<2x32xf32>
    %544 = arith.subf %543, %536 : vector<2x32xf32>
    %545 = arith.mulf %544, %542 : vector<2x32xf32>
    %546 = arith.mulf %536, %517 : vector<2x32xf32>
    %547 = arith.addf %545, %546 : vector<2x32xf32>
    %c14_295 = arith.constant 14 : index
    %c0_296 = arith.constant 0 : index
    %548 = vector.load %arg38[%c14_295, %c0_296] : memref<16x32xf32, #tpu.memory_space<vmem>>, vector<2x32xf32>
    tpu.vector_store %arg38[%c14_295, %c0_296], %547 {strides = array<i32>} : memref<16x32xf32, #tpu.memory_space<vmem>>, vector<2x32xf32>,
    %c0_297 = arith.constant 0 : index
    %c0_298 = arith.constant 0 : index
    %549 = vector.load %arg38[%c0_297, %c0_298] : memref<16x32xf32, #tpu.memory_space<vmem>>, vector<16x32xf32>
    %550 = arith.truncf %549 : vector<16x32xf32> to vector<16x32xbf16>
    %c0_299 = arith.constant 0 : index
    %c0_300 = arith.constant 0 : index
    %551 = vector.load %arg14[%c0_299, %c0_300] : memref<32x96xbf16, #tpu.memory_space<vmem>>, vector<32x96xbf16>
    %cst_301 = arith.constant dense<0.000000e+00> : vector<16x96xf32>
    %552 = tpu.matmul %550, %551, %cst_301 {dimension_numbers = #tpu.dot_dimension_numbers<[1], [0], [0], [1], [0, 0, 1, 1], [], []>} : vector<16x32xbf16>, vector<32x96xbf16>, vector<16x96xf32> -> vector<16x96xf32>
    %c0_302 = arith.constant 0 : index
    %c0_303 = arith.constant 0 : index
    %553 = vector.load %arg15[%c0_302, %c0_303] : memref<1x96xf32, #tpu.memory_space<vmem>>, vector<1x96xf32>
    %554 = vector.broadcast %553 : vector<1x96xf32> to vector<16x96xf32>
    %555 = arith.addf %552, %554 : vector<16x96xf32>
    %c0_304 = arith.constant 0 : index
    %c0_305 = arith.constant 0 : index
    %556 = vector.load %arg39[%c0_304, %c0_305] : memref<16x96xf32, #tpu.memory_space<vmem>>, vector<16x96xf32>
    tpu.vector_store %arg39[%c0_304, %c0_305], %555 {strides = array<i32>} : memref<16x96xf32, #tpu.memory_space<vmem>>, vector<16x96xf32>,
    %c0_306 = arith.constant 0 : index
    %c0_307 = arith.constant 0 : index
    %557 = tpu.strided_load %arg39[%c0_306, %c0_307] {strides = array<i32: 2, 1>} : memref<16x96xf32, #tpu.memory_space<vmem>>, vector<8x96xf32>
    %558 = vector.extract_strided_slice %557 {offsets = [0, 0], sizes = [8, 32], strides = [1, 1]} : vector<8x96xf32> to vector<8x32xf32>
    %559 = arith.truncf %558 : vector<8x32xf32> to vector<8x32xbf16>
    %560 = vector.extract_strided_slice %557 {offsets = [0, 32], sizes = [8, 32], strides = [1, 1]} : vector<8x96xf32> to vector<8x32xf32>
    %561 = arith.truncf %560 : vector<8x32xf32> to vector<8x32xbf16>
    %562 = vector.extract_strided_slice %557 {offsets = [0, 64], sizes = [8, 32], strides = [1, 1]} : vector<8x96xf32> to vector<8x32xf32>
    %563 = arith.truncf %562 : vector<8x32xf32> to vector<8x32xbf16>
    %564 = vector.extract_strided_slice %559 {offsets = [0, 0], sizes = [8, 4], strides = [1, 1]} : vector<8x32xbf16> to vector<8x4xbf16>
    %565 = vector.extract_strided_slice %561 {offsets = [0, 0], sizes = [8, 4], strides = [1, 1]} : vector<8x32xbf16> to vector<8x4xbf16>
    %cst_308 = arith.constant dense<0.000000e+00> : vector<8x8xf32>
    %566 = tpu.matmul %564, %565, %cst_308 {dimension_numbers = #tpu.dot_dimension_numbers<[1], [1], [0], [0], [0, 0, 1, 0], [], []>} : vector<8x4xbf16>, vector<8x4xbf16>, vector<8x8xf32> -> vector<8x8xf32>
    %cst_309 = arith.constant dense<0xFF800000> : vector<8xf32>
    %567 = vector.multi_reduction <maximumf>, %566, %cst_309 [1] : vector<8x8xf32> to vector<8xf32>
    %568 = vector.shape_cast %567 : vector<8xf32> to vector<8x1xf32>
    %569 = vector.broadcast %568 : vector<8x1xf32> to vector<8x8xf32>
    %570 = arith.subf %566, %569 : vector<8x8xf32>
    %571 = math.exp %570 : vector<8x8xf32>
    %cst_310 = arith.constant dense<0.000000e+00> : vector<8xf32>
    %572 = vector.multi_reduction <add>, %571, %cst_310 [1] : vector<8x8xf32> to vector<8xf32>
    %573 = vector.shape_cast %572 : vector<8xf32> to vector<8x1xf32>
    %574 = tpu.reciprocal %573 {approx = true} : vector<8x1xf32> -> vector<8x1xf32>
    %575 = vector.broadcast %574 : vector<8x1xf32> to vector<8x8xf32>
    %576 = arith.mulf %571, %575 : vector<8x8xf32>
    %577 = arith.truncf %576 : vector<8x8xf32> to vector<8x8xbf16>
    %578 = vector.extract_strided_slice %563 {offsets = [0, 0], sizes = [8, 4], strides = [1, 1]} : vector<8x32xbf16> to vector<8x4xbf16>
    %cst_311 = arith.constant dense<0.000000e+00> : vector<8x4xf32>
    %579 = tpu.matmul %577, %578, %cst_311 {dimension_numbers = #tpu.dot_dimension_numbers<[1], [0], [0], [1], [0, 0, 1, 1], [], []>} : vector<8x8xbf16>, vector<8x4xbf16>, vector<8x4xf32> -> vector<8x4xf32>
    %580 = vector.extract_strided_slice %559 {offsets = [0, 4], sizes = [8, 4], strides = [1, 1]} : vector<8x32xbf16> to vector<8x4xbf16>
    %581 = vector.extract_strided_slice %561 {offsets = [0, 4], sizes = [8, 4], strides = [1, 1]} : vector<8x32xbf16> to vector<8x4xbf16>
    %cst_312 = arith.constant dense<0.000000e+00> : vector<8x8xf32>
    %582 = tpu.matmul %580, %581, %cst_312 {dimension_numbers = #tpu.dot_dimension_numbers<[1], [1], [0], [0], [0, 0, 1, 0], [], []>} : vector<8x4xbf16>, vector<8x4xbf16>, vector<8x8xf32> -> vector<8x8xf32>
    %cst_313 = arith.constant dense<0xFF800000> : vector<8xf32>
    %583 = vector.multi_reduction <maximumf>, %582, %cst_313 [1] : vector<8x8xf32> to vector<8xf32>
    %584 = vector.shape_cast %583 : vector<8xf32> to vector<8x1xf32>
    %585 = vector.broadcast %584 : vector<8x1xf32> to vector<8x8xf32>
    %586 = arith.subf %582, %585 : vector<8x8xf32>
    %587 = math.exp %586 : vector<8x8xf32>
    %cst_314 = arith.constant dense<0.000000e+00> : vector<8xf32>
    %588 = vector.multi_reduction <add>, %587, %cst_314 [1] : vector<8x8xf32> to vector<8xf32>
    %589 = vector.shape_cast %588 : vector<8xf32> to vector<8x1xf32>
    %590 = tpu.reciprocal %589 {approx = true} : vector<8x1xf32> -> vector<8x1xf32>
    %591 = vector.broadcast %590 : vector<8x1xf32> to vector<8x8xf32>
    %592 = arith.mulf %587, %591 : vector<8x8xf32>
    %593 = arith.truncf %592 : vector<8x8xf32> to vector<8x8xbf16>
    %594 = vector.extract_strided_slice %563 {offsets = [0, 4], sizes = [8, 4], strides = [1, 1]} : vector<8x32xbf16> to vector<8x4xbf16>
    %cst_315 = arith.constant dense<0.000000e+00> : vector<8x4xf32>
    %595 = tpu.matmul %593, %594, %cst_315 {dimension_numbers = #tpu.dot_dimension_numbers<[1], [0], [0], [1], [0, 0, 1, 1], [], []>} : vector<8x8xbf16>, vector<8x4xbf16>, vector<8x4xf32> -> vector<8x4xf32>
    %596 = vector.extract_strided_slice %559 {offsets = [0, 8], sizes = [8, 4], strides = [1, 1]} : vector<8x32xbf16> to vector<8x4xbf16>
    %597 = vector.extract_strided_slice %561 {offsets = [0, 8], sizes = [8, 4], strides = [1, 1]} : vector<8x32xbf16> to vector<8x4xbf16>
    %cst_316 = arith.constant dense<0.000000e+00> : vector<8x8xf32>
    %598 = tpu.matmul %596, %597, %cst_316 {dimension_numbers = #tpu.dot_dimension_numbers<[1], [1], [0], [0], [0, 0, 1, 0], [], []>} : vector<8x4xbf16>, vector<8x4xbf16>, vector<8x8xf32> -> vector<8x8xf32>
    %cst_317 = arith.constant dense<0xFF800000> : vector<8xf32>
    %599 = vector.multi_reduction <maximumf>, %598, %cst_317 [1] : vector<8x8xf32> to vector<8xf32>
    %600 = vector.shape_cast %599 : vector<8xf32> to vector<8x1xf32>
    %601 = vector.broadcast %600 : vector<8x1xf32> to vector<8x8xf32>
    %602 = arith.subf %598, %601 : vector<8x8xf32>
    %603 = math.exp %602 : vector<8x8xf32>
    %cst_318 = arith.constant dense<0.000000e+00> : vector<8xf32>
    %604 = vector.multi_reduction <add>, %603, %cst_318 [1] : vector<8x8xf32> to vector<8xf32>
    %605 = vector.shape_cast %604 : vector<8xf32> to vector<8x1xf32>
    %606 = tpu.reciprocal %605 {approx = true} : vector<8x1xf32> -> vector<8x1xf32>
    %607 = vector.broadcast %606 : vector<8x1xf32> to vector<8x8xf32>
    %608 = arith.mulf %603, %607 : vector<8x8xf32>
    %609 = arith.truncf %608 : vector<8x8xf32> to vector<8x8xbf16>
    %610 = vector.extract_strided_slice %563 {offsets = [0, 8], sizes = [8, 4], strides = [1, 1]} : vector<8x32xbf16> to vector<8x4xbf16>
    %cst_319 = arith.constant dense<0.000000e+00> : vector<8x4xf32>
    %611 = tpu.matmul %609, %610, %cst_319 {dimension_numbers = #tpu.dot_dimension_numbers<[1], [0], [0], [1], [0, 0, 1, 1], [], []>} : vector<8x8xbf16>, vector<8x4xbf16>, vector<8x4xf32> -> vector<8x4xf32>
    %612 = vector.extract_strided_slice %559 {offsets = [0, 12], sizes = [8, 4], strides = [1, 1]} : vector<8x32xbf16> to vector<8x4xbf16>
    %613 = vector.extract_strided_slice %561 {offsets = [0, 12], sizes = [8, 4], strides = [1, 1]} : vector<8x32xbf16> to vector<8x4xbf16>
    %cst_320 = arith.constant dense<0.000000e+00> : vector<8x8xf32>
    %614 = tpu.matmul %612, %613, %cst_320 {dimension_numbers = #tpu.dot_dimension_numbers<[1], [1], [0], [0], [0, 0, 1, 0], [], []>} : vector<8x4xbf16>, vector<8x4xbf16>, vector<8x8xf32> -> vector<8x8xf32>
    %cst_321 = arith.constant dense<0xFF800000> : vector<8xf32>
    %615 = vector.multi_reduction <maximumf>, %614, %cst_321 [1] : vector<8x8xf32> to vector<8xf32>
    %616 = vector.shape_cast %615 : vector<8xf32> to vector<8x1xf32>
    %617 = vector.broadcast %616 : vector<8x1xf32> to vector<8x8xf32>
    %618 = arith.subf %614, %617 : vector<8x8xf32>
    %619 = math.exp %618 : vector<8x8xf32>
    %cst_322 = arith.constant dense<0.000000e+00> : vector<8xf32>
    %620 = vector.multi_reduction <add>, %619, %cst_322 [1] : vector<8x8xf32> to vector<8xf32>
    %621 = vector.shape_cast %620 : vector<8xf32> to vector<8x1xf32>
    %622 = tpu.reciprocal %621 {approx = true} : vector<8x1xf32> -> vector<8x1xf32>
    %623 = vector.broadcast %622 : vector<8x1xf32> to vector<8x8xf32>
    %624 = arith.mulf %619, %623 : vector<8x8xf32>
    %625 = arith.truncf %624 : vector<8x8xf32> to vector<8x8xbf16>
    %626 = vector.extract_strided_slice %563 {offsets = [0, 12], sizes = [8, 4], strides = [1, 1]} : vector<8x32xbf16> to vector<8x4xbf16>
    %cst_323 = arith.constant dense<0.000000e+00> : vector<8x4xf32>
    %627 = tpu.matmul %625, %626, %cst_323 {dimension_numbers = #tpu.dot_dimension_numbers<[1], [0], [0], [1], [0, 0, 1, 1], [], []>} : vector<8x8xbf16>, vector<8x4xbf16>, vector<8x4xf32> -> vector<8x4xf32>
    %628 = vector.extract_strided_slice %559 {offsets = [0, 16], sizes = [8, 4], strides = [1, 1]} : vector<8x32xbf16> to vector<8x4xbf16>
    %629 = vector.extract_strided_slice %561 {offsets = [0, 16], sizes = [8, 4], strides = [1, 1]} : vector<8x32xbf16> to vector<8x4xbf16>
    %cst_324 = arith.constant dense<0.000000e+00> : vector<8x8xf32>
    %630 = tpu.matmul %628, %629, %cst_324 {dimension_numbers = #tpu.dot_dimension_numbers<[1], [1], [0], [0], [0, 0, 1, 0], [], []>} : vector<8x4xbf16>, vector<8x4xbf16>, vector<8x8xf32> -> vector<8x8xf32>
    %cst_325 = arith.constant dense<0xFF800000> : vector<8xf32>
    %631 = vector.multi_reduction <maximumf>, %630, %cst_325 [1] : vector<8x8xf32> to vector<8xf32>
    %632 = vector.shape_cast %631 : vector<8xf32> to vector<8x1xf32>
    %633 = vector.broadcast %632 : vector<8x1xf32> to vector<8x8xf32>
    %634 = arith.subf %630, %633 : vector<8x8xf32>
    %635 = math.exp %634 : vector<8x8xf32>
    %cst_326 = arith.constant dense<0.000000e+00> : vector<8xf32>
    %636 = vector.multi_reduction <add>, %635, %cst_326 [1] : vector<8x8xf32> to vector<8xf32>
    %637 = vector.shape_cast %636 : vector<8xf32> to vector<8x1xf32>
    %638 = tpu.reciprocal %637 {approx = true} : vector<8x1xf32> -> vector<8x1xf32>
    %639 = vector.broadcast %638 : vector<8x1xf32> to vector<8x8xf32>
    %640 = arith.mulf %635, %639 : vector<8x8xf32>
    %641 = arith.truncf %640 : vector<8x8xf32> to vector<8x8xbf16>
    %642 = vector.extract_strided_slice %563 {offsets = [0, 16], sizes = [8, 4], strides = [1, 1]} : vector<8x32xbf16> to vector<8x4xbf16>
    %cst_327 = arith.constant dense<0.000000e+00> : vector<8x4xf32>
    %643 = tpu.matmul %641, %642, %cst_327 {dimension_numbers = #tpu.dot_dimension_numbers<[1], [0], [0], [1], [0, 0, 1, 1], [], []>} : vector<8x8xbf16>, vector<8x4xbf16>, vector<8x4xf32> -> vector<8x4xf32>
    %644 = vector.extract_strided_slice %559 {offsets = [0, 20], sizes = [8, 4], strides = [1, 1]} : vector<8x32xbf16> to vector<8x4xbf16>
    %645 = vector.extract_strided_slice %561 {offsets = [0, 20], sizes = [8, 4], strides = [1, 1]} : vector<8x32xbf16> to vector<8x4xbf16>
    %cst_328 = arith.constant dense<0.000000e+00> : vector<8x8xf32>
    %646 = tpu.matmul %644, %645, %cst_328 {dimension_numbers = #tpu.dot_dimension_numbers<[1], [1], [0], [0], [0, 0, 1, 0], [], []>} : vector<8x4xbf16>, vector<8x4xbf16>, vector<8x8xf32> -> vector<8x8xf32>
    %cst_329 = arith.constant dense<0xFF800000> : vector<8xf32>
    %647 = vector.multi_reduction <maximumf>, %646, %cst_329 [1] : vector<8x8xf32> to vector<8xf32>
    %648 = vector.shape_cast %647 : vector<8xf32> to vector<8x1xf32>
    %649 = vector.broadcast %648 : vector<8x1xf32> to vector<8x8xf32>
    %650 = arith.subf %646, %649 : vector<8x8xf32>
    %651 = math.exp %650 : vector<8x8xf32>
    %cst_330 = arith.constant dense<0.000000e+00> : vector<8xf32>
    %652 = vector.multi_reduction <add>, %651, %cst_330 [1] : vector<8x8xf32> to vector<8xf32>
    %653 = vector.shape_cast %652 : vector<8xf32> to vector<8x1xf32>
    %654 = tpu.reciprocal %653 {approx = true} : vector<8x1xf32> -> vector<8x1xf32>
    %655 = vector.broadcast %654 : vector<8x1xf32> to vector<8x8xf32>
    %656 = arith.mulf %651, %655 : vector<8x8xf32>
    %657 = arith.truncf %656 : vector<8x8xf32> to vector<8x8xbf16>
    %658 = vector.extract_strided_slice %563 {offsets = [0, 20], sizes = [8, 4], strides = [1, 1]} : vector<8x32xbf16> to vector<8x4xbf16>
    %cst_331 = arith.constant dense<0.000000e+00> : vector<8x4xf32>
    %659 = tpu.matmul %657, %658, %cst_331 {dimension_numbers = #tpu.dot_dimension_numbers<[1], [0], [0], [1], [0, 0, 1, 1], [], []>} : vector<8x8xbf16>, vector<8x4xbf16>, vector<8x4xf32> -> vector<8x4xf32>
    %660 = vector.extract_strided_slice %559 {offsets = [0, 24], sizes = [8, 4], strides = [1, 1]} : vector<8x32xbf16> to vector<8x4xbf16>
    %661 = vector.extract_strided_slice %561 {offsets = [0, 24], sizes = [8, 4], strides = [1, 1]} : vector<8x32xbf16> to vector<8x4xbf16>
    %cst_332 = arith.constant dense<0.000000e+00> : vector<8x8xf32>
    %662 = tpu.matmul %660, %661, %cst_332 {dimension_numbers = #tpu.dot_dimension_numbers<[1], [1], [0], [0], [0, 0, 1, 0], [], []>} : vector<8x4xbf16>, vector<8x4xbf16>, vector<8x8xf32> -> vector<8x8xf32>
    %cst_333 = arith.constant dense<0xFF800000> : vector<8xf32>
    %663 = vector.multi_reduction <maximumf>, %662, %cst_333 [1] : vector<8x8xf32> to vector<8xf32>
    %664 = vector.shape_cast %663 : vector<8xf32> to vector<8x1xf32>
    %665 = vector.broadcast %664 : vector<8x1xf32> to vector<8x8xf32>
    %666 = arith.subf %662, %665 : vector<8x8xf32>
    %667 = math.exp %666 : vector<8x8xf32>
    %cst_334 = arith.constant dense<0.000000e+00> : vector<8xf32>
    %668 = vector.multi_reduction <add>, %667, %cst_334 [1] : vector<8x8xf32> to vector<8xf32>
    %669 = vector.shape_cast %668 : vector<8xf32> to vector<8x1xf32>
    %670 = tpu.reciprocal %669 {approx = true} : vector<8x1xf32> -> vector<8x1xf32>
    %671 = vector.broadcast %670 : vector<8x1xf32> to vector<8x8xf32>
    %672 = arith.mulf %667, %671 : vector<8x8xf32>
    %673 = arith.truncf %672 : vector<8x8xf32> to vector<8x8xbf16>
    %674 = vector.extract_strided_slice %563 {offsets = [0, 24], sizes = [8, 4], strides = [1, 1]} : vector<8x32xbf16> to vector<8x4xbf16>
    %cst_335 = arith.constant dense<0.000000e+00> : vector<8x4xf32>
    %675 = tpu.matmul %673, %674, %cst_335 {dimension_numbers = #tpu.dot_dimension_numbers<[1], [0], [0], [1], [0, 0, 1, 1], [], []>} : vector<8x8xbf16>, vector<8x4xbf16>, vector<8x4xf32> -> vector<8x4xf32>
    %676 = vector.extract_strided_slice %559 {offsets = [0, 28], sizes = [8, 4], strides = [1, 1]} : vector<8x32xbf16> to vector<8x4xbf16>
    %677 = vector.extract_strided_slice %561 {offsets = [0, 28], sizes = [8, 4], strides = [1, 1]} : vector<8x32xbf16> to vector<8x4xbf16>
    %cst_336 = arith.constant dense<0.000000e+00> : vector<8x8xf32>
    %678 = tpu.matmul %676, %677, %cst_336 {dimension_numbers = #tpu.dot_dimension_numbers<[1], [1], [0], [0], [0, 0, 1, 0], [], []>} : vector<8x4xbf16>, vector<8x4xbf16>, vector<8x8xf32> -> vector<8x8xf32>
    %cst_337 = arith.constant dense<0xFF800000> : vector<8xf32>
    %679 = vector.multi_reduction <maximumf>, %678, %cst_337 [1] : vector<8x8xf32> to vector<8xf32>
    %680 = vector.shape_cast %679 : vector<8xf32> to vector<8x1xf32>
    %681 = vector.broadcast %680 : vector<8x1xf32> to vector<8x8xf32>
    %682 = arith.subf %678, %681 : vector<8x8xf32>
    %683 = math.exp %682 : vector<8x8xf32>
    %cst_338 = arith.constant dense<0.000000e+00> : vector<8xf32>
    %684 = vector.multi_reduction <add>, %683, %cst_338 [1] : vector<8x8xf32> to vector<8xf32>
    %685 = vector.shape_cast %684 : vector<8xf32> to vector<8x1xf32>
    %686 = tpu.reciprocal %685 {approx = true} : vector<8x1xf32> -> vector<8x1xf32>
    %687 = vector.broadcast %686 : vector<8x1xf32> to vector<8x8xf32>
    %688 = arith.mulf %683, %687 : vector<8x8xf32>
    %689 = arith.truncf %688 : vector<8x8xf32> to vector<8x8xbf16>
    %690 = vector.extract_strided_slice %563 {offsets = [0, 28], sizes = [8, 4], strides = [1, 1]} : vector<8x32xbf16> to vector<8x4xbf16>
    %cst_339 = arith.constant dense<0.000000e+00> : vector<8x4xf32>
    %691 = tpu.matmul %689, %690, %cst_339 {dimension_numbers = #tpu.dot_dimension_numbers<[1], [0], [0], [1], [0, 0, 1, 1], [], []>} : vector<8x8xbf16>, vector<8x4xbf16>, vector<8x4xf32> -> vector<8x4xf32>
    %692 = tpu.concatenate %579, %595, %611, %627, %643, %659, %675, %691 in 1 : vector<8x4xf32>, vector<8x4xf32>, vector<8x4xf32>, vector<8x4xf32>, vector<8x4xf32>, vector<8x4xf32>, vector<8x4xf32>, vector<8x4xf32> -> vector<8x32xf32>
    %c0_340 = arith.constant 0 : index
    %c0_341 = arith.constant 0 : index
    %693 = tpu.strided_load %arg34[%c0_340, %c0_341] {strides = array<i32: 2, 1>} : memref<16x32xf32, #tpu.memory_space<vmem>>, vector<8x32xf32>
    tpu.strided_store %arg34[%c0_340, %c0_341], %692 {strides = array<i32: 2, 1>} : memref<16x32xf32, #tpu.memory_space<vmem>>, vector<8x32xf32>
    %c1_342 = arith.constant 1 : index
    %c0_343 = arith.constant 0 : index
    %694 = tpu.strided_load %arg39[%c1_342, %c0_343] {strides = array<i32: 2, 1>} : memref<16x96xf32, #tpu.memory_space<vmem>>, vector<8x96xf32>
    %695 = vector.extract_strided_slice %694 {offsets = [0, 0], sizes = [8, 32], strides = [1, 1]} : vector<8x96xf32> to vector<8x32xf32>
    %696 = arith.truncf %695 : vector<8x32xf32> to vector<8x32xbf16>
    %697 = vector.extract_strided_slice %694 {offsets = [0, 32], sizes = [8, 32], strides = [1, 1]} : vector<8x96xf32> to vector<8x32xf32>
    %698 = arith.truncf %697 : vector<8x32xf32> to vector<8x32xbf16>
    %699 = vector.extract_strided_slice %694 {offsets = [0, 64], sizes = [8, 32], strides = [1, 1]} : vector<8x96xf32> to vector<8x32xf32>
    %700 = arith.truncf %699 : vector<8x32xf32> to vector<8x32xbf16>
    %701 = vector.extract_strided_slice %696 {offsets = [0, 0], sizes = [8, 4], strides = [1, 1]} : vector<8x32xbf16> to vector<8x4xbf16>
    %702 = vector.extract_strided_slice %698 {offsets = [0, 0], sizes = [8, 4], strides = [1, 1]} : vector<8x32xbf16> to vector<8x4xbf16>
    %cst_344 = arith.constant dense<0.000000e+00> : vector<8x8xf32>
    %703 = tpu.matmul %701, %702, %cst_344 {dimension_numbers = #tpu.dot_dimension_numbers<[1], [1], [0], [0], [0, 0, 1, 0], [], []>} : vector<8x4xbf16>, vector<8x4xbf16>, vector<8x8xf32> -> vector<8x8xf32>
    %cst_345 = arith.constant dense<0xFF800000> : vector<8xf32>
    %704 = vector.multi_reduction <maximumf>, %703, %cst_345 [1] : vector<8x8xf32> to vector<8xf32>
    %705 = vector.shape_cast %704 : vector<8xf32> to vector<8x1xf32>
    %706 = vector.broadcast %705 : vector<8x1xf32> to vector<8x8xf32>
    %707 = arith.subf %703, %706 : vector<8x8xf32>
    %708 = math.exp %707 : vector<8x8xf32>
    %cst_346 = arith.constant dense<0.000000e+00> : vector<8xf32>
    %709 = vector.multi_reduction <add>, %708, %cst_346 [1] : vector<8x8xf32> to vector<8xf32>
    %710 = vector.shape_cast %709 : vector<8xf32> to vector<8x1xf32>
    %711 = tpu.reciprocal %710 {approx = true} : vector<8x1xf32> -> vector<8x1xf32>
    %712 = vector.broadcast %711 : vector<8x1xf32> to vector<8x8xf32>
    %713 = arith.mulf %708, %712 : vector<8x8xf32>
    %714 = arith.truncf %713 : vector<8x8xf32> to vector<8x8xbf16>
    %715 = vector.extract_strided_slice %700 {offsets = [0, 0], sizes = [8, 4], strides = [1, 1]} : vector<8x32xbf16> to vector<8x4xbf16>
    %cst_347 = arith.constant dense<0.000000e+00> : vector<8x4xf32>
    %716 = tpu.matmul %714, %715, %cst_347 {dimension_numbers = #tpu.dot_dimension_numbers<[1], [0], [0], [1], [0, 0, 1, 1], [], []>} : vector<8x8xbf16>, vector<8x4xbf16>, vector<8x4xf32> -> vector<8x4xf32>
    %717 = vector.extract_strided_slice %696 {offsets = [0, 4], sizes = [8, 4], strides = [1, 1]} : vector<8x32xbf16> to vector<8x4xbf16>
    %718 = vector.extract_strided_slice %698 {offsets = [0, 4], sizes = [8, 4], strides = [1, 1]} : vector<8x32xbf16> to vector<8x4xbf16>
    %cst_348 = arith.constant dense<0.000000e+00> : vector<8x8xf32>
    %719 = tpu.matmul %717, %718, %cst_348 {dimension_numbers = #tpu.dot_dimension_numbers<[1], [1], [0], [0], [0, 0, 1, 0], [], []>} : vector<8x4xbf16>, vector<8x4xbf16>, vector<8x8xf32> -> vector<8x8xf32>
    %cst_349 = arith.constant dense<0xFF800000> : vector<8xf32>
    %720 = vector.multi_reduction <maximumf>, %719, %cst_349 [1] : vector<8x8xf32> to vector<8xf32>
    %721 = vector.shape_cast %720 : vector<8xf32> to vector<8x1xf32>
    %722 = vector.broadcast %721 : vector<8x1xf32> to vector<8x8xf32>
    %723 = arith.subf %719, %722 : vector<8x8xf32>
    %724 = math.exp %723 : vector<8x8xf32>
    %cst_350 = arith.constant dense<0.000000e+00> : vector<8xf32>
    %725 = vector.multi_reduction <add>, %724, %cst_350 [1] : vector<8x8xf32> to vector<8xf32>
    %726 = vector.shape_cast %725 : vector<8xf32> to vector<8x1xf32>
    %727 = tpu.reciprocal %726 {approx = true} : vector<8x1xf32> -> vector<8x1xf32>
    %728 = vector.broadcast %727 : vector<8x1xf32> to vector<8x8xf32>
    %729 = arith.mulf %724, %728 : vector<8x8xf32>
    %730 = arith.truncf %729 : vector<8x8xf32> to vector<8x8xbf16>
    %731 = vector.extract_strided_slice %700 {offsets = [0, 4], sizes = [8, 4], strides = [1, 1]} : vector<8x32xbf16> to vector<8x4xbf16>
    %cst_351 = arith.constant dense<0.000000e+00> : vector<8x4xf32>
    %732 = tpu.matmul %730, %731, %cst_351 {dimension_numbers = #tpu.dot_dimension_numbers<[1], [0], [0], [1], [0, 0, 1, 1], [], []>} : vector<8x8xbf16>, vector<8x4xbf16>, vector<8x4xf32> -> vector<8x4xf32>
    %733 = vector.extract_strided_slice %696 {offsets = [0, 8], sizes = [8, 4], strides = [1, 1]} : vector<8x32xbf16> to vector<8x4xbf16>
    %734 = vector.extract_strided_slice %698 {offsets = [0, 8], sizes = [8, 4], strides = [1, 1]} : vector<8x32xbf16> to vector<8x4xbf16>
    %cst_352 = arith.constant dense<0.000000e+00> : vector<8x8xf32>
    %735 = tpu.matmul %733, %734, %cst_352 {dimension_numbers = #tpu.dot_dimension_numbers<[1], [1], [0], [0], [0, 0, 1, 0], [], []>} : vector<8x4xbf16>, vector<8x4xbf16>, vector<8x8xf32> -> vector<8x8xf32>
    %cst_353 = arith.constant dense<0xFF800000> : vector<8xf32>
    %736 = vector.multi_reduction <maximumf>, %735, %cst_353 [1] : vector<8x8xf32> to vector<8xf32>
    %737 = vector.shape_cast %736 : vector<8xf32> to vector<8x1xf32>
    %738 = vector.broadcast %737 : vector<8x1xf32> to vector<8x8xf32>
    %739 = arith.subf %735, %738 : vector<8x8xf32>
    %740 = math.exp %739 : vector<8x8xf32>
    %cst_354 = arith.constant dense<0.000000e+00> : vector<8xf32>
    %741 = vector.multi_reduction <add>, %740, %cst_354 [1] : vector<8x8xf32> to vector<8xf32>
    %742 = vector.shape_cast %741 : vector<8xf32> to vector<8x1xf32>
    %743 = tpu.reciprocal %742 {approx = true} : vector<8x1xf32> -> vector<8x1xf32>
    %744 = vector.broadcast %743 : vector<8x1xf32> to vector<8x8xf32>
    %745 = arith.mulf %740, %744 : vector<8x8xf32>
    %746 = arith.truncf %745 : vector<8x8xf32> to vector<8x8xbf16>
    %747 = vector.extract_strided_slice %700 {offsets = [0, 8], sizes = [8, 4], strides = [1, 1]} : vector<8x32xbf16> to vector<8x4xbf16>
    %cst_355 = arith.constant dense<0.000000e+00> : vector<8x4xf32>
    %748 = tpu.matmul %746, %747, %cst_355 {dimension_numbers = #tpu.dot_dimension_numbers<[1], [0], [0], [1], [0, 0, 1, 1], [], []>} : vector<8x8xbf16>, vector<8x4xbf16>, vector<8x4xf32> -> vector<8x4xf32>
    %749 = vector.extract_strided_slice %696 {offsets = [0, 12], sizes = [8, 4], strides = [1, 1]} : vector<8x32xbf16> to vector<8x4xbf16>
    %750 = vector.extract_strided_slice %698 {offsets = [0, 12], sizes = [8, 4], strides = [1, 1]} : vector<8x32xbf16> to vector<8x4xbf16>
    %cst_356 = arith.constant dense<0.000000e+00> : vector<8x8xf32>
    %751 = tpu.matmul %749, %750, %cst_356 {dimension_numbers = #tpu.dot_dimension_numbers<[1], [1], [0], [0], [0, 0, 1, 0], [], []>} : vector<8x4xbf16>, vector<8x4xbf16>, vector<8x8xf32> -> vector<8x8xf32>
    %cst_357 = arith.constant dense<0xFF800000> : vector<8xf32>
    %752 = vector.multi_reduction <maximumf>, %751, %cst_357 [1] : vector<8x8xf32> to vector<8xf32>
    %753 = vector.shape_cast %752 : vector<8xf32> to vector<8x1xf32>
    %754 = vector.broadcast %753 : vector<8x1xf32> to vector<8x8xf32>
    %755 = arith.subf %751, %754 : vector<8x8xf32>
    %756 = math.exp %755 : vector<8x8xf32>
    %cst_358 = arith.constant dense<0.000000e+00> : vector<8xf32>
    %757 = vector.multi_reduction <add>, %756, %cst_358 [1] : vector<8x8xf32> to vector<8xf32>
    %758 = vector.shape_cast %757 : vector<8xf32> to vector<8x1xf32>
    %759 = tpu.reciprocal %758 {approx = true} : vector<8x1xf32> -> vector<8x1xf32>
    %760 = vector.broadcast %759 : vector<8x1xf32> to vector<8x8xf32>
    %761 = arith.mulf %756, %760 : vector<8x8xf32>
    %762 = arith.truncf %761 : vector<8x8xf32> to vector<8x8xbf16>
    %763 = vector.extract_strided_slice %700 {offsets = [0, 12], sizes = [8, 4], strides = [1, 1]} : vector<8x32xbf16> to vector<8x4xbf16>
    %cst_359 = arith.constant dense<0.000000e+00> : vector<8x4xf32>
    %764 = tpu.matmul %762, %763, %cst_359 {dimension_numbers = #tpu.dot_dimension_numbers<[1], [0], [0], [1], [0, 0, 1, 1], [], []>} : vector<8x8xbf16>, vector<8x4xbf16>, vector<8x4xf32> -> vector<8x4xf32>
    %765 = vector.extract_strided_slice %696 {offsets = [0, 16], sizes = [8, 4], strides = [1, 1]} : vector<8x32xbf16> to vector<8x4xbf16>
    %766 = vector.extract_strided_slice %698 {offsets = [0, 16], sizes = [8, 4], strides = [1, 1]} : vector<8x32xbf16> to vector<8x4xbf16>
    %cst_360 = arith.constant dense<0.000000e+00> : vector<8x8xf32>
    %767 = tpu.matmul %765, %766, %cst_360 {dimension_numbers = #tpu.dot_dimension_numbers<[1], [1], [0], [0], [0, 0, 1, 0], [], []>} : vector<8x4xbf16>, vector<8x4xbf16>, vector<8x8xf32> -> vector<8x8xf32>
    %cst_361 = arith.constant dense<0xFF800000> : vector<8xf32>
    %768 = vector.multi_reduction <maximumf>, %767, %cst_361 [1] : vector<8x8xf32> to vector<8xf32>
    %769 = vector.shape_cast %768 : vector<8xf32> to vector<8x1xf32>
    %770 = vector.broadcast %769 : vector<8x1xf32> to vector<8x8xf32>
    %771 = arith.subf %767, %770 : vector<8x8xf32>
    %772 = math.exp %771 : vector<8x8xf32>
    %cst_362 = arith.constant dense<0.000000e+00> : vector<8xf32>
    %773 = vector.multi_reduction <add>, %772, %cst_362 [1] : vector<8x8xf32> to vector<8xf32>
    %774 = vector.shape_cast %773 : vector<8xf32> to vector<8x1xf32>
    %775 = tpu.reciprocal %774 {approx = true} : vector<8x1xf32> -> vector<8x1xf32>
    %776 = vector.broadcast %775 : vector<8x1xf32> to vector<8x8xf32>
    %777 = arith.mulf %772, %776 : vector<8x8xf32>
    %778 = arith.truncf %777 : vector<8x8xf32> to vector<8x8xbf16>
    %779 = vector.extract_strided_slice %700 {offsets = [0, 16], sizes = [8, 4], strides = [1, 1]} : vector<8x32xbf16> to vector<8x4xbf16>
    %cst_363 = arith.constant dense<0.000000e+00> : vector<8x4xf32>
    %780 = tpu.matmul %778, %779, %cst_363 {dimension_numbers = #tpu.dot_dimension_numbers<[1], [0], [0], [1], [0, 0, 1, 1], [], []>} : vector<8x8xbf16>, vector<8x4xbf16>, vector<8x4xf32> -> vector<8x4xf32>
    %781 = vector.extract_strided_slice %696 {offsets = [0, 20], sizes = [8, 4], strides = [1, 1]} : vector<8x32xbf16> to vector<8x4xbf16>
    %782 = vector.extract_strided_slice %698 {offsets = [0, 20], sizes = [8, 4], strides = [1, 1]} : vector<8x32xbf16> to vector<8x4xbf16>
    %cst_364 = arith.constant dense<0.000000e+00> : vector<8x8xf32>
    %783 = tpu.matmul %781, %782, %cst_364 {dimension_numbers = #tpu.dot_dimension_numbers<[1], [1], [0], [0], [0, 0, 1, 0], [], []>} : vector<8x4xbf16>, vector<8x4xbf16>, vector<8x8xf32> -> vector<8x8xf32>
    %cst_365 = arith.constant dense<0xFF800000> : vector<8xf32>
    %784 = vector.multi_reduction <maximumf>, %783, %cst_365 [1] : vector<8x8xf32> to vector<8xf32>
    %785 = vector.shape_cast %784 : vector<8xf32> to vector<8x1xf32>
    %786 = vector.broadcast %785 : vector<8x1xf32> to vector<8x8xf32>
    %787 = arith.subf %783, %786 : vector<8x8xf32>
    %788 = math.exp %787 : vector<8x8xf32>
    %cst_366 = arith.constant dense<0.000000e+00> : vector<8xf32>
    %789 = vector.multi_reduction <add>, %788, %cst_366 [1] : vector<8x8xf32> to vector<8xf32>
    %790 = vector.shape_cast %789 : vector<8xf32> to vector<8x1xf32>
    %791 = tpu.reciprocal %790 {approx = true} : vector<8x1xf32> -> vector<8x1xf32>
    %792 = vector.broadcast %791 : vector<8x1xf32> to vector<8x8xf32>
    %793 = arith.mulf %788, %792 : vector<8x8xf32>
    %794 = arith.truncf %793 : vector<8x8xf32> to vector<8x8xbf16>
    %795 = vector.extract_strided_slice %700 {offsets = [0, 20], sizes = [8, 4], strides = [1, 1]} : vector<8x32xbf16> to vector<8x4xbf16>
    %cst_367 = arith.constant dense<0.000000e+00> : vector<8x4xf32>
    %796 = tpu.matmul %794, %795, %cst_367 {dimension_numbers = #tpu.dot_dimension_numbers<[1], [0], [0], [1], [0, 0, 1, 1], [], []>} : vector<8x8xbf16>, vector<8x4xbf16>, vector<8x4xf32> -> vector<8x4xf32>
    %797 = vector.extract_strided_slice %696 {offsets = [0, 24], sizes = [8, 4], strides = [1, 1]} : vector<8x32xbf16> to vector<8x4xbf16>
    %798 = vector.extract_strided_slice %698 {offsets = [0, 24], sizes = [8, 4], strides = [1, 1]} : vector<8x32xbf16> to vector<8x4xbf16>
    %cst_368 = arith.constant dense<0.000000e+00> : vector<8x8xf32>
    %799 = tpu.matmul %797, %798, %cst_368 {dimension_numbers = #tpu.dot_dimension_numbers<[1], [1], [0], [0], [0, 0, 1, 0], [], []>} : vector<8x4xbf16>, vector<8x4xbf16>, vector<8x8xf32> -> vector<8x8xf32>
    %cst_369 = arith.constant dense<0xFF800000> : vector<8xf32>
    %800 = vector.multi_reduction <maximumf>, %799, %cst_369 [1] : vector<8x8xf32> to vector<8xf32>
    %801 = vector.shape_cast %800 : vector<8xf32> to vector<8x1xf32>
    %802 = vector.broadcast %801 : vector<8x1xf32> to vector<8x8xf32>
    %803 = arith.subf %799, %802 : vector<8x8xf32>
    %804 = math.exp %803 : vector<8x8xf32>
    %cst_370 = arith.constant dense<0.000000e+00> : vector<8xf32>
    %805 = vector.multi_reduction <add>, %804, %cst_370 [1] : vector<8x8xf32> to vector<8xf32>
    %806 = vector.shape_cast %805 : vector<8xf32> to vector<8x1xf32>
    %807 = tpu.reciprocal %806 {approx = true} : vector<8x1xf32> -> vector<8x1xf32>
    %808 = vector.broadcast %807 : vector<8x1xf32> to vector<8x8xf32>
    %809 = arith.mulf %804, %808 : vector<8x8xf32>
    %810 = arith.truncf %809 : vector<8x8xf32> to vector<8x8xbf16>
    %811 = vector.extract_strided_slice %700 {offsets = [0, 24], sizes = [8, 4], strides = [1, 1]} : vector<8x32xbf16> to vector<8x4xbf16>
    %cst_371 = arith.constant dense<0.000000e+00> : vector<8x4xf32>
    %812 = tpu.matmul %810, %811, %cst_371 {dimension_numbers = #tpu.dot_dimension_numbers<[1], [0], [0], [1], [0, 0, 1, 1], [], []>} : vector<8x8xbf16>, vector<8x4xbf16>, vector<8x4xf32> -> vector<8x4xf32>
    %813 = vector.extract_strided_slice %696 {offsets = [0, 28], sizes = [8, 4], strides = [1, 1]} : vector<8x32xbf16> to vector<8x4xbf16>
    %814 = vector.extract_strided_slice %698 {offsets = [0, 28], sizes = [8, 4], strides = [1, 1]} : vector<8x32xbf16> to vector<8x4xbf16>
    %cst_372 = arith.constant dense<0.000000e+00> : vector<8x8xf32>
    %815 = tpu.matmul %813, %814, %cst_372 {dimension_numbers = #tpu.dot_dimension_numbers<[1], [1], [0], [0], [0, 0, 1, 0], [], []>} : vector<8x4xbf16>, vector<8x4xbf16>, vector<8x8xf32> -> vector<8x8xf32>
    %cst_373 = arith.constant dense<0xFF800000> : vector<8xf32>
    %816 = vector.multi_reduction <maximumf>, %815, %cst_373 [1] : vector<8x8xf32> to vector<8xf32>
    %817 = vector.shape_cast %816 : vector<8xf32> to vector<8x1xf32>
    %818 = vector.broadcast %817 : vector<8x1xf32> to vector<8x8xf32>
    %819 = arith.subf %815, %818 : vector<8x8xf32>
    %820 = math.exp %819 : vector<8x8xf32>
    %cst_374 = arith.constant dense<0.000000e+00> : vector<8xf32>
    %821 = vector.multi_reduction <add>, %820, %cst_374 [1] : vector<8x8xf32> to vector<8xf32>
    %822 = vector.shape_cast %821 : vector<8xf32> to vector<8x1xf32>
    %823 = tpu.reciprocal %822 {approx = true} : vector<8x1xf32> -> vector<8x1xf32>
    %824 = vector.broadcast %823 : vector<8x1xf32> to vector<8x8xf32>
    %825 = arith.mulf %820, %824 : vector<8x8xf32>
    %826 = arith.truncf %825 : vector<8x8xf32> to vector<8x8xbf16>
    %827 = vector.extract_strided_slice %700 {offsets = [0, 28], sizes = [8, 4], strides = [1, 1]} : vector<8x32xbf16> to vector<8x4xbf16>
    %cst_375 = arith.constant dense<0.000000e+00> : vector<8x4xf32>
    %828 = tpu.matmul %826, %827, %cst_375 {dimension_numbers = #tpu.dot_dimension_numbers<[1], [0], [0], [1], [0, 0, 1, 1], [], []>} : vector<8x8xbf16>, vector<8x4xbf16>, vector<8x4xf32> -> vector<8x4xf32>
    %829 = tpu.concatenate %716, %732, %748, %764, %780, %796, %812, %828 in 1 : vector<8x4xf32>, vector<8x4xf32>, vector<8x4xf32>, vector<8x4xf32>, vector<8x4xf32>, vector<8x4xf32>, vector<8x4xf32>, vector<8x4xf32> -> vector<8x32xf32>
    %c1_376 = arith.constant 1 : index
    %c0_377 = arith.constant 0 : index
    %830 = tpu.strided_load %arg34[%c1_376, %c0_377] {strides = array<i32: 2, 1>} : memref<16x32xf32, #tpu.memory_space<vmem>>, vector<8x32xf32>
    tpu.strided_store %arg34[%c1_376, %c0_377], %829 {strides = array<i32: 2, 1>} : memref<16x32xf32, #tpu.memory_space<vmem>>, vector<8x32xf32>
    %c0_378 = arith.constant 0 : index
    %c0_379 = arith.constant 0 : index
    %831 = vector.load %arg34[%c0_378, %c0_379] : memref<16x32xf32, #tpu.memory_space<vmem>>, vector<16x32xf32>
    %832 = arith.truncf %831 : vector<16x32xf32> to vector<16x32xbf16>
    %c0_380 = arith.constant 0 : index
    %c0_381 = arith.constant 0 : index
    %833 = vector.load %arg16[%c0_380, %c0_381] : memref<32x32xbf16, #tpu.memory_space<vmem>>, vector<32x32xbf16>
    %cst_382 = arith.constant dense<0.000000e+00> : vector<16x32xf32>
    %834 = tpu.matmul %832, %833, %cst_382 {dimension_numbers = #tpu.dot_dimension_numbers<[1], [0], [0], [1], [0, 0, 1, 1], [], []>} : vector<16x32xbf16>, vector<32x32xbf16>, vector<16x32xf32> -> vector<16x32xf32>
    %c0_383 = arith.constant 0 : index
    %c0_384 = arith.constant 0 : index
    %835 = vector.load %arg17[%c0_383, %c0_384] : memref<1x32xf32, #tpu.memory_space<vmem>>, vector<1x32xf32>
    %836 = vector.broadcast %835 : vector<1x32xf32> to vector<16x32xf32>
    %837 = arith.addf %834, %836 : vector<16x32xf32>
    %c0_385 = arith.constant 0 : index
    %c0_386 = arith.constant 0 : index
    %838 = vector.load %arg38[%c0_385, %c0_386] : memref<16x32xf32, #tpu.memory_space<vmem>>, vector<16x32xf32>
    tpu.vector_store %arg38[%c0_385, %c0_386], %837 {strides = array<i32>} : memref<16x32xf32, #tpu.memory_space<vmem>>, vector<16x32xf32>,
    %c0_387 = arith.constant 0 : index
    %c0_388 = arith.constant 0 : index
    %839 = vector.load %arg38[%c0_387, %c0_388] : memref<16x32xf32, #tpu.memory_space<vmem>>, vector<16x32xf32>
    %840 = arith.truncf %839 : vector<16x32xf32> to vector<16x32xbf16>
    %c0_389 = arith.constant 0 : index
    %c0_390 = arith.constant 0 : index
    %c0_391 = arith.constant 0 : index
    %841 = vector.load %arg10[%c0_389, %c0_390, %c0_391] : memref<3x32x16xbf16, #tpu.memory_space<vmem>>, vector<1x32x16xbf16>
    %842 = vector.shape_cast %841 : vector<1x32x16xbf16> to vector<32x16xbf16>
    %cst_392 = arith.constant dense<0.000000e+00> : vector<16x16xf32>
    %843 = tpu.matmul %840, %842, %cst_392 {dimension_numbers = #tpu.dot_dimension_numbers<[1], [0], [0], [1], [0, 0, 1, 1], [], []>} : vector<16x32xbf16>, vector<32x16xbf16>, vector<16x16xf32> -> vector<16x16xf32>
    %c0_393 = arith.constant 0 : index
    %c0_394 = arith.constant 0 : index
    %c0_395 = arith.constant 0 : index
    %844 = vector.load %arg12[%c0_393, %c0_394, %c0_395] : memref<3x1x16xf32, #tpu.memory_space<vmem>>, vector<1x1x16xf32>
    %845 = vector.shape_cast %844 : vector<1x1x16xf32> to vector<1x16xf32>
    %846 = vector.broadcast %845 : vector<1x16xf32> to vector<16x16xf32>
    %847 = arith.addf %843, %846 : vector<16x16xf32>
    %c0_396 = arith.constant 0 : index
    %c0_397 = arith.constant 0 : index
    %848 = vector.load %arg35[%c0_396, %c0_397] : memref<16x16xf32, #tpu.memory_space<vmem>>, vector<16x16xf32>
    tpu.vector_store %arg35[%c0_396, %c0_397], %847 {strides = array<i32>} : memref<16x16xf32, #tpu.memory_space<vmem>>, vector<16x16xf32>,
    %c1_398 = arith.constant 1 : index
    %c0_399 = arith.constant 0 : index
    %c0_400 = arith.constant 0 : index
    %849 = vector.load %arg10[%c1_398, %c0_399, %c0_400] : memref<3x32x16xbf16, #tpu.memory_space<vmem>>, vector<1x32x16xbf16>
    %850 = vector.shape_cast %849 : vector<1x32x16xbf16> to vector<32x16xbf16>
    %cst_401 = arith.constant dense<0.000000e+00> : vector<16x16xf32>
    %851 = tpu.matmul %840, %850, %cst_401 {dimension_numbers = #tpu.dot_dimension_numbers<[1], [0], [0], [1], [0, 0, 1, 1], [], []>} : vector<16x32xbf16>, vector<32x16xbf16>, vector<16x16xf32> -> vector<16x16xf32>
    %c1_402 = arith.constant 1 : index
    %c0_403 = arith.constant 0 : index
    %c0_404 = arith.constant 0 : index
    %852 = vector.load %arg12[%c1_402, %c0_403, %c0_404] : memref<3x1x16xf32, #tpu.memory_space<vmem>>, vector<1x1x16xf32>
    %853 = vector.shape_cast %852 : vector<1x1x16xf32> to vector<1x16xf32>
    %854 = vector.broadcast %853 : vector<1x16xf32> to vector<16x16xf32>
    %855 = arith.addf %851, %854 : vector<16x16xf32>
    %c0_405 = arith.constant 0 : index
    %c0_406 = arith.constant 0 : index
    %856 = vector.load %arg36[%c0_405, %c0_406] : memref<16x16xf32, #tpu.memory_space<vmem>>, vector<16x16xf32>
    tpu.vector_store %arg36[%c0_405, %c0_406], %855 {strides = array<i32>} : memref<16x16xf32, #tpu.memory_space<vmem>>, vector<16x16xf32>,
    %c2_407 = arith.constant 2 : index
    %c0_408 = arith.constant 0 : index
    %c0_409 = arith.constant 0 : index
    %857 = vector.load %arg10[%c2_407, %c0_408, %c0_409] : memref<3x32x16xbf16, #tpu.memory_space<vmem>>, vector<1x32x16xbf16>
    %858 = vector.shape_cast %857 : vector<1x32x16xbf16> to vector<32x16xbf16>
    %cst_410 = arith.constant dense<0.000000e+00> : vector<16x16xf32>
    %859 = tpu.matmul %840, %858, %cst_410 {dimension_numbers = #tpu.dot_dimension_numbers<[1], [0], [0], [1], [0, 0, 1, 1], [], []>} : vector<16x32xbf16>, vector<32x16xbf16>, vector<16x16xf32> -> vector<16x16xf32>
    %c2_411 = arith.constant 2 : index
    %c0_412 = arith.constant 0 : index
    %c0_413 = arith.constant 0 : index
    %860 = vector.load %arg12[%c2_411, %c0_412, %c0_413] : memref<3x1x16xf32, #tpu.memory_space<vmem>>, vector<1x1x16xf32>
    %861 = vector.shape_cast %860 : vector<1x1x16xf32> to vector<1x16xf32>
    %862 = vector.broadcast %861 : vector<1x16xf32> to vector<16x16xf32>
    %863 = arith.addf %859, %862 : vector<16x16xf32>
    %c0_414 = arith.constant 0 : index
    %c0_415 = arith.constant 0 : index
    %864 = vector.load %arg37[%c0_414, %c0_415] : memref<16x16xf32, #tpu.memory_space<vmem>>, vector<16x16xf32>
    tpu.vector_store %arg37[%c0_414, %c0_415], %863 {strides = array<i32>} : memref<16x16xf32, #tpu.memory_space<vmem>>, vector<16x16xf32>,
    %c0_416 = arith.constant 0 : index
    %c0_417 = arith.constant 0 : index
    %c0_418 = arith.constant 0 : index
    %865 = vector.load %arg11[%c0_416, %c0_417, %c0_418] : memref<3x16x16xbf16, #tpu.memory_space<vmem>>, vector<1x16x16xbf16>
    %866 = vector.shape_cast %865 : vector<1x16x16xbf16> to vector<16x16xbf16>
    %c1_419 = arith.constant 1 : index
    %c0_420 = arith.constant 0 : index
    %c0_421 = arith.constant 0 : index
    %867 = vector.load %arg11[%c1_419, %c0_420, %c0_421] : memref<3x16x16xbf16, #tpu.memory_space<vmem>>, vector<1x16x16xbf16>
    %868 = vector.shape_cast %867 : vector<1x16x16xbf16> to vector<16x16xbf16>
    %c2_422 = arith.constant 2 : index
    %c0_423 = arith.constant 0 : index
    %c0_424 = arith.constant 0 : index
    %869 = vector.load %arg11[%c2_422, %c0_423, %c0_424] : memref<3x16x16xbf16, #tpu.memory_space<vmem>>, vector<1x16x16xbf16>
    %870 = vector.shape_cast %869 : vector<1x16x16xbf16> to vector<16x16xbf16>
    %c0_425 = arith.constant 0 : index
    %c0_426 = arith.constant 0 : index
    %871 = vector.load %arg13[%c0_425, %c0_426] : memref<1x16xf32, #tpu.memory_space<vmem>>, vector<1x16xf32>
    %cst_427 = arith.constant 0.000000e+00 : f32
    %872 = vector.broadcast %cst_427 : f32 to vector<2x16xf32>
    %cst_428 = arith.constant 0.000000e+00 : f32
    %873 = vector.broadcast %cst_428 : f32 to vector<2x16xf32>
    %c0_429 = arith.constant 0 : index
    %c0_430 = arith.constant 0 : index
    %874 = vector.load %arg35[%c0_429, %c0_430] : memref<16x16xf32, #tpu.memory_space<vmem>>, vector<2x16xf32>
    %c0_431 = arith.constant 0 : index
    %c0_432 = arith.constant 0 : index
    %875 = vector.load %arg36[%c0_431, %c0_432] : memref<16x16xf32, #tpu.memory_space<vmem>>, vector<2x16xf32>
    %c0_433 = arith.constant 0 : index
    %c0_434 = arith.constant 0 : index
    %876 = vector.load %arg37[%c0_433, %c0_434] : memref<16x16xf32, #tpu.memory_space<vmem>>, vector<2x16xf32>
    %877 = arith.truncf %872 : vector<2x16xf32> to vector<2x16xbf16>
    %cst_435 = arith.constant dense<0.000000e+00> : vector<2x16xf32>
    %878 = tpu.matmul %877, %866, %cst_435 {dimension_numbers = #tpu.dot_dimension_numbers<[1], [0], [0], [1], [0, 0, 1, 1], [], []>} : vector<2x16xbf16>, vector<16x16xbf16>, vector<2x16xf32> -> vector<2x16xf32>
    %879 = arith.addf %874, %878 : vector<2x16xf32>
    %880 = arith.negf %879 : vector<2x16xf32>
    %881 = math.exp %880 : vector<2x16xf32>
    %cst_436 = arith.constant 1.000000e+00 : f32
    %882 = vector.broadcast %cst_436 : f32 to vector<2x16xf32>
    %883 = arith.addf %882, %881 : vector<2x16xf32>
    %884 = arith.divf %882, %883 : vector<2x16xf32>
    %cst_437 = arith.constant dense<0.000000e+00> : vector<2x16xf32>
    %885 = tpu.matmul %877, %868, %cst_437 {dimension_numbers = #tpu.dot_dimension_numbers<[1], [0], [0], [1], [0, 0, 1, 1], [], []>} : vector<2x16xbf16>, vector<16x16xbf16>, vector<2x16xf32> -> vector<2x16xf32>
    %886 = arith.addf %875, %885 : vector<2x16xf32>
    %887 = arith.negf %886 : vector<2x16xf32>
    %888 = math.exp %887 : vector<2x16xf32>
    %cst_438 = arith.constant 1.000000e+00 : f32
    %889 = vector.broadcast %cst_438 : f32 to vector<2x16xf32>
    %890 = arith.addf %889, %888 : vector<2x16xf32>
    %891 = arith.divf %889, %890 : vector<2x16xf32>
    %cst_439 = arith.constant dense<0.000000e+00> : vector<2x16xf32>
    %892 = tpu.matmul %877, %870, %cst_439 {dimension_numbers = #tpu.dot_dimension_numbers<[1], [0], [0], [1], [0, 0, 1, 1], [], []>} : vector<2x16xbf16>, vector<16x16xbf16>, vector<2x16xf32> -> vector<2x16xf32>
    %893 = vector.broadcast %871 : vector<1x16xf32> to vector<2x16xf32>
    %894 = arith.addf %892, %893 : vector<2x16xf32>
    %895 = arith.mulf %884, %894 : vector<2x16xf32>
    %896 = arith.addf %876, %895 : vector<2x16xf32>
    %897 = math.tanh %896 : vector<2x16xf32>
    %cst_440 = arith.constant 1.000000e+00 : f32
    %898 = vector.broadcast %cst_440 : f32 to vector<2x16xf32>
    %899 = arith.subf %898, %891 : vector<2x16xf32>
    %900 = arith.mulf %899, %897 : vector<2x16xf32>
    %901 = arith.mulf %891, %872 : vector<2x16xf32>
    %902 = arith.addf %900, %901 : vector<2x16xf32>
    %903 = arith.addf %873, %902 : vector<2x16xf32>
    %c2_441 = arith.constant 2 : index
    %c0_442 = arith.constant 0 : index
    %904 = vector.load %arg35[%c2_441, %c0_442] : memref<16x16xf32, #tpu.memory_space<vmem>>, vector<2x16xf32>
    %c2_443 = arith.constant 2 : index
    %c0_444 = arith.constant 0 : index
    %905 = vector.load %arg36[%c2_443, %c0_444] : memref<16x16xf32, #tpu.memory_space<vmem>>, vector<2x16xf32>
    %c2_445 = arith.constant 2 : index
    %c0_446 = arith.constant 0 : index
    %906 = vector.load %arg37[%c2_445, %c0_446] : memref<16x16xf32, #tpu.memory_space<vmem>>, vector<2x16xf32>
    %907 = arith.truncf %902 : vector<2x16xf32> to vector<2x16xbf16>
    %cst_447 = arith.constant dense<0.000000e+00> : vector<2x16xf32>
    %908 = tpu.matmul %907, %866, %cst_447 {dimension_numbers = #tpu.dot_dimension_numbers<[1], [0], [0], [1], [0, 0, 1, 1], [], []>} : vector<2x16xbf16>, vector<16x16xbf16>, vector<2x16xf32> -> vector<2x16xf32>
    %909 = arith.addf %904, %908 : vector<2x16xf32>
    %910 = arith.negf %909 : vector<2x16xf32>
    %911 = math.exp %910 : vector<2x16xf32>
    %cst_448 = arith.constant 1.000000e+00 : f32
    %912 = vector.broadcast %cst_448 : f32 to vector<2x16xf32>
    %913 = arith.addf %912, %911 : vector<2x16xf32>
    %914 = arith.divf %912, %913 : vector<2x16xf32>
    %cst_449 = arith.constant dense<0.000000e+00> : vector<2x16xf32>
    %915 = tpu.matmul %907, %868, %cst_449 {dimension_numbers = #tpu.dot_dimension_numbers<[1], [0], [0], [1], [0, 0, 1, 1], [], []>} : vector<2x16xbf16>, vector<16x16xbf16>, vector<2x16xf32> -> vector<2x16xf32>
    %916 = arith.addf %905, %915 : vector<2x16xf32>
    %917 = arith.negf %916 : vector<2x16xf32>
    %918 = math.exp %917 : vector<2x16xf32>
    %cst_450 = arith.constant 1.000000e+00 : f32
    %919 = vector.broadcast %cst_450 : f32 to vector<2x16xf32>
    %920 = arith.addf %919, %918 : vector<2x16xf32>
    %921 = arith.divf %919, %920 : vector<2x16xf32>
    %cst_451 = arith.constant dense<0.000000e+00> : vector<2x16xf32>
    %922 = tpu.matmul %907, %870, %cst_451 {dimension_numbers = #tpu.dot_dimension_numbers<[1], [0], [0], [1], [0, 0, 1, 1], [], []>} : vector<2x16xbf16>, vector<16x16xbf16>, vector<2x16xf32> -> vector<2x16xf32>
    %923 = vector.broadcast %871 : vector<1x16xf32> to vector<2x16xf32>
    %924 = arith.addf %922, %923 : vector<2x16xf32>
    %925 = arith.mulf %914, %924 : vector<2x16xf32>
    %926 = arith.addf %906, %925 : vector<2x16xf32>
    %927 = math.tanh %926 : vector<2x16xf32>
    %cst_452 = arith.constant 1.000000e+00 : f32
    %928 = vector.broadcast %cst_452 : f32 to vector<2x16xf32>
    %929 = arith.subf %928, %921 : vector<2x16xf32>
    %930 = arith.mulf %929, %927 : vector<2x16xf32>
    %931 = arith.mulf %921, %902 : vector<2x16xf32>
    %932 = arith.addf %930, %931 : vector<2x16xf32>
    %933 = arith.addf %903, %932 : vector<2x16xf32>
    %c4_453 = arith.constant 4 : index
    %c0_454 = arith.constant 0 : index
    %934 = vector.load %arg35[%c4_453, %c0_454] : memref<16x16xf32, #tpu.memory_space<vmem>>, vector<2x16xf32>
    %c4_455 = arith.constant 4 : index
    %c0_456 = arith.constant 0 : index
    %935 = vector.load %arg36[%c4_455, %c0_456] : memref<16x16xf32, #tpu.memory_space<vmem>>, vector<2x16xf32>
    %c4_457 = arith.constant 4 : index
    %c0_458 = arith.constant 0 : index
    %936 = vector.load %arg37[%c4_457, %c0_458] : memref<16x16xf32, #tpu.memory_space<vmem>>, vector<2x16xf32>
    %937 = arith.truncf %932 : vector<2x16xf32> to vector<2x16xbf16>
    %cst_459 = arith.constant dense<0.000000e+00> : vector<2x16xf32>
    %938 = tpu.matmul %937, %866, %cst_459 {dimension_numbers = #tpu.dot_dimension_numbers<[1], [0], [0], [1], [0, 0, 1, 1], [], []>} : vector<2x16xbf16>, vector<16x16xbf16>, vector<2x16xf32> -> vector<2x16xf32>
    %939 = arith.addf %934, %938 : vector<2x16xf32>
    %940 = arith.negf %939 : vector<2x16xf32>
    %941 = math.exp %940 : vector<2x16xf32>
    %cst_460 = arith.constant 1.000000e+00 : f32
    %942 = vector.broadcast %cst_460 : f32 to vector<2x16xf32>
    %943 = arith.addf %942, %941 : vector<2x16xf32>
    %944 = arith.divf %942, %943 : vector<2x16xf32>
    %cst_461 = arith.constant dense<0.000000e+00> : vector<2x16xf32>
    %945 = tpu.matmul %937, %868, %cst_461 {dimension_numbers = #tpu.dot_dimension_numbers<[1], [0], [0], [1], [0, 0, 1, 1], [], []>} : vector<2x16xbf16>, vector<16x16xbf16>, vector<2x16xf32> -> vector<2x16xf32>
    %946 = arith.addf %935, %945 : vector<2x16xf32>
    %947 = arith.negf %946 : vector<2x16xf32>
    %948 = math.exp %947 : vector<2x16xf32>
    %cst_462 = arith.constant 1.000000e+00 : f32
    %949 = vector.broadcast %cst_462 : f32 to vector<2x16xf32>
    %950 = arith.addf %949, %948 : vector<2x16xf32>
    %951 = arith.divf %949, %950 : vector<2x16xf32>
    %cst_463 = arith.constant dense<0.000000e+00> : vector<2x16xf32>
    %952 = tpu.matmul %937, %870, %cst_463 {dimension_numbers = #tpu.dot_dimension_numbers<[1], [0], [0], [1], [0, 0, 1, 1], [], []>} : vector<2x16xbf16>, vector<16x16xbf16>, vector<2x16xf32> -> vector<2x16xf32>
    %953 = vector.broadcast %871 : vector<1x16xf32> to vector<2x16xf32>
    %954 = arith.addf %952, %953 : vector<2x16xf32>
    %955 = arith.mulf %944, %954 : vector<2x16xf32>
    %956 = arith.addf %936, %955 : vector<2x16xf32>
    %957 = math.tanh %956 : vector<2x16xf32>
    %cst_464 = arith.constant 1.000000e+00 : f32
    %958 = vector.broadcast %cst_464 : f32 to vector<2x16xf32>
    %959 = arith.subf %958, %951 : vector<2x16xf32>
    %960 = arith.mulf %959, %957 : vector<2x16xf32>
    %961 = arith.mulf %951, %932 : vector<2x16xf32>
    %962 = arith.addf %960, %961 : vector<2x16xf32>
    %963 = arith.addf %933, %962 : vector<2x16xf32>
    %c6_465 = arith.constant 6 : index
    %c0_466 = arith.constant 0 : index
    %964 = vector.load %arg35[%c6_465, %c0_466] : memref<16x16xf32, #tpu.memory_space<vmem>>, vector<2x16xf32>
    %c6_467 = arith.constant 6 : index
    %c0_468 = arith.constant 0 : index
    %965 = vector.load %arg36[%c6_467, %c0_468] : memref<16x16xf32, #tpu.memory_space<vmem>>, vector<2x16xf32>
    %c6_469 = arith.constant 6 : index
    %c0_470 = arith.constant 0 : index
    %966 = vector.load %arg37[%c6_469, %c0_470] : memref<16x16xf32, #tpu.memory_space<vmem>>, vector<2x16xf32>
    %967 = arith.truncf %962 : vector<2x16xf32> to vector<2x16xbf16>
    %cst_471 = arith.constant dense<0.000000e+00> : vector<2x16xf32>
    %968 = tpu.matmul %967, %866, %cst_471 {dimension_numbers = #tpu.dot_dimension_numbers<[1], [0], [0], [1], [0, 0, 1, 1], [], []>} : vector<2x16xbf16>, vector<16x16xbf16>, vector<2x16xf32> -> vector<2x16xf32>
    %969 = arith.addf %964, %968 : vector<2x16xf32>
    %970 = arith.negf %969 : vector<2x16xf32>
    %971 = math.exp %970 : vector<2x16xf32>
    %cst_472 = arith.constant 1.000000e+00 : f32
    %972 = vector.broadcast %cst_472 : f32 to vector<2x16xf32>
    %973 = arith.addf %972, %971 : vector<2x16xf32>
    %974 = arith.divf %972, %973 : vector<2x16xf32>
    %cst_473 = arith.constant dense<0.000000e+00> : vector<2x16xf32>
    %975 = tpu.matmul %967, %868, %cst_473 {dimension_numbers = #tpu.dot_dimension_numbers<[1], [0], [0], [1], [0, 0, 1, 1], [], []>} : vector<2x16xbf16>, vector<16x16xbf16>, vector<2x16xf32> -> vector<2x16xf32>
    %976 = arith.addf %965, %975 : vector<2x16xf32>
    %977 = arith.negf %976 : vector<2x16xf32>
    %978 = math.exp %977 : vector<2x16xf32>
    %cst_474 = arith.constant 1.000000e+00 : f32
    %979 = vector.broadcast %cst_474 : f32 to vector<2x16xf32>
    %980 = arith.addf %979, %978 : vector<2x16xf32>
    %981 = arith.divf %979, %980 : vector<2x16xf32>
    %cst_475 = arith.constant dense<0.000000e+00> : vector<2x16xf32>
    %982 = tpu.matmul %967, %870, %cst_475 {dimension_numbers = #tpu.dot_dimension_numbers<[1], [0], [0], [1], [0, 0, 1, 1], [], []>} : vector<2x16xbf16>, vector<16x16xbf16>, vector<2x16xf32> -> vector<2x16xf32>
    %983 = vector.broadcast %871 : vector<1x16xf32> to vector<2x16xf32>
    %984 = arith.addf %982, %983 : vector<2x16xf32>
    %985 = arith.mulf %974, %984 : vector<2x16xf32>
    %986 = arith.addf %966, %985 : vector<2x16xf32>
    %987 = math.tanh %986 : vector<2x16xf32>
    %cst_476 = arith.constant 1.000000e+00 : f32
    %988 = vector.broadcast %cst_476 : f32 to vector<2x16xf32>
    %989 = arith.subf %988, %981 : vector<2x16xf32>
    %990 = arith.mulf %989, %987 : vector<2x16xf32>
    %991 = arith.mulf %981, %962 : vector<2x16xf32>
    %992 = arith.addf %990, %991 : vector<2x16xf32>
    %993 = arith.addf %963, %992 : vector<2x16xf32>
    %c8_477 = arith.constant 8 : index
    %c0_478 = arith.constant 0 : index
    %994 = vector.load %arg35[%c8_477, %c0_478] : memref<16x16xf32, #tpu.memory_space<vmem>>, vector<2x16xf32>
    %c8_479 = arith.constant 8 : index
    %c0_480 = arith.constant 0 : index
    %995 = vector.load %arg36[%c8_479, %c0_480] : memref<16x16xf32, #tpu.memory_space<vmem>>, vector<2x16xf32>
    %c8_481 = arith.constant 8 : index
    %c0_482 = arith.constant 0 : index
    %996 = vector.load %arg37[%c8_481, %c0_482] : memref<16x16xf32, #tpu.memory_space<vmem>>, vector<2x16xf32>
    %997 = arith.truncf %992 : vector<2x16xf32> to vector<2x16xbf16>
    %cst_483 = arith.constant dense<0.000000e+00> : vector<2x16xf32>
    %998 = tpu.matmul %997, %866, %cst_483 {dimension_numbers = #tpu.dot_dimension_numbers<[1], [0], [0], [1], [0, 0, 1, 1], [], []>} : vector<2x16xbf16>, vector<16x16xbf16>, vector<2x16xf32> -> vector<2x16xf32>
    %999 = arith.addf %994, %998 : vector<2x16xf32>
    %1000 = arith.negf %999 : vector<2x16xf32>
    %1001 = math.exp %1000 : vector<2x16xf32>
    %cst_484 = arith.constant 1.000000e+00 : f32
    %1002 = vector.broadcast %cst_484 : f32 to vector<2x16xf32>
    %1003 = arith.addf %1002, %1001 : vector<2x16xf32>
    %1004 = arith.divf %1002, %1003 : vector<2x16xf32>
    %cst_485 = arith.constant dense<0.000000e+00> : vector<2x16xf32>
    %1005 = tpu.matmul %997, %868, %cst_485 {dimension_numbers = #tpu.dot_dimension_numbers<[1], [0], [0], [1], [0, 0, 1, 1], [], []>} : vector<2x16xbf16>, vector<16x16xbf16>, vector<2x16xf32> -> vector<2x16xf32>
    %1006 = arith.addf %995, %1005 : vector<2x16xf32>
    %1007 = arith.negf %1006 : vector<2x16xf32>
    %1008 = math.exp %1007 : vector<2x16xf32>
    %cst_486 = arith.constant 1.000000e+00 : f32
    %1009 = vector.broadcast %cst_486 : f32 to vector<2x16xf32>
    %1010 = arith.addf %1009, %1008 : vector<2x16xf32>
    %1011 = arith.divf %1009, %1010 : vector<2x16xf32>
    %cst_487 = arith.constant dense<0.000000e+00> : vector<2x16xf32>
    %1012 = tpu.matmul %997, %870, %cst_487 {dimension_numbers = #tpu.dot_dimension_numbers<[1], [0], [0], [1], [0, 0, 1, 1], [], []>} : vector<2x16xbf16>, vector<16x16xbf16>, vector<2x16xf32> -> vector<2x16xf32>
    %1013 = vector.broadcast %871 : vector<1x16xf32> to vector<2x16xf32>
    %1014 = arith.addf %1012, %1013 : vector<2x16xf32>
    %1015 = arith.mulf %1004, %1014 : vector<2x16xf32>
    %1016 = arith.addf %996, %1015 : vector<2x16xf32>
    %1017 = math.tanh %1016 : vector<2x16xf32>
    %cst_488 = arith.constant 1.000000e+00 : f32
    %1018 = vector.broadcast %cst_488 : f32 to vector<2x16xf32>
    %1019 = arith.subf %1018, %1011 : vector<2x16xf32>
    %1020 = arith.mulf %1019, %1017 : vector<2x16xf32>
    %1021 = arith.mulf %1011, %992 : vector<2x16xf32>
    %1022 = arith.addf %1020, %1021 : vector<2x16xf32>
    %1023 = arith.addf %993, %1022 : vector<2x16xf32>
    %c10_489 = arith.constant 10 : index
    %c0_490 = arith.constant 0 : index
    %1024 = vector.load %arg35[%c10_489, %c0_490] : memref<16x16xf32, #tpu.memory_space<vmem>>, vector<2x16xf32>
    %c10_491 = arith.constant 10 : index
    %c0_492 = arith.constant 0 : index
    %1025 = vector.load %arg36[%c10_491, %c0_492] : memref<16x16xf32, #tpu.memory_space<vmem>>, vector<2x16xf32>
    %c10_493 = arith.constant 10 : index
    %c0_494 = arith.constant 0 : index
    %1026 = vector.load %arg37[%c10_493, %c0_494] : memref<16x16xf32, #tpu.memory_space<vmem>>, vector<2x16xf32>
    %1027 = arith.truncf %1022 : vector<2x16xf32> to vector<2x16xbf16>
    %cst_495 = arith.constant dense<0.000000e+00> : vector<2x16xf32>
    %1028 = tpu.matmul %1027, %866, %cst_495 {dimension_numbers = #tpu.dot_dimension_numbers<[1], [0], [0], [1], [0, 0, 1, 1], [], []>} : vector<2x16xbf16>, vector<16x16xbf16>, vector<2x16xf32> -> vector<2x16xf32>
    %1029 = arith.addf %1024, %1028 : vector<2x16xf32>
    %1030 = arith.negf %1029 : vector<2x16xf32>
    %1031 = math.exp %1030 : vector<2x16xf32>
    %cst_496 = arith.constant 1.000000e+00 : f32
    %1032 = vector.broadcast %cst_496 : f32 to vector<2x16xf32>
    %1033 = arith.addf %1032, %1031 : vector<2x16xf32>
    %1034 = arith.divf %1032, %1033 : vector<2x16xf32>
    %cst_497 = arith.constant dense<0.000000e+00> : vector<2x16xf32>
    %1035 = tpu.matmul %1027, %868, %cst_497 {dimension_numbers = #tpu.dot_dimension_numbers<[1], [0], [0], [1], [0, 0, 1, 1], [], []>} : vector<2x16xbf16>, vector<16x16xbf16>, vector<2x16xf32> -> vector<2x16xf32>
    %1036 = arith.addf %1025, %1035 : vector<2x16xf32>
    %1037 = arith.negf %1036 : vector<2x16xf32>
    %1038 = math.exp %1037 : vector<2x16xf32>
    %cst_498 = arith.constant 1.000000e+00 : f32
    %1039 = vector.broadcast %cst_498 : f32 to vector<2x16xf32>
    %1040 = arith.addf %1039, %1038 : vector<2x16xf32>
    %1041 = arith.divf %1039, %1040 : vector<2x16xf32>
    %cst_499 = arith.constant dense<0.000000e+00> : vector<2x16xf32>
    %1042 = tpu.matmul %1027, %870, %cst_499 {dimension_numbers = #tpu.dot_dimension_numbers<[1], [0], [0], [1], [0, 0, 1, 1], [], []>} : vector<2x16xbf16>, vector<16x16xbf16>, vector<2x16xf32> -> vector<2x16xf32>
    %1043 = vector.broadcast %871 : vector<1x16xf32> to vector<2x16xf32>
    %1044 = arith.addf %1042, %1043 : vector<2x16xf32>
    %1045 = arith.mulf %1034, %1044 : vector<2x16xf32>
    %1046 = arith.addf %1026, %1045 : vector<2x16xf32>
    %1047 = math.tanh %1046 : vector<2x16xf32>
    %cst_500 = arith.constant 1.000000e+00 : f32
    %1048 = vector.broadcast %cst_500 : f32 to vector<2x16xf32>
    %1049 = arith.subf %1048, %1041 : vector<2x16xf32>
    %1050 = arith.mulf %1049, %1047 : vector<2x16xf32>
    %1051 = arith.mulf %1041, %1022 : vector<2x16xf32>
    %1052 = arith.addf %1050, %1051 : vector<2x16xf32>
    %1053 = arith.addf %1023, %1052 : vector<2x16xf32>
    %c12_501 = arith.constant 12 : index
    %c0_502 = arith.constant 0 : index
    %1054 = vector.load %arg35[%c12_501, %c0_502] : memref<16x16xf32, #tpu.memory_space<vmem>>, vector<2x16xf32>
    %c12_503 = arith.constant 12 : index
    %c0_504 = arith.constant 0 : index
    %1055 = vector.load %arg36[%c12_503, %c0_504] : memref<16x16xf32, #tpu.memory_space<vmem>>, vector<2x16xf32>
    %c12_505 = arith.constant 12 : index
    %c0_506 = arith.constant 0 : index
    %1056 = vector.load %arg37[%c12_505, %c0_506] : memref<16x16xf32, #tpu.memory_space<vmem>>, vector<2x16xf32>
    %1057 = arith.truncf %1052 : vector<2x16xf32> to vector<2x16xbf16>
    %cst_507 = arith.constant dense<0.000000e+00> : vector<2x16xf32>
    %1058 = tpu.matmul %1057, %866, %cst_507 {dimension_numbers = #tpu.dot_dimension_numbers<[1], [0], [0], [1], [0, 0, 1, 1], [], []>} : vector<2x16xbf16>, vector<16x16xbf16>, vector<2x16xf32> -> vector<2x16xf32>
    %1059 = arith.addf %1054, %1058 : vector<2x16xf32>
    %1060 = arith.negf %1059 : vector<2x16xf32>
    %1061 = math.exp %1060 : vector<2x16xf32>
    %cst_508 = arith.constant 1.000000e+00 : f32
    %1062 = vector.broadcast %cst_508 : f32 to vector<2x16xf32>
    %1063 = arith.addf %1062, %1061 : vector<2x16xf32>
    %1064 = arith.divf %1062, %1063 : vector<2x16xf32>
    %cst_509 = arith.constant dense<0.000000e+00> : vector<2x16xf32>
    %1065 = tpu.matmul %1057, %868, %cst_509 {dimension_numbers = #tpu.dot_dimension_numbers<[1], [0], [0], [1], [0, 0, 1, 1], [], []>} : vector<2x16xbf16>, vector<16x16xbf16>, vector<2x16xf32> -> vector<2x16xf32>
    %1066 = arith.addf %1055, %1065 : vector<2x16xf32>
    %1067 = arith.negf %1066 : vector<2x16xf32>
    %1068 = math.exp %1067 : vector<2x16xf32>
    %cst_510 = arith.constant 1.000000e+00 : f32
    %1069 = vector.broadcast %cst_510 : f32 to vector<2x16xf32>
    %1070 = arith.addf %1069, %1068 : vector<2x16xf32>
    %1071 = arith.divf %1069, %1070 : vector<2x16xf32>
    %cst_511 = arith.constant dense<0.000000e+00> : vector<2x16xf32>
    %1072 = tpu.matmul %1057, %870, %cst_511 {dimension_numbers = #tpu.dot_dimension_numbers<[1], [0], [0], [1], [0, 0, 1, 1], [], []>} : vector<2x16xbf16>, vector<16x16xbf16>, vector<2x16xf32> -> vector<2x16xf32>
    %1073 = vector.broadcast %871 : vector<1x16xf32> to vector<2x16xf32>
    %1074 = arith.addf %1072, %1073 : vector<2x16xf32>
    %1075 = arith.mulf %1064, %1074 : vector<2x16xf32>
    %1076 = arith.addf %1056, %1075 : vector<2x16xf32>
    %1077 = math.tanh %1076 : vector<2x16xf32>
    %cst_512 = arith.constant 1.000000e+00 : f32
    %1078 = vector.broadcast %cst_512 : f32 to vector<2x16xf32>
    %1079 = arith.subf %1078, %1071 : vector<2x16xf32>
    %1080 = arith.mulf %1079, %1077 : vector<2x16xf32>
    %1081 = arith.mulf %1071, %1052 : vector<2x16xf32>
    %1082 = arith.addf %1080, %1081 : vector<2x16xf32>
    %1083 = arith.addf %1053, %1082 : vector<2x16xf32>
    %c14_513 = arith.constant 14 : index
    %c0_514 = arith.constant 0 : index
    %1084 = vector.load %arg35[%c14_513, %c0_514] : memref<16x16xf32, #tpu.memory_space<vmem>>, vector<2x16xf32>
    %c14_515 = arith.constant 14 : index
    %c0_516 = arith.constant 0 : index
    %1085 = vector.load %arg36[%c14_515, %c0_516] : memref<16x16xf32, #tpu.memory_space<vmem>>, vector<2x16xf32>
    %c14_517 = arith.constant 14 : index
    %c0_518 = arith.constant 0 : index
    %1086 = vector.load %arg37[%c14_517, %c0_518] : memref<16x16xf32, #tpu.memory_space<vmem>>, vector<2x16xf32>
    %1087 = arith.truncf %1082 : vector<2x16xf32> to vector<2x16xbf16>
    %cst_519 = arith.constant dense<0.000000e+00> : vector<2x16xf32>
    %1088 = tpu.matmul %1087, %866, %cst_519 {dimension_numbers = #tpu.dot_dimension_numbers<[1], [0], [0], [1], [0, 0, 1, 1], [], []>} : vector<2x16xbf16>, vector<16x16xbf16>, vector<2x16xf32> -> vector<2x16xf32>
    %1089 = arith.addf %1084, %1088 : vector<2x16xf32>
    %1090 = arith.negf %1089 : vector<2x16xf32>
    %1091 = math.exp %1090 : vector<2x16xf32>
    %cst_520 = arith.constant 1.000000e+00 : f32
    %1092 = vector.broadcast %cst_520 : f32 to vector<2x16xf32>
    %1093 = arith.addf %1092, %1091 : vector<2x16xf32>
    %1094 = arith.divf %1092, %1093 : vector<2x16xf32>
    %cst_521 = arith.constant dense<0.000000e+00> : vector<2x16xf32>
    %1095 = tpu.matmul %1087, %868, %cst_521 {dimension_numbers = #tpu.dot_dimension_numbers<[1], [0], [0], [1], [0, 0, 1, 1], [], []>} : vector<2x16xbf16>, vector<16x16xbf16>, vector<2x16xf32> -> vector<2x16xf32>
    %1096 = arith.addf %1085, %1095 : vector<2x16xf32>
    %1097 = arith.negf %1096 : vector<2x16xf32>
    %1098 = math.exp %1097 : vector<2x16xf32>
    %cst_522 = arith.constant 1.000000e+00 : f32
    %1099 = vector.broadcast %cst_522 : f32 to vector<2x16xf32>
    %1100 = arith.addf %1099, %1098 : vector<2x16xf32>
    %1101 = arith.divf %1099, %1100 : vector<2x16xf32>
    %cst_523 = arith.constant dense<0.000000e+00> : vector<2x16xf32>
    %1102 = tpu.matmul %1087, %870, %cst_523 {dimension_numbers = #tpu.dot_dimension_numbers<[1], [0], [0], [1], [0, 0, 1, 1], [], []>} : vector<2x16xbf16>, vector<16x16xbf16>, vector<2x16xf32> -> vector<2x16xf32>
    %1103 = vector.broadcast %871 : vector<1x16xf32> to vector<2x16xf32>
    %1104 = arith.addf %1102, %1103 : vector<2x16xf32>
    %1105 = arith.mulf %1094, %1104 : vector<2x16xf32>
    %1106 = arith.addf %1086, %1105 : vector<2x16xf32>
    %1107 = math.tanh %1106 : vector<2x16xf32>
    %cst_524 = arith.constant 1.000000e+00 : f32
    %1108 = vector.broadcast %cst_524 : f32 to vector<2x16xf32>
    %1109 = arith.subf %1108, %1101 : vector<2x16xf32>
    %1110 = arith.mulf %1109, %1107 : vector<2x16xf32>
    %1111 = arith.mulf %1101, %1082 : vector<2x16xf32>
    %1112 = arith.addf %1110, %1111 : vector<2x16xf32>
    %1113 = arith.addf %1083, %1112 : vector<2x16xf32>
    %cst_525 = arith.constant 1.250000e-01 : f32
    %1114 = vector.broadcast %cst_525 : f32 to vector<2x16xf32>
    %1115 = arith.mulf %1113, %1114 : vector<2x16xf32>
    %1116 = arith.truncf %1112 : vector<2x16xf32> to vector<2x16xbf16>
    %c0_526 = arith.constant 0 : index
    %c0_527 = arith.constant 0 : index
    %1117 = vector.load %arg18[%c0_526, %c0_527] : memref<16x256xbf16, #tpu.memory_space<vmem>>, vector<16x256xbf16>
    %cst_528 = arith.constant dense<0.000000e+00> : vector<2x256xf32>
    %1118 = tpu.matmul %1116, %1117, %cst_528 {dimension_numbers = #tpu.dot_dimension_numbers<[1], [0], [0], [1], [0, 0, 1, 1], [], []>} : vector<2x16xbf16>, vector<16x256xbf16>, vector<2x256xf32> -> vector<2x256xf32>
    %1119 = arith.truncf %1115 : vector<2x16xf32> to vector<2x16xbf16>
    %c0_529 = arith.constant 0 : index
    %c0_530 = arith.constant 0 : index
    %1120 = vector.load %arg19[%c0_529, %c0_530] : memref<16x256xbf16, #tpu.memory_space<vmem>>, vector<16x256xbf16>
    %cst_531 = arith.constant dense<0.000000e+00> : vector<2x256xf32>
    %1121 = tpu.matmul %1119, %1120, %cst_531 {dimension_numbers = #tpu.dot_dimension_numbers<[1], [0], [0], [1], [0, 0, 1, 1], [], []>} : vector<2x16xbf16>, vector<16x256xbf16>, vector<2x256xf32> -> vector<2x256xf32>
    %1122 = arith.addf %1118, %1121 : vector<2x256xf32>
    %c0_532 = arith.constant 0 : index
    %c0_533 = arith.constant 0 : index
    %1123 = vector.load %arg20[%c0_532, %c0_533] : memref<1x256xf32, #tpu.memory_space<vmem>>, vector<1x256xf32>
    %1124 = vector.broadcast %1123 : vector<1x256xf32> to vector<2x256xf32>
    %1125 = arith.addf %1122, %1124 : vector<2x256xf32>
    %cst_534 = arith.constant 0.000000e+00 : f32
    %1126 = vector.broadcast %cst_534 : f32 to vector<2x256xf32>
    %1127 = arith.maximumf %1125, %1126 : vector<2x256xf32>
    %c0_535 = arith.constant 0 : index
    %c0_536 = arith.constant 0 : index
    %1128 = vector.load %arg21[%c0_535, %c0_536] : memref<1x256xf32, #tpu.memory_space<vmem>>, vector<1x256xf32>
    %1129 = vector.broadcast %1128 : vector<1x256xf32> to vector<2x256xf32>
    %1130 = arith.mulf %1127, %1129 : vector<2x256xf32>
    %c0_537 = arith.constant 0 : index
    %c0_538 = arith.constant 0 : index
    %1131 = vector.load %arg22[%c0_537, %c0_538] : memref<1x256xf32, #tpu.memory_space<vmem>>, vector<1x256xf32>
    %1132 = vector.broadcast %1131 : vector<1x256xf32> to vector<2x256xf32>
    %1133 = arith.addf %1130, %1132 : vector<2x256xf32>
    %1134 = arith.truncf %1133 : vector<2x256xf32> to vector<2x256xbf16>
    %c0_539 = arith.constant 0 : index
    %c0_540 = arith.constant 0 : index
    %1135 = vector.load %arg23[%c0_539, %c0_540] : memref<256x128xbf16, #tpu.memory_space<vmem>>, vector<256x128xbf16>
    %cst_541 = arith.constant dense<0.000000e+00> : vector<2x128xf32>
    %1136 = tpu.matmul %1134, %1135, %cst_541 {dimension_numbers = #tpu.dot_dimension_numbers<[1], [0], [0], [1], [0, 0, 1, 1], [], []>} : vector<2x256xbf16>, vector<256x128xbf16>, vector<2x128xf32> -> vector<2x128xf32>
    %c0_542 = arith.constant 0 : index
    %c0_543 = arith.constant 0 : index
    %1137 = vector.load %arg24[%c0_542, %c0_543] : memref<1x128xf32, #tpu.memory_space<vmem>>, vector<1x128xf32>
    %1138 = vector.broadcast %1137 : vector<1x128xf32> to vector<2x128xf32>
    %1139 = arith.addf %1136, %1138 : vector<2x128xf32>
    %cst_544 = arith.constant 0.000000e+00 : f32
    %1140 = vector.broadcast %cst_544 : f32 to vector<2x128xf32>
    %1141 = arith.maximumf %1139, %1140 : vector<2x128xf32>
    %c0_545 = arith.constant 0 : index
    %c0_546 = arith.constant 0 : index
    %1142 = vector.load %arg25[%c0_545, %c0_546] : memref<1x128xf32, #tpu.memory_space<vmem>>, vector<1x128xf32>
    %1143 = vector.broadcast %1142 : vector<1x128xf32> to vector<2x128xf32>
    %1144 = arith.mulf %1141, %1143 : vector<2x128xf32>
    %c0_547 = arith.constant 0 : index
    %c0_548 = arith.constant 0 : index
    %1145 = vector.load %arg26[%c0_547, %c0_548] : memref<1x128xf32, #tpu.memory_space<vmem>>, vector<1x128xf32>
    %1146 = vector.broadcast %1145 : vector<1x128xf32> to vector<2x128xf32>
    %1147 = arith.addf %1144, %1146 : vector<2x128xf32>
    %1148 = arith.truncf %1147 : vector<2x128xf32> to vector<2x128xbf16>
    %c0_549 = arith.constant 0 : index
    %c0_550 = arith.constant 0 : index
    %1149 = vector.load %arg27[%c0_549, %c0_550] : memref<128x64xbf16, #tpu.memory_space<vmem>>, vector<128x64xbf16>
    %cst_551 = arith.constant dense<0.000000e+00> : vector<2x64xf32>
    %1150 = tpu.matmul %1148, %1149, %cst_551 {dimension_numbers = #tpu.dot_dimension_numbers<[1], [0], [0], [1], [0, 0, 1, 1], [], []>} : vector<2x128xbf16>, vector<128x64xbf16>, vector<2x64xf32> -> vector<2x64xf32>
    %c0_552 = arith.constant 0 : index
    %c0_553 = arith.constant 0 : index
    %1151 = vector.load %arg28[%c0_552, %c0_553] : memref<1x64xf32, #tpu.memory_space<vmem>>, vector<1x64xf32>
    %1152 = vector.broadcast %1151 : vector<1x64xf32> to vector<2x64xf32>
    %1153 = arith.addf %1150, %1152 : vector<2x64xf32>
    %cst_554 = arith.constant 0.000000e+00 : f32
    %1154 = vector.broadcast %cst_554 : f32 to vector<2x64xf32>
    %1155 = arith.maximumf %1153, %1154 : vector<2x64xf32>
    %1156 = arith.truncf %1155 : vector<2x64xf32> to vector<2x64xbf16>
    %c0_555 = arith.constant 0 : index
    %c0_556 = arith.constant 0 : index
    %1157 = vector.load %arg29[%c0_555, %c0_556] : memref<64x3xbf16, #tpu.memory_space<vmem>>, vector<64x3xbf16>
    %cst_557 = arith.constant dense<0.000000e+00> : vector<2x3xf32>
    %1158 = tpu.matmul %1156, %1157, %cst_557 {dimension_numbers = #tpu.dot_dimension_numbers<[1], [0], [0], [1], [0, 0, 1, 1], [], []>} : vector<2x64xbf16>, vector<64x3xbf16>, vector<2x3xf32> -> vector<2x3xf32>
    %c0_558 = arith.constant 0 : index
    %c0_559 = arith.constant 0 : index
    %1159 = vector.load %arg30[%c0_558, %c0_559] : memref<1x3xf32, #tpu.memory_space<vmem>>, vector<1x3xf32>
    %1160 = vector.broadcast %1159 : vector<1x3xf32> to vector<2x3xf32>
    %1161 = arith.addf %1158, %1160 : vector<2x3xf32>
    %1162 = vector.extract_strided_slice %1161 {offsets = [0, 0], sizes = [2, 1], strides = [1, 1]} : vector<2x3xf32> to vector<2x1xf32>
    %1163 = math.tanh %1162 : vector<2x1xf32>
    %1164 = vector.extract_strided_slice %1161 {offsets = [0, 1], sizes = [2, 1], strides = [1, 1]} : vector<2x3xf32> to vector<2x1xf32>
    %1165 = math.tanh %1164 : vector<2x1xf32>
    %1166 = vector.extract_strided_slice %1161 {offsets = [0, 2], sizes = [2, 1], strides = [1, 1]} : vector<2x3xf32> to vector<2x1xf32>
    %1167 = arith.negf %1166 : vector<2x1xf32>
    %1168 = math.exp %1167 : vector<2x1xf32>
    %cst_560 = arith.constant 1.000000e+00 : f32
    %1169 = vector.broadcast %cst_560 : f32 to vector<2x1xf32>
    %1170 = arith.addf %1169, %1168 : vector<2x1xf32>
    %1171 = arith.divf %1169, %1170 : vector<2x1xf32>
    %cst_561 = arith.constant 1.000000e+00 : f32
    %1172 = vector.broadcast %cst_561 : f32 to vector<2x1xf32>
    %1173 = arith.subf %1172, %1171 : vector<2x1xf32>
    %1174 = arith.mulf %1173, %1163 : vector<2x1xf32>
    %1175 = arith.mulf %1171, %1165 : vector<2x1xf32>
    %1176 = arith.addf %1174, %1175 : vector<2x1xf32>
    %c0_562 = arith.constant 0 : index
    %c0_563 = arith.constant 0 : index
    %1177 = vector.load %arg31[%c0_562, %c0_563] : memref<2x1xf32, #tpu.memory_space<vmem>>, vector<2x1xf32>
    tpu.vector_store %arg31[%c0_562, %c0_563], %1176 {strides = array<i32>} : memref<2x1xf32, #tpu.memory_space<vmem>>, vector<2x1xf32>,
    return
  }
  func.func @transform_0(%arg0: i32) -> (i32, i32, i32) {
    %c0_i32 = arith.constant 0 : i32
    %c0_i32_0 = arith.constant 0 : i32
    %c0_i32_1 = arith.constant 0 : i32
    return %arg0, %c0_i32, %c0_i32_0 : i32, i32, i32
  }
  func.func @transform_1(%arg0: i32) -> (i32, i32, i32) {
    %c0_i32 = arith.constant 0 : i32
    %c0_i32_0 = arith.constant 0 : i32
    %c0_i32_1 = arith.constant 0 : i32
    %c0_i32_2 = arith.constant 0 : i32
    return %c0_i32, %c0_i32_0, %c0_i32_1 : i32, i32, i32
  }
  func.func @transform_2(%arg0: i32) -> (i32, i32, i32) {
    %c0_i32 = arith.constant 0 : i32
    %c0_i32_0 = arith.constant 0 : i32
    %c0_i32_1 = arith.constant 0 : i32
    %c0_i32_2 = arith.constant 0 : i32
    return %c0_i32, %c0_i32_0, %c0_i32_1 : i32, i32, i32
  }
  func.func @transform_3(%arg0: i32) -> (i32, i32, i32) {
    %c0_i32 = arith.constant 0 : i32
    %c0_i32_0 = arith.constant 0 : i32
    %c0_i32_1 = arith.constant 0 : i32
    %c0_i32_2 = arith.constant 0 : i32
    return %c0_i32, %c0_i32_0, %c0_i32_1 : i32, i32, i32
  }
  func.func @transform_4(%arg0: i32) -> (i32, i32) {
    %c0_i32 = arith.constant 0 : i32
    %c0_i32_0 = arith.constant 0 : i32
    %c0_i32_1 = arith.constant 0 : i32
    return %c0_i32, %c0_i32_0 : i32, i32
  }
  func.func @transform_5(%arg0: i32) -> (i32, i32, i32) {
    %c0_i32 = arith.constant 0 : i32
    %c0_i32_0 = arith.constant 0 : i32
    %c0_i32_1 = arith.constant 0 : i32
    %c0_i32_2 = arith.constant 0 : i32
    return %c0_i32, %c0_i32_0, %c0_i32_1 : i32, i32, i32
  }
  func.func @transform_6(%arg0: i32) -> (i32, i32, i32) {
    %c0_i32 = arith.constant 0 : i32
    %c0_i32_0 = arith.constant 0 : i32
    %c0_i32_1 = arith.constant 0 : i32
    %c0_i32_2 = arith.constant 0 : i32
    return %c0_i32, %c0_i32_0, %c0_i32_1 : i32, i32, i32
  }
  func.func @transform_7(%arg0: i32) -> (i32, i32, i32) {
    %c0_i32 = arith.constant 0 : i32
    %c0_i32_0 = arith.constant 0 : i32
    %c0_i32_1 = arith.constant 0 : i32
    %c0_i32_2 = arith.constant 0 : i32
    return %c0_i32, %c0_i32_0, %c0_i32_1 : i32, i32, i32
  }
  func.func @transform_8(%arg0: i32) -> (i32, i32) {
    %c0_i32 = arith.constant 0 : i32
    %c0_i32_0 = arith.constant 0 : i32
    %c0_i32_1 = arith.constant 0 : i32
    return %c0_i32, %c0_i32_0 : i32, i32
  }
  func.func @transform_9(%arg0: i32) -> (i32, i32, i32) {
    %c0_i32 = arith.constant 0 : i32
    %c0_i32_0 = arith.constant 0 : i32
    %c0_i32_1 = arith.constant 0 : i32
    %c0_i32_2 = arith.constant 0 : i32
    return %c0_i32, %c0_i32_0, %c0_i32_1 : i32, i32, i32
  }
  func.func @transform_10(%arg0: i32) -> (i32, i32, i32) {
    %c0_i32 = arith.constant 0 : i32
    %c0_i32_0 = arith.constant 0 : i32
    %c0_i32_1 = arith.constant 0 : i32
    %c0_i32_2 = arith.constant 0 : i32
    return %c0_i32, %c0_i32_0, %c0_i32_1 : i32, i32, i32
  }
  func.func @transform_11(%arg0: i32) -> (i32, i32, i32) {
    %c0_i32 = arith.constant 0 : i32
    %c0_i32_0 = arith.constant 0 : i32
    %c0_i32_1 = arith.constant 0 : i32
    %c0_i32_2 = arith.constant 0 : i32
    return %c0_i32, %c0_i32_0, %c0_i32_1 : i32, i32, i32
  }
  func.func @transform_12(%arg0: i32) -> (i32, i32) {
    %c0_i32 = arith.constant 0 : i32
    %c0_i32_0 = arith.constant 0 : i32
    %c0_i32_1 = arith.constant 0 : i32
    return %c0_i32, %c0_i32_0 : i32, i32
  }
  func.func @transform_13(%arg0: i32) -> (i32, i32) {
    %c0_i32 = arith.constant 0 : i32
    %c0_i32_0 = arith.constant 0 : i32
    %c0_i32_1 = arith.constant 0 : i32
    return %c0_i32, %c0_i32_0 : i32, i32
  }
  func.func @transform_14(%arg0: i32) -> (i32, i32) {
    %c0_i32 = arith.constant 0 : i32
    %c0_i32_0 = arith.constant 0 : i32
    %c0_i32_1 = arith.constant 0 : i32
    return %c0_i32, %c0_i32_0 : i32, i32
  }
  func.func @transform_15(%arg0: i32) -> (i32, i32) {
    %c0_i32 = arith.constant 0 : i32
    %c0_i32_0 = arith.constant 0 : i32
    %c0_i32_1 = arith.constant 0 : i32
    return %c0_i32, %c0_i32_0 : i32, i32
  }
  func.func @transform_16(%arg0: i32) -> (i32, i32) {
    %c0_i32 = arith.constant 0 : i32
    %c0_i32_0 = arith.constant 0 : i32
    %c0_i32_1 = arith.constant 0 : i32
    return %c0_i32, %c0_i32_0 : i32, i32
  }
  func.func @transform_17(%arg0: i32) -> (i32, i32) {
    %c0_i32 = arith.constant 0 : i32
    %c0_i32_0 = arith.constant 0 : i32
    %c0_i32_1 = arith.constant 0 : i32
    return %c0_i32, %c0_i32_0 : i32, i32
  }
  func.func @transform_18(%arg0: i32) -> (i32, i32) {
    %c0_i32 = arith.constant 0 : i32
    %c0_i32_0 = arith.constant 0 : i32
    %c0_i32_1 = arith.constant 0 : i32
    return %c0_i32, %c0_i32_0 : i32, i32
  }
  func.func @transform_19(%arg0: i32) -> (i32, i32) {
    %c0_i32 = arith.constant 0 : i32
    %c0_i32_0 = arith.constant 0 : i32
    %c0_i32_1 = arith.constant 0 : i32
    return %c0_i32, %c0_i32_0 : i32, i32
  }
  func.func @transform_20(%arg0: i32) -> (i32, i32) {
    %c0_i32 = arith.constant 0 : i32
    %c0_i32_0 = arith.constant 0 : i32
    %c0_i32_1 = arith.constant 0 : i32
    return %c0_i32, %c0_i32_0 : i32, i32
  }
  func.func @transform_21(%arg0: i32) -> (i32, i32) {
    %c0_i32 = arith.constant 0 : i32
    %c0_i32_0 = arith.constant 0 : i32
    %c0_i32_1 = arith.constant 0 : i32
    return %c0_i32, %c0_i32_0 : i32, i32
  }
  func.func @transform_22(%arg0: i32) -> (i32, i32) {
    %c0_i32 = arith.constant 0 : i32
    %c0_i32_0 = arith.constant 0 : i32
    %c0_i32_1 = arith.constant 0 : i32
    return %c0_i32, %c0_i32_0 : i32, i32
  }
  func.func @transform_23(%arg0: i32) -> (i32, i32) {
    %c0_i32 = arith.constant 0 : i32
    %c0_i32_0 = arith.constant 0 : i32
    %c0_i32_1 = arith.constant 0 : i32
    return %c0_i32, %c0_i32_0 : i32, i32
  }
  func.func @transform_24(%arg0: i32) -> (i32, i32) {
    %c0_i32 = arith.constant 0 : i32
    %c0_i32_0 = arith.constant 0 : i32
    %c0_i32_1 = arith.constant 0 : i32
    return %c0_i32, %c0_i32_0 : i32, i32
  }
  func.func @transform_25(%arg0: i32) -> (i32, i32) {
    %c0_i32 = arith.constant 0 : i32
    %c0_i32_0 = arith.constant 0 : i32
    %c0_i32_1 = arith.constant 0 : i32
    return %c0_i32, %c0_i32_0 : i32, i32
  }
  func.func @transform_26(%arg0: i32) -> (i32, i32) {
    %c0_i32 = arith.constant 0 : i32
    %c0_i32_0 = arith.constant 0 : i32
    %c0_i32_1 = arith.constant 0 : i32
    return %c0_i32, %c0_i32_0 : i32, i32
  }
  func.func @transform_27(%arg0: i32) -> (i32, i32) {
    %c0_i32 = arith.constant 0 : i32
    %c0_i32_0 = arith.constant 0 : i32
    %c0_i32_1 = arith.constant 0 : i32
    return %c0_i32, %c0_i32_0 : i32, i32
  }
  func.func @transform_28(%arg0: i32) -> (i32, i32) {
    %c0_i32 = arith.constant 0 : i32
    %c0_i32_0 = arith.constant 0 : i32
    %c0_i32_1 = arith.constant 0 : i32
    return %c0_i32, %c0_i32_0 : i32, i32
  }
  func.func @transform_29(%arg0: i32) -> (i32, i32) {
    %c0_i32 = arith.constant 0 : i32
    %c0_i32_0 = arith.constant 0 : i32
    %c0_i32_1 = arith.constant 0 : i32
    return %c0_i32, %c0_i32_0 : i32, i32
  }
  func.func @transform_30(%arg0: i32) -> (i32, i32) {
    %c0_i32 = arith.constant 0 : i32
    %c0_i32_0 = arith.constant 0 : i32
    return %arg0, %c0_i32 : i32, i32
  }
}

</mosaic_0001>

<bundles_post_ra>
// kernel: tpu_custom_call.1
= control target key start
LH: loop header
LB: loop body
LE: loop exit
PB: predicated region body
PF: predicated region fallthrough
CT: control target
= control target key end

     0   :  { %s9345_s6 = smov 1   ;;  %s9346_s10 = smov 2   ;;  %s10851_s0 = inlined_call_operand.smem [shape: u32[31], index: -1, kind: input, shape index: {}] }
   0x1   :  { %s9431_s5 = sld [smem:[%s10851_s0]]   ;;  %s9347_s14 = smov 3  }
   0x2   :  { %s9436_s9 = sld [smem:[%s10851_s0 + %s9345_s6]]   ;;  %s9348_s18 = smov 4  }
   0x3   :  { %s9441_s13 = sld [smem:[%s10851_s0 + %s9346_s10]]   ;;  %s9349_s22 = smov 5  }
   0x4   :  { %s9446_s17 = sld [smem:[%s10851_s0 + %s9347_s14]]   ;;  %s9350_s26 = smov 6  }
   0x5   :  { %s9451_s21 = sld [smem:[%s10851_s0 + %s9348_s18]]   ;;  %s9351_s30 = smov 7  }
   0x6   :  { %s9456_s25 = sld [smem:[%s10851_s0 + %s9349_s22]]   ;;  %s9352_s4 = smov 8  }
   0x7   :  { %s9461_s29 = sld [smem:[%s10851_s0 + %s9350_s26]]   ;;  %s9353_s10 = smov 9  }
   0x8   :  { %s9466_s3 = sld [smem:[%s10851_s0 + %s9351_s30]]   ;;  %s9354_s15 = smov 10  }
   0x9   :  { %s9471_s8 = sld [smem:[%s10851_s0 + %s9352_s4]]   ;;  %s9355_s20 = smov 11  }
   0xa   :  { %s9476_s14 = sld [smem:[%s10851_s0 + %s9353_s10]]   ;;  %s9356_s26 = smov 12  }
   0xb   :  { %s9481_s19 = sld [smem:[%s10851_s0 + %s9354_s15]]   ;;  %s9357_s1 = smov 13  }
   0xc   :  { %10859 = sst [smem:[#allocation33_spill]] %s9456_s25  ;;  %s9358_s7 = smov 14  }
   0xd   :  { %10860 = sst [smem:[#allocation34_spill]] %s9461_s29  ;;  %s9359_s15 = smov 15  }
   0xe   :  { %s9486_s24 = sld [smem:[%s10851_s0 + %s9355_s20]]   ;;  %s9360_s22 = smov 16  }
   0xf   :  { %s9491_s30 = sld [smem:[%s10851_s0 + %s9356_s26]]   ;;  %s9361_s28 = smov 17  }
  0x10   :  { %10861 = sst [smem:[#allocation35_spill]] %s9476_s14 }
  0x11   :  { %s9496_s6 = sld [smem:[%s10851_s0 + %s9357_s1]]  }
  0x12   :  { %s9501_s12 = sld [smem:[%s10851_s0 + %s9358_s7]]   ;;  %s9362_s7 = smov 18  }
  0x13   :  { %s9506_s20 = sld [smem:[%s10851_s0 + %s9359_s15]]   ;;  %s9363_s15 = smov 19  }
  0x14   :  { %s9511_s27 = sld [smem:[%s10851_s0 + %s9360_s22]]   ;;  %s9364_s22 = smov 20  }
  0x15   :  { %s9516_s4 = sld [smem:[%s10851_s0 + %s9361_s28]]   ;;  %s9365_s28 = smov 21  }
  0x16   :  { %s9521_s14 = sld [smem:[%s10851_s0 + %s9362_s7]]   ;;  %s9366_s7 = smov 22  }
  0x17   :  { %10862 = sst [smem:[#allocation36_spill]] %s9496_s6 }
  0x18   :  { %s9526_s6 = sld [smem:[%s10851_s0 + %s9363_s15]]   ;;  %s9367_s15 = smov 23  }
  0x19   :  { %s9531_s29 = sld [smem:[%s10851_s0 + %s9364_s22]]   ;;  %s9368_s22 = smov 24  }
  0x1a   :  { %s9541_s25 = sld [smem:[%s10851_s0 + %s9366_s7]]   ;;  %s9370_s7 = smov 26  }
  0x1b   :  { %10863 = sst [smem:[#allocation37_spill]] %s9516_s4 }
  0x1c   :  { %s9536_s4 = sld [smem:[%s10851_s0 + %s9365_s28]]   ;;  %s9369_s28 = smov 25  }
  0x1e   :  { %10864 = sst [smem:[#allocation38_spill]] %s9526_s6 }
  0x1f   :  { %10865 = sst [smem:[#allocation39_spill]] %s9531_s29 }
  0x20   :  { %10867 = sst [smem:[#allocation41_spill]] %s9541_s25 }
  0x21   :  { %s9546_s6 = sld [smem:[%s10851_s0 + %s9367_s15]]   ;;  %s9371_s15 = smov 27  }
  0x22   :  { %10866 = sst [smem:[#allocation40_spill]] %s9536_s4 }
  0x23   :  { %s9551_s29 = sld [smem:[%s10851_s0 + %s9368_s22]]   ;;  %s9372_s22 = smov 28  }
  0x24   :  { %s9556_s4 = sld [smem:[%s10851_s0 + %s9369_s28]]   ;;  %s9373_s28 = smov 29  }
  0x25   :  { %s9561_s25 = sld [smem:[%s10851_s0 + %s9370_s7]]   ;;  %s9374_s7 = smov 30  }
  0x27   :  { %10868 = sst [smem:[#allocation42_spill]] %s9546_s6 }
  0x28   :  { %s9566_s6 = sld [smem:[%s10851_s0 + %s9371_s15]]  }
  0x29   :  { %10869 = sst [smem:[#allocation43_spill]] %s9551_s29 }
  0x2a   :  { %10870 = sst [smem:[#allocation44_spill]] %s9556_s4 }
  0x2b   :  { %10871 = sst [smem:[#allocation45_spill]] %s9561_s25 }
  0x2c   :  { %s9571_s29 = sld [smem:[%s10851_s0 + %s9372_s22]]  }
  0x2d   :  { %s9576_s4 = sld [smem:[%s10851_s0 + %s9373_s28]]  }
  0x2e   :  { %s9581_s25 = sld [smem:[%s10851_s0 + %s9374_s7]]  }
  0x2f   :  { %66 = vsyncpa [#allocation11], 0 }
  0x30   :  { %67 = vsyncpa [#allocation13], 0 }
  0x31   :  { %68 = vsyncpa [#allocation16], 0 }
  0x32   :  { %69 = vsyncpa [#allocation19], 0 }
  0x33   :  { %70 = vsyncpa [#allocation22], 0 }
  0x34   :  { %71 = vsyncpa [#allocation25], 0  ;;  %s9375_s15 = smov [#allocation12]   ;;  %s9376_s18 = smov [#allocation15]  }
  0x35   :  { %s96_s16 = sshll.u32 %s9375_s15, 4  ;;  %s122_s22 = sshll.u32 %s9376_s18, 4  ;;  %s97_s16 = int_to_ptr.vmem [resolvable:$true] %s96_s16  ;;  %s123_s22 = int_to_ptr.vmem [resolvable:$true] %s122_s22 }
  0x36   :  { %s9091_s23 = scalar_lea.hbm %s9451_s21, 16 }
  0x37   :  { %p9092_p0 = scmp.ne.s32.totalorder %s9451_s21, %s9091_s23  ;;  %p9095_p1 = scmp.lt.u32.totalorder %s9091_s23, %s9451_s21 }
  0x39   :  { %p9097_p2 = pnand %p9095_p1, %p9092_p0 }
  0x3b   :  { %9100 = shalt.err (!%p9097_p2)
}
  0x3c   :  { %s9101_s0 = scalar_lea.vmem %s97_s16, 16  ;;  %s9105_s26 = scalar_lea.vmem %s97_s16, 32 }
  0x3d   :  { %p9102_p3 = scmp.ne.s32.totalorder %s97_s16, %s9101_s0  ;;  %p9106_p4 = scmp.lt.s32.totalorder %s97_s16, %s97_s16 }
  0x3e   :  { %p9107_p5 = scmp.lt.s32.totalorder %s9105_s26, %s9101_s0 }
  0x40   :  { %p9108_p6 = por %p9107_p5, %p9106_p4 }
  0x42   :  { %p9109_p7 = pnand %p9108_p6, %p9102_p3 }
  0x44   :  { %9112 = shalt.err (!%p9109_p7)
}
  0x45   :  { %99 = dma.hbm_to_vmem [thread:$0]  %s9451_s21, 16, %s97_s16, [#allocation13]  }
  0x46   :  { %s9113_s28 = scalar_lea.hbm %s9471_s8, 16 }
  0x47   :  { %p9114_p8 = scmp.ne.s32.totalorder %s9471_s8, %s9113_s28  ;;  %p9117_p9 = scmp.lt.u32.totalorder %s9113_s28, %s9471_s8 }
  0x49   :  { %p9119_p10 = pnand %p9117_p9, %p9114_p8 }
  0x4b   :  { %9122 = shalt.err (!%p9119_p10)
}
  0x4c   :  { %s9123_s1 = scalar_lea.vmem %s123_s22, 16  ;;  %s9127_s2 = scalar_lea.vmem %s123_s22, 32 }
  0x4d   :  { %p9124_p11 = scmp.ne.s32.totalorder %s123_s22, %s9123_s1  ;;  %p9128_p12 = scmp.lt.s32.totalorder %s123_s22, %s123_s22 }
  0x4e   :  { %p9129_p13 = scmp.lt.s32.totalorder %s9127_s2, %s9123_s1 }
  0x50   :  { %p9130_p0 = por %p9129_p13, %p9128_p12 }
  0x52   :  { %p9131_p1 = pnand %p9130_p0, %p9124_p11 }
  0x54   :  { %9134 = shalt.err (!%p9131_p1)
}
  0x55   :  { %125 = dma.hbm_to_vmem [thread:$0]  %s9471_s8, 16, %s123_s22, [#allocation16]  }
  0x56   :  { %s9377_s7 = smov [#allocation18]   ;;  %s9378_s10 = smov [#allocation21]  }
  0x57   :  { %s145_s21 = sshll.u32 %s9377_s7, 4  ;;  %s170_s11 = sshll.u32 %s9378_s10, 4  ;;  %s146_s21 = int_to_ptr.vmem [resolvable:$true] %s145_s21  ;;  %s9591_s11 = int_to_ptr.vmem [resolvable:$true] %s170_s11 }
  0x58   :  { %s9135_s15 = scalar_lea.hbm %s9486_s24, 48 }
  0x59   :  { %p9136_p2 = scmp.ne.s32.totalorder %s9486_s24, %s9135_s15  ;;  %p9139_p3 = scmp.lt.u32.totalorder %s9135_s15, %s9486_s24 }
  0x5b   :  { %p9141_p4 = pnand %p9139_p3, %p9136_p2 }
  0x5d   :  { %9144 = shalt.err (!%p9141_p4)
}
  0x5e   :  { %s9145_s16 = scalar_lea.vmem %s146_s21, 48  ;;  %s9149_s18 = scalar_lea.vmem %s146_s21, 64 }
  0x5f   :  { %p9146_p5 = scmp.ne.s32.totalorder %s146_s21, %s9145_s16  ;;  %p9150_p6 = scmp.lt.s32.totalorder %s146_s21, %s146_s21 }
  0x60   :  { %p9151_p7 = scmp.lt.s32.totalorder %s9149_s18, %s9145_s16 }
  0x62   :  { %p9152_p8 = por %p9151_p7, %p9150_p6 }
  0x64   :  { %p9153_p9 = pnand %p9152_p8, %p9146_p5 }
  0x66   :  { %9156 = shalt.err (!%p9153_p9)
}
  0x67   :  { %s9379_s8 = smov 16   ;;  %s9380_s22 = smov 1  }
  0x68   :  { %151 = dma.hbm_to_vmem [thread:$0]  %s9486_s24, 48, %s146_s21, [#allocation19], %s9379_s8, %s9379_s8, %s9380_s22  }
  0x69   :  { %s9157_s23 = scalar_lea.hbm %s9501_s12, 16 }
  0x6a   :  { %p9158_p10 = scmp.ne.s32.totalorder %s9501_s12, %s9157_s23  ;;  %p9161_p11 = scmp.lt.u32.totalorder %s9157_s23, %s9501_s12 }
  0x6c   :  { %p9163_p12 = pnand %p9161_p11, %p9158_p10 }
  0x6e   :  { %9166 = shalt.err (!%p9163_p12)
}
  0x6f   :  { %s9167_s0 = scalar_lea.vmem %s9591_s11, 16  ;;  %s9171_s26 = scalar_lea.vmem %s9591_s11, 32 }
  0x70   :  { %p9168_p13 = scmp.ne.s32.totalorder %s9591_s11, %s9167_s0  ;;  %p9172_p0 = scmp.lt.s32.totalorder %s9591_s11, %s9591_s11 }
  0x71   :  { %p9173_p1 = scmp.lt.s32.totalorder %s9171_s26, %s9167_s0 }
  0x73   :  { %p9174_p2 = por %p9173_p1, %p9172_p0 }
  0x75   :  { %p9175_p3 = pnand %p9174_p2, %p9168_p13 }
  0x77   :  { %9178 = shalt.err (!%p9175_p3)
}
  0x78   :  { %173 = dma.hbm_to_vmem [thread:$0]  %s9501_s12, 16, %s9591_s11, [#allocation22]  }
  0x79   :  { %s9381_s24 = smov [#allocation24]   ;;  %s9382_s1 = smov [#allocation10]  }
  0x7a   :  { %s192_s28 = sshll.u32 %s9381_s24, 4  ;;  %s83_s2 = sshll.u32 %s9382_s1, 4  ;;  %s193_s28 = int_to_ptr.vmem [resolvable:$true] %s192_s28  ;;  %s9610_s2 = int_to_ptr.vmem [resolvable:$true] %s83_s2 }
  0x7b   :  { %s9179_s7 = scalar_lea.hbm %s9511_s27, 16 }
  0x7c   :  { %p9180_p4 = scmp.ne.s32.totalorder %s9511_s27, %s9179_s7  ;;  %p9183_p5 = scmp.lt.u32.totalorder %s9179_s7, %s9511_s27 }
  0x7e   :  { %p9185_p6 = pnand %p9183_p5, %p9180_p4 }
  0x80   :  { %9188 = shalt.err (!%p9185_p6)
}
  0x81   :  { %s9189_s21 = scalar_lea.vmem %s193_s28, 16  ;;  %s9193_s10 = scalar_lea.vmem %s193_s28, 32 }
  0x82   :  { %p9190_p7 = scmp.ne.s32.totalorder %s193_s28, %s9189_s21  ;;  %p9194_p8 = scmp.lt.s32.totalorder %s193_s28, %s193_s28 }
  0x83   :  { %p9195_p9 = scmp.lt.s32.totalorder %s9193_s10, %s9189_s21 }
  0x85   :  { %p9196_p10 = por %p9195_p9, %p9194_p8 }
  0x87   :  { %p9197_p11 = pnand %p9196_p10, %p9190_p7 }
  0x89   :  { %9200 = shalt.err (!%p9197_p11)
}
  0x8a   :  { %195 = dma.hbm_to_vmem [thread:$0]  %s9511_s27, 16, %s193_s28, [#allocation25]  }
  0x8b   :  { %s9201_s12 = scalar_lea.hbm %s9446_s17, 48 }
  0x8c   :  { %p9202_p12 = scmp.ne.s32.totalorder %s9446_s17, %s9201_s12  ;;  %p9205_p13 = scmp.lt.u32.totalorder %s9201_s12, %s9446_s17 }
  0x8e   :  { %p9207_p0 = pnand %p9205_p13, %p9202_p12 }
  0x90   :  { %9210 = shalt.err (!%p9207_p0)
}
  0x91   :  { %s9211_s11 = scalar_lea.vmem %s9610_s2, 48  ;;  %s9215_s15 = scalar_lea.vmem %s9610_s2, 64 }
  0x92   :  { %p9212_p1 = scmp.ne.s32.totalorder %s9610_s2, %s9211_s11  ;;  %p9216_p2 = scmp.lt.s32.totalorder %s9610_s2, %s9610_s2 }
  0x93   :  { %p9217_p3 = scmp.lt.s32.totalorder %s9215_s15, %s9211_s11 }
  0x95   :  { %p9218_p4 = por %p9217_p3, %p9216_p2 }
  0x97   :  { %p9219_p5 = pnand %p9218_p4, %p9212_p1 }
  0x99   :  { %9222 = shalt.err (!%p9219_p5)
}
  0x9a   :  { %89 = dma.hbm_to_vmem [thread:$0]  %s9446_s17, 48, %s9610_s2, [#allocation11], %s9379_s8, %s9379_s8, %s9380_s22  }
  0x9b   :  { %s9383_s27 = smov [#allocation14]   ;;  %s9384_s18 = smov [#allocation17]  }
  0x9c   :  { %s109_s16 = sshll.u32 %s9383_s27, 4  ;;  %s133_s23 = sshll.u32 %s9384_s18, 4  ;;  %s110_s16 = int_to_ptr.vmem [resolvable:$true] %s109_s16  ;;  %s9629_s23 = int_to_ptr.vmem [resolvable:$true] %s133_s23 }
  0x9d   :  { %s9223_s0 = scalar_lea.hbm %s9466_s3, 48 }
  0x9e   :  { %p9224_p6 = scmp.ne.s32.totalorder %s9466_s3, %s9223_s0  ;;  %p9227_p7 = scmp.lt.u32.totalorder %s9223_s0, %s9466_s3 }
  0xa0   :  { %p9229_p8 = pnand %p9227_p7, %p9224_p6 }
  0xa2   :  { %9232 = shalt.err (!%p9229_p8)
}
  0xa3   :  { %s9233_s26 = scalar_lea.vmem %s110_s16, 48  ;;  %s9237_s24 = scalar_lea.vmem %s110_s16, 64 }
  0xa4   :  { %p9234_p9 = scmp.ne.s32.totalorder %s110_s16, %s9233_s26  ;;  %p9238_p10 = scmp.lt.s32.totalorder %s110_s16, %s110_s16 }
  0xa5   :  { %p9239_p11 = scmp.lt.s32.totalorder %s9237_s24, %s9233_s26 }
  0xa7   :  { %p9240_p12 = por %p9239_p11, %p9238_p10 }
  0xa9   :  { %p9241_p13 = pnand %p9240_p12, %p9234_p9 }
  0xab   :  { %9244 = shalt.err (!%p9241_p13)
}
  0xac   :  { %115 = dma.hbm_to_vmem [thread:$0]  %s9466_s3, 48, %s110_s16, [#allocation13], %s9379_s8, %s9379_s8, %s9380_s22  }
  0xad   :  { %s9245_s17 = scalar_lea.hbm %s9481_s19, 384 }
  0xae   :  { %p9246_p0 = scmp.ne.s32.totalorder %s9481_s19, %s9245_s17  ;;  %p9249_p1 = scmp.lt.u32.totalorder %s9245_s17, %s9481_s19 }
  0xb0   :  { %p9251_p2 = pnand %p9249_p1, %p9246_p0 }
  0xb2   :  { %9254 = shalt.err (!%p9251_p2)
}
  0xb3   :  { %s9255_s28 = scalar_lea.vmem %s9629_s23, 384  ;;  %p9260_p4 = scmp.lt.s32.totalorder %s9629_s23, %s9629_s23 }
  0xb4   :  { %p9256_p3 = scmp.ne.s32.totalorder %s9629_s23, %s9255_s28  ;;  %p9261_p5 = scmp.lt.s32.totalorder %s9255_s28, %s9255_s28 }
  0xb6   :  { %p9262_p6 = por %p9261_p5, %p9260_p4 }
  0xb8   :  { %p9263_p7 = pnand %p9262_p6, %p9256_p3 }
  0xba   :  { %9266 = shalt.err (!%p9263_p7)
}
  0xbb   :  { %s9385_s1 = smov 64   ;;  %s9386_s3 = smov 4  }
  0xbc   :  { %139 = dma.hbm_to_vmem [thread:$0]  %s9481_s19, 384, %s9629_s23, [#allocation16], %s9385_s1, %s9385_s1, %s9386_s3  }
  0xbd   :  { %s9387_s2 = smov [#allocation20]   ;;  %s9388_s21 = smov [#allocation23]  }
  0xbe   :  { %s158_s7 = sshll.u32 %s9387_s2, 4  ;;  %s179_s10 = sshll.u32 %s9388_s21, 4  ;;  %s159_s7 = int_to_ptr.vmem [resolvable:$true] %s158_s7  ;;  %s9650_s10 = int_to_ptr.vmem [resolvable:$true] %s179_s10 }
  0xbf   :  { %s9267_s12 = scalar_lea.hbm %s9491_s30, 16 }
  0xc0   :  { %p9268_p8 = scmp.ne.s32.totalorder %s9491_s30, %s9267_s12  ;;  %p9271_p9 = scmp.lt.u32.totalorder %s9267_s12, %s9491_s30 }
  0xc2   :  { %p9273_p10 = pnand %p9271_p9, %p9268_p8 }
  0xc4   :  { %9276 = shalt.err (!%p9273_p10)
}
  0xc5   :  { %s9277_s11 = scalar_lea.vmem %s159_s7, 16  ;;  %s9281_s15 = scalar_lea.vmem %s159_s7, 32 }
  0xc6   :  { %p9278_p11 = scmp.ne.s32.totalorder %s159_s7, %s9277_s11  ;;  %p9282_p12 = scmp.lt.s32.totalorder %s159_s7, %s159_s7 }
  0xc7   :  { %p9283_p13 = scmp.lt.s32.totalorder %s9281_s15, %s9277_s11 }
  0xc9   :  { %p9284_p0 = por %p9283_p13, %p9282_p12 }
  0xcb   :  { %p9285_p1 = pnand %p9284_p0, %p9278_p11 }
  0xcd   :  { %9288 = shalt.err (!%p9285_p1)
}
  0xce   :  { %161 = dma.hbm_to_vmem [thread:$0]  %s9491_s30, 16, %s159_s7, [#allocation19]  }
  0xcf   :  { %s9289_s19 = scalar_lea.hbm %s9506_s20, 256 }
  0xd0   :  { %p9290_p2 = scmp.ne.s32.totalorder %s9506_s20, %s9289_s19  ;;  %p9293_p3 = scmp.lt.u32.totalorder %s9289_s19, %s9506_s20 }
  0xd2   :  { %p9295_p4 = pnand %p9293_p3, %p9290_p2 }
  0xd4   :  { %9298 = shalt.err (!%p9295_p4)
}
  0xd5   :  { %s9299_s27 = scalar_lea.vmem %s9650_s10, 256  ;;  %p9304_p6 = scmp.lt.s32.totalorder %s9650_s10, %s9650_s10 }
  0xd6   :  { %p9300_p5 = scmp.ne.s32.totalorder %s9650_s10, %s9299_s27  ;;  %p9305_p7 = scmp.lt.s32.totalorder %s9299_s27, %s9299_s27 }
  0xd8   :  { %p9306_p8 = por %p9305_p7, %p9304_p6 }
  0xda   :  { %p9307_p9 = pnand %p9306_p8, %p9300_p5 }
  0xdc   :  { %9310 = shalt.err (!%p9307_p9)
}
  0xdd   :  { %185 = dma.hbm_to_vmem [thread:$0]  %s9506_s20, 256, %s9650_s10, [#allocation22], %s9385_s1, %s9385_s1, %s9386_s3  }
  0xde   :  { %s9389_s30 = smov [#allocation26]   ;;  %s9311_s18 = scalar_lea.hbm %s9521_s14, 256 }
  0xdf   :  { %s203_s16 = sshll.u32 %s9389_s30, 4  ;;  %p9312_p10 = scmp.ne.s32.totalorder %s9521_s14, %s9311_s18  ;;  %s204_s16 = int_to_ptr.vmem [resolvable:$true] %s203_s16 }
  0xe0   :  { %p9315_p11 = scmp.lt.u32.totalorder %s9311_s18, %s9521_s14 }
  0xe2   :  { %p9317_p12 = pnand %p9315_p11, %p9312_p10 }
  0xe4   :  { %9320 = shalt.err (!%p9317_p12)
}
  0xe5   :  { %s9321_s23 = scalar_lea.vmem %s204_s16, 256  ;;  %p9326_p0 = scmp.lt.s32.totalorder %s204_s16, %s204_s16 }
  0xe6   :  { %p9322_p13 = scmp.ne.s32.totalorder %s204_s16, %s9321_s23  ;;  %p9327_p1 = scmp.lt.s32.totalorder %s9321_s23, %s9321_s23 }
  0xe8   :  { %p9328_p2 = por %p9327_p1, %p9326_p0 }
  0xea   :  { %p9329_p3 = pnand %p9328_p2, %p9322_p13 }
  0xec   :  { %9332 = shalt.err (!%p9329_p3)
}
  0xed   :  { %s9390_s0 = smov 128   ;;  %s9391_s26 = smov 8  }
  0xee   :  { %209 = dma.hbm_to_vmem [thread:$0]  %s9521_s14, 256, %s204_s16, [#allocation25], %s9390_s0, %s9390_s0, %s9391_s26  }
  0xef   :  { %9333 = dma.done.wait [#allocation11], 48  }
  0xf0   :  { %9334 = vsyncadd [#allocation11], 4294967248 }
  0xf1   :  { %9335 = dma.done.wait [#allocation13], 64  }
  0xf2   :  { %9336 = vsyncadd [#allocation13], 4294967232 }
  0xf3   :  { %9337 = dma.done.wait [#allocation16], 400  }
  0xf4   :  { %9338 = vsyncadd [#allocation16], 4294966896 }
  0xf5   :  { %9339 = dma.done.wait [#allocation19], 64  }
  0xf6   :  { %9340 = vsyncadd [#allocation19], 4294967232 }
  0xf7   :  { %9341 = dma.done.wait [#allocation22], 272  }
  0xf8   :  { %9342 = vsyncadd [#allocation22], 4294967024 }
  0xf9   :  { %9343 = dma.done.wait [#allocation25], 272  }
  0xfa   :  { %9344 = vsyncadd [#allocation25], 4294967024  ;;  %v9392_v0 = vmov 0.0   ;;  %vm9393_vm0 = vmmov 0   ;;  %vm287_vm1 = vcmask 1044480   ;;  %v266_v4 = vld [vmem:[%s9431_s5] sm:$0xff] }
  0xfb   :  { %7796 = vmatprep.subr.bf16.mxu0 %v9392_v0  ;;  %7802 = vmatprep.subr.bf16.mxu1 %v9392_v0  ;;  %v8708_v1 = vld [vmem:[%s9436_s9] sm:$0x1f]   ;;  %v8709_v2 = vld [vmem:[%s9436_s9 + $0x8] sm:$0x1f]   ;;  %vm283_vm2 = vcmask 80896   ;;  %v9704_v12 = vld [vmem:[%s9441_s13 + $0x10] sm:$0xff]  }
  0xfc   :  { %7798 = vmatprep.mubr.msk.bf16.mxu0 %vm9393_vm0, %v9392_v0  ;;  %7804 = vmatprep.mubr.msk.bf16.mxu1 %vm9393_vm0, %v9392_v0  ;;  %v289_v3 = vsel %vm287_vm1, %v8708_v1, 0  ;;  %v267_v5 = vld [vmem:[%s9431_s5 + $0x8] sm:$0xff]  ;;  %v352_v6 = vsel %vm287_vm1, %v8709_v2, 0  ;;  %v9686_v8 = vld [vmem:[%s9441_s13] sm:$0xff]   ;;  %v8711_v9 = vld [vmem:[%s9436_s9 + $0x10] sm:$0x1f]  }
  0xfd   :  { %7797 = vmatpush3.bf16.msra.mxu0 %v289_v3  ;;  %v268_v7 = vpack.c.bf16 %v267_v5, %v266_v4  ;;  %7803 = vmatpush3.bf16.msra.mxu1 %v352_v6  ;;  %v414_v10 = vsel %vm287_vm1, %v8711_v9, 0  ;;  %v9696_v11 = vld [vmem:[%s9441_s13 + $0x8] sm:$0xff]   ;;  %v9708_v13 = vld [vmem:[%s9441_s13 + $0x20] sm:$0xff]   ;;  %v9712_v14 = vld [vmem:[%s9441_s13 + $0x18] sm:$0xff]   ;;  %v9394_v15 = vmov 0   ;;  %vm332_vm3 = vcmask 261120  }
  0xfe   :  { %7808 = vmatprep.subr.bf16.mxu0 %v9392_v0  ;;  %7814 = vmatprep.subr.bf16.mxu1 %v9392_v0  ;;  %v9719_v16 = vld [vmem:[%s9441_s13 + $0x28] sm:$0xff]   ;;  %v7195_v17 = vld [vmem:[#allocation10] ss:$0 sm:$0xff]  ;;  %v7200_v18 = vld [vmem:[#allocation10 + $0x1] ss:$0 sm:$0xff]  ;;  %vm663_vm4 = vcmask 254976  }
  0xff   :  { %v7205_v31 = vld [vmem:[#allocation10 + $0x2] ss:$0 sm:$0xff]  ;;  %v9752_v59 = vld [vmem:[#allocation12] ss:$0 sm:$0xff]  ;;  %s10872_s5 = sld [smem:[#allocation33_spill]]  ;;  %s10873_s9 = sld [smem:[#allocation34_spill]] }
 0x100   :  { %7799 = vmatmul.mubr.msk.bf16.vlgmr.msra.gmra.mrb[0].mxu0 %vm283_vm2, %v268_v7  ;;  %7805 = vmatmul.mubr.msk.bf16.vlgmr.msra.gmra.mrb[0].mxu1 %vm283_vm2, %v268_v7  ;;  %vm3231_vm5 = vcmask 785408   ;;  %s9395_s14 = smov 124   ;;  %s9396_s20 = smov 96   ;;  %vm3239_vm6 = vcmask 31744   ;;  %vm3304_vm7 = vcmask 1043456   ;;  %vm3286_vm8 = vcmask 64512  }
 0x101   :  { %7809 = vmatpush3.bf16.msra.mxu0 %v414_v10  ;;  %7815 = vmatpush3.bf16.msra.mxu1 %v9686_v8  ;;  %s9397_s24 = smov 88   ;;  %s9398_s17 = smov 92   ;;  %vm4148_vm9 = vcmask 97280   ;;  %vm4150_vm10 = vcmask 130048   ;;  %vm4152_vm11 = vcmask 162816   ;;  %vm4154_vm12 = vcmask 195584  }
 0x102   :  { %7810 = vmatprep.mubr.msk.bf16.mxu0 %vm9393_vm0, %v9392_v0  ;;  %7816 = vmatprep.subr.bf16.mxu1 %v9392_v0  ;;  %s9399_s28 = smov 84   ;;  %s9400_s2 = smov 120   ;;  %vm4156_vm13 = vcmask 228352   ;;  %vm7087_vm14 = vcmask 523264   ;;  %vm7153_vm15 = vcmask 1024  }
 0x103   :  { %7818 = vmatprep.mubr.msk.bf16.mxu1 %vm9393_vm0, %v9392_v0  ;;  %7822 = vmatprep.subr.bf16.mxu0 %v9392_v0  ;;  %s9401_s7 = smov 80   ;;  %s9402_s21 = smov 116  }
 0x104   :  { %s9403_s10 = smov 76   ;;  %s9404_s12 = smov 112  }
 0x105   :  { %7817 = vmatpush3.bf16.msra.mxu1 %v9696_v11  ;;  %s9405_s11 = smov 72   ;;  %s9406_s15 = smov 108  }
 0x106   :  { %7830 = vmatprep.subr.bf16.mxu1 %v9392_v0  ;;  %s9407_s19 = smov 68   ;;  %s9408_s27 = smov 104  }
 0x107   :  { %s9409_s30 = smov 100   ;;  %s9410_s16 = smov 60  }
 0x108   :  { %7811 = vmatmul.mubr.msk.bf16.vlgmr.msra.gmra.mrb[4].mxu0 %vm283_vm2, %v268_v7  ;;  %7819 = vmatmul.mubr.bf16.vlgmr.msra.gmra.mrb[4].mxu1 %v9394_v15  ;;  %s9411_s18 = smov 56   ;;  %s9412_s23 = smov 52  }
 0x109   :  { %7823 = vmatpush3.bf16.msra.mxu0 %v9704_v12  ;;  %7826 = vmatprep.mubr.msk.bf16.mxu0 %vm9393_vm0, %v9392_v0  ;;  %s9413_s0 = smov 48  }
 0x10a   :  { %7824 = vmatprep.subr.bf16.mxu0 %v9392_v0  ;;  %7831 = vmatpush3.bf16.msra.mxu1 %v9708_v13 }
 0x10b   :  { %7834 = vmatprep.mubr.msk.bf16.mxu1 %vm9393_vm0, %v9392_v0  ;;  %7832 = vmatprep.subr.bf16.mxu1 %v9392_v0 }
 0x10d   :  { %7825 = vmatpush3.bf16.msra.mxu0 %v9712_v14 }
 0x10e   :  { %7838 = vmatprep.subr.bf16.mxu0 %v9392_v0  ;;  %7833 = vmatpush3.bf16.msra.mxu1 %v9719_v16 }
 0x10f   :  { %7846 = vmatprep.subr.bf16.mxu1 %v9392_v0 }
 0x110   :  { %7827 = vmatmul.mubr.bf16.vlgmr.msra.gmra.mrb[8].mxu0 %v9394_v15 }
 0x111   :  { %7839 = vmatpush3.bf16.msra.mxu0 %v9686_v8  ;;  %7842 = vmatprep.mubr.msk.bf16.mxu0 %vm9393_vm0, %v9392_v0 }
 0x112   :  { %7835 = vmatmul.mubr.bf16.vlgmr.msra.gmra.mrb[8].mxu1 %v9394_v15  ;;  %7840 = vmatprep.subr.bf16.mxu0 %v9392_v0 }
 0x113   :  { %7847 = vmatpush3.bf16.msra.mxu1 %v9704_v12  ;;  %7850 = vmatprep.mubr.msk.bf16.mxu1 %vm9393_vm0, %v9392_v0 }
 0x114   :  { %7848 = vmatprep.subr.bf16.mxu1 %v9392_v0 }
 0x115   :  { %7841 = vmatpush3.bf16.msra.mxu0 %v9696_v11 }
 0x116   :  { %7854 = vmatprep.subr.bf16.mxu0 %v9392_v0 }
 0x117   :  { %7849 = vmatpush3.bf16.msra.mxu1 %v9712_v14 }
 0x118   :  { %7862 = vmatprep.subr.bf16.mxu1 %v9392_v0 }
 0x1d3   :  { %v325_v19 = vpop.f32.mrb[0].mxu0  ;;  %v388_v21 = vpop.f32.mrb[0].mxu1 }
 0x1d4   :  { %v326_v20 = vadd.f32 %v7195_v17, %v325_v19  ;;  %v7800_v22 = vpop.f32.mrb[1].mxu0  ;;  %v389_v23 = vadd.f32 %v7200_v18, %v388_v21  ;;  %v7806_v24 = vpop.f32.mrb[1].mxu1 }
 0x1d5   :  { %v328_v25 = vpop.f32.mrb[2].mxu0  ;;  %v391_v27 = vpop.f32.mrb[2].mxu1 }
 0x1d6   :  { %333 = vst.msk [vmem:[#allocation2] sm:$0xff] %vm332_vm3, %v326_v20  ;;  %v329_v26 = vadd.f32 %v7195_v17, %v328_v25  ;;  %v7801_v28 = vpop.f32.mrb[3].mxu0  ;;  %395 = vst.msk [vmem:[#allocation3] sm:$0xff] %vm332_vm3, %v389_v23  ;;  %v392_v29 = vadd.f32 %v7200_v18, %v391_v27  ;;  %v7807_v30 = vpop.f32.mrb[3].mxu1 }
 0x1d8   :  { %334 = vst.msk [vmem:[#allocation2 + $0x8] sm:$0xff] %vm332_vm3, %v329_v26  ;;  %396 = vst.msk [vmem:[#allocation3 + $0x8] sm:$0xff] %vm332_vm3, %v392_v29 }
 0x1db   :  { %v450_v32 = vpop.f32.mrb[4].mxu0  ;;  %v526_v33 = vpop.f32.mrb[4].mxu1 }
 0x1dc   :  { %v451_v34 = vadd.f32 %v7205_v31, %v450_v32  ;;  %v7812_v35 = vpop.f32.mrb[5].mxu0  ;;  %v7820_v37 = vpop.f32.mrb[5].mxu1 }
 0x1dd   :  { %v474_v36 = vld [vmem:[#allocation2] sm:$0x3]  ;;  %v453_v38 = vpop.f32.mrb[6].mxu0  ;;  %v529_v40 = vpop.f32.mrb[6].mxu1  ;;  %v475_v45 = vld [vmem:[#allocation3] sm:$0x3] }
 0x1de   :  { %v532_v39 = vadd.f32 %v526_v33, %v474_v36  ;;  %457 = vst.msk [vmem:[#allocation4] sm:$0xff] %vm332_vm3, %v451_v34  ;;  %v454_v41 = vadd.f32 %v7205_v31, %v453_v38  ;;  %v7813_v42 = vpop.f32.mrb[7].mxu0  ;;  %v7821_v43 = vpop.f32.mrb[7].mxu1  ;;  %v665_v17 = vld [vmem:[#allocation2 + $0x2] sm:$0x3] }
 0x1df   :  { %v666_v26 = vld [vmem:[#allocation3 + $0x2] sm:$0x3] }
 0x1e0   :  { %v7218_v44 = vmul.f32 -1.442695, %v532_v39  ;;  %458 = vst.msk [vmem:[#allocation4 + $0x8] sm:$0xff] %vm332_vm3, %v454_v41 }
 0x1e2   :  { %8776 = vpow2.f32 %v7218_v44 }
 0x1e3   :  { %v585_v46 = vpop.f32.mrb[8].mxu0 }
 0x1e4   :  { %v591_v47 = vadd.f32 %v585_v46, %v475_v45  ;;  %v7828_v48 = vpop.f32.mrb[9].mxu0 }
 0x1e5   :  { %v588_v49 = vpop.f32.mrb[10].mxu0  ;;  %v650_v50 = vpop.f32.mrb[8].mxu1  ;;  %v476_v1 = vld [vmem:[#allocation4] sm:$0x3]  ;;  %v667_v42 = vld [vmem:[#allocation4 + $0x2] sm:$0x3] }
 0x1e6   :  { %v7221_v51 = vmul.f32 -1.442695, %v591_v47  ;;  %v7829_v52 = vpop.f32.mrb[11].mxu0  ;;  %v7836_v53 = vpop.f32.mrb[9].mxu1  ;;  %v651_v61 = vadd.f32 %v9752_v59, %v650_v50 }
 0x1e7   :  { %v653_v54 = vpop.f32.mrb[10].mxu1 }
 0x1e8   :  { %v7837_v55 = vpop.f32.mrb[11].mxu1  ;;  %8778 = vpow2.f32 %v7221_v51  ;;  %v814_v51 = vld [vmem:[#allocation2 + $0x4] sm:$0x3] }
 0x1ec   :  { %v8777_v56 = vpop.eup %8776 }
 0x1ed   :  { %v536_v57 = vadd.f32 1.0, %v8777_v56 }
 0x1ef   :  { %8780 = vrcp.f32 %v536_v57 }
 0x1f2   :  { %v8779_v58 = vpop.eup %8778 }
 0x1f3   :  { %v595_v60 = vadd.f32 1.0, %v8779_v58 }
 0x1f5   :  { %8782 = vrcp.f32 %v595_v60 }
 0x1f9   :  { %v8781_v62 = vpop.eup %8780 }
 0x1fa   :  { %v656_v63 = vmul.f32 %v8781_v62, %v651_v61  ;;  %v815_v61 = vld [vmem:[#allocation3 + $0x4] sm:$0x3] }
 0x1fc   :  { %v657_v2 = vadd.f32 %v656_v63, %v476_v1 }
 0x1fe   :  { %8784 = vtanh.f32 %v657_v2 }
 0x1ff   :  { %v8783_v3 = vpop.eup %8782 }
 0x200   :  { %v659_v4 = vsub.f32 1.0, %v8783_v3  ;;  %v661_v6 = vmul.f32 0.0, %v8783_v3 }
 0x208   :  { %v8785_v5 = vpop.eup %8784 }
 0x209   :  { %v660_v7 = vmul.f32 %v8785_v5, %v659_v4 }
 0x20b   :  { %v662_v9 = vadd.f32 %v661_v6, %v660_v7 }
 0x20d   :  { %664 = vst.msk [vmem:[#allocation8] sm:$0x3] %vm663_vm4, %v662_v9  ;;  %v668_v10 = vpack.c.bf16 %v662_v9, %v662_v9 }
 0x20f   :  { %7843 = vmatmul.mubr.msk.bf16.vlgmr.msra.gmra.mrb[12].mxu0 %vm332_vm3, %v668_v10  ;;  %7851 = vmatmul.mubr.msk.bf16.vlgmr.msra.gmra.mrb[12].mxu1 %vm332_vm3, %v668_v10 }
 0x210   :  { %7855 = vmatpush3.bf16.msra.mxu0 %v9708_v13  ;;  %7858 = vmatprep.mubr.msk.bf16.mxu0 %vm9393_vm0, %v9392_v0 }
 0x211   :  { %7856 = vmatprep.subr.bf16.mxu0 %v9392_v0  ;;  %7863 = vmatpush3.bf16.msra.mxu1 %v9686_v8 }
 0x212   :  { %7864 = vmatprep.subr.bf16.mxu1 %v9392_v0  ;;  %7866 = vmatprep.mubr.msk.bf16.mxu1 %vm9393_vm0, %v9392_v0 }
 0x214   :  { %7857 = vmatpush3.bf16.msra.mxu0 %v9719_v16 }
 0x215   :  { %7870 = vmatprep.subr.bf16.mxu0 %v9392_v0  ;;  %7865 = vmatpush3.bf16.msra.mxu1 %v9696_v11 }
 0x216   :  { %7878 = vmatprep.subr.bf16.mxu1 %v9392_v0 }
 0x217   :  { %7859 = vmatmul.mubr.msk.bf16.vlgmr.msra.gmra.mrb[16].mxu0 %vm332_vm3, %v668_v10 }
 0x218   :  { %7871 = vmatpush3.bf16.msra.mxu0 %v9704_v12  ;;  %7874 = vmatprep.mubr.msk.bf16.mxu0 %vm9393_vm0, %v9392_v0 }
 0x219   :  { %7872 = vmatprep.subr.bf16.mxu0 %v9392_v0 }
 0x21c   :  { %7873 = vmatpush3.bf16.msra.mxu0 %v9712_v14 }
 0x21d   :  { %7886 = vmatprep.subr.bf16.mxu0 %v9392_v0 }
 0x2e2   :  { %v706_v18 = vpop.f32.mrb[12].mxu0  ;;  %v753_v19 = vpop.f32.mrb[12].mxu1 }
 0x2e3   :  { %v712_v20 = vadd.f32 %v706_v18, %v665_v17  ;;  %v7844_v21 = vpop.f32.mrb[13].mxu0  ;;  %v7852_v22 = vpop.f32.mrb[13].mxu1  ;;  %v759_v29 = vadd.f32 %v753_v19, %v666_v26 }
 0x2e4   :  { %v709_v23 = vpop.f32.mrb[14].mxu0  ;;  %v756_v24 = vpop.f32.mrb[14].mxu1  ;;  %v816_v21 = vld [vmem:[#allocation4 + $0x4] sm:$0x3] }
 0x2e5   :  { %v7226_v25 = vmul.f32 -1.442695, %v712_v20  ;;  %v7845_v27 = vpop.f32.mrb[15].mxu0  ;;  %v7853_v28 = vpop.f32.mrb[15].mxu1  ;;  %v7228_v30 = vmul.f32 -1.442695, %v759_v29 }
 0x2e7   :  { %8786 = vpow2.f32 %v7226_v25 }
 0x2e8   :  { %8788 = vpow2.f32 %v7228_v30  ;;  %v963_v30 = vld [vmem:[#allocation2 + $0x6] sm:$0x3] }
 0x2ea   :  { %v800_v31 = vpop.f32.mrb[16].mxu0 }
 0x2eb   :  { %v7860_v32 = vpop.f32.mrb[17].mxu0  ;;  %v801_v39 = vadd.f32 %v9752_v59, %v800_v31 }
 0x2ec   :  { %v803_v33 = vpop.f32.mrb[18].mxu0 }
 0x2ed   :  { %v7861_v34 = vpop.f32.mrb[19].mxu0 }
 0x2f1   :  { %v8787_v35 = vpop.eup %8786 }
 0x2f2   :  { %v716_v36 = vadd.f32 1.0, %v8787_v35  ;;  %v8789_v37 = vpop.eup %8788 }
 0x2f3   :  { %v763_v38 = vadd.f32 1.0, %v8789_v37 }
 0x2f4   :  { %8790 = vrcp.f32 %v716_v36 }
 0x2f5   :  { %8792 = vrcp.f32 %v763_v38 }
 0x2fe   :  { %v8791_v40 = vpop.eup %8790 }
 0x2ff   :  { %v806_v41 = vmul.f32 %v8791_v40, %v801_v39  ;;  %v8793_v44 = vpop.eup %8792  ;;  %v964_v39 = vld [vmem:[#allocation3 + $0x6] sm:$0x3] }
 0x300   :  { %v809_v45 = vsub.f32 1.0, %v8793_v44  ;;  %v811_v47 = vmul.f32 %v8793_v44, %v662_v9 }
 0x301   :  { %v807_v43 = vadd.f32 %v806_v41, %v667_v42 }
 0x303   :  { %8794 = vtanh.f32 %v807_v43 }
 0x30d   :  { %v8795_v46 = vpop.eup %8794 }
 0x30e   :  { %v810_v48 = vmul.f32 %v8795_v46, %v809_v45 }
 0x310   :  { %v812_v49 = vadd.f32 %v811_v47, %v810_v48 }
 0x312   :  { %813 = vst.msk [vmem:[#allocation8 + $0x2] sm:$0x3] %vm663_vm4, %v812_v49  ;;  %v817_v50 = vpack.c.bf16 %v812_v49, %v812_v49 }
 0x314   :  { %7867 = vmatmul.mubr.msk.bf16.vlgmr.msra.gmra.mrb[16].mxu1 %vm332_vm3, %v817_v50  ;;  %7875 = vmatmul.mubr.msk.bf16.vlgmr.msra.gmra.mrb[20].mxu0 %vm332_vm3, %v817_v50 }
 0x315   :  { %7879 = vmatpush3.bf16.msra.mxu1 %v9708_v13  ;;  %7882 = vmatprep.mubr.msk.bf16.mxu1 %vm9393_vm0, %v9392_v0 }
 0x316   :  { %7880 = vmatprep.subr.bf16.mxu1 %v9392_v0  ;;  %7887 = vmatpush3.bf16.msra.mxu0 %v9686_v8 }
 0x317   :  { %7888 = vmatprep.subr.bf16.mxu0 %v9392_v0  ;;  %7890 = vmatprep.mubr.msk.bf16.mxu0 %vm9393_vm0, %v9392_v0 }
 0x319   :  { %7881 = vmatpush3.bf16.msra.mxu1 %v9719_v16 }
 0x31a   :  { %7894 = vmatprep.subr.bf16.mxu1 %v9392_v0  ;;  %7889 = vmatpush3.bf16.msra.mxu0 %v9696_v11 }
 0x31b   :  { %7902 = vmatprep.subr.bf16.mxu0 %v9392_v0 }
 0x31c   :  { %7883 = vmatmul.mubr.msk.bf16.vlgmr.msra.gmra.mrb[20].mxu1 %vm332_vm3, %v817_v50 }
 0x31d   :  { %7895 = vmatpush3.bf16.msra.mxu1 %v9704_v12  ;;  %7898 = vmatprep.mubr.msk.bf16.mxu1 %vm9393_vm0, %v9392_v0 }
 0x31e   :  { %7896 = vmatprep.subr.bf16.mxu1 %v9392_v0 }
 0x321   :  { %7897 = vmatpush3.bf16.msra.mxu1 %v9712_v14 }
 0x322   :  { %7910 = vmatprep.subr.bf16.mxu1 %v9392_v0 }
 0x3e7   :  { %v855_v52 = vpop.f32.mrb[16].mxu1  ;;  %v902_v53 = vpop.f32.mrb[20].mxu0 }
 0x3e8   :  { %v861_v54 = vadd.f32 %v855_v52, %v814_v51  ;;  %v7868_v55 = vpop.f32.mrb[17].mxu1  ;;  %v7876_v56 = vpop.f32.mrb[21].mxu0  ;;  %v908_v1 = vadd.f32 %v902_v53, %v815_v61 }
 0x3e9   :  { %v858_v57 = vpop.f32.mrb[18].mxu1  ;;  %v905_v58 = vpop.f32.mrb[22].mxu0  ;;  %v965_v55 = vld [vmem:[#allocation4 + $0x6] sm:$0x3] }
 0x3ea   :  { %v7231_v60 = vmul.f32 -1.442695, %v861_v54  ;;  %v7869_v62 = vpop.f32.mrb[19].mxu1  ;;  %v7877_v63 = vpop.f32.mrb[23].mxu0  ;;  %v7233_v2 = vmul.f32 -1.442695, %v908_v1 }
 0x3ec   :  { %8796 = vpow2.f32 %v7231_v60 }
 0x3ed   :  { %8798 = vpow2.f32 %v7233_v2  ;;  %v1112_v2 = vld [vmem:[#allocation2 + $0x8] sm:$0x3] }
 0x3ef   :  { %v949_v3 = vpop.f32.mrb[20].mxu1 }
 0x3f0   :  { %v7884_v4 = vpop.f32.mrb[21].mxu1  ;;  %v950_v18 = vadd.f32 %v9752_v59, %v949_v3 }
 0x3f1   :  { %v952_v5 = vpop.f32.mrb[22].mxu1 }
 0x3f2   :  { %v7885_v6 = vpop.f32.mrb[23].mxu1 }
 0x3f6   :  { %v8797_v7 = vpop.eup %8796 }
 0x3f7   :  { %v865_v9 = vadd.f32 1.0, %v8797_v7  ;;  %v8799_v10 = vpop.eup %8798 }
 0x3f8   :  { %v912_v17 = vadd.f32 1.0, %v8799_v10 }
 0x3f9   :  { %8800 = vrcp.f32 %v865_v9 }
 0x3fa   :  { %8802 = vrcp.f32 %v912_v17 }
 0x403   :  { %v8801_v19 = vpop.eup %8800 }
 0x404   :  { %v955_v20 = vmul.f32 %v8801_v19, %v950_v18  ;;  %v8803_v23 = vpop.eup %8802  ;;  %v1113_v18 = vld [vmem:[#allocation3 + $0x8] sm:$0x3] }
 0x405   :  { %v958_v24 = vsub.f32 1.0, %v8803_v23  ;;  %v960_v26 = vmul.f32 %v8803_v23, %v812_v49 }
 0x406   :  { %v956_v22 = vadd.f32 %v955_v20, %v816_v21 }
 0x408   :  { %8804 = vtanh.f32 %v956_v22 }
 0x412   :  { %v8805_v25 = vpop.eup %8804 }
 0x413   :  { %v959_v27 = vmul.f32 %v8805_v25, %v958_v24 }
 0x415   :  { %v961_v28 = vadd.f32 %v960_v26, %v959_v27 }
 0x417   :  { %962 = vst.msk [vmem:[#allocation8 + $0x4] sm:$0x3] %vm663_vm4, %v961_v28  ;;  %v966_v29 = vpack.c.bf16 %v961_v28, %v961_v28 }
 0x419   :  { %7891 = vmatmul.mubr.msk.bf16.vlgmr.msra.gmra.mrb[24].mxu0 %vm332_vm3, %v966_v29  ;;  %7899 = vmatmul.mubr.msk.bf16.vlgmr.msra.gmra.mrb[24].mxu1 %vm332_vm3, %v966_v29 }
 0x41a   :  { %7903 = vmatpush3.bf16.msra.mxu0 %v9708_v13  ;;  %7906 = vmatprep.mubr.msk.bf16.mxu0 %vm9393_vm0, %v9392_v0 }
 0x41b   :  { %7904 = vmatprep.subr.bf16.mxu0 %v9392_v0  ;;  %7911 = vmatpush3.bf16.msra.mxu1 %v9686_v8 }
 0x41c   :  { %7912 = vmatprep.subr.bf16.mxu1 %v9392_v0  ;;  %7914 = vmatprep.mubr.msk.bf16.mxu1 %vm9393_vm0, %v9392_v0 }
 0x41e   :  { %7905 = vmatpush3.bf16.msra.mxu0 %v9719_v16 }
 0x41f   :  { %7918 = vmatprep.subr.bf16.mxu0 %v9392_v0  ;;  %7913 = vmatpush3.bf16.msra.mxu1 %v9696_v11 }
 0x420   :  { %7926 = vmatprep.subr.bf16.mxu1 %v9392_v0 }
 0x421   :  { %7907 = vmatmul.mubr.msk.bf16.vlgmr.msra.gmra.mrb[28].mxu0 %vm332_vm3, %v966_v29 }
 0x422   :  { %7919 = vmatpush3.bf16.msra.mxu0 %v9704_v12  ;;  %7922 = vmatprep.mubr.msk.bf16.mxu0 %vm9393_vm0, %v9392_v0 }
 0x423   :  { %7920 = vmatprep.subr.bf16.mxu0 %v9392_v0 }
 0x426   :  { %7921 = vmatpush3.bf16.msra.mxu0 %v9712_v14 }
 0x427   :  { %7934 = vmatprep.subr.bf16.mxu0 %v9392_v0 }
 0x4ec   :  { %v1004_v31 = vpop.f32.mrb[24].mxu0  ;;  %v1051_v32 = vpop.f32.mrb[24].mxu1 }
 0x4ed   :  { %v1010_v33 = vadd.f32 %v1004_v31, %v963_v30  ;;  %v7892_v34 = vpop.f32.mrb[25].mxu0  ;;  %v7900_v35 = vpop.f32.mrb[25].mxu1  ;;  %v1057_v42 = vadd.f32 %v1051_v32, %v964_v39 }
 0x4ee   :  { %v1007_v36 = vpop.f32.mrb[26].mxu0  ;;  %v1054_v37 = vpop.f32.mrb[26].mxu1  ;;  %v1114_v34 = vld [vmem:[#allocation4 + $0x8] sm:$0x3] }
 0x4ef   :  { %v7236_v38 = vmul.f32 -1.442695, %v1010_v33  ;;  %v7893_v40 = vpop.f32.mrb[27].mxu0  ;;  %v7901_v41 = vpop.f32.mrb[27].mxu1  ;;  %v7238_v43 = vmul.f32 -1.442695, %v1057_v42 }
 0x4f1   :  { %8806 = vpow2.f32 %v7236_v38 }
 0x4f2   :  { %8808 = vpow2.f32 %v7238_v43 }
 0x4f4   :  { %v1098_v44 = vpop.f32.mrb[28].mxu0 }
 0x4f5   :  { %v7908_v45 = vpop.f32.mrb[29].mxu0  ;;  %v1099_v52 = vadd.f32 %v9752_v59, %v1098_v44 }
 0x4f6   :  { %v1101_v46 = vpop.f32.mrb[30].mxu0 }
 0x4f7   :  { %v7909_v47 = vpop.f32.mrb[31].mxu0 }
 0x4fb   :  { %v8807_v48 = vpop.eup %8806 }
 0x4fc   :  { %v1014_v49 = vadd.f32 1.0, %v8807_v48  ;;  %v8809_v50 = vpop.eup %8808 }
 0x4fd   :  { %v1061_v51 = vadd.f32 1.0, %v8809_v50  ;;  %v1262_v50 = vld [vmem:[#allocation3 + $0xa] sm:$0x3] }
 0x4fe   :  { %8810 = vrcp.f32 %v1014_v49 }
 0x4ff   :  { %8812 = vrcp.f32 %v1061_v51 }
 0x508   :  { %v8811_v53 = vpop.eup %8810 }
 0x509   :  { %v1104_v54 = vmul.f32 %v8811_v53, %v1099_v52  ;;  %v8813_v57 = vpop.eup %8812 }
 0x50a   :  { %v1107_v58 = vsub.f32 1.0, %v8813_v57  ;;  %v1109_v61 = vmul.f32 %v8813_v57, %v961_v28 }
 0x50b   :  { %v1105_v56 = vadd.f32 %v1104_v54, %v965_v55 }
 0x50d   :  { %8814 = vtanh.f32 %v1105_v56 }
 0x517   :  { %v8815_v60 = vpop.eup %8814 }
 0x518   :  { %v1108_v62 = vmul.f32 %v8815_v60, %v1107_v58 }
 0x51a   :  { %v1110_v63 = vadd.f32 %v1109_v61, %v1108_v62 }
 0x51c   :  { %1111 = vst.msk [vmem:[#allocation8 + $0x6] sm:$0x3] %vm663_vm4, %v1110_v63  ;;  %v1115_v1 = vpack.c.bf16 %v1110_v63, %v1110_v63 }
 0x51e   :  { %7915 = vmatmul.mubr.msk.bf16.vlgmr.msra.gmra.mrb[28].mxu1 %vm332_vm3, %v1115_v1  ;;  %7923 = vmatmul.mubr.msk.bf16.vlgmr.msra.gmra.mrb[32].mxu0 %vm332_vm3, %v1115_v1 }
 0x51f   :  { %7927 = vmatpush3.bf16.msra.mxu1 %v9708_v13  ;;  %7930 = vmatprep.mubr.msk.bf16.mxu1 %vm9393_vm0, %v9392_v0 }
 0x520   :  { %7928 = vmatprep.subr.bf16.mxu1 %v9392_v0  ;;  %7935 = vmatpush3.bf16.msra.mxu0 %v9686_v8 }
 0x521   :  { %7936 = vmatprep.subr.bf16.mxu0 %v9392_v0  ;;  %7938 = vmatprep.mubr.msk.bf16.mxu0 %vm9393_vm0, %v9392_v0 }
 0x523   :  { %7929 = vmatpush3.bf16.msra.mxu1 %v9719_v16 }
 0x524   :  { %7942 = vmatprep.subr.bf16.mxu1 %v9392_v0  ;;  %7937 = vmatpush3.bf16.msra.mxu0 %v9696_v11 }
 0x525   :  { %7950 = vmatprep.subr.bf16.mxu0 %v9392_v0 }
 0x526   :  { %7931 = vmatmul.mubr.msk.bf16.vlgmr.msra.gmra.mrb[32].mxu1 %vm332_vm3, %v1115_v1 }
 0x527   :  { %7943 = vmatpush3.bf16.msra.mxu1 %v9704_v12  ;;  %7946 = vmatprep.mubr.msk.bf16.mxu1 %vm9393_vm0, %v9392_v0 }
 0x528   :  { %7944 = vmatprep.subr.bf16.mxu1 %v9392_v0 }
 0x52b   :  { %7945 = vmatpush3.bf16.msra.mxu1 %v9712_v14 }
 0x52c   :  { %7958 = vmatprep.subr.bf16.mxu1 %v9392_v0 }
 0x5f1   :  { %v1153_v3 = vpop.f32.mrb[28].mxu1  ;;  %v1200_v4 = vpop.f32.mrb[32].mxu0 }
 0x5f2   :  { %v1159_v5 = vadd.f32 %v1153_v3, %v1112_v2  ;;  %v7916_v6 = vpop.f32.mrb[29].mxu1  ;;  %v7924_v7 = vpop.f32.mrb[33].mxu0  ;;  %v1206_v21 = vadd.f32 %v1200_v4, %v1113_v18  ;;  %v1263_v3 = vld [vmem:[#allocation4 + $0xa] sm:$0x3] }
 0x5f3   :  { %v1156_v9 = vpop.f32.mrb[30].mxu1  ;;  %v1203_v10 = vpop.f32.mrb[34].mxu0 }
 0x5f4   :  { %v7241_v17 = vmul.f32 -1.442695, %v1159_v5  ;;  %v7917_v19 = vpop.f32.mrb[31].mxu1  ;;  %v7925_v20 = vpop.f32.mrb[35].mxu0  ;;  %v7243_v22 = vmul.f32 -1.442695, %v1206_v21 }
 0x5f5   :  { %v9086_v19 = vld [vmem:[%s9441_s13] sm:$0xff]   ;;  %v9087_v20 = vld [vmem:[%s9441_s13 + $0x8] sm:$0xff]  }
 0x5f6   :  { %8816 = vpow2.f32 %v7241_v17 }
 0x5f7   :  { %8818 = vpow2.f32 %v7243_v22 }
 0x5f9   :  { %v1247_v23 = vpop.f32.mrb[32].mxu1 }
 0x5fa   :  { %v7932_v24 = vpop.f32.mrb[33].mxu1  ;;  %v1248_v31 = vadd.f32 %v9752_v59, %v1247_v23 }
 0x5fb   :  { %v1250_v25 = vpop.f32.mrb[34].mxu1 }
 0x5fc   :  { %v7933_v26 = vpop.f32.mrb[35].mxu1 }
 0x600   :  { %v8817_v27 = vpop.eup %8816 }
 0x601   :  { %v1163_v28 = vadd.f32 1.0, %v8817_v27  ;;  %v8819_v29 = vpop.eup %8818 }
 0x602   :  { %v1210_v30 = vadd.f32 1.0, %v8819_v29  ;;  %v1411_v29 = vld [vmem:[#allocation3 + $0xc] sm:$0x3] }
 0x603   :  { %8820 = vrcp.f32 %v1163_v28 }
 0x604   :  { %8822 = vrcp.f32 %v1210_v30 }
 0x60d   :  { %v8821_v32 = vpop.eup %8820 }
 0x60e   :  { %v1253_v33 = vmul.f32 %v8821_v32, %v1248_v31  ;;  %v8823_v36 = vpop.eup %8822 }
 0x60f   :  { %v1256_v37 = vsub.f32 1.0, %v8823_v36  ;;  %v1258_v39 = vmul.f32 %v8823_v36, %v1110_v63 }
 0x610   :  { %v1254_v35 = vadd.f32 %v1253_v33, %v1114_v34 }
 0x612   :  { %8824 = vtanh.f32 %v1254_v35 }
 0x61c   :  { %v8825_v38 = vpop.eup %8824 }
 0x61d   :  { %v1257_v40 = vmul.f32 %v8825_v38, %v1256_v37 }
 0x61f   :  { %v1259_v41 = vadd.f32 %v1258_v39, %v1257_v40 }
 0x621   :  { %1260 = vst.msk [vmem:[#allocation8 + $0x8] sm:$0x3] %vm663_vm4, %v1259_v41  ;;  %v1264_v42 = vpack.c.bf16 %v1259_v41, %v1259_v41 }
 0x623   :  { %7939 = vmatmul.mubr.msk.bf16.vlgmr.msra.gmra.mrb[36].mxu0 %vm332_vm3, %v1264_v42  ;;  %7947 = vmatmul.mubr.msk.bf16.vlgmr.msra.gmra.mrb[36].mxu1 %vm332_vm3, %v1264_v42 }
 0x624   :  { %7951 = vmatpush3.bf16.msra.mxu0 %v9708_v13  ;;  %7954 = vmatprep.mubr.msk.bf16.mxu0 %vm9393_vm0, %v9392_v0 }
 0x625   :  { %7952 = vmatprep.subr.bf16.mxu0 %v9392_v0  ;;  %7959 = vmatpush3.bf16.msra.mxu1 %v9686_v8  ;;  %v1261_v8 = vld [vmem:[#allocation2 + $0xa] sm:$0x3] }
 0x626   :  { %7960 = vmatprep.subr.bf16.mxu1 %v9392_v0  ;;  %7962 = vmatprep.mubr.msk.bf16.mxu1 %vm9393_vm0, %v9392_v0 }
 0x628   :  { %7953 = vmatpush3.bf16.msra.mxu0 %v9719_v16 }
 0x629   :  { %7966 = vmatprep.subr.bf16.mxu0 %v9392_v0  ;;  %7961 = vmatpush3.bf16.msra.mxu1 %v9696_v11 }
 0x62a   :  { %7974 = vmatprep.subr.bf16.mxu1 %v9392_v0 }
 0x62b   :  { %7955 = vmatmul.mubr.msk.bf16.vlgmr.msra.gmra.mrb[40].mxu0 %vm332_vm3, %v1264_v42 }
 0x62c   :  { %7967 = vmatpush3.bf16.msra.mxu0 %v9704_v12  ;;  %7970 = vmatprep.mubr.msk.bf16.mxu0 %vm9393_vm0, %v9392_v0 }
 0x62d   :  { %7968 = vmatprep.subr.bf16.mxu0 %v9392_v0 }
 0x630   :  { %7969 = vmatpush3.bf16.msra.mxu0 %v9712_v14 }
 0x631   :  { %7982 = vmatprep.subr.bf16.mxu0 %v9392_v0 }
 0x6f6   :  { %v1302_v43 = vpop.f32.mrb[36].mxu0  ;;  %v1349_v44 = vpop.f32.mrb[36].mxu1 }
 0x6f7   :  { %v1308_v45 = vadd.f32 %v1302_v43, %v1261_v8  ;;  %v7940_v11 = vpop.f32.mrb[37].mxu0  ;;  %v7948_v46 = vpop.f32.mrb[37].mxu1  ;;  %v1355_v52 = vadd.f32 %v1349_v44, %v1262_v50  ;;  %v1412_v43 = vld [vmem:[#allocation4 + $0xc] sm:$0x3] }
 0x6f8   :  { %v1305_v47 = vpop.f32.mrb[38].mxu0  ;;  %v1352_v48 = vpop.f32.mrb[38].mxu1 }
 0x6f9   :  { %v7246_v49 = vmul.f32 -1.442695, %v1308_v45  ;;  %v7941_v12 = vpop.f32.mrb[39].mxu0  ;;  %v7949_v51 = vpop.f32.mrb[39].mxu1  ;;  %v7248_v53 = vmul.f32 -1.442695, %v1355_v52 }
 0x6fa   :  { %v9089_v12 = vld [vmem:[%s9441_s13 + $0x20] sm:$0xff]   ;;  %v9090_v51 = vld [vmem:[%s9441_s13 + $0x28] sm:$0xff]  }
 0x6fb   :  { %8826 = vpow2.f32 %v7246_v49  ;;  %v8717_v52 = vld [vmem:[%s10872_s5] sm:$0xff]  }
 0x6fc   :  { %8828 = vpow2.f32 %v7248_v53  ;;  %v8718_v53 = vld [vmem:[%s10872_s5 + $0x10] sm:$0xff]  }
 0x6fe   :  { %v1396_v54 = vpop.f32.mrb[40].mxu0 }
 0x6ff   :  { %v7956_v55 = vpop.f32.mrb[41].mxu0  ;;  %v1397_v63 = vadd.f32 %v9752_v59, %v1396_v54  ;;  %v8719_v54 = vld [vmem:[%s10872_s5 + $0x8] sm:$0xff]  }
 0x700   :  { %v1399_v56 = vpop.f32.mrb[42].mxu0  ;;  %v8720_v55 = vld [vmem:[%s10872_s5 + $0x18] sm:$0xff]  }
 0x701   :  { %v7957_v57 = vpop.f32.mrb[43].mxu0  ;;  %v1559_v56 = vld [vmem:[#allocation2 + $0xe] sm:$0x3] }
 0x705   :  { %v8827_v58 = vpop.eup %8826 }
 0x706   :  { %v1312_v60 = vadd.f32 1.0, %v8827_v58  ;;  %v8829_v61 = vpop.eup %8828 }
 0x707   :  { %v1359_v62 = vadd.f32 1.0, %v8829_v61 }
 0x708   :  { %8830 = vrcp.f32 %v1312_v60 }
 0x709   :  { %8832 = vrcp.f32 %v1359_v62 }
 0x712   :  { %v8831_v1 = vpop.eup %8830 }
 0x713   :  { %v1402_v2 = vmul.f32 %v8831_v1, %v1397_v63  ;;  %v8833_v5 = vpop.eup %8832 }
 0x714   :  { %v1405_v6 = vsub.f32 1.0, %v8833_v5  ;;  %v1407_v9 = vmul.f32 %v8833_v5, %v1259_v41 }
 0x715   :  { %v1403_v4 = vadd.f32 %v1402_v2, %v1263_v3  ;;  %v1560_v3 = vld [vmem:[#allocation3 + $0xe] sm:$0x3] }
 0x717   :  { %8834 = vtanh.f32 %v1403_v4 }
 0x721   :  { %v8835_v7 = vpop.eup %8834 }
 0x722   :  { %v1406_v10 = vmul.f32 %v8835_v7, %v1405_v6 }
 0x724   :  { %v1408_v17 = vadd.f32 %v1407_v9, %v1406_v10 }
 0x726   :  { %1409 = vst.msk [vmem:[#allocation8 + $0xa] sm:$0x3] %vm663_vm4, %v1408_v17  ;;  %v1413_v18 = vpack.c.bf16 %v1408_v17, %v1408_v17 }
 0x728   :  { %7963 = vmatmul.mubr.msk.bf16.vlgmr.msra.gmra.mrb[40].mxu1 %vm332_vm3, %v1413_v18  ;;  %7971 = vmatmul.mubr.msk.bf16.vlgmr.msra.gmra.mrb[44].mxu0 %vm332_vm3, %v1413_v18 }
 0x729   :  { %7975 = vmatpush3.bf16.msra.mxu1 %v9708_v13  ;;  %7978 = vmatprep.mubr.msk.bf16.mxu1 %vm9393_vm0, %v9392_v0  ;;  %v9088_v13 = vld [vmem:[%s9441_s13 + $0x10] sm:$0xff]   ;;  %s10874_s13 = sld [smem:[#allocation36_spill]] }
 0x72a   :  { %7976 = vmatprep.subr.bf16.mxu1 %v9392_v0  ;;  %7983 = vmatpush3.bf16.msra.mxu0 %v9086_v19 }
 0x72b   :  { %7984 = vmatprep.subr.bf16.mxu0 %v9392_v0  ;;  %7986 = vmatprep.mubr.msk.bf16.mxu0 %vm9393_vm0, %v9392_v0 }
 0x72d   :  { %7977 = vmatpush3.bf16.msra.mxu1 %v9719_v16  ;;  %v1410_v16 = vld [vmem:[#allocation2 + $0xc] sm:$0x3] }
 0x72e   :  { %7990 = vmatprep.subr.bf16.mxu1 %v9392_v0  ;;  %7985 = vmatpush3.bf16.msra.mxu0 %v9087_v20 }
 0x72f   :  { %7998 = vmatprep.subr.bf16.mxu0 %v9392_v0 }
 0x730   :  { %7979 = vmatmul.mubr.msk.bf16.vlgmr.msra.gmra.mrb[44].mxu1 %vm332_vm3, %v1413_v18 }
 0x731   :  { %7991 = vmatpush3.bf16.msra.mxu1 %v9088_v13  ;;  %7994 = vmatprep.mubr.msk.bf16.mxu1 %vm9393_vm0, %v9392_v0 }
 0x732   :  { %7992 = vmatprep.subr.bf16.mxu1 %v9392_v0 }
 0x735   :  { %7993 = vmatpush3.bf16.msra.mxu1 %v9712_v14 }
 0x736   :  { %8006 = vmatprep.subr.bf16.mxu1 %v9392_v0 }
 0x7fb   :  { %v1451_v21 = vpop.f32.mrb[40].mxu1  ;;  %v1498_v22 = vpop.f32.mrb[44].mxu0 }
 0x7fc   :  { %v1457_v23 = vadd.f32 %v1451_v21, %v1410_v16  ;;  %v7964_v24 = vpop.f32.mrb[41].mxu1  ;;  %v7972_v25 = vpop.f32.mrb[45].mxu0  ;;  %v1504_v32 = vadd.f32 %v1498_v22, %v1411_v29 }
 0x7fd   :  { %v1454_v26 = vpop.f32.mrb[42].mxu1  ;;  %v1501_v27 = vpop.f32.mrb[46].mxu0  ;;  %v1561_v24 = vld [vmem:[#allocation4 + $0xe] sm:$0x3] }
 0x7fe   :  { %v7251_v28 = vmul.f32 -1.442695, %v1457_v23  ;;  %v7965_v30 = vpop.f32.mrb[43].mxu1  ;;  %v7973_v31 = vpop.f32.mrb[47].mxu0  ;;  %v7253_v33 = vmul.f32 -1.442695, %v1504_v32 }
 0x7ff   :  { %v1708_v32 = vld [vmem:[#allocation8] sm:$0xff] }
 0x800   :  { %8836 = vpow2.f32 %v7251_v28 }
 0x801   :  { %8838 = vpow2.f32 %v7253_v33  ;;  %v8721_v33 = vld [vmem:[%s10872_s5 + $0x20] sm:$0xff]  }
 0x803   :  { %v1545_v34 = vpop.f32.mrb[44].mxu1 }
 0x804   :  { %v7980_v35 = vpop.f32.mrb[45].mxu1  ;;  %v1546_v41 = vadd.f32 %v9752_v59, %v1545_v34  ;;  %v9919_v34 = vld [vmem:[%s10873_s9] sm:$0xff]  }
 0x805   :  { %v1548_v14 = vpop.f32.mrb[46].mxu1 }
 0x806   :  { %v7981_v36 = vpop.f32.mrb[47].mxu1  ;;  %v8723_v14 = vld [vmem:[%s10872_s5 + $0x28] sm:$0xff]   ;;  %s9414_s5 = smov 40  }
 0x807   :  { %v9926_v36 = vld [vmem:[%s10873_s9 + $0x8] sm:$0xff]  }
 0x80a   :  { %v8837_v37 = vpop.eup %8836 }
 0x80b   :  { %v1461_v38 = vadd.f32 1.0, %v8837_v37  ;;  %v8839_v39 = vpop.eup %8838  ;;  %v9936_v37 = vld [vmem:[%s10873_s9 + $0x10] sm:$0xff]  }
 0x80c   :  { %v1508_v40 = vadd.f32 1.0, %v8839_v39  ;;  %v9947_v39 = vld [vmem:[%s10873_s9 + $0x18] sm:$0xff]  }
 0x80d   :  { %8840 = vrcp.f32 %v1461_v38  ;;  %v9941_v38 = vld [vmem:[%s10873_s9 + $0x20] sm:$0xff]  }
 0x80e   :  { %8842 = vrcp.f32 %v1508_v40  ;;  %v9954_v40 = vld [vmem:[%s10873_s9 + $0x28] sm:$0xff]   ;;  %s9415_s9 = smov 36  }
 0x817   :  { %v8841_v42 = vpop.eup %8840 }
 0x818   :  { %v1551_v8 = vmul.f32 %v8841_v42, %v1546_v41  ;;  %v8843_v45 = vpop.eup %8842  ;;  %v7260_v41 = vld [vmem:[#allocation14] ss:$0 sm:$0xff]  ;;  %v7268_v42 = vld [vmem:[#allocation14 + $0x1] ss:$0 sm:$0xff] }
 0x819   :  { %v1554_v11 = vsub.f32 1.0, %v8843_v45  ;;  %v1556_v47 = vmul.f32 %v8843_v45, %v1408_v17 }
 0x81a   :  { %v1552_v44 = vadd.f32 %v1551_v8, %v1412_v43 }
 0x81c   :  { %8844 = vtanh.f32 %v1552_v44 }
 0x826   :  { %v8845_v46 = vpop.eup %8844 }
 0x827   :  { %v1555_v48 = vmul.f32 %v8845_v46, %v1554_v11 }
 0x829   :  { %v1557_v49 = vadd.f32 %v1556_v47, %v1555_v48 }
 0x82b   :  { %1558 = vst.msk [vmem:[#allocation8 + $0xc] sm:$0x3] %vm663_vm4, %v1557_v49  ;;  %v1562_v50 = vpack.c.bf16 %v1557_v49, %v1557_v49 }
 0x82d   :  { %7987 = vmatmul.mubr.msk.bf16.vlgmr.msra.gmra.mrb[48].mxu0 %vm332_vm3, %v1562_v50  ;;  %7995 = vmatmul.mubr.msk.bf16.vlgmr.msra.gmra.mrb[48].mxu1 %vm332_vm3, %v1562_v50 }
 0x82e   :  { %7999 = vmatpush3.bf16.msra.mxu0 %v9089_v12  ;;  %8002 = vmatprep.mubr.msk.bf16.mxu0 %vm9393_vm0, %v9392_v0 }
 0x82f   :  { %8000 = vmatprep.subr.bf16.mxu0 %v9392_v0  ;;  %8010 = vmatprep.mubr.msk.bf16.mxu1 %vm9393_vm0, %v9392_v0 }
 0x830   :  { %8007 = vmatpush3.bf16.msra.mxu1 %v8717_v52  ;;  %v7276_v52 = vld [vmem:[#allocation14 + $0x2] ss:$0 sm:$0xff] }
 0x831   :  { %8008 = vmatprep.subr.bf16.mxu1 %v9392_v0 }
 0x832   :  { %8001 = vmatpush3.bf16.msra.mxu0 %v9090_v51 }
 0x833   :  { %8014 = vmatprep.subr.bf16.mxu0 %v9392_v0 }
 0x834   :  { %8009 = vmatpush3.bf16.msra.mxu1 %v8719_v54 }
 0x835   :  { %8003 = vmatmul.mubr.msk.bf16.vlgmr.msra.gmra.mrb[52].mxu0 %vm332_vm3, %v1562_v50  ;;  %8022 = vmatprep.subr.bf16.mxu1 %v9392_v0 }
 0x836   :  { %8018 = vmatprep.mubr.msk.bf16.mxu0 %vm9393_vm0, %v9392_v0  ;;  %8015 = vmatpush3.bf16.msra.mxu0 %v8718_v53 }
 0x837   :  { %8016 = vmatprep.subr.bf16.mxu0 %v9392_v0 }
 0x83a   :  { %8017 = vmatpush3.bf16.msra.mxu0 %v8720_v55 }
 0x83b   :  { %8030 = vmatprep.subr.bf16.mxu0 %v9392_v0 }
 0x900   :  { %v1600_v57 = vpop.f32.mrb[48].mxu0  ;;  %v1647_v58 = vpop.f32.mrb[48].mxu1 }
 0x901   :  { %v1606_v60 = vadd.f32 %v1600_v57, %v1559_v56  ;;  %v7988_v61 = vpop.f32.mrb[49].mxu0  ;;  %v7996_v62 = vpop.f32.mrb[49].mxu1  ;;  %v1653_v6 = vadd.f32 %v1647_v58, %v1560_v3 }
 0x902   :  { %v1603_v63 = vpop.f32.mrb[50].mxu0  ;;  %v1650_v1 = vpop.f32.mrb[50].mxu1 }
 0x903   :  { %v7256_v2 = vmul.f32 -1.442695, %v1606_v60  ;;  %v7989_v4 = vpop.f32.mrb[51].mxu0  ;;  %v7997_v5 = vpop.f32.mrb[51].mxu1  ;;  %v7258_v7 = vmul.f32 -1.442695, %v1653_v6 }
 0x905   :  { %8846 = vpow2.f32 %v7256_v2 }
 0x906   :  { %8848 = vpow2.f32 %v7258_v7 }
 0x908   :  { %v1694_v9 = vpop.f32.mrb[52].mxu0 }
 0x909   :  { %v8004_v10 = vpop.f32.mrb[53].mxu0  ;;  %v1695_v21 = vadd.f32 %v9752_v59, %v1694_v9 }
 0x90a   :  { %v1697_v17 = vpop.f32.mrb[54].mxu0 }
 0x90b   :  { %v8005_v18 = vpop.f32.mrb[55].mxu0 }
 0x90f   :  { %v8847_v19 = vpop.eup %8846 }
 0x910   :  { %v1610_v20 = vadd.f32 1.0, %v8847_v19  ;;  %v8849_v13 = vpop.eup %8848 }
 0x911   :  { %v1657_v16 = vadd.f32 1.0, %v8849_v13 }
 0x912   :  { %8850 = vrcp.f32 %v1610_v20 }
 0x913   :  { %8852 = vrcp.f32 %v1657_v16 }
 0x91c   :  { %v8851_v22 = vpop.eup %8850 }
 0x91d   :  { %v1700_v23 = vmul.f32 %v8851_v22, %v1695_v21  ;;  %v8853_v26 = vpop.eup %8852 }
 0x91e   :  { %v1703_v27 = vsub.f32 1.0, %v8853_v26  ;;  %v1705_v29 = vmul.f32 %v8853_v26, %v1557_v49 }
 0x91f   :  { %v1701_v25 = vadd.f32 %v1700_v23, %v1561_v24  ;;  %v9983_v23 = vld [vmem:[#allocation15] ss:$0 sm:$0xff] }
 0x921   :  { %8854 = vtanh.f32 %v1701_v25 }
 0x92b   :  { %v8855_v28 = vpop.eup %8854 }
 0x92c   :  { %v1704_v30 = vmul.f32 %v8855_v28, %v1703_v27 }
 0x92e   :  { %v1706_v31 = vadd.f32 %v1705_v29, %v1704_v30 }
 0x930   :  { %1707 = vst.msk [vmem:[#allocation8 + $0xe] sm:$0x3] %vm663_vm4, %v1706_v31 }
 0x937   :  { %v1709_v59 = vld [vmem:[#allocation8 + $0x8] sm:$0xff] }
 0x938   :  { %v1710_v35 = vpack.c.bf16 %v1709_v59, %v1708_v32 }
 0x93a   :  { %8011 = vmatmul.mubr.msk.bf16.vlgmr.msra.gmra.mrb[52].mxu1 %vm332_vm3, %v1710_v35  ;;  %8019 = vmatmul.mubr.msk.bf16.vlgmr.msra.gmra.mrb[56].mxu0 %vm332_vm3, %v1710_v35 }
 0x93b   :  { %8023 = vmatpush3.bf16.msra.mxu1 %v8721_v33  ;;  %8031 = vmatpush3.bf16.msra.mxu0 %v9919_v34 }
 0x93c   :  { %8024 = vmatprep.subr.bf16.mxu1 %v9392_v0  ;;  %8032 = vmatprep.subr.bf16.mxu0 %v9392_v0 }
 0x93d   :  { %8026 = vmatprep.mubr.msk.bf16.mxu1 %vm9393_vm0, %v9392_v0  ;;  %8034 = vmatprep.mubr.msk.bf16.mxu0 %vm9393_vm0, %v9392_v0 }
 0x93f   :  { %8025 = vmatpush3.bf16.msra.mxu1 %v8723_v14  ;;  %8033 = vmatpush3.bf16.msra.mxu0 %v9926_v36 }
 0x940   :  { %8038 = vmatprep.subr.bf16.mxu1 %v9392_v0  ;;  %8046 = vmatprep.subr.bf16.mxu0 %v9392_v0 }
 0x942   :  { %8027 = vmatmul.mubr.msk.bf16.vlgmr.msra.gmra.mrb[56].mxu1 %vm332_vm3, %v1710_v35  ;;  %8035 = vmatmul.mubr.bf16.vlgmr.msra.gmra.mrb[60].mxu0 %v9394_v15 }
 0x943   :  { %8039 = vmatpush3.bf16.msra.mxu1 %v9936_v37  ;;  %8042 = vmatprep.mubr.msk.bf16.mxu1 %vm9393_vm0, %v9392_v0 }
 0x944   :  { %8040 = vmatprep.subr.bf16.mxu1 %v9392_v0  ;;  %8047 = vmatpush3.bf16.msra.mxu0 %v9941_v38 }
 0x945   :  { %8048 = vmatprep.subr.bf16.mxu0 %v9392_v0  ;;  %8050 = vmatprep.mubr.msk.bf16.mxu0 %vm9393_vm0, %v9392_v0 }
 0x947   :  { %8041 = vmatpush3.bf16.msra.mxu1 %v9947_v39 }
 0x948   :  { %8049 = vmatpush3.bf16.msra.mxu0 %v9954_v40  ;;  %8054 = vmatprep.subr.bf16.mxu1 %v9392_v0 }
 0x949   :  { %8062 = vmatprep.subr.bf16.mxu0 %v9392_v0 }
 0x94a   :  { %8043 = vmatmul.mubr.bf16.vlgmr.msra.gmra.mrb[60].mxu1 %v9394_v15 }
 0x94b   :  { %8051 = vmatmul.mubr.bf16.vlgmr.msra.gmra.mrb[64].mxu0 %v9394_v15  ;;  %8055 = vmatpush3.bf16.msra.mxu1 %v9919_v34 }
 0x94c   :  { %8063 = vmatpush3.bf16.msra.mxu0 %v9936_v37  ;;  %8056 = vmatprep.subr.bf16.mxu1 %v9392_v0 }
 0x94d   :  { %8064 = vmatprep.subr.bf16.mxu0 %v9392_v0  ;;  %8058 = vmatprep.mubr.msk.bf16.mxu1 %vm9393_vm0, %v9392_v0 }
 0x94e   :  { %8066 = vmatprep.mubr.msk.bf16.mxu0 %vm9393_vm0, %v9392_v0 }
 0x94f   :  { %8057 = vmatpush3.bf16.msra.mxu1 %v9926_v36 }
 0x950   :  { %8065 = vmatpush3.bf16.msra.mxu0 %v9947_v39  ;;  %8070 = vmatprep.subr.bf16.mxu1 %v9392_v0 }
 0x951   :  { %8078 = vmatprep.subr.bf16.mxu0 %v9392_v0 }
 0xa0d   :  { %v1771_v8 = vpop.f32.mrb[52].mxu1  ;;  %v1839_v43 = vpop.f32.mrb[56].mxu0 }
 0xa0e   :  { %v1772_v44 = vadd.f32 %v7260_v41, %v1771_v8  ;;  %v1840_v45 = vadd.f32 %v7268_v42, %v1839_v43  ;;  %v8012_v11 = vpop.f32.mrb[53].mxu1  ;;  %v8020_v46 = vpop.f32.mrb[57].mxu0 }
 0xa0f   :  { %v1774_v47 = vpop.f32.mrb[54].mxu1  ;;  %v1842_v48 = vpop.f32.mrb[58].mxu0 }
 0xa10   :  { %1778 = vst.msk [vmem:[#allocation2] sm:$0xff] %vm332_vm3, %v1772_v44  ;;  %1846 = vst.msk [vmem:[#allocation3] sm:$0xff] %vm332_vm3, %v1840_v45  ;;  %v1775_v49 = vadd.f32 %v7260_v41, %v1774_v47  ;;  %v1843_v50 = vadd.f32 %v7268_v42, %v1842_v48  ;;  %v8013_v12 = vpop.f32.mrb[55].mxu1  ;;  %v8021_v51 = vpop.f32.mrb[59].mxu0 }
 0xa12   :  { %1779 = vst.msk [vmem:[#allocation2 + $0x8] sm:$0xff] %vm332_vm3, %v1775_v49  ;;  %1847 = vst.msk [vmem:[#allocation3 + $0x8] sm:$0xff] %vm332_vm3, %v1843_v50 }
 0xa15   :  { %v1907_v53 = vpop.f32.mrb[56].mxu1  ;;  %v1980_v54 = vpop.f32.mrb[60].mxu0 }
 0xa16   :  { %v1908_v55 = vadd.f32 %v7276_v52, %v1907_v53  ;;  %v8028_v56 = vpop.f32.mrb[57].mxu1  ;;  %v8036_v57 = vpop.f32.mrb[61].mxu0 }
 0xa17   :  { %v1931_v58 = vld [vmem:[#allocation2] sm:$0x3]  ;;  %v1910_v60 = vpop.f32.mrb[58].mxu1  ;;  %v1983_v61 = vpop.f32.mrb[62].mxu0  ;;  %v1932_v4 = vld [vmem:[#allocation3] sm:$0x3] }
 0xa18   :  { %1914 = vst.msk [vmem:[#allocation4] sm:$0xff] %vm332_vm3, %v1908_v55  ;;  %v1986_v62 = vadd.f32 %v1980_v54, %v1931_v58  ;;  %v1911_v63 = vadd.f32 %v7276_v52, %v1910_v60  ;;  %v8029_v1 = vpop.f32.mrb[59].mxu1  ;;  %v8037_v2 = vpop.f32.mrb[63].mxu0  ;;  %v2118_v41 = vld [vmem:[#allocation2 + $0x2] sm:$0x3] }
 0xa19   :  { %v2119_v48 = vld [vmem:[#allocation3 + $0x2] sm:$0x3] }
 0xa1a   :  { %v7290_v3 = vmul.f32 -1.442695, %v1986_v62  ;;  %1915 = vst.msk [vmem:[#allocation4 + $0x8] sm:$0xff] %vm332_vm3, %v1911_v63 }
 0xa1c   :  { %8856 = vpow2.f32 %v7290_v3 }
 0xa1d   :  { %v2039_v5 = vpop.f32.mrb[60].mxu1 }
 0xa1e   :  { %v2045_v6 = vadd.f32 %v2039_v5, %v1932_v4  ;;  %v8044_v7 = vpop.f32.mrb[61].mxu1  ;;  %v2104_v9 = vpop.f32.mrb[64].mxu0 }
 0xa1f   :  { %v2042_v10 = vpop.f32.mrb[62].mxu1  ;;  %v8052_v17 = vpop.f32.mrb[65].mxu0  ;;  %v2105_v25 = vadd.f32 %v9983_v23, %v2104_v9  ;;  %v1933_v28 = vld [vmem:[#allocation4] sm:$0x3]  ;;  %v2120_v1 = vld [vmem:[#allocation4 + $0x2] sm:$0x3] }
 0xa20   :  { %v7293_v18 = vmul.f32 -1.442695, %v2045_v6  ;;  %v8045_v19 = vpop.f32.mrb[63].mxu1  ;;  %v2107_v20 = vpop.f32.mrb[66].mxu0  ;;  %v2267_v17 = vld [vmem:[#allocation2 + $0x4] sm:$0x3] }
 0xa21   :  { %v8053_v13 = vpop.f32.mrb[67].mxu0 }
 0xa22   :  { %8858 = vpow2.f32 %v7293_v18 }
 0xa26   :  { %v8857_v16 = vpop.eup %8856 }
 0xa27   :  { %v1990_v21 = vadd.f32 1.0, %v8857_v16 }
 0xa29   :  { %8860 = vrcp.f32 %v1990_v21 }
 0xa2c   :  { %v8859_v22 = vpop.eup %8858 }
 0xa2d   :  { %v2049_v24 = vadd.f32 1.0, %v8859_v22 }
 0xa2f   :  { %8862 = vrcp.f32 %v2049_v24 }
 0xa33   :  { %v8861_v26 = vpop.eup %8860 }
 0xa34   :  { %v2110_v27 = vmul.f32 %v8861_v26, %v2105_v25  ;;  %v2268_v25 = vld [vmem:[#allocation3 + $0x4] sm:$0x3] }
 0xa36   :  { %v2111_v29 = vadd.f32 %v2110_v27, %v1933_v28 }
 0xa38   :  { %8864 = vtanh.f32 %v2111_v29 }
 0xa39   :  { %v8863_v30 = vpop.eup %8862 }
 0xa3a   :  { %v2113_v31 = vsub.f32 1.0, %v8863_v30  ;;  %v2115_v59 = vmul.f32 0.0, %v8863_v30 }
 0xa42   :  { %v8865_v32 = vpop.eup %8864 }
 0xa43   :  { %v2114_v33 = vmul.f32 %v8865_v32, %v2113_v31 }
 0xa45   :  { %v2116_v35 = vadd.f32 %v2115_v59, %v2114_v33 }
 0xa47   :  { %2117 = vst.msk [vmem:[#allocation8] sm:$0x3] %vm663_vm4, %v2116_v35  ;;  %v2121_v14 = vpack.c.bf16 %v2116_v35, %v2116_v35 }
 0xa49   :  { %8059 = vmatmul.mubr.msk.bf16.vlgmr.msra.gmra.mrb[64].mxu1 %vm332_vm3, %v2121_v14  ;;  %8067 = vmatmul.mubr.msk.bf16.vlgmr.msra.gmra.mrb[68].mxu0 %vm332_vm3, %v2121_v14 }
 0xa4a   :  { %8071 = vmatpush3.bf16.msra.mxu1 %v9941_v38  ;;  %8074 = vmatprep.mubr.msk.bf16.mxu1 %vm9393_vm0, %v9392_v0 }
 0xa4b   :  { %8072 = vmatprep.subr.bf16.mxu1 %v9392_v0  ;;  %8079 = vmatpush3.bf16.msra.mxu0 %v9919_v34 }
 0xa4c   :  { %8080 = vmatprep.subr.bf16.mxu0 %v9392_v0  ;;  %8082 = vmatprep.mubr.msk.bf16.mxu0 %vm9393_vm0, %v9392_v0 }
 0xa4e   :  { %8073 = vmatpush3.bf16.msra.mxu1 %v9954_v40 }
 0xa4f   :  { %8086 = vmatprep.subr.bf16.mxu1 %v9392_v0  ;;  %8081 = vmatpush3.bf16.msra.mxu0 %v9926_v36 }
 0xa50   :  { %8094 = vmatprep.subr.bf16.mxu0 %v9392_v0 }
 0xa51   :  { %8075 = vmatmul.mubr.msk.bf16.vlgmr.msra.gmra.mrb[68].mxu1 %vm332_vm3, %v2121_v14 }
 0xa52   :  { %8087 = vmatpush3.bf16.msra.mxu1 %v9936_v37  ;;  %8090 = vmatprep.mubr.msk.bf16.mxu1 %vm9393_vm0, %v9392_v0 }
 0xa53   :  { %8088 = vmatprep.subr.bf16.mxu1 %v9392_v0 }
 0xa56   :  { %8089 = vmatpush3.bf16.msra.mxu1 %v9947_v39 }
 0xa57   :  { %8102 = vmatprep.subr.bf16.mxu1 %v9392_v0 }
 0xb1c   :  { %v2159_v42 = vpop.f32.mrb[64].mxu1  ;;  %v2206_v8 = vpop.f32.mrb[68].mxu0 }
 0xb1d   :  { %v2165_v43 = vadd.f32 %v2159_v42, %v2118_v41  ;;  %v8060_v44 = vpop.f32.mrb[65].mxu1  ;;  %v8068_v45 = vpop.f32.mrb[69].mxu0  ;;  %v2212_v12 = vadd.f32 %v2206_v8, %v2119_v48 }
 0xb1e   :  { %v2162_v11 = vpop.f32.mrb[66].mxu1  ;;  %v2209_v46 = vpop.f32.mrb[70].mxu0  ;;  %v2269_v44 = vld [vmem:[#allocation4 + $0x4] sm:$0x3] }
 0xb1f   :  { %v7298_v47 = vmul.f32 -1.442695, %v2165_v43  ;;  %v8061_v49 = vpop.f32.mrb[67].mxu1  ;;  %v8069_v50 = vpop.f32.mrb[71].mxu0  ;;  %v7300_v51 = vmul.f32 -1.442695, %v2212_v12 }
 0xb21   :  { %8866 = vpow2.f32 %v7298_v47 }
 0xb22   :  { %8868 = vpow2.f32 %v7300_v51  ;;  %v2416_v51 = vld [vmem:[#allocation2 + $0x6] sm:$0x3] }
 0xb24   :  { %v2253_v52 = vpop.f32.mrb[68].mxu1 }
 0xb25   :  { %v8076_v53 = vpop.f32.mrb[69].mxu1  ;;  %v2254_v61 = vadd.f32 %v9983_v23, %v2253_v52 }
 0xb26   :  { %v2256_v54 = vpop.f32.mrb[70].mxu1 }
 0xb27   :  { %v8077_v55 = vpop.f32.mrb[71].mxu1 }
 0xb2b   :  { %v8867_v56 = vpop.eup %8866 }
 0xb2c   :  { %v2169_v57 = vadd.f32 1.0, %v8867_v56  ;;  %v8869_v58 = vpop.eup %8868 }
 0xb2d   :  { %v2216_v60 = vadd.f32 1.0, %v8869_v58 }
 0xb2e   :  { %8870 = vrcp.f32 %v2169_v57 }
 0xb2f   :  { %8872 = vrcp.f32 %v2216_v60 }
 0xb38   :  { %v8871_v62 = vpop.eup %8870 }
 0xb39   :  { %v2259_v63 = vmul.f32 %v8871_v62, %v2254_v61  ;;  %v8873_v3 = vpop.eup %8872  ;;  %v2417_v61 = vld [vmem:[#allocation3 + $0x6] sm:$0x3] }
 0xb3a   :  { %v2262_v4 = vsub.f32 1.0, %v8873_v3  ;;  %v2264_v6 = vmul.f32 %v8873_v3, %v2116_v35 }
 0xb3b   :  { %v2260_v2 = vadd.f32 %v2259_v63, %v2120_v1 }
 0xb3d   :  { %8874 = vtanh.f32 %v2260_v2 }
 0xb47   :  { %v8875_v5 = vpop.eup %8874 }
 0xb48   :  { %v2263_v7 = vmul.f32 %v8875_v5, %v2262_v4 }
 0xb4a   :  { %v2265_v9 = vadd.f32 %v2264_v6, %v2263_v7 }
 0xb4c   :  { %2266 = vst.msk [vmem:[#allocation8 + $0x2] sm:$0x3] %vm663_vm4, %v2265_v9  ;;  %v2270_v10 = vpack.c.bf16 %v2265_v9, %v2265_v9 }
 0xb4e   :  { %8083 = vmatmul.mubr.msk.bf16.vlgmr.msra.gmra.mrb[72].mxu0 %vm332_vm3, %v2270_v10  ;;  %8091 = vmatmul.mubr.msk.bf16.vlgmr.msra.gmra.mrb[72].mxu1 %vm332_vm3, %v2270_v10 }
 0xb4f   :  { %8095 = vmatpush3.bf16.msra.mxu0 %v9941_v38  ;;  %8098 = vmatprep.mubr.msk.bf16.mxu0 %vm9393_vm0, %v9392_v0 }
 0xb50   :  { %8096 = vmatprep.subr.bf16.mxu0 %v9392_v0  ;;  %8103 = vmatpush3.bf16.msra.mxu1 %v9919_v34 }
 0xb51   :  { %8104 = vmatprep.subr.bf16.mxu1 %v9392_v0  ;;  %8106 = vmatprep.mubr.msk.bf16.mxu1 %vm9393_vm0, %v9392_v0 }
 0xb53   :  { %8097 = vmatpush3.bf16.msra.mxu0 %v9954_v40 }
 0xb54   :  { %8110 = vmatprep.subr.bf16.mxu0 %v9392_v0  ;;  %8105 = vmatpush3.bf16.msra.mxu1 %v9926_v36 }
 0xb55   :  { %8118 = vmatprep.subr.bf16.mxu1 %v9392_v0 }
 0xb56   :  { %8099 = vmatmul.mubr.msk.bf16.vlgmr.msra.gmra.mrb[76].mxu0 %vm332_vm3, %v2270_v10 }
 0xb57   :  { %8111 = vmatpush3.bf16.msra.mxu0 %v9936_v37  ;;  %8114 = vmatprep.mubr.msk.bf16.mxu0 %vm9393_vm0, %v9392_v0 }
 0xb58   :  { %8112 = vmatprep.subr.bf16.mxu0 %v9392_v0 }
 0xb5b   :  { %8113 = vmatpush3.bf16.msra.mxu0 %v9947_v39 }
 0xb5c   :  { %8126 = vmatprep.subr.bf16.mxu0 %v9392_v0 }
 0xc21   :  { %v2308_v18 = vpop.f32.mrb[72].mxu0  ;;  %v2355_v19 = vpop.f32.mrb[72].mxu1 }
 0xc22   :  { %v2314_v20 = vadd.f32 %v2308_v18, %v2267_v17  ;;  %v8084_v13 = vpop.f32.mrb[73].mxu0  ;;  %v8092_v16 = vpop.f32.mrb[73].mxu1  ;;  %v2361_v28 = vadd.f32 %v2355_v19, %v2268_v25 }
 0xc23   :  { %v2311_v21 = vpop.f32.mrb[74].mxu0  ;;  %v2358_v22 = vpop.f32.mrb[74].mxu1  ;;  %v2418_v13 = vld [vmem:[#allocation4 + $0x6] sm:$0x3] }
 0xc24   :  { %v7303_v24 = vmul.f32 -1.442695, %v2314_v20  ;;  %v8085_v26 = vpop.f32.mrb[75].mxu0  ;;  %v8093_v27 = vpop.f32.mrb[75].mxu1  ;;  %v7305_v29 = vmul.f32 -1.442695, %v2361_v28 }
 0xc26   :  { %8876 = vpow2.f32 %v7303_v24 }
 0xc27   :  { %8878 = vpow2.f32 %v7305_v29  ;;  %v2565_v29 = vld [vmem:[#allocation2 + $0x8] sm:$0x3] }
 0xc29   :  { %v2402_v30 = vpop.f32.mrb[76].mxu0 }
 0xc2a   :  { %v8100_v31 = vpop.f32.mrb[77].mxu0  ;;  %v2403_v42 = vadd.f32 %v9983_v23, %v2402_v30 }
 0xc2b   :  { %v2405_v32 = vpop.f32.mrb[78].mxu0 }
 0xc2c   :  { %v8101_v59 = vpop.f32.mrb[79].mxu0 }
 0xc30   :  { %v8877_v33 = vpop.eup %8876 }
 0xc31   :  { %v2318_v35 = vadd.f32 1.0, %v8877_v33  ;;  %v8879_v14 = vpop.eup %8878 }
 0xc32   :  { %v2365_v41 = vadd.f32 1.0, %v8879_v14 }
 0xc33   :  { %8880 = vrcp.f32 %v2318_v35 }
 0xc34   :  { %8882 = vrcp.f32 %v2365_v41 }
 0xc3d   :  { %v8881_v8 = vpop.eup %8880 }
 0xc3e   :  { %v2408_v43 = vmul.f32 %v8881_v8, %v2403_v42  ;;  %v8883_v11 = vpop.eup %8882  ;;  %v2566_v42 = vld [vmem:[#allocation3 + $0x8] sm:$0x3] }
 0xc3f   :  { %v2411_v46 = vsub.f32 1.0, %v8883_v11  ;;  %v2413_v48 = vmul.f32 %v8883_v11, %v2265_v9 }
 0xc40   :  { %v2409_v45 = vadd.f32 %v2408_v43, %v2269_v44 }
 0xc42   :  { %8884 = vtanh.f32 %v2409_v45 }
 0xc4c   :  { %v8885_v47 = vpop.eup %8884 }
 0xc4d   :  { %v2412_v49 = vmul.f32 %v8885_v47, %v2411_v46 }
 0xc4f   :  { %v2414_v50 = vadd.f32 %v2413_v48, %v2412_v49 }
 0xc51   :  { %2415 = vst.msk [vmem:[#allocation8 + $0x4] sm:$0x3] %vm663_vm4, %v2414_v50  ;;  %v2419_v12 = vpack.c.bf16 %v2414_v50, %v2414_v50 }
 0xc53   :  { %8107 = vmatmul.mubr.msk.bf16.vlgmr.msra.gmra.mrb[76].mxu1 %vm332_vm3, %v2419_v12  ;;  %8115 = vmatmul.mubr.msk.bf16.vlgmr.msra.gmra.mrb[80].mxu0 %vm332_vm3, %v2419_v12 }
 0xc54   :  { %8119 = vmatpush3.bf16.msra.mxu1 %v9941_v38  ;;  %8122 = vmatprep.mubr.msk.bf16.mxu1 %vm9393_vm0, %v9392_v0 }
 0xc55   :  { %8120 = vmatprep.subr.bf16.mxu1 %v9392_v0  ;;  %8127 = vmatpush3.bf16.msra.mxu0 %v9919_v34 }
 0xc56   :  { %8128 = vmatprep.subr.bf16.mxu0 %v9392_v0  ;;  %8130 = vmatprep.mubr.msk.bf16.mxu0 %vm9393_vm0, %v9392_v0 }
 0xc58   :  { %8121 = vmatpush3.bf16.msra.mxu1 %v9954_v40 }
 0xc59   :  { %8134 = vmatprep.subr.bf16.mxu1 %v9392_v0  ;;  %8129 = vmatpush3.bf16.msra.mxu0 %v9926_v36 }
 0xc5a   :  { %8142 = vmatprep.subr.bf16.mxu0 %v9392_v0 }
 0xc5b   :  { %8123 = vmatmul.mubr.msk.bf16.vlgmr.msra.gmra.mrb[80].mxu1 %vm332_vm3, %v2419_v12 }
 0xc5c   :  { %8135 = vmatpush3.bf16.msra.mxu1 %v9936_v37  ;;  %8138 = vmatprep.mubr.msk.bf16.mxu1 %vm9393_vm0, %v9392_v0 }
 0xc5d   :  { %8136 = vmatprep.subr.bf16.mxu1 %v9392_v0 }
 0xc60   :  { %8137 = vmatpush3.bf16.msra.mxu1 %v9947_v39 }
 0xc61   :  { %8150 = vmatprep.subr.bf16.mxu1 %v9392_v0 }
 0xd26   :  { %v2457_v52 = vpop.f32.mrb[76].mxu1  ;;  %v2504_v53 = vpop.f32.mrb[80].mxu0 }
 0xd27   :  { %v2463_v54 = vadd.f32 %v2457_v52, %v2416_v51  ;;  %v8108_v55 = vpop.f32.mrb[77].mxu1  ;;  %v8116_v56 = vpop.f32.mrb[81].mxu0  ;;  %v2510_v1 = vadd.f32 %v2504_v53, %v2417_v61 }
 0xd28   :  { %v2460_v57 = vpop.f32.mrb[78].mxu1  ;;  %v2507_v58 = vpop.f32.mrb[82].mxu0  ;;  %v2567_v55 = vld [vmem:[#allocation4 + $0x8] sm:$0x3] }
 0xd29   :  { %v7308_v60 = vmul.f32 -1.442695, %v2463_v54  ;;  %v8109_v62 = vpop.f32.mrb[79].mxu1  ;;  %v8117_v63 = vpop.f32.mrb[83].mxu0  ;;  %v7310_v2 = vmul.f32 -1.442695, %v2510_v1 }
 0xd2b   :  { %8886 = vpow2.f32 %v7308_v60 }
 0xd2c   :  { %8888 = vpow2.f32 %v7310_v2  ;;  %v2714_v2 = vld [vmem:[#allocation2 + $0xa] sm:$0x3] }
 0xd2e   :  { %v2551_v3 = vpop.f32.mrb[80].mxu1 }
 0xd2f   :  { %v8124_v4 = vpop.f32.mrb[81].mxu1  ;;  %v2552_v18 = vadd.f32 %v9983_v23, %v2551_v3 }
 0xd30   :  { %v2554_v5 = vpop.f32.mrb[82].mxu1 }
 0xd31   :  { %v8125_v6 = vpop.f32.mrb[83].mxu1 }
 0xd35   :  { %v8887_v7 = vpop.eup %8886 }
 0xd36   :  { %v2467_v9 = vadd.f32 1.0, %v8887_v7  ;;  %v8889_v10 = vpop.eup %8888 }
 0xd37   :  { %v2514_v17 = vadd.f32 1.0, %v8889_v10 }
 0xd38   :  { %8890 = vrcp.f32 %v2467_v9 }
 0xd39   :  { %8892 = vrcp.f32 %v2514_v17 }
 0xd42   :  { %v8891_v19 = vpop.eup %8890 }
 0xd43   :  { %v2557_v20 = vmul.f32 %v8891_v19, %v2552_v18  ;;  %v8893_v21 = vpop.eup %8892  ;;  %v2715_v18 = vld [vmem:[#allocation3 + $0xa] sm:$0x3] }
 0xd44   :  { %v2560_v22 = vsub.f32 1.0, %v8893_v21  ;;  %v2562_v25 = vmul.f32 %v8893_v21, %v2414_v50 }
 0xd45   :  { %v2558_v16 = vadd.f32 %v2557_v20, %v2418_v13 }
 0xd47   :  { %8894 = vtanh.f32 %v2558_v16 }
 0xd51   :  { %v8895_v24 = vpop.eup %8894 }
 0xd52   :  { %v2561_v26 = vmul.f32 %v8895_v24, %v2560_v22 }
 0xd54   :  { %v2563_v27 = vadd.f32 %v2562_v25, %v2561_v26 }
 0xd56   :  { %2564 = vst.msk [vmem:[#allocation8 + $0x6] sm:$0x3] %vm663_vm4, %v2563_v27  ;;  %v2568_v28 = vpack.c.bf16 %v2563_v27, %v2563_v27 }
 0xd58   :  { %8131 = vmatmul.mubr.msk.bf16.vlgmr.msra.gmra.mrb[84].mxu0 %vm332_vm3, %v2568_v28  ;;  %8139 = vmatmul.mubr.msk.bf16.vlgmr.msra.gmra.mrb[84].mxu1 %vm332_vm3, %v2568_v28 }
 0xd59   :  { %8143 = vmatpush3.bf16.msra.mxu0 %v9941_v38  ;;  %8146 = vmatprep.mubr.msk.bf16.mxu0 %vm9393_vm0, %v9392_v0 }
 0xd5a   :  { %8144 = vmatprep.subr.bf16.mxu0 %v9392_v0  ;;  %8151 = vmatpush3.bf16.msra.mxu1 %v9919_v34 }
 0xd5b   :  { %8152 = vmatprep.subr.bf16.mxu1 %v9392_v0  ;;  %8154 = vmatprep.mubr.msk.bf16.mxu1 %vm9393_vm0, %v9392_v0 }
 0xd5d   :  { %8145 = vmatpush3.bf16.msra.mxu0 %v9954_v40 }
 0xd5e   :  { %8158 = vmatprep.subr.bf16.mxu0 %v9392_v0  ;;  %8153 = vmatpush3.bf16.msra.mxu1 %v9926_v36 }
 0xd5f   :  { %8166 = vmatprep.subr.bf16.mxu1 %v9392_v0 }
 0xd60   :  { %8147 = vmatmul.mubr.msk.bf16.vlgmr.msra.gmra.mrb[88].mxu0 %vm332_vm3, %v2568_v28 }
 0xd61   :  { %8159 = vmatpush3.bf16.msra.mxu0 %v9936_v37  ;;  %8162 = vmatprep.mubr.msk.bf16.mxu0 %vm9393_vm0, %v9392_v0 }
 0xd62   :  { %8160 = vmatprep.subr.bf16.mxu0 %v9392_v0 }
 0xd65   :  { %8161 = vmatpush3.bf16.msra.mxu0 %v9947_v39 }
 0xd66   :  { %8174 = vmatprep.subr.bf16.mxu0 %v9392_v0 }
 0xe2b   :  { %v2606_v30 = vpop.f32.mrb[84].mxu0  ;;  %v2653_v31 = vpop.f32.mrb[84].mxu1 }
 0xe2c   :  { %v2612_v32 = vadd.f32 %v2606_v30, %v2565_v29  ;;  %v8132_v59 = vpop.f32.mrb[85].mxu0  ;;  %v8140_v33 = vpop.f32.mrb[85].mxu1  ;;  %v2659_v44 = vadd.f32 %v2653_v31, %v2566_v42 }
 0xe2d   :  { %v2609_v35 = vpop.f32.mrb[86].mxu0  ;;  %v2656_v14 = vpop.f32.mrb[86].mxu1  ;;  %v2716_v59 = vld [vmem:[#allocation4 + $0xa] sm:$0x3] }
 0xe2e   :  { %v7313_v41 = vmul.f32 -1.442695, %v2612_v32  ;;  %v8133_v8 = vpop.f32.mrb[87].mxu0  ;;  %v8141_v43 = vpop.f32.mrb[87].mxu1  ;;  %v7315_v45 = vmul.f32 -1.442695, %v2659_v44 }
 0xe30   :  { %8896 = vpow2.f32 %v7313_v41 }
 0xe31   :  { %8898 = vpow2.f32 %v7315_v45 }
 0xe33   :  { %v2700_v11 = vpop.f32.mrb[88].mxu0 }
 0xe34   :  { %v8148_v46 = vpop.f32.mrb[89].mxu0  ;;  %v2701_v52 = vadd.f32 %v9983_v23, %v2700_v11 }
 0xe35   :  { %v2703_v47 = vpop.f32.mrb[90].mxu0 }
 0xe36   :  { %v8149_v48 = vpop.f32.mrb[91].mxu0 }
 0xe3a   :  { %v8897_v49 = vpop.eup %8896 }
 0xe3b   :  { %v2616_v50 = vadd.f32 1.0, %v8897_v49  ;;  %v8899_v12 = vpop.eup %8898 }
 0xe3c   :  { %v2663_v51 = vadd.f32 1.0, %v8899_v12  ;;  %v2864_v12 = vld [vmem:[#allocation3 + $0xc] sm:$0x3] }
 0xe3d   :  { %8900 = vrcp.f32 %v2616_v50 }
 0xe3e   :  { %8902 = vrcp.f32 %v2663_v51 }
 0xe47   :  { %v8901_v53 = vpop.eup %8900 }
 0xe48   :  { %v2706_v54 = vmul.f32 %v8901_v53, %v2701_v52  ;;  %v8903_v57 = vpop.eup %8902 }
 0xe49   :  { %v2709_v58 = vsub.f32 1.0, %v8903_v57  ;;  %v2711_v61 = vmul.f32 %v8903_v57, %v2563_v27 }
 0xe4a   :  { %v2707_v56 = vadd.f32 %v2706_v54, %v2567_v55 }
 0xe4c   :  { %8904 = vtanh.f32 %v2707_v56 }
 0xe56   :  { %v8905_v60 = vpop.eup %8904 }
 0xe57   :  { %v2710_v62 = vmul.f32 %v8905_v60, %v2709_v58 }
 0xe59   :  { %v2712_v63 = vadd.f32 %v2711_v61, %v2710_v62 }
 0xe5b   :  { %2713 = vst.msk [vmem:[#allocation8 + $0x8] sm:$0x3] %vm663_vm4, %v2712_v63  ;;  %v2717_v1 = vpack.c.bf16 %v2712_v63, %v2712_v63 }
 0xe5d   :  { %8155 = vmatmul.mubr.msk.bf16.vlgmr.msra.gmra.mrb[88].mxu1 %vm332_vm3, %v2717_v1  ;;  %8163 = vmatmul.mubr.msk.bf16.vlgmr.msra.gmra.mrb[92].mxu0 %vm332_vm3, %v2717_v1 }
 0xe5e   :  { %8167 = vmatpush3.bf16.msra.mxu1 %v9941_v38  ;;  %8170 = vmatprep.mubr.msk.bf16.mxu1 %vm9393_vm0, %v9392_v0 }
 0xe5f   :  { %8168 = vmatprep.subr.bf16.mxu1 %v9392_v0  ;;  %8175 = vmatpush3.bf16.msra.mxu0 %v9919_v34 }
 0xe60   :  { %8176 = vmatprep.subr.bf16.mxu0 %v9392_v0  ;;  %8178 = vmatprep.mubr.msk.bf16.mxu0 %vm9393_vm0, %v9392_v0 }
 0xe62   :  { %8169 = vmatpush3.bf16.msra.mxu1 %v9954_v40 }
 0xe63   :  { %8182 = vmatprep.subr.bf16.mxu1 %v9392_v0  ;;  %8177 = vmatpush3.bf16.msra.mxu0 %v9926_v36 }
 0xe64   :  { %8190 = vmatprep.subr.bf16.mxu0 %v9392_v0 }
 0xe65   :  { %8171 = vmatmul.mubr.msk.bf16.vlgmr.msra.gmra.mrb[92].mxu1 %vm332_vm3, %v2717_v1 }
 0xe66   :  { %8183 = vmatpush3.bf16.msra.mxu1 %v9936_v37  ;;  %8186 = vmatprep.mubr.msk.bf16.mxu1 %vm9393_vm0, %v9392_v0 }
 0xe67   :  { %8184 = vmatprep.subr.bf16.mxu1 %v9392_v0 }
 0xe6a   :  { %8185 = vmatpush3.bf16.msra.mxu1 %v9947_v39 }
 0xe6b   :  { %8198 = vmatprep.subr.bf16.mxu1 %v9392_v0 }
 0xf30   :  { %v2755_v3 = vpop.f32.mrb[88].mxu1  ;;  %v2802_v4 = vpop.f32.mrb[92].mxu0 }
 0xf31   :  { %v2761_v5 = vadd.f32 %v2755_v3, %v2714_v2  ;;  %v8156_v6 = vpop.f32.mrb[89].mxu1  ;;  %v8164_v7 = vpop.f32.mrb[93].mxu0  ;;  %v2808_v13 = vadd.f32 %v2802_v4, %v2715_v18  ;;  %v2865_v2 = vld [vmem:[#allocation4 + $0xc] sm:$0x3] }
 0xf32   :  { %v2758_v9 = vpop.f32.mrb[90].mxu1  ;;  %v2805_v10 = vpop.f32.mrb[94].mxu0  ;;  %v8729_v18 = vld [vmem:[%s10874_s13] sm:$0xff]  }
 0xf33   :  { %v7318_v17 = vmul.f32 -1.442695, %v2761_v5  ;;  %v8157_v19 = vpop.f32.mrb[91].mxu1  ;;  %v8165_v20 = vpop.f32.mrb[95].mxu0  ;;  %v7320_v16 = vmul.f32 -1.442695, %v2808_v13 }
 0xf34   :  { %v3012_v19 = vld [vmem:[#allocation2 + $0xe] sm:$0x3] }
 0xf35   :  { %8906 = vpow2.f32 %v7318_v17 }
 0xf36   :  { %8908 = vpow2.f32 %v7320_v16 }
 0xf38   :  { %v2849_v21 = vpop.f32.mrb[92].mxu1 }
 0xf39   :  { %v8172_v22 = vpop.f32.mrb[93].mxu1  ;;  %v2850_v30 = vadd.f32 %v9983_v23, %v2849_v21 }
 0xf3a   :  { %v2852_v24 = vpop.f32.mrb[94].mxu1 }
 0xf3b   :  { %v8173_v25 = vpop.f32.mrb[95].mxu1 }
 0xf3f   :  { %v8907_v26 = vpop.eup %8906 }
 0xf40   :  { %v2765_v27 = vadd.f32 1.0, %v8907_v26  ;;  %v8909_v28 = vpop.eup %8908  ;;  %v3013_v26 = vld [vmem:[#allocation3 + $0xe] sm:$0x3] }
 0xf41   :  { %v2812_v29 = vadd.f32 1.0, %v8909_v28 }
 0xf42   :  { %8910 = vrcp.f32 %v2765_v27 }
 0xf43   :  { %8912 = vrcp.f32 %v2812_v29 }
 0xf4c   :  { %v8911_v31 = vpop.eup %8910 }
 0xf4d   :  { %v2855_v32 = vmul.f32 %v8911_v31, %v2850_v30  ;;  %v8913_v35 = vpop.eup %8912 }
 0xf4e   :  { %v2858_v14 = vsub.f32 1.0, %v8913_v35  ;;  %v2860_v42 = vmul.f32 %v8913_v35, %v2712_v63 }
 0xf4f   :  { %v2856_v33 = vadd.f32 %v2855_v32, %v2716_v59 }
 0xf51   :  { %8914 = vtanh.f32 %v2856_v33 }
 0xf5b   :  { %v8915_v41 = vpop.eup %8914 }
 0xf5c   :  { %v2859_v8 = vmul.f32 %v8915_v41, %v2858_v14 }
 0xf5e   :  { %v2861_v43 = vadd.f32 %v2860_v42, %v2859_v8 }
 0xf60   :  { %2862 = vst.msk [vmem:[#allocation8 + $0xa] sm:$0x3] %vm663_vm4, %v2861_v43  ;;  %v2866_v44 = vpack.c.bf16 %v2861_v43, %v2861_v43 }
 0xf62   :  { %8179 = vmatmul.mubr.msk.bf16.vlgmr.msra.gmra.mrb[96].mxu0 %vm332_vm3, %v2866_v44  ;;  %8187 = vmatmul.mubr.msk.bf16.vlgmr.msra.gmra.mrb[96].mxu1 %vm332_vm3, %v2866_v44 }
 0xf63   :  { %8191 = vmatpush3.bf16.msra.mxu0 %v9941_v38  ;;  %8194 = vmatprep.mubr.msk.bf16.mxu0 %vm9393_vm0, %v9392_v0 }
 0xf64   :  { %8192 = vmatprep.subr.bf16.mxu0 %v9392_v0  ;;  %8199 = vmatpush3.bf16.msra.mxu1 %v9919_v34  ;;  %v2863_v34 = vld [vmem:[#allocation2 + $0xc] sm:$0x3] }
 0xf65   :  { %8200 = vmatprep.subr.bf16.mxu1 %v9392_v0  ;;  %8202 = vmatprep.mubr.msk.bf16.mxu1 %vm9393_vm0, %v9392_v0 }
 0xf67   :  { %8193 = vmatpush3.bf16.msra.mxu0 %v9954_v40 }
 0xf68   :  { %8206 = vmatprep.subr.bf16.mxu0 %v9392_v0  ;;  %8201 = vmatpush3.bf16.msra.mxu1 %v9926_v36 }
 0xf69   :  { %8214 = vmatprep.subr.bf16.mxu1 %v9392_v0 }
 0xf6a   :  { %8195 = vmatmul.mubr.msk.bf16.vlgmr.msra.gmra.mrb[100].mxu0 %vm332_vm3, %v2866_v44 }
 0xf6b   :  { %8207 = vmatpush3.bf16.msra.mxu0 %v9936_v37  ;;  %8210 = vmatprep.mubr.msk.bf16.mxu0 %vm9393_vm0, %v9392_v0 }
 0xf6c   :  { %8208 = vmatprep.subr.bf16.mxu0 %v9392_v0 }
 0xf6f   :  { %8209 = vmatpush3.bf16.msra.mxu0 %v9947_v39 }
 0xf70   :  { %8222 = vmatprep.subr.bf16.mxu0 %v9392_v0 }
0x1035   :  { %v2904_v45 = vpop.f32.mrb[96].mxu0  ;;  %v2951_v11 = vpop.f32.mrb[96].mxu1 }
0x1036   :  { %v2910_v46 = vadd.f32 %v2904_v45, %v2863_v34  ;;  %v8180_v36 = vpop.f32.mrb[97].mxu0  ;;  %v8188_v47 = vpop.f32.mrb[97].mxu1  ;;  %v2957_v52 = vadd.f32 %v2951_v11, %v2864_v12  ;;  %v3014_v34 = vld [vmem:[#allocation4 + $0xe] sm:$0x3] }
0x1037   :  { %v2907_v48 = vpop.f32.mrb[98].mxu0  ;;  %v2954_v49 = vpop.f32.mrb[98].mxu1 }
0x1038   :  { %v7323_v50 = vmul.f32 -1.442695, %v2910_v46  ;;  %v8181_v37 = vpop.f32.mrb[99].mxu0  ;;  %v8189_v51 = vpop.f32.mrb[99].mxu1  ;;  %v7325_v53 = vmul.f32 -1.442695, %v2957_v52 }
0x103a   :  { %8916 = vpow2.f32 %v7323_v50  ;;  %v3161_v50 = vld [vmem:[#allocation8] sm:$0xff] }
0x103b   :  { %8918 = vpow2.f32 %v7325_v53 }
0x103d   :  { %v2998_v54 = vpop.f32.mrb[100].mxu0 }
0x103e   :  { %v8196_v55 = vpop.f32.mrb[101].mxu0  ;;  %v2999_v62 = vadd.f32 %v9983_v23, %v2998_v54 }
0x103f   :  { %v3001_v39 = vpop.f32.mrb[102].mxu0 }
0x1040   :  { %v8197_v56 = vpop.f32.mrb[103].mxu0 }
0x1044   :  { %v8917_v57 = vpop.eup %8916 }
0x1045   :  { %v2914_v58 = vadd.f32 1.0, %v8917_v57  ;;  %v8919_v60 = vpop.eup %8918 }
0x1046   :  { %v2961_v61 = vadd.f32 1.0, %v8919_v60 }
0x1047   :  { %8920 = vrcp.f32 %v2914_v58 }
0x1048   :  { %8922 = vrcp.f32 %v2961_v61 }
0x1051   :  { %v8921_v63 = vpop.eup %8920 }
0x1052   :  { %v3004_v1 = vmul.f32 %v8921_v63, %v2999_v62  ;;  %v8923_v4 = vpop.eup %8922 }
0x1053   :  { %v3007_v5 = vsub.f32 1.0, %v8923_v4  ;;  %v3009_v7 = vmul.f32 %v8923_v4, %v2861_v43 }
0x1054   :  { %v3005_v3 = vadd.f32 %v3004_v1, %v2865_v2 }
0x1056   :  { %8924 = vtanh.f32 %v3005_v3 }
0x1060   :  { %v8925_v6 = vpop.eup %8924 }
0x1061   :  { %v3008_v9 = vmul.f32 %v8925_v6, %v3007_v5 }
0x1063   :  { %v3010_v10 = vadd.f32 %v3009_v7, %v3008_v9 }
0x1065   :  { %3011 = vst.msk [vmem:[#allocation8 + $0xc] sm:$0x3] %vm663_vm4, %v3010_v10  ;;  %v3015_v17 = vpack.c.bf16 %v3010_v10, %v3010_v10 }
0x1067   :  { %8203 = vmatmul.mubr.msk.bf16.vlgmr.msra.gmra.mrb[100].mxu1 %vm332_vm3, %v3015_v17  ;;  %8211 = vmatmul.mubr.msk.bf16.vlgmr.msra.gmra.mrb[104].mxu0 %vm332_vm3, %v3015_v17 }
0x1068   :  { %8215 = vmatpush3.bf16.msra.mxu1 %v9941_v38  ;;  %8218 = vmatprep.mubr.msk.bf16.mxu1 %vm9393_vm0, %v9392_v0  ;;  %v8730_v38 = vld [vmem:[%s10874_s13 + $0x8] sm:$0xff]   ;;  %s9416_s13 = smov 44  }
0x1069   :  { %8216 = vmatprep.subr.bf16.mxu1 %v9392_v0  ;;  %8226 = vmatprep.mubr.msk.bf16.mxu0 %vm9393_vm0, %v9392_v0 }
0x106a   :  { %8223 = vmatpush3.bf16.msra.mxu0 %v8729_v18 }
0x106b   :  { %8224 = vmatprep.subr.bf16.mxu0 %v9392_v0 }
0x106c   :  { %8217 = vmatpush3.bf16.msra.mxu1 %v9954_v40 }
0x106d   :  { %8230 = vmatprep.subr.bf16.mxu1 %v9392_v0 }
0x106e   :  { %8225 = vmatpush3.bf16.msra.mxu0 %v8730_v38 }
0x106f   :  { %8219 = vmatmul.mubr.msk.bf16.vlgmr.msra.gmra.mrb[104].mxu1 %vm332_vm3, %v3015_v17  ;;  %8236 = vmatprep.subr.bf16.mxu0 %v9392_v0 }
0x1070   :  { %8232 = vmatprep.mubr.msk.bf16.mxu1 %vm9393_vm0, %v9392_v0 }
0x113a   :  { %v3053_v20 = vpop.f32.mrb[100].mxu1  ;;  %v3100_v13 = vpop.f32.mrb[104].mxu0 }
0x113b   :  { %v3059_v16 = vadd.f32 %v3053_v20, %v3012_v19  ;;  %v8204_v40 = vpop.f32.mrb[101].mxu1  ;;  %v8212_v21 = vpop.f32.mrb[105].mxu0  ;;  %v3106_v29 = vadd.f32 %v3100_v13, %v3013_v26 }
0x113c   :  { %v3056_v22 = vpop.f32.mrb[102].mxu1  ;;  %v3103_v24 = vpop.f32.mrb[106].mxu0 }
0x113d   :  { %v7328_v25 = vmul.f32 -1.442695, %v3059_v16  ;;  %v8205_v27 = vpop.f32.mrb[103].mxu1  ;;  %v8213_v28 = vpop.f32.mrb[107].mxu0  ;;  %v7330_v30 = vmul.f32 -1.442695, %v3106_v29 }
0x113f   :  { %8926 = vpow2.f32 %v7328_v25 }
0x1140   :  { %8928 = vpow2.f32 %v7330_v30 }
0x1142   :  { %v3147_v31 = vpop.f32.mrb[104].mxu1 }
0x1143   :  { %v8220_v32 = vpop.f32.mrb[105].mxu1  ;;  %v3148_v8 = vadd.f32 %v9983_v23, %v3147_v31  ;;  %v7332_v23 = vld [vmem:[#allocation21] ss:$0 sm:$0xff] }
0x1144   :  { %v3150_v59 = vpop.f32.mrb[106].mxu1 }
0x1145   :  { %v8221_v33 = vpop.f32.mrb[107].mxu1 }
0x1149   :  { %v8927_v35 = vpop.eup %8926 }
0x114a   :  { %v3063_v14 = vadd.f32 1.0, %v8927_v35  ;;  %v8929_v41 = vpop.eup %8928 }
0x114b   :  { %v3110_v42 = vadd.f32 1.0, %v8929_v41 }
0x114c   :  { %8930 = vrcp.f32 %v3063_v14 }
0x114d   :  { %8932 = vrcp.f32 %v3110_v42 }
0x1156   :  { %v8931_v43 = vpop.eup %8930 }
0x1157   :  { %v3153_v44 = vmul.f32 %v8931_v43, %v3148_v8  ;;  %v8933_v11 = vpop.eup %8932 }
0x1158   :  { %v3156_v46 = vsub.f32 1.0, %v8933_v11  ;;  %v3158_v47 = vmul.f32 %v8933_v11, %v3010_v10 }
0x1159   :  { %v3154_v45 = vadd.f32 %v3153_v44, %v3014_v34 }
0x115b   :  { %8934 = vtanh.f32 %v3154_v45 }
0x1165   :  { %v8935_v36 = vpop.eup %8934 }
0x1166   :  { %v3157_v48 = vmul.f32 %v8935_v36, %v3156_v46 }
0x1168   :  { %v3159_v49 = vadd.f32 %v3158_v47, %v3157_v48 }
0x116a   :  { %3160 = vst.msk [vmem:[#allocation8 + $0xe] sm:$0x3] %vm663_vm4, %v3159_v49 }
0x1171   :  { %v3162_v12 = vld [vmem:[#allocation8 + $0x8] sm:$0xff] }
0x1172   :  { %v3163_v37 = vpack.c.bf16 %v3162_v12, %v3161_v50 }
0x1174   :  { %8227 = vmatmul.mubr.msk.bf16.vlgmr.msra.gmra.mrb[108].mxu0 %vm332_vm3, %v3163_v37 }
0x1175   :  { %8238 = vmatprep.mubr.msk.bf16.mxu0 %vm9393_vm0, %v9392_v0 }
0x1247   :  { %v3224_v51 = vpop.f32.mrb[108].mxu0 }
0x1248   :  { %v3225_v52 = vadd.f32 %v7332_v23, %v3224_v51  ;;  %v8228_v53 = vpop.f32.mrb[109].mxu0 }
0x1249   :  { %v3227_v54 = vpop.f32.mrb[110].mxu0 }
0x124a   :  { %3232 = vst.msk [vmem:[#allocation9] sm:$0xff] %vm3231_vm5, %v3225_v52  ;;  %v3228_v55 = vadd.f32 %v7332_v23, %v3227_v54  ;;  %v8229_v39 = vpop.f32.mrb[111].mxu0 }
0x124c   :  { %3233 = vst.msk [vmem:[#allocation9 + $0x8] sm:$0xff] %vm3231_vm5, %v3228_v55 }
0x1253   :  { %v3234_v56 = vld [vmem:[#allocation9] ss:$2 sm:$0xff]  ;;  %v4160_v58 = vld [vmem:[#allocation9 + $0x1] ss:$2 sm:$0xff] }
0x1254   :  { %v10147_v57 = vpack.c.bf16 %v3234_v56, %v3234_v56  ;;  %v10166_v60 = vpack.c.bf16 %v4160_v58, %v4160_v58 }
0x1256   :  { %3348 = vrot.lane.b32.xlu1 %v10147_v57, %s9395_s14  ;;  %3237 = vrot.lane.b32.xlu0 %v10147_v57, %s9396_s20 }
0x125a   :  { %3460 = vrot.lane.b32.xlu1 %v10147_v57, %s9397_s24  ;;  %3350 = vrot.lane.b32.xlu0 %v10147_v57, %s9398_s17 }
0x125e   :  { %3570 = vrot.lane.b32.xlu1 %v10147_v57, %s9399_s28  ;;  %3458 = vrot.lane.b32.xlu0 %v10147_v57, %s9400_s2 }
0x1262   :  { %3680 = vrot.lane.b32.xlu1 %v10147_v57, %s9401_s7  ;;  %3568 = vrot.lane.b32.xlu0 %v10147_v57, %s9402_s21 }
0x1266   :  { %3790 = vrot.lane.b32.xlu1 %v10147_v57, %s9403_s10  ;;  %3678 = vrot.lane.b32.xlu0 %v10147_v57, %s9404_s12 }
0x126a   :  { %3900 = vrot.lane.b32.xlu1 %v10147_v57, %s9405_s11  ;;  %3788 = vrot.lane.b32.xlu0 %v10147_v57, %s9406_s15 }
0x126e   :  { %4010 = vrot.lane.b32.xlu1 %v10147_v57, %s9407_s19  ;;  %3898 = vrot.lane.b32.xlu0 %v10147_v57, %s9408_s27 }
0x1272   :  { %4163 = vrot.lane.b32.xlu1 %v10166_v60, %s9396_s20  ;;  %4008 = vrot.lane.b32.xlu0 %v10147_v57, %s9409_s30  ;;  %s9419_s20 = smov 24  }
0x1276   :  { %4271 = vrot.lane.b32.xlu1 %v10166_v60, %s9395_s14  ;;  %4273 = vrot.lane.b32.xlu0 %v10166_v60, %s9398_s17  ;;  %s9418_s14 = smov 20   ;;  %s10878_s17 = sld [smem:[#allocation45_spill]] }
0x127a   :  { %4381 = vrot.lane.b32.xlu1 %v10166_v60, %s9400_s2  ;;  %4383 = vrot.lane.b32.xlu0 %v10166_v60, %s9397_s24  ;;  %s9420_s24 = smov 28   ;;  %s10880_s2 = sld [smem:[#allocation39_spill]] }
0x127e   :  { %4491 = vrot.lane.b32.xlu1 %v10166_v60, %s9402_s21  ;;  %4493 = vrot.lane.b32.xlu0 %v10166_v60, %s9399_s28  ;;  %s10879_s28 = sld [smem:[#allocation38_spill]]  ;;  %s10882_s21 = sld [smem:[#allocation42_spill]] }
0x1282   :  { %4601 = vrot.lane.b32.xlu1 %v10166_v60, %s9404_s12  ;;  %4603 = vrot.lane.b32.xlu0 %v10166_v60, %s9401_s7  ;;  %s10881_s7 = sld [smem:[#allocation40_spill]]  ;;  %s10884_s12 = sld [smem:[#allocation44_spill]] }
0x1286   :  { %4711 = vrot.lane.b32.xlu1 %v10166_v60, %s9406_s15  ;;  %4713 = vrot.lane.b32.xlu0 %v10166_v60, %s9403_s10  ;;  %s10883_s10 = sld [smem:[#allocation43_spill]] }
0x128a   :  { %4821 = vrot.lane.b32.xlu1 %v10166_v60, %s9408_s27  ;;  %4823 = vrot.lane.b32.xlu0 %v10166_v60, %s9405_s11 }
0x128e   :  { %4931 = vrot.lane.b32.xlu1 %v10166_v60, %s9409_s30  ;;  %4933 = vrot.lane.b32.xlu0 %v10166_v60, %s9407_s19 }
0x1292   :  { %3410 = vrot.lane.b32.xlu1 %v10147_v57, %s9410_s16  ;;  %3299 = vrot.lane.b32.xlu0 %v10147_v57, %s9385_s1 }
0x1296   :  { %3520 = vrot.lane.b32.xlu1 %v10147_v57, %s9411_s18 }
0x12c8   :  { %v3238_v61 = vpop.permute.xlu0 %3237  ;;  %v3349_v1 = vpop.permute.xlu1 %3348 }
0x12c9   :  { %v3244_v62 = vsel %vm3239_vm6, %v3238_v61, 0 }
0x12ca   :  { %8231 = vmatpush3.bf16.xpose.msra.mxu1 %v3244_v62 }
0x12cb   :  { %8242 = vmatprep.subr.bf16.mxu1 %v9392_v0 }
0x12cc   :  { %v3351_v63 = vpop.permute.xlu0 %3350  ;;  %v3461_v5 = vpop.permute.xlu1 %3460 }
0x12cd   :  { %v3356_v3 = vsel %vm3239_vm6, %v3351_v63, 0  ;;  %v3466_v7 = vsel %vm3239_vm6, %v3461_v5, 0 }
0x12d0   :  { %v3459_v2 = vpop.permute.xlu0 %3458  ;;  %v3571_v10 = vpop.permute.xlu1 %3570 }
0x12d1   :  { %8233 = vmatmul.mubr.msk.bf16.vlgmr.msra.gmra.mrb[108].mxu1 %vm3239_vm6, %v10147_v57  ;;  %v3576_v18 = vsel %vm3239_vm6, %v3571_v10, 0 }
0x12d2   :  { %8243 = vmatpush3.bf16.xpose.msra.mxu1 %v3356_v3  ;;  %8244 = vmatprep.mubr.msk.bf16.mxu1 %vm9393_vm0, %v9392_v0 }
0x12d3   :  { %8254 = vmatprep.subr.bf16.mxu1 %v9392_v0 }
0x12d4   :  { %v3569_v4 = vpop.permute.xlu0 %3568  ;;  %v3681_v19 = vpop.permute.xlu1 %3680 }
0x12d5   :  { %v3686_v13 = vsel %vm3239_vm6, %v3681_v19, 0 }
0x12d8   :  { %v3679_v6 = vpop.permute.xlu0 %3678  ;;  %v3791_v40 = vpop.permute.xlu1 %3790 }
0x12d9   :  { %8245 = vmatmul.mubr.msk.bf16.vlgmr.msra.gmra.mrb[112].mxu1 %vm3239_vm6, %v3349_v1  ;;  %v3796_v22 = vsel %vm3239_vm6, %v3791_v40, 0 }
0x12da   :  { %8255 = vmatpush3.bf16.xpose.msra.mxu1 %v3466_v7  ;;  %8256 = vmatprep.mubr.msk.bf16.mxu1 %vm9393_vm0, %v9392_v0 }
0x12db   :  { %8266 = vmatprep.subr.bf16.mxu1 %v9392_v0 }
0x12dc   :  { %v3789_v9 = vpop.permute.xlu0 %3788  ;;  %v3901_v25 = vpop.permute.xlu1 %3900 }
0x12dd   :  { %v3906_v27 = vsel %vm3239_vm6, %v3901_v25, 0 }
0x12e0   :  { %v3899_v17 = vpop.permute.xlu0 %3898  ;;  %v4011_v29 = vpop.permute.xlu1 %4010 }
0x12e1   :  { %8257 = vmatmul.mubr.msk.bf16.vlgmr.msra.gmra.mrb[116].mxu1 %vm3239_vm6, %v3459_v2  ;;  %v4016_v31 = vsel %vm3239_vm6, %v4011_v29, 0 }
0x12e2   :  { %8267 = vmatpush3.bf16.xpose.msra.mxu1 %v3576_v18  ;;  %8268 = vmatprep.mubr.msk.bf16.mxu1 %vm9393_vm0, %v9392_v0 }
0x12e3   :  { %8278 = vmatprep.subr.bf16.mxu1 %v9392_v0 }
0x12e4   :  { %v4009_v38 = vpop.permute.xlu0 %4008  ;;  %v4164_v33 = vpop.permute.xlu1 %4163 }
0x12e5   :  { %v4169_v35 = vsel %vm3239_vm6, %v4164_v33, 0 }
0x12e8   :  { %v4274_v20 = vpop.permute.xlu0 %4273  ;;  %v4272_v41 = vpop.permute.xlu1 %4271 }
0x12e9   :  { %8269 = vmatmul.mubr.msk.bf16.vlgmr.msra.gmra.mrb[120].mxu1 %vm3239_vm6, %v3569_v4  ;;  %v4279_v14 = vsel %vm3239_vm6, %v4274_v20, 0 }
0x12ea   :  { %8279 = vmatpush3.bf16.xpose.msra.mxu1 %v3686_v13  ;;  %8280 = vmatprep.mubr.msk.bf16.mxu1 %vm9393_vm0, %v9392_v0 }
0x12eb   :  { %8290 = vmatprep.subr.bf16.mxu1 %v9392_v0 }
0x12ec   :  { %v4384_v16 = vpop.permute.xlu0 %4383  ;;  %v4382_v8 = vpop.permute.xlu1 %4381 }
0x12ed   :  { %v4389_v42 = vsel %vm3239_vm6, %v4384_v16, 0 }
0x12f0   :  { %v4494_v21 = vpop.permute.xlu0 %4493  ;;  %v4492_v44 = vpop.permute.xlu1 %4491 }
0x12f1   :  { %8281 = vmatmul.mubr.msk.bf16.vlgmr.msra.gmra.mrb[124].mxu1 %vm3239_vm6, %v3679_v6  ;;  %v4499_v43 = vsel %vm3239_vm6, %v4494_v21, 0 }
0x12f2   :  { %8291 = vmatpush3.bf16.xpose.msra.mxu1 %v3796_v22  ;;  %8292 = vmatprep.mubr.msk.bf16.mxu1 %vm9393_vm0, %v9392_v0 }
0x12f3   :  { %8302 = vmatprep.subr.bf16.mxu1 %v9392_v0 }
0x12f4   :  { %v4604_v24 = vpop.permute.xlu0 %4603  ;;  %v4602_v45 = vpop.permute.xlu1 %4601 }
0x12f5   :  { %v4609_v34 = vsel %vm3239_vm6, %v4604_v24, 0 }
0x12f8   :  { %v4714_v26 = vpop.permute.xlu0 %4713  ;;  %v4712_v46 = vpop.permute.xlu1 %4711 }
0x12f9   :  { %8293 = vmatmul.mubr.msk.bf16.vlgmr.msra.gmra.mrb[128].mxu1 %vm3239_vm6, %v3789_v9  ;;  %v4719_v11 = vsel %vm3239_vm6, %v4714_v26, 0 }
0x12fa   :  { %8303 = vmatpush3.bf16.xpose.msra.mxu1 %v3906_v27  ;;  %8304 = vmatprep.mubr.msk.bf16.mxu1 %vm9393_vm0, %v9392_v0 }
0x12fb   :  { %8314 = vmatprep.subr.bf16.mxu1 %v9392_v0 }
0x12fc   :  { %v4824_v28 = vpop.permute.xlu0 %4823  ;;  %v4822_v47 = vpop.permute.xlu1 %4821 }
0x12fd   :  { %v4829_v36 = vsel %vm3239_vm6, %v4824_v28, 0 }
0x1300   :  { %v4934_v30 = vpop.permute.xlu0 %4933  ;;  %v4932_v49 = vpop.permute.xlu1 %4931 }
0x1301   :  { %8305 = vmatmul.mubr.msk.bf16.vlgmr.msra.gmra.mrb[132].mxu1 %vm3239_vm6, %v3899_v17  ;;  %v4939_v48 = vsel %vm3239_vm6, %v4934_v30, 0 }
0x1302   :  { %8315 = vmatpush3.bf16.xpose.msra.mxu1 %v4016_v31  ;;  %8316 = vmatprep.mubr.msk.bf16.mxu1 %vm9393_vm0, %v9392_v0 }
0x1303   :  { %8326 = vmatprep.subr.bf16.mxu1 %v9392_v0 }
0x1304   :  { %v3300_v32 = vpop.permute.xlu0 %3299 }
0x1305   :  { %v3306_v59 = vsel %vm3304_vm7, %v3300_v32, 0 }
0x1306   :  { %8237 = vmatpush3.bf16.msra.mxu0 %v3306_v59 }
0x1307   :  { %8248 = vmatprep.subr.bf16.mxu0 %v9392_v0 }
0x1309   :  { %8317 = vmatmul.mubr.msk.bf16.vlgmr.msra.gmra.mrb[136].mxu1 %vm3239_vm6, %v4009_v38 }
0x130a   :  { %8327 = vmatpush3.bf16.xpose.msra.mxu1 %v4169_v35  ;;  %8328 = vmatprep.mubr.msk.bf16.mxu1 %vm9393_vm0, %v9392_v0 }
0x130b   :  { %8338 = vmatprep.subr.bf16.mxu1 %v9392_v0 }
0x1311   :  { %8329 = vmatmul.mubr.msk.bf16.vlgmr.msra.gmra.mrb[140].mxu1 %vm3239_vm6, %v10166_v60 }
0x1312   :  { %8339 = vmatpush3.bf16.xpose.msra.mxu1 %v4279_v14  ;;  %8340 = vmatprep.mubr.msk.bf16.mxu1 %vm9393_vm0, %v9392_v0 }
0x1313   :  { %8350 = vmatprep.subr.bf16.mxu1 %v9392_v0 }
0x1319   :  { %8341 = vmatmul.mubr.msk.bf16.vlgmr.msra.gmra.mrb[144].mxu1 %vm3239_vm6, %v4272_v41 }
0x131a   :  { %8351 = vmatpush3.bf16.xpose.msra.mxu1 %v4389_v42  ;;  %8352 = vmatprep.mubr.msk.bf16.mxu1 %vm9393_vm0, %v9392_v0 }
0x131b   :  { %8362 = vmatprep.subr.bf16.mxu1 %v9392_v0 }
0x1321   :  { %8353 = vmatmul.mubr.msk.bf16.vlgmr.msra.gmra.mrb[148].mxu1 %vm3239_vm6, %v4382_v8 }
0x1322   :  { %8363 = vmatpush3.bf16.xpose.msra.mxu1 %v4499_v43  ;;  %8364 = vmatprep.mubr.msk.bf16.mxu1 %vm9393_vm0, %v9392_v0 }
0x1323   :  { %8374 = vmatprep.subr.bf16.mxu1 %v9392_v0 }
0x1329   :  { %8365 = vmatmul.mubr.msk.bf16.vlgmr.msra.gmra.mrb[152].mxu1 %vm3239_vm6, %v4492_v44 }
0x132a   :  { %8375 = vmatpush3.bf16.xpose.msra.mxu1 %v4609_v34  ;;  %8376 = vmatprep.mubr.msk.bf16.mxu1 %vm9393_vm0, %v9392_v0 }
0x132b   :  { %8386 = vmatprep.subr.bf16.mxu1 %v9392_v0 }
0x1331   :  { %8377 = vmatmul.mubr.msk.bf16.vlgmr.msra.gmra.mrb[156].mxu1 %vm3239_vm6, %v4602_v45 }
0x1332   :  { %8387 = vmatpush3.bf16.xpose.msra.mxu1 %v4719_v11  ;;  %8388 = vmatprep.mubr.msk.bf16.mxu1 %vm9393_vm0, %v9392_v0 }
0x1333   :  { %8398 = vmatprep.subr.bf16.mxu1 %v9392_v0 }
0x1339   :  { %8389 = vmatmul.mubr.msk.bf16.vlgmr.msra.gmra.mrb[160].mxu1 %vm3239_vm6, %v4712_v46 }
0x133a   :  { %8399 = vmatpush3.bf16.xpose.msra.mxu1 %v4829_v36  ;;  %8400 = vmatprep.mubr.msk.bf16.mxu1 %vm9393_vm0, %v9392_v0 }
0x133b   :  { %8410 = vmatprep.subr.bf16.mxu1 %v9392_v0 }
0x1341   :  { %8401 = vmatmul.mubr.msk.bf16.vlgmr.msra.gmra.mrb[164].mxu1 %vm3239_vm6, %v4822_v47 }
0x1342   :  { %8411 = vmatpush3.bf16.xpose.msra.mxu1 %v4939_v48  ;;  %8412 = vmatprep.mubr.msk.bf16.mxu1 %vm9393_vm0, %v9392_v0 }
0x1343   :  { %8422 = vmatprep.subr.bf16.mxu1 %v9392_v0 }
0x1349   :  { %8413 = vmatmul.mubr.msk.bf16.vlgmr.msra.gmra.mrb[168].mxu1 %vm3239_vm6, %v4932_v49 }
0x134a   :  { %8426 = vmatprep.mubr.msk.bf16.mxu1 %vm9393_vm0, %v9392_v0 }
0x13a4   :  { %v10277_v50 = vpop.f32.mrb[108].mxu1 }
0x13a5   :  { %v8234_v12 = vpop.f32.mrb[109].mxu1  ;;  %v3287_v37 = vsel %vm3286_vm8, %v10277_v50, -inf }
0x13a6   :  { %3288 = vmax.xlane.f32.xlu0 %v3287_v37  ;;  %v3283_v23 = vpop.f32.mrb[110].mxu1 }
0x13a7   :  { %v8235_v51 = vpop.f32.mrb[111].mxu1 }
0x13ac   :  { %v10281_v52 = vpop.f32.mrb[112].mxu1 }
0x13ad   :  { %v8246_v53 = vpop.f32.mrb[113].mxu1  ;;  %v3398_v54 = vsel %vm3286_vm8, %v10281_v52, -inf }
0x13ae   :  { %3399 = vmax.xlane.f32.xlu1 %v3398_v54  ;;  %v3395_v55 = vpop.f32.mrb[114].mxu1 }
0x13af   :  { %v8247_v39 = vpop.f32.mrb[115].mxu1 }
0x13b4   :  { %v10285_v56 = vpop.f32.mrb[116].mxu1 }
0x13b5   :  { %v8258_v58 = vpop.f32.mrb[117].mxu1  ;;  %v3508_v61 = vsel %vm3286_vm8, %v10285_v56, -inf }
0x13b6   :  { %3509 = vmax.xlane.f32.xlu0 %v3508_v61  ;;  %v3505_v62 = vpop.f32.mrb[118].mxu1 }
0x13b7   :  { %v8259_v63 = vpop.f32.mrb[119].mxu1 }
0x13bc   :  { %v10289_v1 = vpop.f32.mrb[120].mxu1 }
0x13bd   :  { %v8270_v2 = vpop.f32.mrb[121].mxu1  ;;  %v3618_v3 = vsel %vm3286_vm8, %v10289_v1, -inf }
0x13be   :  { %3619 = vmax.xlane.f32.xlu0 %v3618_v3  ;;  %v3615_v4 = vpop.f32.mrb[122].mxu1 }
0x13bf   :  { %v8271_v5 = vpop.f32.mrb[123].mxu1 }
0x13c4   :  { %v10293_v6 = vpop.f32.mrb[124].mxu1 }
0x13c5   :  { %v8282_v7 = vpop.f32.mrb[125].mxu1  ;;  %v3728_v9 = vsel %vm3286_vm8, %v10293_v6, -inf }
0x13c6   :  { %3729 = vmax.xlane.f32.xlu1 %v3728_v9  ;;  %v3725_v10 = vpop.f32.mrb[126].mxu1 }
0x13c7   :  { %v8283_v17 = vpop.f32.mrb[127].mxu1 }
0x13cc   :  { %v10297_v18 = vpop.f32.mrb[128].mxu1 }
0x13cd   :  { %v8294_v38 = vpop.f32.mrb[129].mxu1  ;;  %v3838_v19 = vsel %vm3286_vm8, %v10297_v18, -inf }
0x13ce   :  { %3839 = vmax.xlane.f32.xlu0 %v3838_v19  ;;  %v3835_v20 = vpop.f32.mrb[130].mxu1  ;;  %v10345_v38 = vpop.permute.xlu1 %3410 }
0x13cf   :  { %v8295_v13 = vpop.f32.mrb[131].mxu1 }
0x13d4   :  { %v10301_v16 = vpop.f32.mrb[132].mxu1 }
0x13d5   :  { %v8306_v40 = vpop.f32.mrb[133].mxu1  ;;  %v3948_v21 = vsel %vm3286_vm8, %v10301_v16, -inf }
0x13d6   :  { %3949 = vmax.xlane.f32.xlu1 %v3948_v21  ;;  %v3945_v22 = vpop.f32.mrb[134].mxu1  ;;  %v10348_v40 = vpop.permute.xlu1 %3520 }
0x13d7   :  { %v8307_v24 = vpop.f32.mrb[135].mxu1 }
0x13dc   :  { %v10305_v25 = vpop.f32.mrb[136].mxu1 }
0x13dd   :  { %v8318_v26 = vpop.f32.mrb[137].mxu1  ;;  %v4058_v27 = vsel %vm3286_vm8, %v10305_v25, -inf }
0x13de   :  { %4059 = vmax.xlane.f32.xlu0 %v4058_v27  ;;  %v4055_v28 = vpop.f32.mrb[138].mxu1 }
0x13df   :  { %v8319_v29 = vpop.f32.mrb[139].mxu1 }
0x13e4   :  { %v10309_v30 = vpop.f32.mrb[140].mxu1 }
0x13e5   :  { %v8330_v31 = vpop.f32.mrb[141].mxu1  ;;  %v4211_v32 = vsel %vm3286_vm8, %v10309_v30, -inf }
0x13e6   :  { %4212 = vmax.xlane.f32.xlu1 %v4211_v32  ;;  %v4208_v59 = vpop.f32.mrb[142].mxu1 }
0x13e7   :  { %v8331_v33 = vpop.f32.mrb[143].mxu1 }
0x13ec   :  { %v10313_v35 = vpop.f32.mrb[144].mxu1 }
0x13ed   :  { %v8342_v14 = vpop.f32.mrb[145].mxu1  ;;  %v4321_v54 = vsel %vm3286_vm8, %v10313_v35, -inf }
0x13ee   :  { %v4318_v41 = vpop.f32.mrb[146].mxu1 }
0x13ef   :  { %v8343_v42 = vpop.f32.mrb[147].mxu1 }
0x13f4   :  { %3630 = vrot.lane.b32.xlu0 %v10147_v57, %s9412_s23  ;;  %v10317_v8 = vpop.f32.mrb[148].mxu1 }
0x13f5   :  { %v8354_v43 = vpop.f32.mrb[149].mxu1  ;;  %v4431_v62 = vsel %vm3286_vm8, %v10317_v8, -inf }
0x13f6   :  { %v4428_v44 = vpop.f32.mrb[150].mxu1 }
0x13f7   :  { %3740 = vrot.lane.b32.xlu1 %v10147_v57, %s9413_s0  ;;  %v8355_v34 = vpop.f32.mrb[151].mxu1 }
0x13fc   :  { %v10321_v45 = vpop.f32.mrb[152].mxu1 }
0x13fd   :  { %v8366_v11 = vpop.f32.mrb[153].mxu1  ;;  %v4541_v4 = vsel %vm3286_vm8, %v10321_v45, -inf }
0x13fe   :  { %v4538_v46 = vpop.f32.mrb[154].mxu1 }
0x13ff   :  { %v8367_v36 = vpop.f32.mrb[155].mxu1 }
0x1404   :  { %v10323_v47 = vpop.f32.mrb[156].mxu1 }
0x1405   :  { %v8378_v48 = vpop.f32.mrb[157].mxu1  ;;  %v4651_v7 = vsel %vm3286_vm8, %v10323_v47, -inf }
0x1406   :  { %v4648_v49 = vpop.f32.mrb[158].mxu1 }
0x1407   :  { %v8379_v12 = vpop.f32.mrb[159].mxu1 }
0x140c   :  { %v10325_v37 = vpop.f32.mrb[160].mxu1 }
0x140d   :  { %v8390_v23 = vpop.f32.mrb[161].mxu1  ;;  %v4761_v9 = vsel %vm3286_vm8, %v10325_v37, -inf }
0x140e   :  { %v4758_v51 = vpop.f32.mrb[162].mxu1 }
0x140f   :  { %v8391_v53 = vpop.f32.mrb[163].mxu1 }
0x1413   :  { %4322 = vmax.xlane.f32.xlu0 %v4321_v54 }
0x1414   :  { %v10329_v55 = vpop.f32.mrb[164].mxu1 }
0x1415   :  { %v8402_v39 = vpop.f32.mrb[165].mxu1  ;;  %v4871_v10 = vsel %vm3286_vm8, %v10329_v55, -inf }
0x1416   :  { %v4868_v58 = vpop.f32.mrb[166].mxu1 }
0x1417   :  { %v8403_v61 = vpop.f32.mrb[167].mxu1 }
0x141b   :  { %4432 = vmax.xlane.f32.xlu1 %v4431_v62 }
0x141c   :  { %v10333_v63 = vpop.f32.mrb[168].mxu1 }
0x141d   :  { %v8414_v2 = vpop.f32.mrb[169].mxu1  ;;  %v4981_v17 = vsel %vm3286_vm8, %v10333_v63, -inf }
0x141e   :  { %v4978_v3 = vpop.f32.mrb[170].mxu1 }
0x141f   :  { %4542 = vmax.xlane.f32.xlu1 %v4541_v4  ;;  %v8415_v5 = vpop.f32.mrb[171].mxu1 }
0x1423   :  { %4652 = vmax.xlane.f32.xlu1 %v4651_v7 }
0x1427   :  { %4762 = vmax.xlane.f32.xlu1 %v4761_v9 }
0x142b   :  { %4872 = vmax.xlane.f32.xlu1 %v4871_v10 }
0x142f   :  { %4982 = vmax.xlane.f32.xlu1 %v4981_v17 }
0x1433   :  { %v3289_v19 = vpop.xlane.xlu0 %3288 }
0x1434   :  { %v3290_v20 = vsub.f32 %v10277_v50, %v3289_v19 }
0x1436   :  { %v3291_v13 = vmul.f32 1.442695, %v3290_v20 }
0x1438   :  { %8936 = vpow2.f32 %v3291_v13 }
0x143b   :  { %v3400_v21 = vpop.xlane.xlu1 %3399 }
0x143c   :  { %v3401_v22 = vsub.f32 %v10281_v52, %v3400_v21 }
0x143e   :  { %v3402_v24 = vmul.f32 1.442695, %v3401_v22 }
0x1440   :  { %8938 = vpow2.f32 %v3402_v24 }
0x1442   :  { %v10351_v26 = vpop.eup %8936 }
0x1443   :  { %v3510_v27 = vpop.xlane.xlu0 %3509  ;;  %v3293_v28 = vsel %vm3286_vm8, %v10351_v26, 0.0 }
0x1444   :  { %v3511_v29 = vsub.f32 %v10285_v56, %v3510_v27  ;;  %3294 = vadd.xlane.f32.xlu0 %v3293_v28 }
0x1446   :  { %v3512_v31 = vmul.f32 1.442695, %v3511_v29 }
0x1448   :  { %8940 = vpow2.f32 %v3512_v31 }
0x144a   :  { %v10356_v50 = vpop.eup %8938 }
0x144b   :  { %v3620_v32 = vpop.xlane.xlu0 %3619  ;;  %v3404_v59 = vsel %vm3286_vm8, %v10356_v50, 0.0 }
0x144c   :  { %v3621_v52 = vsub.f32 %v10289_v1, %v3620_v32  ;;  %3405 = vadd.xlane.f32.xlu0 %v3404_v59 }
0x144e   :  { %v3622_v33 = vmul.f32 1.442695, %v3621_v52 }
0x1450   :  { %8942 = vpow2.f32 %v3622_v33 }
0x1452   :  { %v10361_v14 = vpop.eup %8940 }
0x1453   :  { %v3730_v41 = vpop.xlane.xlu1 %3729  ;;  %v3514_v56 = vsel %vm3286_vm8, %v10361_v14, 0.0 }
0x1454   :  { %v3731_v42 = vsub.f32 %v10293_v6, %v3730_v41  ;;  %3515 = vadd.xlane.f32.xlu0 %v3514_v56 }
0x1456   :  { %v3732_v43 = vmul.f32 1.442695, %v3731_v42 }
0x1458   :  { %8944 = vpow2.f32 %v3732_v43 }
0x145a   :  { %v10366_v44 = vpop.eup %8942 }
0x145b   :  { %v3840_v34 = vpop.xlane.xlu0 %3839  ;;  %v3624_v1 = vsel %vm3286_vm8, %v10366_v44, 0.0 }
0x145c   :  { %v3841_v11 = vsub.f32 %v10297_v18, %v3840_v34  ;;  %3625 = vadd.xlane.f32.xlu0 %v3624_v1 }
0x145e   :  { %v3842_v46 = vmul.f32 1.442695, %v3841_v11 }
0x1460   :  { %8946 = vpow2.f32 %v3842_v46 }
0x1462   :  { %v10371_v36 = vpop.eup %8944 }
0x1463   :  { %v3950_v48 = vpop.xlane.xlu1 %3949  ;;  %v3734_v6 = vsel %vm3286_vm8, %v10371_v36, 0.0 }
0x1464   :  { %v3951_v49 = vsub.f32 %v10301_v16, %v3950_v48  ;;  %3735 = vadd.xlane.f32.xlu1 %v3734_v6 }
0x1466   :  { %v3952_v12 = vmul.f32 1.442695, %v3951_v49 }
0x1468   :  { %8948 = vpow2.f32 %v3952_v12 }
0x146a   :  { %v10376_v23 = vpop.eup %8946 }
0x146b   :  { %v4060_v51 = vpop.xlane.xlu0 %4059  ;;  %v3844_v18 = vsel %vm3286_vm8, %v10376_v23, 0.0 }
0x146c   :  { %v4061_v53 = vsub.f32 %v10305_v25, %v4060_v51  ;;  %3845 = vadd.xlane.f32.xlu0 %v3844_v18 }
0x146e   :  { %v4062_v54 = vmul.f32 1.442695, %v4061_v53  ;;  %v3416_v53 = vsel %vm3304_vm7, %v10345_v38, 0 }
0x146f   :  { %v10396_v3 = vpop.permute.xlu0 %3630 }
0x1470   :  { %8950 = vpow2.f32 %v4062_v54 }
0x1472   :  { %v10381_v39 = vpop.eup %8948 }
0x1473   :  { %v3954_v58 = vsel %vm3286_vm8, %v10381_v39, 0.0  ;;  %v4213_v25 = vpop.xlane.xlu1 %4212 }
0x1474   :  { %3955 = vadd.xlane.f32.xlu1 %v3954_v58  ;;  %v4214_v62 = vsub.f32 %v10309_v30, %v4213_v25 }
0x1476   :  { %v4215_v2 = vmul.f32 1.442695, %v4214_v62 }
0x1477   :  { %v10401_v10 = vpop.permute.xlu1 %3740 }
0x1478   :  { %8952 = vpow2.f32 %v4215_v2 }
0x147a   :  { %v10385_v16 = vpop.eup %8950 }
0x147b   :  { %v4064_v61 = vsel %vm3286_vm8, %v10385_v16, 0.0 }
0x147c   :  { %4065 = vadd.xlane.f32.xlu1 %v4064_v61 }
0x1482   :  { %3960 = vrot.lane.b32.xlu0 %v10147_v57, %s9414_s5  ;;  %v10398_v5 = vpop.eup %8952 }
0x1483   :  { %v4217_v17 = vsel %vm3286_vm8, %v10398_v5, 0.0 }
0x1486   :  { %4070 = vrot.lane.b32.xlu0 %v10147_v57, %s9415_s9 }
0x148d   :  { %3850 = vrot.lane.b32.xlu1 %v10147_v57, %s9416_s13 }
0x14a0   :  { %v4323_v4 = vpop.xlane.xlu0 %4322 }
0x14a1   :  { %v4324_v7 = vsub.f32 %v10313_v35, %v4323_v4 }
0x14a3   :  { %v4325_v9 = vmul.f32 1.442695, %v4324_v7 }
0x14a5   :  { %8954 = vpow2.f32 %v4325_v9  ;;  %4218 = vadd.xlane.f32.xlu0 %v4217_v17 }
0x14a8   :  { %v4433_v57 = vpop.xlane.xlu1 %4432 }
0x14a9   :  { %v4434_v30 = vsub.f32 %v10317_v8, %v4433_v57 }
0x14ab   :  { %v4435_v19 = vmul.f32 1.442695, %v4434_v30 }
0x14ac   :  { %v4543_v20 = vpop.xlane.xlu1 %4542 }
0x14ad   :  { %8956 = vpow2.f32 %v4435_v19  ;;  %v4544_v13 = vsub.f32 %v10321_v45, %v4543_v20 }
0x14af   :  { %v10407_v21 = vpop.eup %8954  ;;  %v4545_v22 = vmul.f32 1.442695, %v4544_v13 }
0x14b0   :  { %v4653_v35 = vpop.xlane.xlu1 %4652  ;;  %v4327_v24 = vsel %vm3286_vm8, %v10407_v21, 0.0 }
0x14b1   :  { %8958 = vpow2.f32 %v4545_v22  ;;  %v4654_v27 = vsub.f32 %v10323_v47, %v4653_v35  ;;  %4328 = vadd.xlane.f32.xlu1 %v4327_v24 }
0x14b3   :  { %v4655_v28 = vmul.f32 1.442695, %v4654_v27 }
0x14b4   :  { %v4763_v29 = vpop.xlane.xlu1 %4762 }
0x14b5   :  { %8960 = vpow2.f32 %v4655_v28  ;;  %v4764_v8 = vsub.f32 %v10325_v37, %v4763_v29 }
0x14b7   :  { %v10413_v31 = vpop.eup %8956  ;;  %v4765_v32 = vmul.f32 1.442695, %v4764_v8 }
0x14b8   :  { %v4873_v45 = vpop.xlane.xlu1 %4872  ;;  %v4437_v59 = vsel %vm3286_vm8, %v10413_v31, 0.0 }
0x14b9   :  { %8962 = vpow2.f32 %v4765_v32  ;;  %v4874_v52 = vsub.f32 %v10329_v55, %v4873_v45  ;;  %4438 = vadd.xlane.f32.xlu1 %v4437_v59 }
0x14bb   :  { %v10418_v33 = vpop.eup %8958  ;;  %v4875_v47 = vmul.f32 1.442695, %v4874_v52  ;;  %4223 = vrot.lane.b32.xlu0 %v10166_v60, %s9385_s1  ;;  %s9417_s1 = smov 12  }
0x14bc   :  { %v4983_v41 = vpop.xlane.xlu1 %4982  ;;  %v4547_v37 = vsel %vm3286_vm8, %v10418_v33, 0.0 }
0x14bd   :  { %8964 = vpow2.f32 %v4875_v47  ;;  %v4984_v56 = vsub.f32 %v10333_v63, %v4983_v41  ;;  %4548 = vadd.xlane.f32.xlu1 %v4547_v37 }
0x14bf   :  { %v10425_v42 = vpop.eup %8960  ;;  %v4985_v43 = vmul.f32 1.442695, %v4984_v56  ;;  %4333 = vrot.lane.b32.xlu0 %v10166_v60, %s9410_s16 }
0x14c0   :  { %v4657_v55 = vsel %vm3286_vm8, %v10425_v42, 0.0 }
0x14c1   :  { %8966 = vpow2.f32 %v4985_v43  ;;  %4658 = vadd.xlane.f32.xlu1 %v4657_v55 }
0x14c3   :  { %v10431_v34 = vpop.eup %8962  ;;  %4443 = vrot.lane.b32.xlu0 %v10166_v60, %s9411_s18 }
0x14c4   :  { %v4767_v63 = vsel %vm3286_vm8, %v10431_v34, 0.0 }
0x14c5   :  { %4768 = vadd.xlane.f32.xlu1 %v4767_v63 }
0x14c7   :  { %v10437_v1 = vpop.eup %8964  ;;  %4553 = vrot.lane.b32.xlu0 %v10166_v60, %s9412_s23 }
0x14c8   :  { %v4877_v11 = vsel %vm3286_vm8, %v10437_v1, 0.0 }
0x14c9   :  { %4878 = vadd.xlane.f32.xlu1 %v4877_v11 }
0x14cb   :  { %v10443_v46 = vpop.eup %8966  ;;  %4663 = vrot.lane.b32.xlu0 %v10166_v60, %s9413_s0 }
0x14cc   :  { %v4987_v48 = vsel %vm3286_vm8, %v10443_v46, 0.0 }
0x14cd   :  { %4988 = vadd.xlane.f32.xlu1 %v4987_v48 }
0x14cf   :  { %4883 = vrot.lane.b32.xlu0 %v10166_v60, %s9414_s5 }
0x14d1   :  { %v3295_v6 = vpop.xlane.xlu0 %3294 }
0x14d2   :  { %8968 = vrcp.f32 %v3295_v6 }
0x14d3   :  { %4993 = vrot.lane.b32.xlu0 %v10166_v60, %s9415_s9 }
0x14d9   :  { %v3406_v49 = vpop.xlane.xlu0 %3405 }
0x14da   :  { %8970 = vrcp.f32 %v3406_v49 }
0x14dc   :  { %v8969_v12 = vpop.eup %8968 }
0x14dd   :  { %v3297_v51 = vmul.f32 %v8969_v12, %v10351_v26 }
0x14de   :  { %4773 = vrot.lane.b32.xlu1 %v10166_v60, %s9416_s13  ;;  %v3526_v60 = vsel %vm3304_vm7, %v10348_v40, 0 }
0x14df   :  { %v3298_v18 = vpack.c.bf16 %v3297_v51, %v3297_v51 }
0x14e1   :  { %8239 = vmatmul.mubr.msk.bf16.vlgmr.msra.gmra.mrb[112].mxu0 %vm3286_vm8, %v3298_v18  ;;  %v3516_v54 = vpop.xlane.xlu0 %3515 }
0x14e2   :  { %8249 = vmatpush3.bf16.msra.mxu0 %v3416_v53  ;;  %8972 = vrcp.f32 %v3516_v54  ;;  %8250 = vmatprep.mubr.msk.bf16.mxu0 %vm9393_vm0, %v9392_v0 }
0x14e3   :  { %8260 = vmatprep.subr.bf16.mxu0 %v9392_v0 }
0x14e4   :  { %v8971_v58 = vpop.eup %8970 }
0x14e5   :  { %v3408_v26 = vmul.f32 %v8971_v58, %v10356_v50  ;;  %v3636_v50 = vsel %vm3304_vm7, %v10396_v3, 0 }
0x14e7   :  { %v3409_v61 = vpack.c.bf16 %v3408_v26, %v3408_v26 }
0x14e9   :  { %8251 = vmatmul.mubr.msk.bf16.vlgmr.msra.gmra.mrb[116].mxu0 %vm3286_vm8, %v3409_v61  ;;  %v3626_v38 = vpop.xlane.xlu0 %3625 }
0x14ea   :  { %8261 = vmatpush3.bf16.msra.mxu0 %v3526_v60  ;;  %8974 = vrcp.f32 %v3626_v38  ;;  %8262 = vmatprep.mubr.msk.bf16.mxu0 %vm9393_vm0, %v9392_v0 }
0x14eb   :  { %8272 = vmatprep.subr.bf16.mxu0 %v9392_v0 }
0x14ec   :  { %v8973_v25 = vpop.eup %8972 }
0x14ed   :  { %v3518_v62 = vmul.f32 %v8973_v25, %v10361_v14  ;;  %v3746_v14 = vsel %vm3304_vm7, %v10401_v10, 0 }
0x14ef   :  { %v3519_v2 = vpack.c.bf16 %v3518_v62, %v3518_v62 }
0x14f1   :  { %v3736_v4 = vpop.xlane.xlu1 %3735  ;;  %8263 = vmatmul.mubr.msk.bf16.vlgmr.msra.gmra.mrb[120].mxu0 %vm3286_vm8, %v3519_v2 }
0x14f2   :  { %8976 = vrcp.f32 %v3736_v4  ;;  %8273 = vmatpush3.bf16.msra.mxu0 %v3636_v50  ;;  %8274 = vmatprep.mubr.msk.bf16.mxu0 %vm9393_vm0, %v9392_v0 }
0x14f3   :  { %8284 = vmatprep.subr.bf16.mxu0 %v9392_v0 }
0x14f4   :  { %v8975_v40 = vpop.eup %8974 }
0x14f5   :  { %v3628_v7 = vmul.f32 %v8975_v40, %v10366_v44 }
0x14f7   :  { %v3629_v9 = vpack.c.bf16 %v3628_v7, %v3628_v7 }
0x14f9   :  { %8275 = vmatmul.mubr.msk.bf16.vlgmr.msra.gmra.mrb[124].mxu0 %vm3286_vm8, %v3629_v9  ;;  %v3846_v17 = vpop.xlane.xlu0 %3845 }
0x14fa   :  { %8285 = vmatpush3.bf16.msra.mxu0 %v3746_v14  ;;  %8286 = vmatprep.mubr.msk.bf16.mxu0 %vm9393_vm0, %v9392_v0  ;;  %8978 = vrcp.f32 %v3846_v17 }
0x14fb   :  { %8296 = vmatprep.subr.bf16.mxu0 %v9392_v0 }
0x14fc   :  { %v8977_v3 = vpop.eup %8976 }
0x14fd   :  { %v3738_v57 = vmul.f32 %v8977_v3, %v10371_v36  ;;  %v3961_v35 = vpop.permute.xlu0 %3960 }
0x14fe   :  { %v3966_v27 = vsel %vm3304_vm7, %v3961_v35, 0 }
0x14ff   :  { %v3739_v30 = vpack.c.bf16 %v3738_v57, %v3738_v57 }
0x1501   :  { %8287 = vmatmul.mubr.msk.bf16.vlgmr.msra.gmra.mrb[128].mxu0 %vm3286_vm8, %v3739_v30  ;;  %v3956_v44 = vpop.xlane.xlu1 %3955  ;;  %v4071_v28 = vpop.permute.xlu0 %4070 }
0x1502   :  { %8298 = vmatprep.mubr.msk.bf16.mxu0 %vm9393_vm0, %v9392_v0  ;;  %8980 = vrcp.f32 %v3956_v44  ;;  %v4076_v32 = vsel %vm3304_vm7, %v4071_v28, 0 }
0x1504   :  { %v8979_v10 = vpop.eup %8978 }
0x1505   :  { %v3848_v20 = vmul.f32 %v8979_v10, %v10376_v23 }
0x1507   :  { %v3849_v36 = vpack.c.bf16 %v3848_v20, %v3848_v20 }
0x1509   :  { %v4066_v19 = vpop.xlane.xlu1 %4065 }
0x150a   :  { %8982 = vrcp.f32 %v4066_v19 }
0x150c   :  { %v8981_v24 = vpop.eup %8980 }
0x150d   :  { %v3851_v13 = vpop.permute.xlu1 %3850  ;;  %v3958_v23 = vmul.f32 %v8981_v24, %v10381_v39 }
0x150e   :  { %v3856_v22 = vsel %vm3304_vm7, %v3851_v13, 0 }
0x150f   :  { %8297 = vmatpush3.bf16.msra.mxu0 %v3856_v22  ;;  %v3959_v29 = vpack.c.bf16 %v3958_v23, %v3958_v23 }
0x1510   :  { %8308 = vmatprep.subr.bf16.mxu0 %v9392_v0 }
0x1512   :  { %8299 = vmatmul.mubr.msk.bf16.vlgmr.msra.gmra.mrb[132].mxu0 %vm3286_vm8, %v3849_v36 }
0x1513   :  { %8309 = vmatpush3.bf16.msra.mxu0 %v3966_v27  ;;  %8310 = vmatprep.mubr.msk.bf16.mxu0 %vm9393_vm0, %v9392_v0 }
0x1514   :  { %8320 = vmatprep.subr.bf16.mxu0 %v9392_v0  ;;  %v8983_v8 = vpop.eup %8982 }
0x1515   :  { %v4068_v45 = vmul.f32 %v8983_v8, %v10385_v16 }
0x1517   :  { %v4069_v59 = vpack.c.bf16 %v4068_v45, %v4068_v45 }
0x151a   :  { %8311 = vmatmul.mubr.msk.bf16.vlgmr.msra.gmra.mrb[136].mxu0 %vm3286_vm8, %v3959_v29 }
0x151b   :  { %8321 = vmatpush3.bf16.msra.mxu0 %v4076_v32  ;;  %8322 = vmatprep.mubr.msk.bf16.mxu0 %vm9393_vm0, %v9392_v0 }
0x151c   :  { %8332 = vmatprep.subr.bf16.mxu0 %v9392_v0 }
0x1522   :  { %8323 = vmatmul.mubr.msk.bf16.vlgmr.msra.gmra.mrb[140].mxu0 %vm3286_vm8, %v4069_v59 }
0x1523   :  { %8334 = vmatprep.mubr.msk.bf16.mxu0 %vm9393_vm0, %v9392_v0 }
0x1532   :  { %v4219_v39 = vpop.xlane.xlu0 %4218 }
0x1533   :  { %8984 = vrcp.f32 %v4219_v39 }
0x1536   :  { %v4224_v52 = vpop.permute.xlu0 %4223 }
0x1537   :  { %v4229_v47 = vsel %vm3304_vm7, %v4224_v52, 0 }
0x1538   :  { %8333 = vmatpush3.bf16.msra.mxu0 %v4229_v47 }
0x1539   :  { %8344 = vmatprep.subr.bf16.mxu0 %v9392_v0 }
0x153a   :  { %v4334_v56 = vpop.permute.xlu0 %4333 }
0x153b   :  { %v4339_v55 = vsel %vm3304_vm7, %v4334_v56, 0 }
0x153d   :  { %v8985_v41 = vpop.eup %8984 }
0x153e   :  { %v4221_v37 = vmul.f32 %v8985_v41, %v10398_v5  ;;  %v4329_v16 = vpop.xlane.xlu1 %4328  ;;  %v4444_v6 = vpop.permute.xlu0 %4443 }
0x153f   :  { %8986 = vrcp.f32 %v4329_v16  ;;  %v4449_v12 = vsel %vm3304_vm7, %v4444_v6, 0 }
0x1540   :  { %v4222_v43 = vpack.c.bf16 %v4221_v37, %v4221_v37 }
0x1542   :  { %8335 = vmatmul.mubr.msk.bf16.vlgmr.msra.gmra.mrb[144].mxu0 %vm3286_vm8, %v4222_v43 }
0x1543   :  { %8345 = vmatpush3.bf16.msra.mxu0 %v4339_v55  ;;  %8346 = vmatprep.mubr.msk.bf16.mxu0 %vm9393_vm0, %v9392_v0 }
0x1544   :  { %8356 = vmatprep.subr.bf16.mxu0 %v9392_v0 }
0x1546   :  { %v4439_v63 = vpop.xlane.xlu1 %4438 }
0x1547   :  { %8988 = vrcp.f32 %v4439_v63 }
0x1549   :  { %v8987_v11 = vpop.eup %8986 }
0x154a   :  { %v4331_v48 = vmul.f32 %v8987_v11, %v10407_v21  ;;  %v4549_v5 = vpop.xlane.xlu1 %4548  ;;  %v4554_v21 = vpop.permute.xlu0 %4553 }
0x154b   :  { %8990 = vrcp.f32 %v4549_v5  ;;  %v4559_v61 = vsel %vm3304_vm7, %v4554_v21, 0 }
0x154c   :  { %v4332_v49 = vpack.c.bf16 %v4331_v48, %v4331_v48 }
0x154e   :  { %v4659_v51 = vpop.xlane.xlu1 %4658  ;;  %8347 = vmatmul.mubr.msk.bf16.vlgmr.msra.gmra.mrb[148].mxu0 %vm3286_vm8, %v4332_v49  ;;  %v4664_v25 = vpop.permute.xlu0 %4663 }
0x154f   :  { %8357 = vmatpush3.bf16.msra.mxu0 %v4449_v12  ;;  %8358 = vmatprep.mubr.msk.bf16.mxu0 %vm9393_vm0, %v9392_v0  ;;  %8992 = vrcp.f32 %v4659_v51  ;;  %v4669_v50 = vsel %vm3304_vm7, %v4664_v25, 0 }
0x1550   :  { %8368 = vmatprep.subr.bf16.mxu0 %v9392_v0 }
0x1551   :  { %v8989_v18 = vpop.eup %8988 }
0x1552   :  { %v4441_v53 = vmul.f32 %v8989_v18, %v10413_v31  ;;  %v4769_v54 = vpop.xlane.xlu1 %4768  ;;  %v4884_v3 = vpop.permute.xlu0 %4883 }
0x1553   :  { %8994 = vrcp.f32 %v4769_v54  ;;  %v4889_v57 = vsel %vm3304_vm7, %v4884_v3, 0 }
0x1554   :  { %v4442_v58 = vpack.c.bf16 %v4441_v53, %v4441_v53 }
0x1555   :  { %v8991_v26 = vpop.eup %8990 }
0x1556   :  { %8359 = vmatmul.mubr.msk.bf16.vlgmr.msra.gmra.mrb[152].mxu0 %vm3286_vm8, %v4442_v58  ;;  %v4879_v60 = vpop.xlane.xlu1 %4878  ;;  %v4551_v38 = vmul.f32 %v8991_v26, %v10418_v33  ;;  %v4994_v44 = vpop.permute.xlu0 %4993 }
0x1557   :  { %8369 = vmatpush3.bf16.msra.mxu0 %v4559_v61  ;;  %8370 = vmatprep.mubr.msk.bf16.mxu0 %vm9393_vm0, %v9392_v0  ;;  %8996 = vrcp.f32 %v4879_v60  ;;  %v4999_v19 = vsel %vm3304_vm7, %v4994_v44, 0  ;;  %v8731_v44 = vld [vmem:[#allocation23] sm:$0xff]  }
0x1558   :  { %8380 = vmatprep.subr.bf16.mxu0 %v9392_v0  ;;  %v4552_v31 = vpack.c.bf16 %v4551_v38, %v4551_v38  ;;  %8423 = vmatpush3.bf16.msra.mxu1 %v8731_v44 }
0x1559   :  { %v8993_v62 = vpop.eup %8992  ;;  %8424 = vmatprep.subr.bf16.mxu1 %v9392_v0 }
0x155a   :  { %v4989_v2 = vpop.xlane.xlu1 %4988  ;;  %v4661_v4 = vmul.f32 %v8993_v62, %v10425_v42 }
0x155b   :  { %8998 = vrcp.f32 %v4989_v2 }
0x155c   :  { %v4662_v40 = vpack.c.bf16 %v4661_v4, %v4661_v4 }
0x155d   :  { %v8995_v7 = vpop.eup %8994 }
0x155e   :  { %8371 = vmatmul.mubr.msk.bf16.vlgmr.msra.gmra.mrb[156].mxu0 %vm3286_vm8, %v4552_v31  ;;  %v4774_v33 = vpop.permute.xlu1 %4773  ;;  %v4771_v14 = vmul.f32 %v8995_v7, %v10431_v34 }
0x155f   :  { %8381 = vmatpush3.bf16.msra.mxu0 %v4669_v50  ;;  %8382 = vmatprep.mubr.msk.bf16.mxu0 %vm9393_vm0, %v9392_v0  ;;  %v4779_v9 = vsel %vm3304_vm7, %v4774_v33, 0 }
0x1560   :  { %8392 = vmatprep.subr.bf16.mxu0 %v9392_v0  ;;  %v4772_v42 = vpack.c.bf16 %v4771_v14, %v4771_v14 }
0x1561   :  { %v8997_v17 = vpop.eup %8996 }
0x1562   :  { %v4881_v30 = vmul.f32 %v8997_v17, %v10437_v1 }
0x1564   :  { %v4882_v34 = vpack.c.bf16 %v4881_v30, %v4881_v30 }
0x1565   :  { %v8999_v10 = vpop.eup %8998 }
0x1566   :  { %8383 = vmatmul.mubr.msk.bf16.vlgmr.msra.gmra.mrb[160].mxu0 %vm3286_vm8, %v4662_v40  ;;  %v4991_v20 = vmul.f32 %v8999_v10, %v10443_v46 }
0x1567   :  { %8393 = vmatpush3.bf16.msra.mxu0 %v4779_v9  ;;  %8394 = vmatprep.mubr.msk.bf16.mxu0 %vm9393_vm0, %v9392_v0 }
0x1568   :  { %8404 = vmatprep.subr.bf16.mxu0 %v9392_v0  ;;  %v4992_v13 = vpack.c.bf16 %v4991_v20, %v4991_v20 }
0x156e   :  { %8395 = vmatmul.mubr.msk.bf16.vlgmr.msra.gmra.mrb[164].mxu0 %vm3286_vm8, %v4772_v42 }
0x156f   :  { %8405 = vmatpush3.bf16.msra.mxu0 %v4889_v57  ;;  %8406 = vmatprep.mubr.msk.bf16.mxu0 %vm9393_vm0, %v9392_v0 }
0x1570   :  { %8416 = vmatprep.subr.bf16.mxu0 %v9392_v0 }
0x1576   :  { %8407 = vmatmul.mubr.msk.bf16.vlgmr.msra.gmra.mrb[168].mxu0 %vm3286_vm8, %v4882_v34  ;;  %v8732_v34 = vld [vmem:[#allocation23 + $0x8] sm:$0xff]  }
0x1577   :  { %8417 = vmatpush3.bf16.msra.mxu0 %v4999_v19  ;;  %8418 = vmatprep.mubr.msk.bf16.mxu0 %vm9393_vm0, %v9392_v0 }
0x1578   :  { %8430 = vmatprep.subr.bf16.mxu0 %v9392_v0  ;;  %8425 = vmatpush3.bf16.msra.mxu1 %v8732_v34 }
0x1579   :  { %8438 = vmatprep.subr.bf16.mxu1 %v9392_v0 }
0x157e   :  { %8419 = vmatmul.mubr.msk.bf16.vlgmr.msra.gmra.mrb[172].mxu0 %vm3286_vm8, %v4992_v13 }
0x157f   :  { %8434 = vmatprep.mubr.msk.bf16.mxu0 %vm9393_vm0, %v9392_v0 }
0x15b4   :  { %v10553_v1 = vpop.f32.mrb[112].mxu0 }
0x15b5   :  { %v8240_v22 = vpop.f32.mrb[113].mxu0 }
0x15b6   :  { %v3345_v35 = vpop.f32.mrb[114].mxu0 }
0x15b7   :  { %v8241_v36 = vpop.f32.mrb[115].mxu0 }
0x15bc   :  { %v3452_v24 = vpop.f32.mrb[116].mxu0 }
0x15bd   :  { %4119 = vrot.lane.b32.xlu0 %v3452_v24, %s9386_s3  ;;  %v8252_v27 = vpop.f32.mrb[117].mxu0 }
0x15be   :  { %v3455_v23 = vpop.f32.mrb[118].mxu0 }
0x15bf   :  { %v8253_v28 = vpop.f32.mrb[119].mxu0 }
0x15c4   :  { %v3562_v46 = vpop.f32.mrb[120].mxu0 }
0x15c5   :  { %4123 = vrot.lane.b32.xlu0 %v3562_v46, %s9391_s26  ;;  %v8264_v29 = vpop.f32.mrb[121].mxu0 }
0x15c6   :  { %v3565_v8 = vpop.f32.mrb[122].mxu0 }
0x15c7   :  { %v8265_v32 = vpop.f32.mrb[123].mxu0 }
0x15cc   :  { %v3672_v45 = vpop.f32.mrb[124].mxu0 }
0x15cd   :  { %4127 = vrot.lane.b32.xlu0 %v3672_v45, %s9417_s1  ;;  %v8276_v59 = vpop.f32.mrb[125].mxu0 }
0x15ce   :  { %v3675_v39 = vpop.f32.mrb[126].mxu0 }
0x15cf   :  { %v8277_v52 = vpop.f32.mrb[127].mxu0 }
0x15d4   :  { %v3782_v47 = vpop.f32.mrb[128].mxu0 }
0x15d5   :  { %4131 = vrot.lane.b32.xlu0 %v3782_v47, %s9379_s8  ;;  %v8288_v41 = vpop.f32.mrb[129].mxu0 }
0x15d6   :  { %v3785_v37 = vpop.f32.mrb[130].mxu0 }
0x15d7   :  { %v8289_v16 = vpop.f32.mrb[131].mxu0 }
0x15e5   :  { %v3892_v56 = vpop.f32.mrb[132].mxu0 }
0x15e6   :  { %4135 = vrot.lane.b32.xlu0 %v3892_v56, %s9418_s14  ;;  %v8300_v43 = vpop.f32.mrb[133].mxu0 }
0x15e7   :  { %v3895_v55 = vpop.f32.mrb[134].mxu0 }
0x15e8   :  { %v8301_v63 = vpop.f32.mrb[135].mxu0 }
0x15ed   :  { %v4002_v11 = vpop.f32.mrb[136].mxu0 }
0x15ee   :  { %v8312_v48 = vpop.f32.mrb[137].mxu0 }
0x15ef   :  { %v4005_v5 = vpop.f32.mrb[138].mxu0 }
0x15f0   :  { %v8313_v6 = vpop.f32.mrb[139].mxu0 }
0x15f5   :  { %v4112_v49 = vpop.f32.mrb[140].mxu0 }
0x15f6   :  { %v8324_v12 = vpop.f32.mrb[141].mxu0 }
0x15f7   :  { %v4115_v51 = vpop.f32.mrb[142].mxu0 }
0x15f8   :  { %v8325_v18 = vpop.f32.mrb[143].mxu0 }
0x1615   :  { %v10560_v53 = vpop.f32.mrb[144].mxu0 }
0x1616   :  { %v8336_v54 = vpop.f32.mrb[145].mxu0 }
0x1617   :  { %v4268_v21 = vpop.f32.mrb[146].mxu0 }
0x1618   :  { %v8337_v58 = vpop.f32.mrb[147].mxu0 }
0x1621   :  { %v4375_v26 = vpop.f32.mrb[148].mxu0 }
0x1622   :  { %5042 = vrot.lane.b32.xlu0 %v4375_v26, %s9386_s3  ;;  %v8348_v61 = vpop.f32.mrb[149].mxu0  ;;  %s10876_s3 = sld [smem:[#allocation37_spill]] }
0x1623   :  { %v4378_v60 = vpop.f32.mrb[150].mxu0 }
0x1624   :  { %v8349_v38 = vpop.f32.mrb[151].mxu0 }
0x1625   :  { %v7368_v38 = vld [vmem:[#allocation24] ss:$0 sm:$0xff] }
0x1626   :  { %4139 = vrot.lane.b32.xlu0 %v4002_v11, %s9419_s20 }
0x1629   :  { %v4485_v25 = vpop.f32.mrb[152].mxu0 }
0x162a   :  { %4143 = vrot.lane.b32.xlu0 %v4112_v49, %s9420_s24  ;;  %5046 = vrot.lane.b32.xlu1 %v4485_v25, %s9391_s26  ;;  %v8360_v31 = vpop.f32.mrb[153].mxu0  ;;  %s10877_s26 = sld [smem:[#allocation41_spill]] }
0x162b   :  { %v4488_v62 = vpop.f32.mrb[154].mxu0 }
0x162c   :  { %v8361_v2 = vpop.f32.mrb[155].mxu0 }
0x162f   :  { %v4120_v27 = vpop.permute.xlu0 %4119 }
0x1630   :  { %v4146_v32 = vsel %vm3239_vm6, %v10553_v1, %v4120_v27 }
0x1631   :  { %v4595_v50 = vpop.f32.mrb[156].mxu0 }
0x1632   :  { %5050 = vrot.lane.b32.xlu1 %v4595_v50, %s9417_s1  ;;  %v8372_v4 = vpop.f32.mrb[157].mxu0 }
0x1633   :  { %v4598_v33 = vpop.f32.mrb[158].mxu0 }
0x1634   :  { %v8373_v40 = vpop.f32.mrb[159].mxu0 }
0x1637   :  { %v4124_v23 = vpop.permute.xlu0 %4123 }
0x1638   :  { %v4147_v45 = vsel %vm3286_vm8, %v4146_v32, %v4124_v23 }
0x1639   :  { %v4705_v7 = vpop.f32.mrb[160].mxu0 }
0x163a   :  { %5054 = vrot.lane.b32.xlu1 %v4705_v7, %s9379_s8  ;;  %v8384_v9 = vpop.f32.mrb[161].mxu0  ;;  %s10875_s8 = sld [smem:[#allocation35_spill]] }
0x163b   :  { %v4708_v14 = vpop.f32.mrb[162].mxu0  ;;  %v10601_v9 = vld [vmem:[#allocation17] sm:$0xff]  }
0x163c   :  { %v8385_v3 = vpop.f32.mrb[163].mxu0 }
0x163f   :  { %v4128_v28 = vpop.permute.xlu0 %4127 }
0x1640   :  { %v4149_v39 = vsel %vm4148_vm9, %v4147_v45, %v4128_v28  ;;  %v8733_v58 = vld [vmem:[%s10875_s8] sm:$0xff]   ;;  %v8734_v26 = vld [vmem:[%s10875_s8 + $0x10] sm:$0xff]   ;;  %v8735_v61 = vld [vmem:[%s10875_s8 + $0x8] sm:$0xff]  }
0x1641   :  { %v4815_v42 = vpop.f32.mrb[164].mxu0  ;;  %8431 = vmatpush3.bf16.msra.mxu0 %v8733_v58  ;;  %v8736_v60 = vld [vmem:[%s10875_s8 + $0x18] sm:$0xff]   ;;  %v8737_v33 = vld [vmem:[%s10875_s8 + $0x20] sm:$0xff]   ;;  %v8739_v3 = vld [vmem:[%s10875_s8 + $0x28] sm:$0xff]  }
0x1642   :  { %5058 = vrot.lane.b32.xlu1 %v4815_v42, %s9418_s14  ;;  %v8396_v17 = vpop.f32.mrb[165].mxu0  ;;  %8432 = vmatprep.subr.bf16.mxu0 %v9392_v0  ;;  %v10613_v42 = vld [vmem:[#allocation17 + $0x8] sm:$0xff]   ;;  %v7388_v28 = vld [vmem:[#allocation18 + $0x2] ss:$0 sm:$0xff] }
0x1643   :  { %v4818_v57 = vpop.f32.mrb[166].mxu0  ;;  %v10616_v17 = vld [vmem:[#allocation17 + $0x10] sm:$0xff]  }
0x1644   :  { %v8397_v30 = vpop.f32.mrb[167].mxu0  ;;  %v7372_v57 = vld [vmem:[#allocation18] ss:$0 sm:$0xff] }
0x1645   :  { %8433 = vmatpush3.bf16.msra.mxu0 %v8735_v61  ;;  %v7380_v30 = vld [vmem:[#allocation18 + $0x1] ss:$0 sm:$0xff] }
0x1646   :  { %8446 = vmatprep.subr.bf16.mxu0 %v9392_v0 }
0x1647   :  { %v4132_v46 = vpop.permute.xlu0 %4131 }
0x1648   :  { %v4151_v52 = vsel %vm4150_vm10, %v4149_v39, %v4132_v46 }
0x1649   :  { %v4925_v10 = vpop.f32.mrb[168].mxu0 }
0x164a   :  { %5062 = vrot.lane.b32.xlu1 %v4925_v10, %s9419_s20  ;;  %v8408_v19 = vpop.f32.mrb[169].mxu0 }
0x164b   :  { %v4928_v20 = vpop.f32.mrb[170].mxu0 }
0x164c   :  { %v8409_v13 = vpop.f32.mrb[171].mxu0 }
0x1651   :  { %v5035_v22 = vpop.f32.mrb[172].mxu0 }
0x1652   :  { %5066 = vrot.lane.b32.xlu1 %v5035_v22, %s9420_s24  ;;  %v8420_v35 = vpop.f32.mrb[173].mxu0 }
0x1653   :  { %v5038_v36 = vpop.f32.mrb[174].mxu0 }
0x1654   :  { %v8421_v24 = vpop.f32.mrb[175].mxu0 }
0x1658   :  { %v4136_v29 = vpop.permute.xlu0 %4135 }
0x1659   :  { %v4153_v47 = vsel %vm4152_vm11, %v4151_v52, %v4136_v29 }
0x1694   :  { %v5043_v8 = vpop.permute.xlu0 %5042 }
0x1695   :  { %v5069_v63 = vsel %vm3239_vm6, %v10560_v53, %v5043_v8 }
0x1698   :  { %v4140_v59 = vpop.permute.xlu0 %4139 }
0x1699   :  { %v4155_v41 = vsel %vm4154_vm12, %v4153_v47, %v4140_v59 }
0x169c   :  { %v4144_v37 = vpop.permute.xlu0 %4143  ;;  %v5047_v1 = vpop.permute.xlu1 %5046 }
0x169d   :  { %v4157_v16 = vsel %vm4156_vm13, %v4155_v41, %v4144_v37  ;;  %v5070_v11 = vsel %vm3286_vm8, %v5069_v63, %v5047_v1 }
0x169e   :  { %4158 = vst [vmem:[#allocation4] ss:$2 sm:$0xff] %v4157_v16 }
0x16a4   :  { %v5051_v56 = vpop.permute.xlu1 %5050 }
0x16a5   :  { %v5071_v5 = vsel %vm4148_vm9, %v5070_v11, %v5051_v56 }
0x16ac   :  { %v5055_v43 = vpop.permute.xlu1 %5054 }
0x16ad   :  { %v5072_v6 = vsel %vm4150_vm10, %v5071_v5, %v5055_v43 }
0x16b4   :  { %v5059_v55 = vpop.permute.xlu1 %5058 }
0x16b5   :  { %v5073_v49 = vsel %vm4152_vm11, %v5072_v6, %v5059_v55 }
0x16bc   :  { %v5063_v48 = vpop.permute.xlu1 %5062 }
0x16bd   :  { %v5074_v12 = vsel %vm4154_vm12, %v5073_v49, %v5063_v48 }
0x16c4   :  { %v5067_v51 = vpop.permute.xlu1 %5066 }
0x16c5   :  { %v5075_v18 = vsel %vm4156_vm13, %v5074_v12, %v5067_v51 }
0x16c6   :  { %5077 = vst [vmem:[#allocation4 + $0x1] ss:$2 sm:$0xff] %v5075_v18 }
0x16cd   :  { %v5078_v54 = vld [vmem:[#allocation4] sm:$0xff]  ;;  %v5079_v53 = vld [vmem:[#allocation4 + $0x8] sm:$0xff] }
0x16ce   :  { %v5080_v21 = vpack.c.bf16 %v5079_v53, %v5078_v54 }
0x16d0   :  { %8427 = vmatmul.mubr.msk.bf16.vlgmr.msra.gmra.mrb[172].mxu1 %vm332_vm3, %v5080_v21  ;;  %v10644_v21 = vld [vmem:[#allocation20] ss:$0 sm:$0xff] }
0x16d1   :  { %8442 = vmatprep.mubr.msk.bf16.mxu1 %vm9393_vm0, %v9392_v0  ;;  %8439 = vmatpush3.bf16.msra.mxu1 %v8734_v26 }
0x16d2   :  { %8440 = vmatprep.subr.bf16.mxu1 %v9392_v0 }
0x16d5   :  { %8441 = vmatpush3.bf16.msra.mxu1 %v8736_v60 }
0x16d6   :  { %8454 = vmatprep.subr.bf16.mxu1 %v9392_v0 }
0x17a3   :  { %v5141_v25 = vpop.f32.mrb[172].mxu1 }
0x17a4   :  { %v5142_v31 = vadd.f32 %v7368_v38, %v5141_v25  ;;  %v8428_v62 = vpop.f32.mrb[173].mxu1 }
0x17a5   :  { %v5144_v2 = vpop.f32.mrb[174].mxu1 }
0x17a6   :  { %5148 = vst.msk [vmem:[#allocation8] sm:$0xff] %vm332_vm3, %v5142_v31  ;;  %v5145_v50 = vadd.f32 %v7368_v38, %v5144_v2  ;;  %v8429_v4 = vpop.f32.mrb[175].mxu1 }
0x17a8   :  { %5149 = vst.msk [vmem:[#allocation8 + $0x8] sm:$0xff] %vm332_vm3, %v5145_v50 }
0x17ad   :  { %v5150_v40 = vld [vmem:[#allocation8] sm:$0xff] }
0x17af   :  { %v5151_v7 = vld [vmem:[#allocation8 + $0x8] sm:$0xff] }
0x17b0   :  { %v5152_v14 = vpack.c.bf16 %v5151_v7, %v5150_v40 }
0x17b2   :  { %8435 = vmatmul.mubr.msk.bf16.vlgmr.msra.gmra.mrb[176].mxu0 %vm332_vm3, %v5152_v14  ;;  %8443 = vmatmul.mubr.msk.bf16.vlgmr.msra.gmra.mrb[176].mxu1 %vm332_vm3, %v5152_v14 }
0x17b3   :  { %8447 = vmatpush3.bf16.msra.mxu0 %v8737_v33  ;;  %8455 = vmatpush3.bf16.msra.mxu1 %v10601_v9 }
0x17b4   :  { %8448 = vmatprep.subr.bf16.mxu0 %v9392_v0  ;;  %8450 = vmatprep.mubr.msk.bf16.mxu0 %vm9393_vm0, %v9392_v0 }
0x17b5   :  { %8456 = vmatprep.mubr.msk.bf16.mxu1 %vm9393_vm0, %v9392_v0  ;;  %8466 = vmatprep.subr.bf16.mxu1 %v9392_v0 }
0x17b7   :  { %8449 = vmatpush3.bf16.msra.mxu0 %v8739_v3 }
0x17b8   :  { %8460 = vmatprep.subr.bf16.mxu0 %v9392_v0 }
0x17ba   :  { %8451 = vmatmul.mubr.msk.bf16.vlgmr.msra.gmra.mrb[180].mxu0 %vm332_vm3, %v5152_v14  ;;  %8457 = vmatmul.mubr.bf16.vlgmr.msra.gmra.mrb[180].mxu1 %v9394_v15 }
0x17bb   :  { %8461 = vmatpush3.bf16.msra.mxu0 %v10613_v42  ;;  %8462 = vmatprep.mubr.msk.bf16.mxu0 %vm9393_vm0, %v9392_v0 }
0x17bc   :  { %8467 = vmatpush3.bf16.msra.mxu1 %v10616_v17  ;;  %8468 = vmatprep.mubr.msk.bf16.mxu1 %vm9393_vm0, %v9392_v0 }
0x17bd   :  { %8472 = vmatprep.subr.bf16.mxu0 %v9392_v0  ;;  %8478 = vmatprep.subr.bf16.mxu1 %v9392_v0 }
0x17c2   :  { %8463 = vmatmul.mubr.bf16.vlgmr.msra.gmra.mrb[184].mxu0 %v9394_v15  ;;  %8469 = vmatmul.mubr.bf16.vlgmr.msra.gmra.mrb[184].mxu1 %v9394_v15 }
0x17c3   :  { %8473 = vmatpush3.bf16.msra.mxu0 %v10601_v9  ;;  %8479 = vmatpush3.bf16.msra.mxu1 %v10613_v42 }
0x17c4   :  { %8474 = vmatprep.mubr.msk.bf16.mxu0 %vm9393_vm0, %v9392_v0  ;;  %8480 = vmatprep.mubr.msk.bf16.mxu1 %vm9393_vm0, %v9392_v0 }
0x17c5   :  { %8484 = vmatprep.subr.bf16.mxu0 %v9392_v0  ;;  %8490 = vmatprep.subr.bf16.mxu1 %v9392_v0 }
0x1885   :  { %v5213_v44 = vpop.f32.mrb[176].mxu0  ;;  %v5281_v34 = vpop.f32.mrb[176].mxu1 }
0x1886   :  { %v5214_v10 = vadd.f32 %v7372_v57, %v5213_v44  ;;  %v5282_v19 = vadd.f32 %v7380_v30, %v5281_v34  ;;  %v8436_v20 = vpop.f32.mrb[177].mxu0  ;;  %v8444_v13 = vpop.f32.mrb[177].mxu1 }
0x1887   :  { %v5216_v22 = vpop.f32.mrb[178].mxu0  ;;  %v5284_v35 = vpop.f32.mrb[178].mxu1 }
0x1888   :  { %5220 = vst.msk [vmem:[#allocation5] sm:$0xff] %vm4150_vm10, %v5214_v10  ;;  %5288 = vst.msk [vmem:[#allocation6] sm:$0xff] %vm4150_vm10, %v5282_v19  ;;  %v5217_v36 = vadd.f32 %v7372_v57, %v5216_v22  ;;  %v5285_v24 = vadd.f32 %v7380_v30, %v5284_v35  ;;  %v8437_v27 = vpop.f32.mrb[179].mxu0  ;;  %v8445_v23 = vpop.f32.mrb[179].mxu1 }
0x188a   :  { %5221 = vst.msk [vmem:[#allocation5 + $0x8] sm:$0xff] %vm4150_vm10, %v5217_v36  ;;  %5289 = vst.msk [vmem:[#allocation6 + $0x8] sm:$0xff] %vm4150_vm10, %v5285_v24 }
0x188d   :  { %v5349_v46 = vpop.f32.mrb[180].mxu0  ;;  %v5412_v29 = vpop.f32.mrb[180].mxu1 }
0x188e   :  { %v5350_v8 = vadd.f32 %v7388_v28, %v5349_v46  ;;  %v8452_v32 = vpop.f32.mrb[181].mxu0  ;;  %v8458_v45 = vpop.f32.mrb[181].mxu1 }
0x188f   :  { %v5367_v59 = vld [vmem:[#allocation5] sm:$0x3]  ;;  %v5352_v39 = vpop.f32.mrb[182].mxu0  ;;  %v5415_v52 = vpop.f32.mrb[182].mxu1  ;;  %v5368_v56 = vld [vmem:[#allocation6] sm:$0x3] }
0x1890   :  { %5356 = vst.msk [vmem:[#allocation7] sm:$0xff] %vm4150_vm10, %v5350_v8  ;;  %v5418_v47 = vadd.f32 %v5412_v29, %v5367_v59  ;;  %v5353_v41 = vadd.f32 %v7388_v28, %v5352_v39  ;;  %v8453_v37 = vpop.f32.mrb[183].mxu0  ;;  %v8459_v16 = vpop.f32.mrb[183].mxu1  ;;  %v5538_v7 = vld [vmem:[#allocation5 + $0x2] sm:$0x3] }
0x1891   :  { %v5539_v20 = vld [vmem:[#allocation6 + $0x2] sm:$0x3] }
0x1892   :  { %v7393_v1 = vmul.f32 -1.442695, %v5418_v47  ;;  %5357 = vst.msk [vmem:[#allocation7 + $0x8] sm:$0xff] %vm4150_vm10, %v5353_v41 }
0x1894   :  { %9000 = vpow2.f32 %v7393_v1 }
0x1895   :  { %v5465_v43 = vpop.f32.mrb[184].mxu0  ;;  %v5524_v55 = vpop.f32.mrb[184].mxu1 }
0x1896   :  { %v5471_v63 = vadd.f32 %v5465_v43, %v5368_v56  ;;  %v8464_v11 = vpop.f32.mrb[185].mxu0  ;;  %v8470_v48 = vpop.f32.mrb[185].mxu1  ;;  %v5525_v26 = vadd.f32 %v10644_v21, %v5524_v55 }
0x1897   :  { %v5468_v5 = vpop.f32.mrb[186].mxu0  ;;  %v5527_v6 = vpop.f32.mrb[186].mxu1  ;;  %v5369_v38 = vld [vmem:[#allocation7] sm:$0x3]  ;;  %v5540_v52 = vld [vmem:[#allocation7 + $0x2] sm:$0x3] }
0x1898   :  { %v7395_v49 = vmul.f32 -1.442695, %v5471_v63  ;;  %v8465_v12 = vpop.f32.mrb[187].mxu0  ;;  %v8471_v51 = vpop.f32.mrb[187].mxu1  ;;  %v5687_v63 = vld [vmem:[#allocation5 + $0x4] sm:$0x3] }
0x189a   :  { %9002 = vpow2.f32 %v7395_v49 }
0x189e   :  { %v9001_v18 = vpop.eup %9000 }
0x189f   :  { %v5422_v54 = vadd.f32 1.0, %v9001_v18 }
0x18a1   :  { %9004 = vrcp.f32 %v5422_v54  ;;  %v5688_v54 = vld [vmem:[#allocation6 + $0x4] sm:$0x3] }
0x18a4   :  { %v9003_v53 = vpop.eup %9002 }
0x18a5   :  { %v5475_v58 = vadd.f32 1.0, %v9003_v53 }
0x18a7   :  { %9006 = vrcp.f32 %v5475_v58 }
0x18ab   :  { %v9005_v61 = vpop.eup %9004 }
0x18ac   :  { %v5530_v60 = vmul.f32 %v9005_v61, %v5525_v26 }
0x18ae   :  { %v5531_v25 = vadd.f32 %v5530_v60, %v5369_v38 }
0x18b0   :  { %9008 = vtanh.f32 %v5531_v25 }
0x18b1   :  { %v9007_v31 = vpop.eup %9006 }
0x18b2   :  { %v5533_v62 = vsub.f32 1.0, %v9007_v31  ;;  %v5535_v50 = vmul.f32 0.0, %v9007_v31 }
0x18ba   :  { %v9009_v2 = vpop.eup %9008 }
0x18bb   :  { %v5534_v4 = vmul.f32 %v9009_v2, %v5533_v62 }
0x18bd   :  { %v10647_v33 = vadd.f32 %v5535_v50, %v5534_v4 }
0x18bf   :  { %v5541_v40 = vpack.c.bf16 %v10647_v33, %v10647_v33 }
0x18c1   :  { %8475 = vmatmul.mubr.msk.bf16.vlgmr.msra.gmra.mrb[188].mxu0 %vm4150_vm10, %v5541_v40  ;;  %8481 = vmatmul.mubr.msk.bf16.vlgmr.msra.gmra.mrb[188].mxu1 %vm4150_vm10, %v5541_v40 }
0x18c2   :  { %8485 = vmatpush3.bf16.msra.mxu0 %v10616_v17  ;;  %8486 = vmatprep.mubr.msk.bf16.mxu0 %vm9393_vm0, %v9392_v0 }
0x18c3   :  { %8491 = vmatpush3.bf16.msra.mxu1 %v10601_v9  ;;  %8496 = vmatprep.subr.bf16.mxu0 %v9392_v0 }
0x18c4   :  { %8492 = vmatprep.mubr.msk.bf16.mxu1 %vm9393_vm0, %v9392_v0  ;;  %8502 = vmatprep.subr.bf16.mxu1 %v9392_v0 }
0x18c9   :  { %8487 = vmatmul.mubr.msk.bf16.vlgmr.msra.gmra.mrb[192].mxu0 %vm4150_vm10, %v5541_v40 }
0x18ca   :  { %8497 = vmatpush3.bf16.msra.mxu0 %v10613_v42  ;;  %8498 = vmatprep.mubr.msk.bf16.mxu0 %vm9393_vm0, %v9392_v0 }
0x18cb   :  { %8508 = vmatprep.subr.bf16.mxu0 %v9392_v0 }
0x1994   :  { %v5579_v14 = vpop.f32.mrb[188].mxu0  ;;  %v5626_v3 = vpop.f32.mrb[188].mxu1 }
0x1995   :  { %v5585_v57 = vadd.f32 %v5579_v14, %v5538_v7  ;;  %v8476_v30 = vpop.f32.mrb[189].mxu0  ;;  %v8482_v44 = vpop.f32.mrb[189].mxu1  ;;  %v5632_v35 = vadd.f32 %v5626_v3, %v5539_v20  ;;  %v5689_v3 = vld [vmem:[#allocation7 + $0x4] sm:$0x3] }
0x1996   :  { %v5582_v34 = vpop.f32.mrb[190].mxu0  ;;  %v5629_v10 = vpop.f32.mrb[190].mxu1 }
0x1997   :  { %v7399_v19 = vmul.f32 -1.442695, %v5585_v57  ;;  %v8477_v13 = vpop.f32.mrb[191].mxu0  ;;  %v8483_v22 = vpop.f32.mrb[191].mxu1  ;;  %v7401_v36 = vmul.f32 -1.442695, %v5632_v35 }
0x1998   :  { %v5836_v22 = vld [vmem:[#allocation5 + $0x6] sm:$0x3] }
0x1999   :  { %9010 = vpow2.f32 %v7399_v19 }
0x199a   :  { %9012 = vpow2.f32 %v7401_v36 }
0x199c   :  { %v5673_v24 = vpop.f32.mrb[192].mxu0 }
0x199d   :  { %v8488_v27 = vpop.f32.mrb[193].mxu0  ;;  %v5674_v45 = vadd.f32 %v10644_v21, %v5673_v24 }
0x199e   :  { %v5676_v23 = vpop.f32.mrb[194].mxu0 }
0x199f   :  { %v8489_v28 = vpop.f32.mrb[195].mxu0 }
0x19a3   :  { %v9011_v46 = vpop.eup %9010 }
0x19a4   :  { %v5589_v29 = vadd.f32 1.0, %v9011_v46  ;;  %v9013_v8 = vpop.eup %9012 }
0x19a5   :  { %v5636_v32 = vadd.f32 1.0, %v9013_v8  ;;  %v5837_v8 = vld [vmem:[#allocation6 + $0x6] sm:$0x3] }
0x19a6   :  { %9014 = vrcp.f32 %v5589_v29 }
0x19a7   :  { %9016 = vrcp.f32 %v5636_v32 }
0x19b0   :  { %v9015_v59 = vpop.eup %9014 }
0x19b1   :  { %v5679_v39 = vmul.f32 %v9015_v59, %v5674_v45  ;;  %v9017_v41 = vpop.eup %9016 }
0x19b2   :  { %v5682_v37 = vsub.f32 1.0, %v9017_v41  ;;  %v5684_v1 = vmul.f32 %v9017_v41, %v10647_v33 }
0x19b3   :  { %v5680_v47 = vadd.f32 %v5679_v39, %v5540_v52 }
0x19b5   :  { %9018 = vtanh.f32 %v5680_v47 }
0x19bf   :  { %v9019_v16 = vpop.eup %9018 }
0x19c0   :  { %v5683_v56 = vmul.f32 %v9019_v16, %v5682_v37 }
0x19c2   :  { %v10668_v43 = vadd.f32 %v5684_v1, %v5683_v56 }
0x19c4   :  { %v5690_v55 = vpack.c.bf16 %v10668_v43, %v10668_v43 }
0x19c6   :  { %8493 = vmatmul.mubr.msk.bf16.vlgmr.msra.gmra.mrb[192].mxu1 %vm4150_vm10, %v5690_v55  ;;  %8499 = vmatmul.mubr.msk.bf16.vlgmr.msra.gmra.mrb[196].mxu0 %vm4150_vm10, %v5690_v55 }
0x19c7   :  { %8503 = vmatpush3.bf16.msra.mxu1 %v10616_v17  ;;  %8504 = vmatprep.mubr.msk.bf16.mxu1 %vm9393_vm0, %v9392_v0 }
0x19c8   :  { %8509 = vmatpush3.bf16.msra.mxu0 %v10601_v9  ;;  %8514 = vmatprep.subr.bf16.mxu1 %v9392_v0 }
0x19c9   :  { %8510 = vmatprep.mubr.msk.bf16.mxu0 %vm9393_vm0, %v9392_v0  ;;  %8520 = vmatprep.subr.bf16.mxu0 %v9392_v0 }
0x19ce   :  { %8505 = vmatmul.mubr.msk.bf16.vlgmr.msra.gmra.mrb[196].mxu1 %vm4150_vm10, %v5690_v55 }
0x19cf   :  { %8515 = vmatpush3.bf16.msra.mxu1 %v10613_v42  ;;  %8516 = vmatprep.mubr.msk.bf16.mxu1 %vm9393_vm0, %v9392_v0 }
0x19d0   :  { %8526 = vmatprep.subr.bf16.mxu1 %v9392_v0 }
0x1a99   :  { %v5728_v11 = vpop.f32.mrb[192].mxu1  ;;  %v5775_v48 = vpop.f32.mrb[196].mxu0 }
0x1a9a   :  { %v5734_v5 = vadd.f32 %v5728_v11, %v5687_v63  ;;  %v8494_v6 = vpop.f32.mrb[193].mxu1  ;;  %v8500_v49 = vpop.f32.mrb[197].mxu0  ;;  %v5781_v26 = vadd.f32 %v5775_v48, %v5688_v54 }
0x1a9b   :  { %v5731_v12 = vpop.f32.mrb[194].mxu1  ;;  %v5778_v51 = vpop.f32.mrb[198].mxu0 }
0x1a9c   :  { %v7404_v18 = vmul.f32 -1.442695, %v5734_v5  ;;  %v8495_v53 = vpop.f32.mrb[195].mxu1  ;;  %v8501_v58 = vpop.f32.mrb[199].mxu0  ;;  %v7406_v61 = vmul.f32 -1.442695, %v5781_v26 }
0x1a9d   :  { %v5838_v5 = vld [vmem:[#allocation7 + $0x6] sm:$0x3]  ;;  %v5985_v26 = vld [vmem:[#allocation5 + $0x8] sm:$0x3] }
0x1a9e   :  { %9020 = vpow2.f32 %v7404_v18 }
0x1a9f   :  { %9022 = vpow2.f32 %v7406_v61 }
0x1aa1   :  { %v5822_v60 = vpop.f32.mrb[196].mxu1 }
0x1aa2   :  { %v8506_v38 = vpop.f32.mrb[197].mxu1  ;;  %v5823_v40 = vadd.f32 %v10644_v21, %v5822_v60 }
0x1aa3   :  { %v5825_v25 = vpop.f32.mrb[198].mxu1 }
0x1aa4   :  { %v8507_v31 = vpop.f32.mrb[199].mxu1 }
0x1aa8   :  { %v9021_v62 = vpop.eup %9020 }
0x1aa9   :  { %v5738_v2 = vadd.f32 1.0, %v9021_v62  ;;  %v9023_v50 = vpop.eup %9022 }
0x1aaa   :  { %v5785_v4 = vadd.f32 1.0, %v9023_v50 }
0x1aab   :  { %9024 = vrcp.f32 %v5738_v2 }
0x1aac   :  { %9026 = vrcp.f32 %v5785_v4  ;;  %v5986_v4 = vld [vmem:[#allocation6 + $0x8] sm:$0x3] }
0x1ab5   :  { %v9025_v7 = vpop.eup %9024 }
0x1ab6   :  { %v5828_v14 = vmul.f32 %v9025_v7, %v5823_v40  ;;  %v9027_v30 = vpop.eup %9026 }
0x1ab7   :  { %v5831_v44 = vsub.f32 1.0, %v9027_v30  ;;  %v5833_v10 = vmul.f32 %v9027_v30, %v10668_v43 }
0x1ab8   :  { %v5829_v57 = vadd.f32 %v5828_v14, %v5689_v3 }
0x1aba   :  { %9028 = vtanh.f32 %v5829_v57 }
0x1ac4   :  { %v9029_v34 = vpop.eup %9028 }
0x1ac5   :  { %v5832_v19 = vmul.f32 %v9029_v34, %v5831_v44 }
0x1ac7   :  { %v10689_v20 = vadd.f32 %v5833_v10, %v5832_v19 }
0x1ac9   :  { %v5839_v13 = vpack.c.bf16 %v10689_v20, %v10689_v20 }
0x1acb   :  { %8511 = vmatmul.mubr.msk.bf16.vlgmr.msra.gmra.mrb[200].mxu0 %vm4150_vm10, %v5839_v13  ;;  %8517 = vmatmul.mubr.msk.bf16.vlgmr.msra.gmra.mrb[200].mxu1 %vm4150_vm10, %v5839_v13 }
0x1acc   :  { %8521 = vmatpush3.bf16.msra.mxu0 %v10616_v17  ;;  %8522 = vmatprep.mubr.msk.bf16.mxu0 %vm9393_vm0, %v9392_v0 }
0x1acd   :  { %8527 = vmatpush3.bf16.msra.mxu1 %v10601_v9  ;;  %8532 = vmatprep.subr.bf16.mxu0 %v9392_v0 }
0x1ace   :  { %8528 = vmatprep.mubr.msk.bf16.mxu1 %vm9393_vm0, %v9392_v0  ;;  %8538 = vmatprep.subr.bf16.mxu1 %v9392_v0 }
0x1ad3   :  { %8523 = vmatmul.mubr.msk.bf16.vlgmr.msra.gmra.mrb[204].mxu0 %vm4150_vm10, %v5839_v13 }
0x1ad4   :  { %8533 = vmatpush3.bf16.msra.mxu0 %v10613_v42  ;;  %8534 = vmatprep.mubr.msk.bf16.mxu0 %vm9393_vm0, %v9392_v0 }
0x1ad5   :  { %8544 = vmatprep.subr.bf16.mxu0 %v9392_v0 }
0x1b9e   :  { %v5877_v35 = vpop.f32.mrb[200].mxu0  ;;  %v5924_v36 = vpop.f32.mrb[200].mxu1 }
0x1b9f   :  { %v5883_v24 = vadd.f32 %v5877_v35, %v5836_v22  ;;  %v8512_v27 = vpop.f32.mrb[201].mxu0  ;;  %v8518_v23 = vpop.f32.mrb[201].mxu1  ;;  %v5930_v59 = vadd.f32 %v5924_v36, %v5837_v8 }
0x1ba0   :  { %v5880_v28 = vpop.f32.mrb[202].mxu0  ;;  %v5927_v46 = vpop.f32.mrb[202].mxu1  ;;  %v5987_v27 = vld [vmem:[#allocation7 + $0x8] sm:$0x3] }
0x1ba1   :  { %v7409_v29 = vmul.f32 -1.442695, %v5883_v24  ;;  %v8513_v32 = vpop.f32.mrb[203].mxu0  ;;  %v8519_v45 = vpop.f32.mrb[203].mxu1  ;;  %v7411_v39 = vmul.f32 -1.442695, %v5930_v59 }
0x1ba3   :  { %9030 = vpow2.f32 %v7409_v29 }
0x1ba4   :  { %9032 = vpow2.f32 %v7411_v39  ;;  %v6134_v39 = vld [vmem:[#allocation5 + $0xa] sm:$0x3] }
0x1ba6   :  { %v5971_v52 = vpop.f32.mrb[204].mxu0 }
0x1ba7   :  { %v8524_v47 = vpop.f32.mrb[205].mxu0  ;;  %v5972_v63 = vadd.f32 %v10644_v21, %v5971_v52 }
0x1ba8   :  { %v5974_v41 = vpop.f32.mrb[206].mxu0 }
0x1ba9   :  { %v8525_v37 = vpop.f32.mrb[207].mxu0 }
0x1bad   :  { %v9031_v16 = vpop.eup %9030 }
0x1bae   :  { %v5887_v1 = vadd.f32 1.0, %v9031_v16  ;;  %v9033_v56 = vpop.eup %9032 }
0x1baf   :  { %v5934_v55 = vadd.f32 1.0, %v9033_v56 }
0x1bb0   :  { %9034 = vrcp.f32 %v5887_v1 }
0x1bb1   :  { %9036 = vrcp.f32 %v5934_v55 }
0x1bba   :  { %v9035_v11 = vpop.eup %9034 }
0x1bbb   :  { %v5977_v48 = vmul.f32 %v9035_v11, %v5972_v63  ;;  %v9037_v49 = vpop.eup %9036  ;;  %v6135_v63 = vld [vmem:[#allocation6 + $0xa] sm:$0x3] }
0x1bbc   :  { %v5980_v12 = vsub.f32 1.0, %v9037_v49  ;;  %v5982_v18 = vmul.f32 %v9037_v49, %v10689_v20 }
0x1bbd   :  { %v5978_v6 = vadd.f32 %v5977_v48, %v5838_v5 }
0x1bbf   :  { %9038 = vtanh.f32 %v5978_v6 }
0x1bc9   :  { %v9039_v51 = vpop.eup %9038 }
0x1bca   :  { %v5981_v54 = vmul.f32 %v9039_v51, %v5980_v12 }
0x1bcc   :  { %v10710_v53 = vadd.f32 %v5982_v18, %v5981_v54 }
0x1bce   :  { %v5988_v58 = vpack.c.bf16 %v10710_v53, %v10710_v53 }
0x1bd0   :  { %8529 = vmatmul.mubr.msk.bf16.vlgmr.msra.gmra.mrb[204].mxu1 %vm4150_vm10, %v5988_v58  ;;  %8535 = vmatmul.mubr.msk.bf16.vlgmr.msra.gmra.mrb[208].mxu0 %vm4150_vm10, %v5988_v58 }
0x1bd1   :  { %8539 = vmatpush3.bf16.msra.mxu1 %v10616_v17  ;;  %8540 = vmatprep.mubr.msk.bf16.mxu1 %vm9393_vm0, %v9392_v0 }
0x1bd2   :  { %8545 = vmatpush3.bf16.msra.mxu0 %v10601_v9  ;;  %8550 = vmatprep.subr.bf16.mxu1 %v9392_v0 }
0x1bd3   :  { %8546 = vmatprep.mubr.msk.bf16.mxu0 %vm9393_vm0, %v9392_v0  ;;  %8556 = vmatprep.subr.bf16.mxu0 %v9392_v0 }
0x1bd8   :  { %8541 = vmatmul.mubr.msk.bf16.vlgmr.msra.gmra.mrb[208].mxu1 %vm4150_vm10, %v5988_v58 }
0x1bd9   :  { %8551 = vmatpush3.bf16.msra.mxu1 %v10613_v42  ;;  %8552 = vmatprep.mubr.msk.bf16.mxu1 %vm9393_vm0, %v9392_v0 }
0x1bda   :  { %8562 = vmatprep.subr.bf16.mxu1 %v9392_v0 }
0x1ca3   :  { %v6026_v61 = vpop.f32.mrb[204].mxu1  ;;  %v6073_v60 = vpop.f32.mrb[208].mxu0 }
0x1ca4   :  { %v6032_v38 = vadd.f32 %v6026_v61, %v5985_v26  ;;  %v8530_v25 = vpop.f32.mrb[205].mxu1  ;;  %v8536_v31 = vpop.f32.mrb[209].mxu0  ;;  %v6079_v14 = vadd.f32 %v6073_v60, %v5986_v4 }
0x1ca5   :  { %v6029_v62 = vpop.f32.mrb[206].mxu1  ;;  %v6076_v2 = vpop.f32.mrb[210].mxu0  ;;  %v6136_v31 = vld [vmem:[#allocation7 + $0xa] sm:$0x3] }
0x1ca6   :  { %v7414_v50 = vmul.f32 -1.442695, %v6032_v38  ;;  %v8531_v40 = vpop.f32.mrb[207].mxu1  ;;  %v8537_v7 = vpop.f32.mrb[211].mxu0  ;;  %v7416_v3 = vmul.f32 -1.442695, %v6079_v14 }
0x1ca8   :  { %9040 = vpow2.f32 %v7414_v50 }
0x1ca9   :  { %9042 = vpow2.f32 %v7416_v3 }
0x1cab   :  { %v6120_v57 = vpop.f32.mrb[208].mxu1 }
0x1cac   :  { %v8542_v30 = vpop.f32.mrb[209].mxu1  ;;  %v6121_v35 = vadd.f32 %v10644_v21, %v6120_v57  ;;  %v6283_v57 = vld [vmem:[#allocation5 + $0xc] sm:$0x3] }
0x1cad   :  { %v6123_v44 = vpop.f32.mrb[210].mxu1 }
0x1cae   :  { %v8543_v34 = vpop.f32.mrb[211].mxu1 }
0x1cb2   :  { %v9041_v10 = vpop.eup %9040 }
0x1cb3   :  { %v6036_v19 = vadd.f32 1.0, %v9041_v10  ;;  %v9043_v13 = vpop.eup %9042 }
0x1cb4   :  { %v6083_v22 = vadd.f32 1.0, %v9043_v13 }
0x1cb5   :  { %9044 = vrcp.f32 %v6036_v19 }
0x1cb6   :  { %9046 = vrcp.f32 %v6083_v22 }
0x1cbf   :  { %v9045_v36 = vpop.eup %9044 }
0x1cc0   :  { %v6126_v24 = vmul.f32 %v9045_v36, %v6121_v35  ;;  %v9047_v28 = vpop.eup %9046  ;;  %v6284_v35 = vld [vmem:[#allocation6 + $0xc] sm:$0x3] }
0x1cc1   :  { %v6129_v46 = vsub.f32 1.0, %v9047_v28  ;;  %v6131_v8 = vmul.f32 %v9047_v28, %v10710_v53 }
0x1cc2   :  { %v6127_v23 = vadd.f32 %v6126_v24, %v5987_v27 }
0x1cc4   :  { %9048 = vtanh.f32 %v6127_v23 }
0x1cce   :  { %v9049_v29 = vpop.eup %9048 }
0x1ccf   :  { %v6130_v32 = vmul.f32 %v9049_v29, %v6129_v46 }
0x1cd1   :  { %v10731_v45 = vadd.f32 %v6131_v8, %v6130_v32 }
0x1cd3   :  { %v6137_v59 = vpack.c.bf16 %v10731_v45, %v10731_v45 }
0x1cd5   :  { %8547 = vmatmul.mubr.msk.bf16.vlgmr.msra.gmra.mrb[212].mxu0 %vm4150_vm10, %v6137_v59  ;;  %8553 = vmatmul.mubr.msk.bf16.vlgmr.msra.gmra.mrb[212].mxu1 %vm4150_vm10, %v6137_v59 }
0x1cd6   :  { %8557 = vmatpush3.bf16.msra.mxu0 %v10616_v17  ;;  %8558 = vmatprep.mubr.msk.bf16.mxu0 %vm9393_vm0, %v9392_v0 }
0x1cd7   :  { %8563 = vmatpush3.bf16.msra.mxu1 %v10601_v9  ;;  %8568 = vmatprep.subr.bf16.mxu0 %v9392_v0 }
0x1cd8   :  { %8564 = vmatprep.mubr.msk.bf16.mxu1 %vm9393_vm0, %v9392_v0  ;;  %8574 = vmatprep.subr.bf16.mxu1 %v9392_v0 }
0x1cdd   :  { %8559 = vmatmul.mubr.msk.bf16.vlgmr.msra.gmra.mrb[216].mxu0 %vm4150_vm10, %v6137_v59 }
0x1cde   :  { %8569 = vmatpush3.bf16.msra.mxu0 %v10613_v42  ;;  %8570 = vmatprep.mubr.msk.bf16.mxu0 %vm9393_vm0, %v9392_v0 }
0x1cdf   :  { %8580 = vmatprep.subr.bf16.mxu0 %v9392_v0 }
0x1da8   :  { %v6175_v52 = vpop.f32.mrb[212].mxu0  ;;  %v6222_v47 = vpop.f32.mrb[212].mxu1 }
0x1da9   :  { %v6181_v41 = vadd.f32 %v6175_v52, %v6134_v39  ;;  %v8548_v37 = vpop.f32.mrb[213].mxu0  ;;  %v8554_v16 = vpop.f32.mrb[213].mxu1  ;;  %v6228_v5 = vadd.f32 %v6222_v47, %v6135_v63 }
0x1daa   :  { %v6178_v1 = vpop.f32.mrb[214].mxu0  ;;  %v6225_v56 = vpop.f32.mrb[214].mxu1  ;;  %v6285_v37 = vld [vmem:[#allocation7 + $0xc] sm:$0x3] }
0x1dab   :  { %v7419_v55 = vmul.f32 -1.442695, %v6181_v41  ;;  %v8549_v11 = vpop.f32.mrb[215].mxu0  ;;  %v8555_v48 = vpop.f32.mrb[215].mxu1  ;;  %v7421_v6 = vmul.f32 -1.442695, %v6228_v5 }
0x1dad   :  { %9050 = vpow2.f32 %v7419_v55 }
0x1dae   :  { %9052 = vpow2.f32 %v7421_v6  ;;  %v8742_v6 = vld [vmem:[#allocation26] ss:$8 sps:$4 sm:$0xff]  }
0x1db0   :  { %v6269_v49 = vpop.f32.mrb[216].mxu0 }
0x1db1   :  { %v8560_v12 = vpop.f32.mrb[217].mxu0  ;;  %v6270_v60 = vadd.f32 %v10644_v21, %v6269_v49  ;;  %v8744_v49 = vld [vmem:[#allocation26 + $0x4] ss:$8 sps:$4 sm:$0xff]  }
0x1db2   :  { %v6272_v51 = vpop.f32.mrb[218].mxu0  ;;  %v8745_v12 = vld [vmem:[%s10876_s3] ss:$8 sps:$4 sm:$0xff]  }
0x1db3   :  { %v8561_v18 = vpop.f32.mrb[219].mxu0  ;;  %v8747_v51 = vld [vmem:[%s10876_s3 + $0x4] ss:$8 sps:$4 sm:$0xff]  }
0x1db4   :  { %v6432_v18 = vld [vmem:[#allocation5 + $0xe] sm:$0x3] }
0x1db7   :  { %v9051_v54 = vpop.eup %9050 }
0x1db8   :  { %v6185_v58 = vadd.f32 1.0, %v9051_v54  ;;  %v9053_v26 = vpop.eup %9052 }
0x1db9   :  { %v6232_v61 = vadd.f32 1.0, %v9053_v26 }
0x1dba   :  { %9054 = vrcp.f32 %v6185_v58 }
0x1dbb   :  { %9056 = vrcp.f32 %v6232_v61 }
0x1dc4   :  { %v9055_v38 = vpop.eup %9054 }
0x1dc5   :  { %v6275_v25 = vmul.f32 %v9055_v38, %v6270_v60  ;;  %v9057_v2 = vpop.eup %9056 }
0x1dc6   :  { %v6278_v50 = vsub.f32 1.0, %v9057_v2  ;;  %v6280_v40 = vmul.f32 %v9057_v2, %v10731_v45 }
0x1dc7   :  { %v6276_v62 = vadd.f32 %v6275_v25, %v6136_v31  ;;  %v6433_v31 = vld [vmem:[#allocation6 + $0xe] sm:$0x3] }
0x1dc9   :  { %9058 = vtanh.f32 %v6276_v62 }
0x1dd3   :  { %v9059_v4 = vpop.eup %9058 }
0x1dd4   :  { %v6279_v7 = vmul.f32 %v9059_v4, %v6278_v50 }
0x1dd6   :  { %v10752_v14 = vadd.f32 %v6280_v40, %v6279_v7 }
0x1dd8   :  { %v6286_v3 = vpack.c.bf16 %v10752_v14, %v10752_v14 }
0x1dda   :  { %8565 = vmatmul.mubr.msk.bf16.vlgmr.msra.gmra.mrb[216].mxu1 %vm4150_vm10, %v6286_v3  ;;  %8571 = vmatmul.mubr.msk.bf16.vlgmr.msra.gmra.mrb[220].mxu0 %vm4150_vm10, %v6286_v3 }
0x1ddb   :  { %8575 = vmatpush3.bf16.msra.mxu1 %v10616_v17  ;;  %8576 = vmatprep.mubr.msk.bf16.mxu1 %vm9393_vm0, %v9392_v0 }
0x1ddc   :  { %8581 = vmatpush3.bf16.msra.mxu0 %v10601_v9  ;;  %8586 = vmatprep.subr.bf16.mxu1 %v9392_v0 }
0x1ddd   :  { %8582 = vmatprep.mubr.msk.bf16.mxu0 %vm9393_vm0, %v9392_v0  ;;  %8592 = vmatprep.subr.bf16.mxu0 %v9392_v0 }
0x1de2   :  { %8577 = vmatmul.mubr.msk.bf16.vlgmr.msra.gmra.mrb[220].mxu1 %vm4150_vm10, %v6286_v3 }
0x1de3   :  { %8587 = vmatpush3.bf16.msra.mxu1 %v10613_v42  ;;  %8588 = vmatprep.mubr.msk.bf16.mxu1 %vm9393_vm0, %v9392_v0 }
0x1de4   :  { %6601 = vmatprep.subr.bf16.mxu1 %v8744_v49  ;;  %v8765_v49 = vld [vmem:[%s10878_s17 + $0x8] sm:$0xff]  }
0x1ead   :  { %v6324_v30 = vpop.f32.mrb[216].mxu1  ;;  %v6371_v44 = vpop.f32.mrb[220].mxu0 }
0x1eae   :  { %v6330_v34 = vadd.f32 %v6324_v30, %v6283_v57  ;;  %v8566_v10 = vpop.f32.mrb[217].mxu1  ;;  %v8572_v9 = vpop.f32.mrb[221].mxu0  ;;  %v6377_v27 = vadd.f32 %v6371_v44, %v6284_v35 }
0x1eaf   :  { %v6327_v19 = vpop.f32.mrb[218].mxu1  ;;  %v6374_v13 = vpop.f32.mrb[222].mxu0 }
0x1eb0   :  { %v7424_v22 = vmul.f32 -1.442695, %v6330_v34  ;;  %v8567_v36 = vpop.f32.mrb[219].mxu1  ;;  %v8573_v24 = vpop.f32.mrb[223].mxu0  ;;  %v7426_v23 = vmul.f32 -1.442695, %v6377_v27 }
0x1eb1   :  { %v5686_v36 = vadd.f32 %v10668_v43, %v10647_v33 }
0x1eb2   :  { %9060 = vpow2.f32 %v7424_v22  ;;  %v6434_v22 = vld [vmem:[#allocation7 + $0xe] sm:$0x3] }
0x1eb3   :  { %9062 = vpow2.f32 %v7426_v23  ;;  %v5835_v24 = vadd.f32 %v10689_v20, %v5686_v36 }
0x1eb5   :  { %v6418_v28 = vpop.f32.mrb[220].mxu1  ;;  %v5984_v23 = vadd.f32 %v10710_v53, %v5835_v24 }
0x1eb6   :  { %v8578_v42 = vpop.f32.mrb[221].mxu1  ;;  %v6419_v52 = vadd.f32 %v10644_v21, %v6418_v28 }
0x1eb7   :  { %v6421_v46 = vpop.f32.mrb[222].mxu1  ;;  %v6133_v42 = vadd.f32 %v10731_v45, %v5984_v23  ;;  %v8749_v45 = vld [vmem:[%s10877_s26] sm:$0xff]  }
0x1eb8   :  { %v8579_v29 = vpop.f32.mrb[223].mxu1 }
0x1ebc   :  { %v9061_v8 = vpop.eup %9060 }
0x1ebd   :  { %v6334_v32 = vadd.f32 1.0, %v9061_v8  ;;  %v9063_v59 = vpop.eup %9062  ;;  %v6282_v8 = vadd.f32 %v10752_v14, %v6133_v42 }
0x1ebe   :  { %v6381_v39 = vadd.f32 1.0, %v9063_v59 }
0x1ebf   :  { %9064 = vrcp.f32 %v6334_v32 }
0x1ec0   :  { %9066 = vrcp.f32 %v6381_v39  ;;  %v8750_v39 = vld [vmem:[%s10877_s26 + $0x48] sm:$0xff]  }
0x1ec9   :  { %v9065_v47 = vpop.eup %9064 }
0x1eca   :  { %v6424_v41 = vmul.f32 %v9065_v47, %v6419_v52  ;;  %v9067_v1 = vpop.eup %9066  ;;  %v8752_v52 = vld [vmem:[%s10877_s26 + $0x50] sm:$0xff]  }
0x1ecb   :  { %v6427_v56 = vsub.f32 1.0, %v9067_v1  ;;  %v6429_v63 = vmul.f32 %v9067_v1, %v10752_v14  ;;  %v8751_v14 = vld [vmem:[%s10877_s26 + $0x8] sm:$0xff]   ;;  %v8753_v47 = vld [vmem:[%s10877_s26 + $0x10] sm:$0xff]   ;;  %v8757_v1 = vld [vmem:[%s10877_s26 + $0x20] sm:$0xff]  }
0x1ecc   :  { %v6425_v16 = vadd.f32 %v6424_v41, %v6285_v37  ;;  %v8754_v41 = vld [vmem:[%s10877_s26 + $0x58] sm:$0xff]  }
0x1ecd   :  { %v8755_v37 = vld [vmem:[%s10877_s26 + $0x18] sm:$0xff]  }
0x1ece   :  { %9068 = vtanh.f32 %v6425_v16  ;;  %v8756_v16 = vld [vmem:[%s10877_s26 + $0x60] sm:$0xff]  }
0x1ed8   :  { %v9069_v55 = vpop.eup %9068 }
0x1ed9   :  { %v6428_v11 = vmul.f32 %v9069_v55, %v6427_v56  ;;  %v8758_v56 = vld [vmem:[%s10877_s26 + $0x68] sm:$0xff]  }
0x1eda   :  { %v8759_v55 = vld [vmem:[%s10877_s26 + $0x28] sm:$0xff]  }
0x1edb   :  { %v10772_v48 = vadd.f32 %v6429_v63, %v6428_v11  ;;  %v8760_v63 = vld [vmem:[%s10877_s26 + $0x70] sm:$0xff]  }
0x1edc   :  { %v8761_v11 = vld [vmem:[%s10877_s26 + $0x30] sm:$0xff]  }
0x1edd   :  { %v6435_v5 = vpack.c.bf16 %v10772_v48, %v10772_v48  ;;  %v6431_v33 = vadd.f32 %v10772_v48, %v6282_v8  ;;  %v8772_v8 = vld [vmem:[%s9571_s29] sm:$0xff]  }
0x1edf   :  { %8583 = vmatmul.mubr.msk.bf16.vlgmr.msra.gmra.mrb[224].mxu0 %vm4150_vm10, %v6435_v5  ;;  %8589 = vmatmul.mubr.msk.bf16.vlgmr.msra.gmra.mrb[224].mxu1 %vm4150_vm10, %v6435_v5 }
0x1ee0   :  { %8593 = vmatpush3.bf16.msra.mxu0 %v10616_v17  ;;  %8594 = vmatprep.mubr.msk.bf16.mxu0 %vm9393_vm0, %v9392_v0  ;;  %v8748_v17 = vld [vmem:[%s10877_s26 + $0x40] sm:$0xff]  }
0x1ee1   :  { %6633 = vmatprep.mubr.bf16.mxu1 %v9394_v15  ;;  %6655 = vmatprep.subr.bf16.mxu0 %v8747_v51  ;;  %v8767_v51 = vld [vmem:[%s10878_s17 + $0x18] sm:$0xff]  }
0x1ee2   :  { %6602 = vmatpush1.bf16.msra.mxu1 %v8742_v6  ;;  %v8764_v6 = vld [vmem:[%s10878_s17] sm:$0xff]  }
0x1ee3   :  { %7760 = vmatprep.subr.bf16.mxu1 %v8748_v17  ;;  %v8768_v17 = vld [vmem:[%s10878_s17 + $0x20] sm:$0xff]  }
0x1ee7   :  { %8595 = vmatmul.mubr.msk.bf16.vlgmr.msra.gmra.mrb[228].mxu0 %vm4150_vm10, %v6435_v5  ;;  %v8763_v5 = vld [vmem:[%s10877_s26 + $0x38] sm:$0xff]  }
0x1ee8   :  { %6687 = vmatprep.mubr.bf16.mxu0 %v9394_v15  ;;  %6656 = vmatpush1.bf16.msra.mxu0 %v8745_v12  ;;  %v8766_v12 = vld [vmem:[%s10878_s17 + $0x10] sm:$0xff]  }
0x1ee9   :  { %8598 = vmatprep.subr.bf16.mxu0 %v9392_v0 }
0x1fb2   :  { %v6473_v54 = vpop.f32.mrb[224].mxu0  ;;  %v6520_v58 = vpop.f32.mrb[224].mxu1 }
0x1fb3   :  { %v6479_v26 = vadd.f32 %v6473_v54, %v6432_v18  ;;  %v8584_v61 = vpop.f32.mrb[225].mxu0  ;;  %v8590_v60 = vpop.f32.mrb[225].mxu1  ;;  %v6526_v50 = vadd.f32 %v6520_v58, %v6433_v31  ;;  %v6698_v18 = vlaneseq }
0x1fb4   :  { %v6476_v38 = vpop.f32.mrb[226].mxu0  ;;  %v6523_v15 = vpop.f32.mrb[226].mxu1  ;;  %v6696_v61 = vld [vmem:[%s10879_s28] sm:$0x3] }
0x1fb5   :  { %v7429_v25 = vmul.f32 -1.442695, %v6479_v26  ;;  %v8585_v62 = vpop.f32.mrb[227].mxu0  ;;  %v8591_v2 = vpop.f32.mrb[227].mxu1  ;;  %v7431_v4 = vmul.f32 -1.442695, %v6526_v50 }
0x1fb6   :  { %v6699_v54 = vshrl.u32 %v6698_v18, 7  ;;  %v6712_v2 = vld [vmem:[%s10880_s2] sm:$0x3] }
0x1fb7   :  { %9070 = vpow2.f32 %v7429_v25 }
0x1fb8   :  { %9072 = vpow2.f32 %v7431_v4  ;;  %v6700_v58 = vsub.s32 0, %v6699_v54  ;;  %v6704_v60 = vsub.s32 1, %v6699_v54 }
0x1fba   :  { %v6567_v40 = vpop.f32.mrb[228].mxu0  ;;  %v6701_v31 = vrot.slane %v6696_v61, %v6700_v58  ;;  %v6705_v50 = vrot.slane %v6696_v61, %v6704_v60 }
0x1fbb   :  { %v8596_v7 = vpop.f32.mrb[229].mxu0  ;;  %v6568_v9 = vadd.f32 %v10644_v21, %v6567_v40 }
0x1fbc   :  { %v6570_v3 = vpop.f32.mrb[230].mxu0  ;;  %v6726_v7 = vld [vmem:[%s10881_s7] sm:$0x3] }
0x1fbd   :  { %v8597_v57 = vpop.f32.mrb[231].mxu0 }
0x1fc1   :  { %v9071_v30 = vpop.eup %9070 }
0x1fc2   :  { %v6483_v44 = vadd.f32 1.0, %v9071_v30  ;;  %v9073_v34 = vpop.eup %9072 }
0x1fc3   :  { %v6530_v10 = vadd.f32 1.0, %v9073_v34 }
0x1fc4   :  { %9074 = vrcp.f32 %v6483_v44  ;;  %v6717_v44 = vrot.slane %v6712_v2, %v6700_v58 }
0x1fc5   :  { %9076 = vrcp.f32 %v6530_v10 }
0x1fce   :  { %v9075_v19 = vpop.eup %9074 }
0x1fcf   :  { %v6573_v13 = vmul.f32 %v9075_v19, %v6568_v9  ;;  %v9077_v27 = vpop.eup %9076  ;;  %v6721_v9 = vrot.slane %v6712_v2, %v6704_v60 }
0x1fd0   :  { %v6576_v28 = vsub.f32 1.0, %v9077_v27  ;;  %v6578_v46 = vmul.f32 %v9077_v27, %v10772_v48  ;;  %v8762_v48 = vld [vmem:[%s10877_s26 + $0x78] sm:$0xff]  }
0x1fd1   :  { %v6574_v35 = vadd.f32 %v6573_v13, %v6434_v22  ;;  %v6731_v13 = vrot.slane %v6726_v7, %v6700_v58 }
0x1fd3   :  { %9078 = vtanh.f32 %v6574_v35  ;;  %v6735_v35 = vrot.slane %v6726_v7, %v6704_v60 }
0x1fdd   :  { %v9079_v21 = vpop.eup %9078 }
0x1fde   :  { %v6577_v29 = vmul.f32 %v9079_v21, %v6576_v28  ;;  %v8769_v21 = vld [vmem:[%s10878_s17 + $0x28] sm:$0xff]  }
0x1fe0   :  { %v6579_v32 = vadd.f32 %v6578_v46, %v6577_v29  ;;  %v8770_v46 = vld [vmem:[%s10878_s17 + $0x30] sm:$0xff]   ;;  %v8771_v29 = vld [vmem:[%s10878_s17 + $0x38] sm:$0xff]  }
0x1fe2   :  { %v6582_v43 = vpack.c.bf16 %v6579_v32, %v6579_v32  ;;  %v6580_v20 = vadd.f32 %v6579_v32, %v6431_v33  ;;  %v8773_v32 = vld [vmem:[%s9571_s29 + $0x8] sm:$0xff]  }
0x1fe4   :  { %7438 = vmatmul.mubr.msk.bf16.vlgmr.msra.gmra.mrb[232].mxu0 %vm4150_vm10, %v6582_v43  ;;  %v6581_v53 = vmul.f32 0.125, %v6580_v20  ;;  %v7439_v43 = vld [vmem:[%s10882_s21] ss:$0 sm:$0xff] }
0x1fe5   :  { %8614 = vmatprep.mubr.msk.bf16.mxu0 %vm9393_vm0, %v9392_v0  ;;  %8599 = vmatpush3.bf16.msra.mxu0 %v8764_v6 }
0x1fe6   :  { %v6585_v59 = vpack.c.bf16 %v6581_v53, %v6581_v53  ;;  %8600 = vmatprep.subr.bf16.mxu0 %v9392_v0 }
0x1fe8   :  { %7435 = vmatmul.mubr.msk.bf16.vlgmr.msra.gmra.mrb[228].mxu1 %vm4150_vm10, %v6585_v59 }
0x1fe9   :  { %7761 = vmatpush3.bf16.msra.mxu1 %v8749_v45  ;;  %8601 = vmatpush3.bf16.msra.mxu0 %v8765_v49 }
0x1fea   :  { %7762 = vmatprep.subr.bf16.mxu1 %v8750_v39  ;;  %8602 = vmatprep.subr.bf16.mxu0 %v9392_v0 }
0x1fed   :  { %7763 = vmatpush3.bf16.msra.mxu1 %v8751_v14  ;;  %8603 = vmatpush3.bf16.msra.mxu0 %v8766_v12  ;;  %v7456_v14 = vld [vmem:[%s10883_s10] ss:$0 sm:$0xff] }
0x1fee   :  { %7764 = vmatprep.subr.bf16.mxu1 %v8752_v52  ;;  %8604 = vmatprep.subr.bf16.mxu0 %v9392_v0 }
0x1ff1   :  { %7765 = vmatpush3.bf16.msra.mxu1 %v8753_v47  ;;  %8605 = vmatpush3.bf16.msra.mxu0 %v8767_v51  ;;  %v7457_v47 = vld [vmem:[%s10884_s12] ss:$0 sm:$0xff] }
0x1ff2   :  { %7766 = vmatprep.subr.bf16.mxu1 %v8754_v41  ;;  %8606 = vmatprep.subr.bf16.mxu0 %v9392_v0  ;;  %v7467_v51 = vld [vmem:[%s9576_s4] ss:$0 sm:$0xff] }
0x1ff5   :  { %7767 = vmatpush3.bf16.msra.mxu1 %v8755_v37  ;;  %8607 = vmatpush3.bf16.msra.mxu0 %v8768_v17 }
0x1ff6   :  { %7768 = vmatprep.subr.bf16.mxu1 %v8756_v16  ;;  %8608 = vmatprep.subr.bf16.mxu0 %v9392_v0 }
0x1ff9   :  { %7769 = vmatpush3.bf16.msra.mxu1 %v8757_v1  ;;  %8609 = vmatpush3.bf16.msra.mxu0 %v8769_v21  ;;  %v8774_v1 = vld [vmem:[%s9571_s29 + $0x10] sm:$0xff]  }
0x1ffa   :  { %7770 = vmatprep.subr.bf16.mxu1 %v8758_v56  ;;  %8610 = vmatprep.subr.bf16.mxu0 %v9392_v0  ;;  %v8775_v56 = vld [vmem:[%s9571_s29 + $0x18] sm:$0xff]   ;;  %s9421_s29 = smov 2  }
0x1ffd   :  { %7771 = vmatpush3.bf16.msra.mxu1 %v8759_v55  ;;  %8611 = vmatpush3.bf16.msra.mxu0 %v8770_v46  ;;  %v7458_v55 = vld [vmem:[%s9566_s6] ss:$0 sm:$0xff]  ;;  %s9422_s6 = smov 126  }
0x1ffe   :  { %7772 = vmatprep.subr.bf16.mxu1 %v8760_v63  ;;  %8612 = vmatprep.subr.bf16.mxu0 %v9392_v0 }
0x2001   :  { %7773 = vmatpush3.bf16.msra.mxu1 %v8761_v11  ;;  %8613 = vmatpush3.bf16.msra.mxu0 %v8771_v29 }
0x2002   :  { %7774 = vmatprep.subr.bf16.mxu1 %v8762_v48 }
0x2005   :  { %7775 = vmatpush3.bf16.msra.mxu1 %v8763_v5 }
0x2006   :  { %8618 = vmatprep.subr.bf16.mxu1 %v9392_v0 }
0x20b7   :  { %v6689_v26 = vpop.f32.mrb[232].mxu0 }
0x20b8   :  { %v6691_v38 = vpop.f32.mrb[233].mxu0 }
0x20b9   :  { %v6693_v15 = vpop.f32.mrb[234].mxu0 }
0x20ba   :  { %v6694_v25 = vpop.f32.mrb[235].mxu0 }
0x20bb   :  { %v6635_v62 = vpop.f32.mrb[228].mxu1 }
0x20bc   :  { %v6690_v4 = vadd.f32 %v6689_v26, %v6635_v62  ;;  %v6637_v40 = vpop.f32.mrb[229].mxu1 }
0x20bd   :  { %v6692_v3 = vadd.f32 %v6691_v38, %v6637_v40  ;;  %v6639_v57 = vpop.f32.mrb[230].mxu1 }
0x20be   :  { %v6708_v30 = vadd.f32 %v6701_v31, %v6690_v4  ;;  %v6640_v34 = vpop.f32.mrb[231].mxu1 }
0x20bf   :  { %v6709_v10 = vadd.f32 %v6705_v50, %v6692_v3 }
0x20c0   :  { %v6710_v19 = vmax.f32 %v6708_v30, 0.0 }
0x20c1   :  { %v6711_v22 = vmax.f32 %v6709_v10, 0.0 }
0x20c2   :  { %v6724_v36 = vmul.f32 %v6717_v44, %v6710_v19 }
0x20c3   :  { %v6725_v24 = vmul.f32 %v6721_v9, %v6711_v22 }
0x20c4   :  { %v6738_v27 = vadd.f32 %v6731_v13, %v6724_v36 }
0x20c5   :  { %v6739_v23 = vadd.f32 %v6735_v35, %v6725_v24 }
0x20c6   :  { %v6740_v42 = vpack.c.bf16 %v6738_v27, %v6738_v27 }
0x20c7   :  { %v6741_v28 = vpack.c.bf16 %v6739_v23, %v6739_v23 }
0x20c9   :  { %6909 = vmatprep.mubr.bf16.mxu1 %v6741_v28 }
0x20ca   :  { %6910 = vmatmul.mubr.bf16.vlgmr.msra.gmra.mrb[232].mxu1 %v6740_v42 }
0x20cb   :  { %8626 = vmatprep.mubr.msk.bf16.mxu1 %vm9393_vm0, %v9392_v0  ;;  %8619 = vmatpush3.bf16.msra.mxu1 %v8772_v8 }
0x20cc   :  { %8620 = vmatprep.subr.bf16.mxu1 %v9392_v0 }
0x20cf   :  { %8621 = vmatpush3.bf16.msra.mxu1 %v8773_v32 }
0x20d0   :  { %8622 = vmatprep.subr.bf16.mxu1 %v9392_v0 }
0x20d3   :  { %8623 = vmatpush3.bf16.msra.mxu1 %v8774_v1 }
0x20d4   :  { %8624 = vmatprep.subr.bf16.mxu1 %v9392_v0 }
0x20d7   :  { %8625 = vmatpush3.bf16.msra.mxu1 %v8775_v56 }
0x219d   :  { %v7776_v33 = vpop.f32.mrb[232].mxu1 }
0x219e   :  { %v7777_v20 = vpop.f32.mrb[233].mxu1 }
0x219f   :  { %v7778_v53 = vadd.f32 %v7777_v20, %v7776_v33  ;;  %v7779_v45 = vpop.f32.mrb[234].mxu1 }
0x21a0   :  { %v7780_v59 = vpop.f32.mrb[235].mxu1 }
0x21a1   :  { %v6912_v39 = vadd.f32 %v7778_v53, %v7439_v43 }
0x21a3   :  { %v6917_v52 = vmax.f32 %v6912_v39, 0.0 }
0x21a5   :  { %v6925_v41 = vmul.f32 %v7456_v14, %v6917_v52 }
0x21a7   :  { %v6933_v37 = vadd.f32 %v7457_v47, %v6925_v41 }
0x21a9   :  { %v6934_v16 = vpack.c.bf16 %v6933_v37, %v6933_v37 }
0x21ab   :  { %8615 = vmatmul.mubr.bf16.vlgmr.msra.gmra.mrb[236].mxu0 %v6934_v16 }
0x227e   :  { %v7040_v63 = vpop.f32.mrb[236].mxu0 }
0x227f   :  { %v7041_v11 = vadd.f32 %v7458_v55, %v7040_v63  ;;  %v8616_v48 = vpop.f32.mrb[237].mxu0 }
0x2280   :  { %v7043_v5 = vpop.f32.mrb[238].mxu0 }
0x2281   :  { %v7046_v6 = vmax.f32 %v7041_v11, 0.0  ;;  %v8617_v49 = vpop.f32.mrb[239].mxu0 }
0x2283   :  { %v7047_v12 = vpack.c.bf16 %v7046_v6, %v7046_v6 }
0x2285   :  { %8627 = vmatmul.mubr.msk.bf16.vlgmr.msra.gmra.mrb[236].mxu1 %vm7087_vm14, %v7047_v12 }
0x2358   :  { %v7125_v17 = vpop.f32.mrb[236].mxu1 }
0x2359   :  { %v7126_v18 = vadd.f32 %v7467_v51, %v7125_v17  ;;  %v8628_v54 = vpop.f32.mrb[237].mxu1 }
0x235a   :  { %v7128_v58 = vpop.f32.mrb[238].mxu1 }
0x235b   :  { %9080 = vtanh.f32 %v7126_v18  ;;  %v8629_v26 = vpop.f32.mrb[239].mxu1  ;;  %v7473_v61 = vmul.f32 -1.442695, %v7126_v18 }
0x235d   :  { %9082 = vpow2.f32 %v7473_v61 }
0x2365   :  { %v9081_v0 = vpop.eup %9080 }
0x2366   :  { %7144 = vrot.lane.b32.xlu1 %v9081_v0, %s9380_s22  ;;  %7140 = vrot.lane.b32.xlu0 %v9081_v0, %s9421_s29 }
0x2367   :  { %v9083_v60 = vpop.eup %9082 }
0x2368   :  { %v7135_v38 = vadd.f32 1.0, %v9083_v60 }
0x236a   :  { %9084 = vrcp.f32 %v7135_v38 }
0x2374   :  { %v9085_v15 = vpop.eup %9084 }
0x2375   :  { %v7138_v25 = vsub.f32 1.0, %v9085_v15 }
0x23d8   :  { %v7145_v31 = vpop.permute.xlu1 %7144  ;;  %v7141_v62 = vpop.permute.xlu0 %7140 }
0x23d9   :  { %v7147_v2 = vmul.f32 %v9085_v15, %v7145_v31  ;;  %v7143_v50 = vmul.f32 %v7141_v62, %v7138_v25 }
0x23db   :  { %v7148_v4 = vadd.f32 %v7147_v2, %v7143_v50 }
0x23dd   :  { %7150 = vrot.lane.b32.xlu0 %v7148_v4, %s9422_s6 }
0x244f   :  { %v7151_v40 = vpop.permute.xlu0 %7150 }
0x2450   :  { %7154 = vst.msk [vmem:[%s9581_s25] sm:$0x3] %vm7153_vm15, %v7151_v40 }
0x2451   :  { %7159 = vsyncpa [#allocation11], 1 }
0x2452   :  { %7160 = vsyncpa [#allocation13], 1 }
0x2453   :  { %7161 = vsyncpa [#allocation16], 1 }
0x2454   :  { %7162 = vsyncpa [#allocation19], 1 }
0x2455   :  { %7163 = vsyncpa [#allocation22], 1 }
0x2456   :  { %7164 = vsyncpa [#allocation25], 1 }

</bundles_post_ra>
